<compile_context>
chip_gen: v6e
topology: v6e:2x2x1
jax: 0.10.0
libtpu: 0.0.40
codegen_flags: <defaults>
</compile_context>

<pallas_src>
import functools

import jax
import jax.numpy as jnp
from jax import lax
from jax.experimental import pallas as pl
from jax.experimental.pallas import tpu as pltpu


def _cdiv(a: int, b: int) -> int:
    return -(-a // b)


def _round_up(a: int, b: int) -> int:
    return _cdiv(a, b) * b


def _mxu_tile() -> int:
    """MXU tile width: 256 on v6e/v7x, 128 on older (v2-v5) parts."""
    try:
        kind = jax.devices()[0].device_kind.lower()
    except Exception:
        return 256
    for old in ("v2", "v3", "v4", "v5"):
        if old in kind:
            return 128
    return 256


def _vmem_capacity_bytes() -> int:
    """Per-core VMEM capacity; conservative (v7x) fallback if query fails."""
    try:
        return int(pltpu.get_tpu_info().vmem_capacity_bytes)
    except Exception:
        return 64 * 1024 * 1024


def _isqrtm_kernel(x_ref, y_ref, pk_ref, *, iter_n, gg, k, d, p, mm_dtype):
    # x_ref : (gg, k, D, D) compact input block (one packed group per k mats).
    # y_ref : (gg, k, D, D) compact output block.
    # pk_ref: (P, P) f32 VMEM scratch holding the block-diagonal packed matrix.
    f32 = jnp.float32

    # D x D identity (per-block traces) and 3*I_P for the iteration, via iota.
    rr = lax.broadcasted_iota(jnp.int32, (d, d), 0)
    cc = lax.broadcasted_iota(jnp.int32, (d, d), 1)
    eyed = jnp.where(rr == cc, 1.0, 0.0).astype(f32)            # (D, D)
    pr = lax.broadcasted_iota(jnp.int32, (p, p), 0)
    pc = lax.broadcasted_iota(jnp.int32, (p, p), 1)
    i3 = jnp.where(pr == pc, 3.0, 0.0).astype(f32)              # 3 * I_P

    def mm(u, v):
        # bf16 operands (MXU-native) with f32 accumulation; elementwise math
        # around the chain stays f32 (keeps v5e off the bf16 VPU path).
        return jnp.dot(u.astype(mm_dtype), v.astype(mm_dtype),
                       preferred_element_type=f32)

    # Only the diagonal D x D blocks are ever written below, so one zero-fill
    # per grid step keeps the off-diagonal (and lane-padding) region exactly
    # zero on every group -- required for correctness and safe under
    # "parallel" grid semantics (each core re-zeros its own scratch).
    pk_ref[...] = jnp.zeros_like(pk_ref)

    @pl.loop(0, gg)
    def _group(g):
        xg = x_ref[g].astype(f32)                               # (k, D, D)

        # Per-matrix normA = trace of each D x D block (exact, f32).
        tr = jnp.sum(xg * eyed[None], axis=-1, keepdims=True)
        tr = jnp.sum(tr, axis=-2, keepdims=True)                # (k, 1, 1)
        a4 = xg * pl.reciprocal(tr, approx=False)               # exact 1/trace

        # Block-diagonal packing into the MXU-tile-sized scratch (VMEM only).
        for i in range(k):
            pk_ref[i * d:(i + 1) * d, i * d:(i + 1) * d] = a4[i]
        a = pk_ref[...]                                          # (P, P) f32

        # Newton-Schulz iteration on the packed matrix (block structure is
        # preserved exactly: off-diagonal products are sums of exact zeros).
        if iter_n < 2:
            zy = 0.5 * (i3 - a)
            yzy = mm(a, zy)
        else:
            zy = 0.5 * (i3 - a)
            yy = mm(a, zy)
            zz = zy
            for _ in range(1, iter_n - 1):   # iter_n is static -> unrolled
                zy = 0.5 * (i3 - mm(zz, yy))
                yy = mm(yy, zy)
                zz = mm(zy, zz)
            yzy = 0.5 * mm(yy, i3 - mm(zz, yy))

        # Extract the diagonal D x D blocks in-kernel and rescale by sqrt(tr).
        blocks = [yzy[i * d:(i + 1) * d, i * d:(i + 1) * d] for i in range(k)]
        out4 = jnp.stack(blocks, axis=0)                         # (k, D, D)
        y_ref[g] = (out4 * jnp.sqrt(tr)).astype(y_ref.dtype)


@functools.partial(jax.jit, static_argnums=(1, 2))
def isqrtm(x: jax.Array, iter_n: int, matmul_dtype=jnp.bfloat16) -> jax.Array:
    """Newton-Schulz matrix square root, batched over the leading axis."""
    b, d, d2 = x.shape
    assert d == d2, "expected square matrices (B, D, D)"
    out_dtype = x.dtype

    # --- pack k = tile//D matrices block-diagonally; P lane-dense (mult 128) --
    tile = _mxu_tile()
    k = max(1, tile // d)
    p = _round_up(k * d, 128)
    g0 = _cdiv(b, k)                 # number of packed groups needed

    # Generation-aware VMEM budget.  Only the compact (gg, k, D, D) I/O blocks
    # scale with gg (double-buffered, last dims padded to (8, 128) in VMEM);
    # the Newton-Schulz working set is a fixed ~14 live (P, P) f32 arrays.
    cap = _vmem_capacity_bytes()
    budget = int(0.45 * cap)
    per_group_io = 4 * k * _round_up(d, 8) * _round_up(d, 128) * 4
    temps = 14 * p * p * 4
    gg_max = max(1, (budget - temps) // per_group_io)
    gg_max = min(gg_max, 128)
    # TODO(synk): for very large D (P >~ 1024) even gg=1 can exceed v7x's
    # 64 MiB VMEM; that regime needs K-tiled matmuls (pltpu.emit_pipeline)
    # plus bf16 chain temporaries.

    if g0 <= 1:
        gg, grid = 1, 1
    else:
        grid = max(2, _cdiv(g0, gg_max))
        if grid % 2 == 1:            # even grid keeps both v7x TCs busy
            grid += 1
        gg = max(1, min(gg_max, _cdiv(g0, grid)))
    n_groups = grid * gg
    b_pad = n_groups * k

    xw = x
    if b_pad > b:  # pad with identity matrices (finite trace, no NaN leakage)
        pad = jnp.broadcast_to(jnp.eye(d, dtype=x.dtype), (b_pad - b, d, d))
        xw = jnp.concatenate([x, pad], axis=0)
    xg = xw.reshape(n_groups, k, d, d)   # free relayout: compact group layout

    n_mm = 1 if iter_n < 2 else 3 * iter_n - 3
    itemsize = jnp.dtype(x.dtype).itemsize
    cost = pl.CostEstimate(
        flops=2 * n_groups * n_mm * p * p * p,
        transcendentals=2 * n_groups * k,
        bytes_accessed=2 * n_groups * k * d * d * itemsize,
    )

    kernel = functools.partial(_isqrtm_kernel, iter_n=int(iter_n), gg=gg,
                               k=k, d=d, p=p, mm_dtype=matmul_dtype)
    out_packed = pl.pallas_call(
        kernel,
        out_shape=jax.ShapeDtypeStruct((n_groups, k, d, d), out_dtype),
        grid_spec=pltpu.PrefetchScalarGridSpec(
            num_scalar_prefetch=0,
            grid=(grid,),
            in_specs=[pl.BlockSpec((gg, k, d, d), lambda i: (i, 0, 0, 0))],
            out_specs=pl.BlockSpec((gg, k, d, d), lambda i: (i, 0, 0, 0)),
            scratch_shapes=[pltpu.VMEM((p, p), jnp.float32)],
        ),
        compiler_params=pltpu.CompilerParams(
            dimension_semantics=("parallel",),
            vmem_limit_bytes=int(min(0.75 * cap, 128 * 1024 * 1024)),
        ),
        cost_estimate=cost,
    )(xg)

    y = out_packed.reshape(b_pad, d, d)   # free relayout back to (B, D, D)
    return y[:b]


def _isqrtm_ref(x: jax.Array, iter_n: int) -> jax.Array:
    """Pure-JAX reference mirroring the PyTorch forward."""
    b, d, _ = x.shape
    i3 = 3.0 * jnp.broadcast_to(jnp.eye(d, dtype=x.dtype), (b, d, d))
    norm_a = (1.0 / 3.0) * jnp.sum(x * i3, axis=(1, 2))          # (B,)
    a = x / norm_a[:, None, None]
    if iter_n < 2:
        zy = 0.5 * (i3 - a)
        yzy = jnp.matmul(a, zy)
    else:
        zy = 0.5 * (i3 - a)
        y = jnp.matmul(a, zy)
        z = zy
        for _ in range(1, iter_n - 1):
            zy = 0.5 * (i3 - jnp.matmul(z, y))
            y = jnp.matmul(y, zy)
            z = jnp.matmul(zy, z)
        yzy = 0.5 * jnp.matmul(y, i3 - jnp.matmul(z, y))
    return yzy * jnp.sqrt(norm_a)[:, None, None]


if __name__ == "__main__":
    key = jax.random.PRNGKey(0)
    cases = [(4, 16, 5),     # single grid step (single padded group)
             (40, 16, 5)]    # multi-step grid (index maps / batch padding)
    for case_i, (batch, dim, iter_n) in enumerate(cases):
        ck = jax.random.fold_in(key, case_i)
        # SPD-ish inputs (covariance-like), as MPN-COV would produce.
        c = jax.random.normal(ck, (batch, dim, 2 * dim), dtype=jnp.float32)
        x = (jnp.einsum("bdk,bek->bde", c, c) / (2 * dim)
             + 1e-3 * jnp.eye(dim, dtype=jnp.float32)[None])

        ref = _isqrtm_ref(x, iter_n)

        # Exact-precision path: must match the pure-JAX reference tightly.
        out_f32 = jax.block_until_ready(isqrtm(x, iter_n, jnp.float32))
        assert out_f32.shape == ref.shape and out_f32.dtype == ref.dtype
        assert jnp.allclose(out_f32, ref, rtol=1e-4, atol=1e-4), (
            f"f32 path mismatch vs reference (case {case_i})")

        # Default bf16-matmul path (MXU-native operands, f32 accumulation).
        out_bf = jax.block_until_ready(isqrtm(x, iter_n, jnp.bfloat16))
        assert out_bf.shape == ref.shape and out_bf.dtype == ref.dtype
        assert bool(jnp.isfinite(out_bf).all())
        scale = float(jnp.max(jnp.abs(ref)))
        err = float(jnp.max(jnp.abs(out_bf - ref)))
        assert err <= 0.1 * scale, (
            f"bf16 path error too large (case {case_i}): {err} vs scale {scale}")

    print("KERNEL_OK")
</pallas_src>

<mosaic_0001>
module attributes {stable_mosaic.version = 11 : i64} {
  func.func @_isqrtm_kernel(%arg0: i32, %arg1: memref<1x16x16x16xf32, #tpu.memory_space<vmem>>, %arg2: memref<1x16x16x16xf32, #tpu.memory_space<vmem>>, %arg3: memref<256x256xf32, #tpu.memory_space<vmem>>) attributes {dimension_semantics = [#tpu.dimension_semantics<parallel>], iteration_bounds = array<i64: 1>, scalar_prefetch = 0 : i64, scratch_operands = 1 : i64, tpu.core_type = #tpu.core_type<tc>, window_params = [{transform_indices = @transform_0, window_bounds = array<i64: 1, 16, 16, 16>}, {transform_indices = @transform_1, window_bounds = array<i64: 1, 16, 16, 16>}]} {
    %0 = tpu.iota {dimensions = array<i32: 0>} : vector<16x16xi32>
    %1 = tpu.iota {dimensions = array<i32: 1>} : vector<16x16xi32>
    %2 = arith.cmpi eq, %0, %1 : vector<16x16xi32>
    %cst = arith.constant 1.000000e+00 : f32
    %cst_0 = arith.constant 0.000000e+00 : f32
    %3 = vector.broadcast %cst : f32 to vector<16x16xf32>
    %4 = vector.broadcast %cst_0 : f32 to vector<16x16xf32>
    %5 = arith.select %2, %3, %4 : vector<16x16xi1>, vector<16x16xf32>
    %6 = tpu.iota {dimensions = array<i32: 0>} : vector<256x256xi32>
    %7 = tpu.iota {dimensions = array<i32: 1>} : vector<256x256xi32>
    %8 = arith.cmpi eq, %6, %7 : vector<256x256xi32>
    %cst_1 = arith.constant 3.000000e+00 : f32
    %cst_2 = arith.constant 0.000000e+00 : f32
    %9 = vector.broadcast %cst_1 : f32 to vector<256x256xf32>
    %10 = vector.broadcast %cst_2 : f32 to vector<256x256xf32>
    %11 = arith.select %8, %9, %10 : vector<256x256xi1>, vector<256x256xf32>
    %cst_3 = arith.constant 0.000000e+00 : f32
    %12 = vector.broadcast %cst_3 : f32 to vector<256x256xf32>
    %c0 = arith.constant 0 : index
    %c0_4 = arith.constant 0 : index
    %13 = vector.load %arg3[%c0, %c0_4] : memref<256x256xf32, #tpu.memory_space<vmem>>, vector<256x256xf32>
    tpu.vector_store %arg3[%c0, %c0_4], %12 {strides = array<i32>} : memref<256x256xf32, #tpu.memory_space<vmem>>, vector<256x256xf32>,
    %c0_i32 = arith.constant 0 : i32
    %c1_i32 = arith.constant 1 : i32
    %14 = arith.muli %c0_i32, %c1_i32 : i32
    %c0_i32_5 = arith.constant 0 : i32
    %15 = arith.addi %c0_i32_5, %14 : i32
    %16 = arith.index_cast %15 : i32 to index
    %c0_6 = arith.constant 0 : index
    %c0_7 = arith.constant 0 : index
    %c0_8 = arith.constant 0 : index
    %17 = vector.load %arg1[%16, %c0_6, %c0_7, %c0_8] : memref<1x16x16x16xf32, #tpu.memory_space<vmem>>, vector<1x16x16x16xf32>
    %18 = vector.shape_cast %17 : vector<1x16x16x16xf32> to vector<16x16x16xf32>
    %19 = vector.shape_cast %5 : vector<16x16xf32> to vector<1x16x16xf32>
    %20 = vector.broadcast %19 : vector<1x16x16xf32> to vector<16x16x16xf32>
    %21 = arith.mulf %18, %20 : vector<16x16x16xf32>
    %cst_9 = arith.constant dense<0.000000e+00> : vector<16x16xf32>
    %22 = vector.multi_reduction <add>, %21, %cst_9 [2] : vector<16x16x16xf32> to vector<16x16xf32>
    %23 = vector.shape_cast %22 : vector<16x16xf32> to vector<16x16x1xf32>
    %cst_10 = arith.constant dense<0.000000e+00> : vector<16x1xf32>
    %24 = vector.multi_reduction <add>, %23, %cst_10 [1] : vector<16x16x1xf32> to vector<16x1xf32>
    %25 = vector.shape_cast %24 : vector<16x1xf32> to vector<16x1x1xf32>
    %26 = tpu.reciprocal %25 : vector<16x1x1xf32> -> vector<16x1x1xf32>
    %27 = vector.broadcast %26 : vector<16x1x1xf32> to vector<16x16x16xf32>
    %28 = arith.mulf %18, %27 : vector<16x16x16xf32>
    %29 = vector.extract_strided_slice %28 {offsets = [0, 0, 0], sizes = [1, 16, 16], strides = [1, 1, 1]} : vector<16x16x16xf32> to vector<1x16x16xf32>
    %30 = vector.shape_cast %29 : vector<1x16x16xf32> to vector<16x16xf32>
    %c0_11 = arith.constant 0 : index
    %c0_12 = arith.constant 0 : index
    %31 = vector.load %arg3[%c0_11, %c0_12] : memref<256x256xf32, #tpu.memory_space<vmem>>, vector<16x16xf32>
    tpu.vector_store %arg3[%c0_11, %c0_12], %30 {strides = array<i32>} : memref<256x256xf32, #tpu.memory_space<vmem>>, vector<16x16xf32>,
    %32 = vector.extract_strided_slice %28 {offsets = [1, 0, 0], sizes = [1, 16, 16], strides = [1, 1, 1]} : vector<16x16x16xf32> to vector<1x16x16xf32>
    %33 = vector.shape_cast %32 : vector<1x16x16xf32> to vector<16x16xf32>
    %c16 = arith.constant 16 : index
    %c16_13 = arith.constant 16 : index
    %34 = vector.load %arg3[%c16, %c16_13] : memref<256x256xf32, #tpu.memory_space<vmem>>, vector<16x16xf32>
    tpu.vector_store %arg3[%c16, %c16_13], %33 {strides = array<i32>} : memref<256x256xf32, #tpu.memory_space<vmem>>, vector<16x16xf32>,
    %35 = vector.extract_strided_slice %28 {offsets = [2, 0, 0], sizes = [1, 16, 16], strides = [1, 1, 1]} : vector<16x16x16xf32> to vector<1x16x16xf32>
    %36 = vector.shape_cast %35 : vector<1x16x16xf32> to vector<16x16xf32>
    %c32 = arith.constant 32 : index
    %c32_14 = arith.constant 32 : index
    %37 = vector.load %arg3[%c32, %c32_14] : memref<256x256xf32, #tpu.memory_space<vmem>>, vector<16x16xf32>
    tpu.vector_store %arg3[%c32, %c32_14], %36 {strides = array<i32>} : memref<256x256xf32, #tpu.memory_space<vmem>>, vector<16x16xf32>,
    %38 = vector.extract_strided_slice %28 {offsets = [3, 0, 0], sizes = [1, 16, 16], strides = [1, 1, 1]} : vector<16x16x16xf32> to vector<1x16x16xf32>
    %39 = vector.shape_cast %38 : vector<1x16x16xf32> to vector<16x16xf32>
    %c48 = arith.constant 48 : index
    %c48_15 = arith.constant 48 : index
    %40 = vector.load %arg3[%c48, %c48_15] : memref<256x256xf32, #tpu.memory_space<vmem>>, vector<16x16xf32>
    tpu.vector_store %arg3[%c48, %c48_15], %39 {strides = array<i32>} : memref<256x256xf32, #tpu.memory_space<vmem>>, vector<16x16xf32>,
    %41 = vector.extract_strided_slice %28 {offsets = [4, 0, 0], sizes = [1, 16, 16], strides = [1, 1, 1]} : vector<16x16x16xf32> to vector<1x16x16xf32>
    %42 = vector.shape_cast %41 : vector<1x16x16xf32> to vector<16x16xf32>
    %c64 = arith.constant 64 : index
    %c64_16 = arith.constant 64 : index
    %43 = vector.load %arg3[%c64, %c64_16] : memref<256x256xf32, #tpu.memory_space<vmem>>, vector<16x16xf32>
    tpu.vector_store %arg3[%c64, %c64_16], %42 {strides = array<i32>} : memref<256x256xf32, #tpu.memory_space<vmem>>, vector<16x16xf32>,
    %44 = vector.extract_strided_slice %28 {offsets = [5, 0, 0], sizes = [1, 16, 16], strides = [1, 1, 1]} : vector<16x16x16xf32> to vector<1x16x16xf32>
    %45 = vector.shape_cast %44 : vector<1x16x16xf32> to vector<16x16xf32>
    %c80 = arith.constant 80 : index
    %c80_17 = arith.constant 80 : index
    %46 = vector.load %arg3[%c80, %c80_17] : memref<256x256xf32, #tpu.memory_space<vmem>>, vector<16x16xf32>
    tpu.vector_store %arg3[%c80, %c80_17], %45 {strides = array<i32>} : memref<256x256xf32, #tpu.memory_space<vmem>>, vector<16x16xf32>,
    %47 = vector.extract_strided_slice %28 {offsets = [6, 0, 0], sizes = [1, 16, 16], strides = [1, 1, 1]} : vector<16x16x16xf32> to vector<1x16x16xf32>
    %48 = vector.shape_cast %47 : vector<1x16x16xf32> to vector<16x16xf32>
    %c96 = arith.constant 96 : index
    %c96_18 = arith.constant 96 : index
    %49 = vector.load %arg3[%c96, %c96_18] : memref<256x256xf32, #tpu.memory_space<vmem>>, vector<16x16xf32>
    tpu.vector_store %arg3[%c96, %c96_18], %48 {strides = array<i32>} : memref<256x256xf32, #tpu.memory_space<vmem>>, vector<16x16xf32>,
    %50 = vector.extract_strided_slice %28 {offsets = [7, 0, 0], sizes = [1, 16, 16], strides = [1, 1, 1]} : vector<16x16x16xf32> to vector<1x16x16xf32>
    %51 = vector.shape_cast %50 : vector<1x16x16xf32> to vector<16x16xf32>
    %c112 = arith.constant 112 : index
    %c112_19 = arith.constant 112 : index
    %52 = vector.load %arg3[%c112, %c112_19] : memref<256x256xf32, #tpu.memory_space<vmem>>, vector<16x16xf32>
    tpu.vector_store %arg3[%c112, %c112_19], %51 {strides = array<i32>} : memref<256x256xf32, #tpu.memory_space<vmem>>, vector<16x16xf32>,
    %53 = vector.extract_strided_slice %28 {offsets = [8, 0, 0], sizes = [1, 16, 16], strides = [1, 1, 1]} : vector<16x16x16xf32> to vector<1x16x16xf32>
    %54 = vector.shape_cast %53 : vector<1x16x16xf32> to vector<16x16xf32>
    %c128 = arith.constant 128 : index
    %c128_20 = arith.constant 128 : index
    %55 = vector.load %arg3[%c128, %c128_20] : memref<256x256xf32, #tpu.memory_space<vmem>>, vector<16x16xf32>
    tpu.vector_store %arg3[%c128, %c128_20], %54 {strides = array<i32>} : memref<256x256xf32, #tpu.memory_space<vmem>>, vector<16x16xf32>,
    %56 = vector.extract_strided_slice %28 {offsets = [9, 0, 0], sizes = [1, 16, 16], strides = [1, 1, 1]} : vector<16x16x16xf32> to vector<1x16x16xf32>
    %57 = vector.shape_cast %56 : vector<1x16x16xf32> to vector<16x16xf32>
    %c144 = arith.constant 144 : index
    %c144_21 = arith.constant 144 : index
    %58 = vector.load %arg3[%c144, %c144_21] : memref<256x256xf32, #tpu.memory_space<vmem>>, vector<16x16xf32>
    tpu.vector_store %arg3[%c144, %c144_21], %57 {strides = array<i32>} : memref<256x256xf32, #tpu.memory_space<vmem>>, vector<16x16xf32>,
    %59 = vector.extract_strided_slice %28 {offsets = [10, 0, 0], sizes = [1, 16, 16], strides = [1, 1, 1]} : vector<16x16x16xf32> to vector<1x16x16xf32>
    %60 = vector.shape_cast %59 : vector<1x16x16xf32> to vector<16x16xf32>
    %c160 = arith.constant 160 : index
    %c160_22 = arith.constant 160 : index
    %61 = vector.load %arg3[%c160, %c160_22] : memref<256x256xf32, #tpu.memory_space<vmem>>, vector<16x16xf32>
    tpu.vector_store %arg3[%c160, %c160_22], %60 {strides = array<i32>} : memref<256x256xf32, #tpu.memory_space<vmem>>, vector<16x16xf32>,
    %62 = vector.extract_strided_slice %28 {offsets = [11, 0, 0], sizes = [1, 16, 16], strides = [1, 1, 1]} : vector<16x16x16xf32> to vector<1x16x16xf32>
    %63 = vector.shape_cast %62 : vector<1x16x16xf32> to vector<16x16xf32>
    %c176 = arith.constant 176 : index
    %c176_23 = arith.constant 176 : index
    %64 = vector.load %arg3[%c176, %c176_23] : memref<256x256xf32, #tpu.memory_space<vmem>>, vector<16x16xf32>
    tpu.vector_store %arg3[%c176, %c176_23], %63 {strides = array<i32>} : memref<256x256xf32, #tpu.memory_space<vmem>>, vector<16x16xf32>,
    %65 = vector.extract_strided_slice %28 {offsets = [12, 0, 0], sizes = [1, 16, 16], strides = [1, 1, 1]} : vector<16x16x16xf32> to vector<1x16x16xf32>
    %66 = vector.shape_cast %65 : vector<1x16x16xf32> to vector<16x16xf32>
    %c192 = arith.constant 192 : index
    %c192_24 = arith.constant 192 : index
    %67 = vector.load %arg3[%c192, %c192_24] : memref<256x256xf32, #tpu.memory_space<vmem>>, vector<16x16xf32>
    tpu.vector_store %arg3[%c192, %c192_24], %66 {strides = array<i32>} : memref<256x256xf32, #tpu.memory_space<vmem>>, vector<16x16xf32>,
    %68 = vector.extract_strided_slice %28 {offsets = [13, 0, 0], sizes = [1, 16, 16], strides = [1, 1, 1]} : vector<16x16x16xf32> to vector<1x16x16xf32>
    %69 = vector.shape_cast %68 : vector<1x16x16xf32> to vector<16x16xf32>
    %c208 = arith.constant 208 : index
    %c208_25 = arith.constant 208 : index
    %70 = vector.load %arg3[%c208, %c208_25] : memref<256x256xf32, #tpu.memory_space<vmem>>, vector<16x16xf32>
    tpu.vector_store %arg3[%c208, %c208_25], %69 {strides = array<i32>} : memref<256x256xf32, #tpu.memory_space<vmem>>, vector<16x16xf32>,
    %71 = vector.extract_strided_slice %28 {offsets = [14, 0, 0], sizes = [1, 16, 16], strides = [1, 1, 1]} : vector<16x16x16xf32> to vector<1x16x16xf32>
    %72 = vector.shape_cast %71 : vector<1x16x16xf32> to vector<16x16xf32>
    %c224 = arith.constant 224 : index
    %c224_26 = arith.constant 224 : index
    %73 = vector.load %arg3[%c224, %c224_26] : memref<256x256xf32, #tpu.memory_space<vmem>>, vector<16x16xf32>
    tpu.vector_store %arg3[%c224, %c224_26], %72 {strides = array<i32>} : memref<256x256xf32, #tpu.memory_space<vmem>>, vector<16x16xf32>,
    %74 = vector.extract_strided_slice %28 {offsets = [15, 0, 0], sizes = [1, 16, 16], strides = [1, 1, 1]} : vector<16x16x16xf32> to vector<1x16x16xf32>
    %75 = vector.shape_cast %74 : vector<1x16x16xf32> to vector<16x16xf32>
    %c240 = arith.constant 240 : index
    %c240_27 = arith.constant 240 : index
    %76 = vector.load %arg3[%c240, %c240_27] : memref<256x256xf32, #tpu.memory_space<vmem>>, vector<16x16xf32>
    tpu.vector_store %arg3[%c240, %c240_27], %75 {strides = array<i32>} : memref<256x256xf32, #tpu.memory_space<vmem>>, vector<16x16xf32>,
    %c0_28 = arith.constant 0 : index
    %c0_29 = arith.constant 0 : index
    %77 = vector.load %arg3[%c0_28, %c0_29] : memref<256x256xf32, #tpu.memory_space<vmem>>, vector<256x256xf32>
    %78 = arith.subf %11, %77 : vector<256x256xf32>
    %cst_30 = arith.constant 5.000000e-01 : f32
    %79 = vector.broadcast %cst_30 : f32 to vector<256x256xf32>
    %80 = arith.mulf %79, %78 : vector<256x256xf32>
    %cst_31 = arith.constant dense<0.000000e+00> : vector<256x256xf32>
    %81 = tpu.matmul %77, %80, %cst_31 {dimension_numbers = #tpu.dot_dimension_numbers<[1], [0], [0], [1], [0, 0, 1, 1], [], []>} : vector<256x256xf32>, vector<256x256xf32>, vector<256x256xf32> -> vector<256x256xf32>
    %cst_32 = arith.constant dense<0.000000e+00> : vector<256x256xf32>
    %82 = tpu.matmul %80, %81, %cst_32 {dimension_numbers = #tpu.dot_dimension_numbers<[1], [0], [0], [1], [0, 0, 1, 1], [], []>} : vector<256x256xf32>, vector<256x256xf32>, vector<256x256xf32> -> vector<256x256xf32>
    %83 = arith.subf %11, %82 : vector<256x256xf32>
    %cst_33 = arith.constant 5.000000e-01 : f32
    %84 = vector.broadcast %cst_33 : f32 to vector<256x256xf32>
    %85 = arith.mulf %84, %83 : vector<256x256xf32>
    %cst_34 = arith.constant dense<0.000000e+00> : vector<256x256xf32>
    %86 = tpu.matmul %81, %85, %cst_34 {dimension_numbers = #tpu.dot_dimension_numbers<[1], [0], [0], [1], [0, 0, 1, 1], [], []>} : vector<256x256xf32>, vector<256x256xf32>, vector<256x256xf32> -> vector<256x256xf32>
    %cst_35 = arith.constant dense<0.000000e+00> : vector<256x256xf32>
    %87 = tpu.matmul %85, %80, %cst_35 {dimension_numbers = #tpu.dot_dimension_numbers<[1], [0], [0], [1], [0, 0, 1, 1], [], []>} : vector<256x256xf32>, vector<256x256xf32>, vector<256x256xf32> -> vector<256x256xf32>
    %cst_36 = arith.constant dense<0.000000e+00> : vector<256x256xf32>
    %88 = tpu.matmul %87, %86, %cst_36 {dimension_numbers = #tpu.dot_dimension_numbers<[1], [0], [0], [1], [0, 0, 1, 1], [], []>} : vector<256x256xf32>, vector<256x256xf32>, vector<256x256xf32> -> vector<256x256xf32>
    %89 = arith.subf %11, %88 : vector<256x256xf32>
    %cst_37 = arith.constant 5.000000e-01 : f32
    %90 = vector.broadcast %cst_37 : f32 to vector<256x256xf32>
    %91 = arith.mulf %90, %89 : vector<256x256xf32>
    %cst_38 = arith.constant dense<0.000000e+00> : vector<256x256xf32>
    %92 = tpu.matmul %86, %91, %cst_38 {dimension_numbers = #tpu.dot_dimension_numbers<[1], [0], [0], [1], [0, 0, 1, 1], [], []>} : vector<256x256xf32>, vector<256x256xf32>, vector<256x256xf32> -> vector<256x256xf32>
    %cst_39 = arith.constant dense<0.000000e+00> : vector<256x256xf32>
    %93 = tpu.matmul %91, %87, %cst_39 {dimension_numbers = #tpu.dot_dimension_numbers<[1], [0], [0], [1], [0, 0, 1, 1], [], []>} : vector<256x256xf32>, vector<256x256xf32>, vector<256x256xf32> -> vector<256x256xf32>
    %cst_40 = arith.constant dense<0.000000e+00> : vector<256x256xf32>
    %94 = tpu.matmul %93, %92, %cst_40 {dimension_numbers = #tpu.dot_dimension_numbers<[1], [0], [0], [1], [0, 0, 1, 1], [], []>} : vector<256x256xf32>, vector<256x256xf32>, vector<256x256xf32> -> vector<256x256xf32>
    %95 = arith.subf %11, %94 : vector<256x256xf32>
    %cst_41 = arith.constant 5.000000e-01 : f32
    %96 = vector.broadcast %cst_41 : f32 to vector<256x256xf32>
    %97 = arith.mulf %96, %95 : vector<256x256xf32>
    %cst_42 = arith.constant dense<0.000000e+00> : vector<256x256xf32>
    %98 = tpu.matmul %92, %97, %cst_42 {dimension_numbers = #tpu.dot_dimension_numbers<[1], [0], [0], [1], [0, 0, 1, 1], [], []>} : vector<256x256xf32>, vector<256x256xf32>, vector<256x256xf32> -> vector<256x256xf32>
    %cst_43 = arith.constant dense<0.000000e+00> : vector<256x256xf32>
    %99 = tpu.matmul %97, %93, %cst_43 {dimension_numbers = #tpu.dot_dimension_numbers<[1], [0], [0], [1], [0, 0, 1, 1], [], []>} : vector<256x256xf32>, vector<256x256xf32>, vector<256x256xf32> -> vector<256x256xf32>
    %cst_44 = arith.constant dense<0.000000e+00> : vector<256x256xf32>
    %100 = tpu.matmul %99, %98, %cst_44 {dimension_numbers = #tpu.dot_dimension_numbers<[1], [0], [0], [1], [0, 0, 1, 1], [], []>} : vector<256x256xf32>, vector<256x256xf32>, vector<256x256xf32> -> vector<256x256xf32>
    %101 = arith.subf %11, %100 : vector<256x256xf32>
    %cst_45 = arith.constant dense<0.000000e+00> : vector<256x256xf32>
    %102 = tpu.matmul %98, %101, %cst_45 {dimension_numbers = #tpu.dot_dimension_numbers<[1], [0], [0], [1], [0, 0, 1, 1], [], []>} : vector<256x256xf32>, vector<256x256xf32>, vector<256x256xf32> -> vector<256x256xf32>
    %cst_46 = arith.constant 5.000000e-01 : f32
    %103 = vector.broadcast %cst_46 : f32 to vector<256x256xf32>
    %104 = arith.mulf %103, %102 : vector<256x256xf32>
    %105 = vector.extract_strided_slice %104 {offsets = [0, 0], sizes = [16, 16], strides = [1, 1]} : vector<256x256xf32> to vector<16x16xf32>
    %106 = vector.extract_strided_slice %104 {offsets = [16, 16], sizes = [16, 16], strides = [1, 1]} : vector<256x256xf32> to vector<16x16xf32>
    %107 = vector.extract_strided_slice %104 {offsets = [32, 32], sizes = [16, 16], strides = [1, 1]} : vector<256x256xf32> to vector<16x16xf32>
    %108 = vector.extract_strided_slice %104 {offsets = [48, 48], sizes = [16, 16], strides = [1, 1]} : vector<256x256xf32> to vector<16x16xf32>
    %109 = vector.extract_strided_slice %104 {offsets = [64, 64], sizes = [16, 16], strides = [1, 1]} : vector<256x256xf32> to vector<16x16xf32>
    %110 = vector.extract_strided_slice %104 {offsets = [80, 80], sizes = [16, 16], strides = [1, 1]} : vector<256x256xf32> to vector<16x16xf32>
    %111 = vector.extract_strided_slice %104 {offsets = [96, 96], sizes = [16, 16], strides = [1, 1]} : vector<256x256xf32> to vector<16x16xf32>
    %112 = vector.extract_strided_slice %104 {offsets = [112, 112], sizes = [16, 16], strides = [1, 1]} : vector<256x256xf32> to vector<16x16xf32>
    %113 = vector.extract_strided_slice %104 {offsets = [128, 128], sizes = [16, 16], strides = [1, 1]} : vector<256x256xf32> to vector<16x16xf32>
    %114 = vector.extract_strided_slice %104 {offsets = [144, 144], sizes = [16, 16], strides = [1, 1]} : vector<256x256xf32> to vector<16x16xf32>
    %115 = vector.extract_strided_slice %104 {offsets = [160, 160], sizes = [16, 16], strides = [1, 1]} : vector<256x256xf32> to vector<16x16xf32>
    %116 = vector.extract_strided_slice %104 {offsets = [176, 176], sizes = [16, 16], strides = [1, 1]} : vector<256x256xf32> to vector<16x16xf32>
    %117 = vector.extract_strided_slice %104 {offsets = [192, 192], sizes = [16, 16], strides = [1, 1]} : vector<256x256xf32> to vector<16x16xf32>
    %118 = vector.extract_strided_slice %104 {offsets = [208, 208], sizes = [16, 16], strides = [1, 1]} : vector<256x256xf32> to vector<16x16xf32>
    %119 = vector.extract_strided_slice %104 {offsets = [224, 224], sizes = [16, 16], strides = [1, 1]} : vector<256x256xf32> to vector<16x16xf32>
    %120 = vector.extract_strided_slice %104 {offsets = [240, 240], sizes = [16, 16], strides = [1, 1]} : vector<256x256xf32> to vector<16x16xf32>
    %121 = vector.shape_cast %105 : vector<16x16xf32> to vector<1x16x16xf32>
    %122 = vector.shape_cast %106 : vector<16x16xf32> to vector<1x16x16xf32>
    %123 = vector.shape_cast %107 : vector<16x16xf32> to vector<1x16x16xf32>
    %124 = vector.shape_cast %108 : vector<16x16xf32> to vector<1x16x16xf32>
    %125 = vector.shape_cast %109 : vector<16x16xf32> to vector<1x16x16xf32>
    %126 = vector.shape_cast %110 : vector<16x16xf32> to vector<1x16x16xf32>
    %127 = vector.shape_cast %111 : vector<16x16xf32> to vector<1x16x16xf32>
    %128 = vector.shape_cast %112 : vector<16x16xf32> to vector<1x16x16xf32>
    %129 = vector.shape_cast %113 : vector<16x16xf32> to vector<1x16x16xf32>
    %130 = vector.shape_cast %114 : vector<16x16xf32> to vector<1x16x16xf32>
    %131 = vector.shape_cast %115 : vector<16x16xf32> to vector<1x16x16xf32>
    %132 = vector.shape_cast %116 : vector<16x16xf32> to vector<1x16x16xf32>
    %133 = vector.shape_cast %117 : vector<16x16xf32> to vector<1x16x16xf32>
    %134 = vector.shape_cast %118 : vector<16x16xf32> to vector<1x16x16xf32>
    %135 = vector.shape_cast %119 : vector<16x16xf32> to vector<1x16x16xf32>
    %136 = vector.shape_cast %120 : vector<16x16xf32> to vector<1x16x16xf32>
    %137 = tpu.concatenate %121, %122, %123, %124, %125, %126, %127, %128, %129, %130, %131, %132, %133, %134, %135, %136 in 0 : vector<1x16x16xf32>, vector<1x16x16xf32>, vector<1x16x16xf32>, vector<1x16x16xf32>, vector<1x16x16xf32>, vector<1x16x16xf32>, vector<1x16x16xf32>, vector<1x16x16xf32>, vector<1x16x16xf32>, vector<1x16x16xf32>, vector<1x16x16xf32>, vector<1x16x16xf32>, vector<1x16x16xf32>, vector<1x16x16xf32>, vector<1x16x16xf32>, vector<1x16x16xf32> -> vector<16x16x16xf32>
    %138 = math.sqrt %25 : vector<16x1x1xf32>
    %139 = vector.broadcast %138 : vector<16x1x1xf32> to vector<16x16x16xf32>
    %140 = arith.mulf %137, %139 : vector<16x16x16xf32>
    %141 = arith.index_cast %15 : i32 to index
    %c0_47 = arith.constant 0 : index
    %c0_48 = arith.constant 0 : index
    %c0_49 = arith.constant 0 : index
    %142 = vector.load %arg2[%141, %c0_47, %c0_48, %c0_49] : memref<1x16x16x16xf32, #tpu.memory_space<vmem>>, vector<1x16x16x16xf32>
    %143 = vector.shape_cast %142 : vector<1x16x16x16xf32> to vector<16x16x16xf32>
    %144 = vector.shape_cast %140 : vector<16x16x16xf32> to vector<1x16x16x16xf32>
    tpu.vector_store %arg2[%141, %c0_47, %c0_48, %c0_49], %144 {strides = array<i32>} : memref<1x16x16x16xf32, #tpu.memory_space<vmem>>, vector<1x16x16x16xf32>,
    %c1_i32_50 = arith.constant 1 : i32
    return
  }
  func.func @transform_0(%arg0: i32) -> (i32, i32, i32, i32) {
    %c0_i32 = arith.constant 0 : i32
    %c0_i32_0 = arith.constant 0 : i32
    %c0_i32_1 = arith.constant 0 : i32
    %c0_i32_2 = arith.constant 0 : i32
    return %arg0, %c0_i32, %c0_i32_0, %c0_i32_1 : i32, i32, i32, i32
  }
  func.func @transform_1(%arg0: i32) -> (i32, i32, i32, i32) {
    %c0_i32 = arith.constant 0 : i32
    %c0_i32_0 = arith.constant 0 : i32
    %c0_i32_1 = arith.constant 0 : i32
    %c0_i32_2 = arith.constant 0 : i32
    return %arg0, %c0_i32, %c0_i32_0, %c0_i32_1 : i32, i32, i32, i32
  }
}

</mosaic_0001>

<bundles_post_ra>
// kernel: isqrtm.1
= control target key start
LH: loop header
LB: loop body
LE: loop exit
PB: predicated region body
PF: predicated region fallthrough
CT: control target
= control target key end

     0   :  { %v8_v0 = vlaneseq  ;;  %v8468_v1 = vmov 0.0   ;;  %vm302_vm1 = vcmask 130048   ;;  %s4800_s10 = smov 112   ;;  %s4801_s11 = smov 96   ;;  %vm635_vm3 = vcmask 1048448   ;;  %s8466_s0 = inlined_call_operand.vmem [shape: f32[1,16,16,16], index: 0, kind: input, shape index: {}]   ;;  %s8467_s1 = inlined_call_operand.vmem [shape: f32[1,16,16,16], index: 1, kind: output, shape index: {}]  }
   0x1   :  { %174 = vst [vmem:[#allocation2] sm:$0xff] %v8468_v1  ;;  %175 = vst [vmem:[#allocation2 + $0x8] sm:$0xff] %v8468_v1  ;;  %966 = vmatprep.mubr.f32.mxu0 %v8468_v1  ;;  %v4858_v4 = vld [vmem:[%s8466_s0 + $0x70] sm:$0xff]  ;;  %v4863_v5 = vld [vmem:[%s8466_s0 + $0x60] sm:$0xff]  ;;  %s4802_s12 = smov 80   ;;  %s4803_s13 = smov 64  }
   0x2   :  { %176 = vst [vmem:[#allocation2 + $0x10] sm:$0xff] %v8468_v1  ;;  %178 = vst [vmem:[#allocation2 + $0x20] sm:$0xff] %v8468_v1  ;;  %v4851_v2 = vshrl.u32 %v8_v0, 7  ;;  %v4853_v3 = vand.u32 127, %v8_v0  ;;  %v4868_v6 = vld [vmem:[%s8466_s0 + $0x50] sm:$0xff]  ;;  %v4884_v9 = vld [vmem:[%s8466_s0 + $0x68] sm:$0xff] }
   0x3   :  { %180 = vst [vmem:[#allocation2 + $0x30] sm:$0xff] %v8468_v1  ;;  %182 = vst [vmem:[#allocation2 + $0x40] sm:$0xff] %v8468_v1  ;;  %v4903_v14 = vld [vmem:[%s8466_s0 + $0x58] sm:$0xff]  ;;  %v4923_v23 = vld [vmem:[%s8466_s0 + $0x48] sm:$0xff]  ;;  %s4804_s14 = smov 32   ;;  %s4806_s17 = smov 48  }
   0x4   :  { %184 = vst [vmem:[#allocation2 + $0x50] sm:$0xff] %v8468_v1  ;;  %186 = vst [vmem:[#allocation2 + $0x60] sm:$0xff] %v8468_v1  ;;  %vm13_vm0 = vcmp.eq.s32.totalorder %v4851_v2, %v4853_v3  ;;  %v4873_v7 = vadd.s32 8, %v4851_v2  ;;  %v4908_v15 = vld [vmem:[%s8466_s0 + $0x78] sm:$0xff]  ;;  %v4928_v24 = vld [vmem:[%s8466_s0 + $0x40] sm:$0xff]  ;;  %vm624_vm4 = vcmask 917248  }
   0x5   :  { %188 = vst [vmem:[#allocation2 + $0x70] sm:$0xff] %v8468_v1  ;;  %190 = vst [vmem:[#allocation2 + $0x80] sm:$0xff] %v8468_v1  ;;  %v4879_v8 = vsel %vm13_vm0, 1.0, %v8468_v1  ;;  %v4939_v29 = vld [vmem:[%s8466_s0 + $0x38] sm:$0xff]  ;;  %v4944_v30 = vld [vmem:[%s8466_s0 + $0x30] sm:$0xff]  ;;  %vm613_vm8 = vcmask 786048  }
   0x6   :  { %192 = vst [vmem:[#allocation2 + $0x90] sm:$0xff] %v8468_v1  ;;  %194 = vst [vmem:[#allocation2 + $0xa0] sm:$0xff] %v8468_v1  ;;  %v284_v10 = vmul.f32 %v4858_v4, %v4879_v8  ;;  %v282_v11 = vmul.f32 %v4863_v5, %v4879_v8  ;;  %vm14_vm2 = vcmp.eq.s32.totalorder %v4873_v7, %v4853_v3  ;;  %v4955_v35 = vld [vmem:[%s8466_s0 + $0x28] sm:$0xff]  ;;  %v4960_v36 = vld [vmem:[%s8466_s0 + $0x20] sm:$0xff]  ;;  %vm602_vm10 = vcmask 654848  }
   0x7   :  { %196 = vst [vmem:[#allocation2 + $0xb0] sm:$0xff] %v8468_v1  ;;  %198 = vst [vmem:[#allocation2 + $0xc0] sm:$0xff] %v8468_v1  ;;  %v280_v12 = vmul.f32 %v4868_v6, %v4879_v8  ;;  %v4898_v13 = vsel %vm14_vm2, 1.0, %v8468_v1  ;;  %v278_v28 = vmul.f32 %v4928_v24, %v4879_v8  ;;  %v276_v34 = vmul.f32 %v4944_v30, %v4879_v8  ;;  %v4971_v41 = vld [vmem:[%s8466_s0 + $0x18] sm:$0xff]  ;;  %v4976_v42 = vld [vmem:[%s8466_s0 + $0x10] sm:$0xff] }
   0x8   :  { %200 = vst [vmem:[#allocation2 + $0xd0] sm:$0xff] %v8468_v1  ;;  %202 = vst [vmem:[#allocation2 + $0xe0] sm:$0xff] %v8468_v1  ;;  %v345_v16 = vsel %vm302_vm1, %v284_v10, 0.0  ;;  %v339_v17 = vsel %vm302_vm1, %v282_v11, 0.0  ;;  %v283_v18 = vmul.f32 %v4884_v9, %v4898_v13  ;;  %v281_v21 = vmul.f32 %v4903_v14, %v4898_v13  ;;  %v4987_v47 = vld [vmem:[%s8466_s0 + $0xf8] sm:$0xff]  ;;  %v4992_v48 = vld [vmem:[%s8466_s0 + $0xf0] sm:$0xff] }
   0x9   :  { %204 = vst [vmem:[#allocation2 + $0xf0] sm:$0xff] %v8468_v1  ;;  %207 = vst [vmem:[#allocation2 + $0x108] sm:$0xff] %v8468_v1  ;;  %346 = vadd.xlane.f32.xlu0 %v345_v16  ;;  %340 = vadd.xlane.f32.xlu1 %v339_v17  ;;  %v333_v20 = vsel %vm302_vm1, %v280_v12, 0.0  ;;  %v285_v22 = vmul.f32 %v4908_v15, %v4898_v13  ;;  %v279_v27 = vmul.f32 %v4923_v23, %v4898_v13  ;;  %v5003_v53 = vld [vmem:[%s8466_s0 + $0xe8] sm:$0xff]  ;;  %v5008_v54 = vld [vmem:[%s8466_s0 + $0xe0] sm:$0xff]  ;;  %vm580_vm11 = vcmask 392448  }
   0xa   :  { %209 = vst [vmem:[#allocation2 + $0x118] sm:$0xff] %v8468_v1  ;;  %211 = vst [vmem:[#allocation2 + $0x128] sm:$0xff] %v8468_v1  ;;  %v342_v19 = vsel %vm302_vm1, %v283_v18, 0.0  ;;  %v336_v25 = vsel %vm302_vm1, %v281_v21, 0.0  ;;  %v327_v32 = vsel %vm302_vm1, %v278_v28, 0.0  ;;  %v277_v33 = vmul.f32 %v4939_v29, %v4898_v13  ;;  %v5019_v59 = vld [vmem:[%s8466_s0 + $0xd8] sm:$0xff] }
   0xb   :  { %213 = vst [vmem:[#allocation2 + $0x138] sm:$0xff] %v8468_v1  ;;  %215 = vst [vmem:[#allocation2 + $0x148] sm:$0xff] %v8468_v1  ;;  %v348_v26 = vsel %vm302_vm1, %v285_v22, 0.0  ;;  %v330_v31 = vsel %vm302_vm1, %v279_v27, 0.0  ;;  %v321_v38 = vsel %vm302_vm1, %v276_v34, 0.0  ;;  %v275_v39 = vmul.f32 %v4955_v35, %v4898_v13  ;;  %v5024_v60 = vld [vmem:[%s8466_s0 + $0xd0] sm:$0xff] }
   0xc   :  { %217 = vst [vmem:[#allocation2 + $0x158] sm:$0xff] %v8468_v1  ;;  %219 = vst [vmem:[#allocation2 + $0x168] sm:$0xff] %v8468_v1  ;;  %v324_v37 = vsel %vm302_vm1, %v277_v33, 0.0  ;;  %v274_v40 = vmul.f32 %v4960_v36, %v4879_v8  ;;  %v273_v45 = vmul.f32 %v4971_v41, %v4898_v13  ;;  %v272_v46 = vmul.f32 %v4976_v42, %v4879_v8  ;;  %v5035_v10 = vld [vmem:[%s8466_s0 + $0xc8] sm:$0xff]  ;;  %v5040_v11 = vld [vmem:[%s8466_s0 + $0xc0] sm:$0xff] }
   0xd   :  { %221 = vst [vmem:[#allocation2 + $0x178] sm:$0xff] %v8468_v1  ;;  %223 = vst [vmem:[#allocation2 + $0x188] sm:$0xff] %v8468_v1  ;;  %343 = vadd.xlane.f32.xlu1 %v342_v19  ;;  %334 = vadd.xlane.f32.xlu0 %v333_v20  ;;  %v318_v43 = vsel %vm302_vm1, %v275_v39, 0.0  ;;  %v301_v51 = vmul.f32 %v4987_v47, %v4898_v13  ;;  %v300_v52 = vmul.f32 %v4992_v48, %v4879_v8  ;;  %v5051_v19 = vld [vmem:[%s8466_s0 + $0xb8] sm:$0xff]  ;;  %v5056_v20 = vld [vmem:[%s8466_s0 + $0xb0] sm:$0xff]  ;;  %vm569_vm12 = vcmask 261248  }
   0xe   :  { %225 = vst [vmem:[#allocation2 + $0x198] sm:$0xff] %v8468_v1  ;;  %227 = vst [vmem:[#allocation2 + $0x1a8] sm:$0xff] %v8468_v1  ;;  %v315_v44 = vsel %vm302_vm1, %v274_v40, 0.0  ;;  %v312_v49 = vsel %vm302_vm1, %v273_v45, 0.0  ;;  %v309_v50 = vsel %vm302_vm1, %v272_v46, 0.0  ;;  %v299_v57 = vmul.f32 %v5003_v53, %v4898_v13  ;;  %v5067_v27 = vld [vmem:[%s8466_s0 + $0xa8] sm:$0xff] }
   0xf   :  { %229 = vst [vmem:[#allocation2 + $0x1b8] sm:$0xff] %v8468_v1  ;;  %231 = vst [vmem:[#allocation2 + $0x1c8] sm:$0xff] %v8468_v1  ;;  %v396_v55 = vsel %vm302_vm1, %v301_v51, 0.0  ;;  %v393_v56 = vsel %vm302_vm1, %v300_v52, 0.0  ;;  %v298_v58 = vmul.f32 %v5008_v54, %v4879_v8  ;;  %v297_v63 = vmul.f32 %v5019_v59, %v4898_v13  ;;  %v5072_v28 = vld [vmem:[%s8466_s0 + $0xa0] sm:$0xff]  ;;  %v5099_v45 = vld [vmem:[%s8466_s0 + $0x8] sm:$0xff] }
  0x10   :  { %233 = vst [vmem:[#allocation2 + $0x1d8] sm:$0xff] %v8468_v1  ;;  %235 = vst [vmem:[#allocation2 + $0x1e8] sm:$0xff] %v8468_v1  ;;  %v390_v61 = vsel %vm302_vm1, %v299_v57, 0.0  ;;  %v296_v0 = vmul.f32 %v5024_v60, %v4879_v8  ;;  %v295_v17 = vmul.f32 %v5035_v10, %v4898_v13  ;;  %v294_v18 = vmul.f32 %v5040_v11, %v4879_v8  ;;  %v5104_v46 = vld [vmem:[%s8466_s0] sm:$0xff] }
  0x11   :  { %237 = vst [vmem:[#allocation2 + $0x1f8] sm:$0xff] %v8468_v1  ;;  %337 = vadd.xlane.f32.xlu1 %v336_v25  ;;  %349 = vadd.xlane.f32.xlu0 %v348_v26  ;;  %v387_v62 = vsel %vm302_vm1, %v298_v58, 0.0  ;;  %v384_v12 = vsel %vm302_vm1, %v297_v63, 0.0  ;;  %v293_v25 = vmul.f32 %v5051_v19, %v4898_v13  ;;  %v292_v26 = vmul.f32 %v5056_v20, %v4879_v8 }
  0x12   :  { %v381_v16 = vsel %vm302_vm1, %v296_v0, 0.0  ;;  %v378_v21 = vsel %vm302_vm1, %v295_v17, 0.0  ;;  %v375_v22 = vsel %vm302_vm1, %v294_v18, 0.0  ;;  %v291_v33 = vmul.f32 %v5067_v27, %v4898_v13 }
  0x13   :  { %v290_v34 = vmul.f32 %v5072_v28, %v4879_v8  ;;  %v271_v51 = vmul.f32 %v5099_v45, %v4898_v13  ;;  %v270_v52 = vmul.f32 %v5104_v46, %v4879_v8  ;;  %vm591_vm13 = vcmask 523648  }
  0x14   :  { %v366_v39 = vsel %vm302_vm1, %v291_v33, 0.0 }
  0x15   :  { %331 = vadd.xlane.f32.xlu1 %v330_v31  ;;  %328 = vadd.xlane.f32.xlu0 %v327_v32  ;;  %v372_v31 = vsel %vm302_vm1, %v293_v25, 0.0  ;;  %v369_v32 = vsel %vm302_vm1, %v292_v26, 0.0  ;;  %v363_v40 = vsel %vm302_vm1, %v290_v34, 0.0  ;;  %v303_v57 = vsel %vm302_vm1, %v270_v52, 0.0 }
  0x19   :  { %325 = vadd.xlane.f32.xlu1 %v324_v37  ;;  %322 = vadd.xlane.f32.xlu0 %v321_v38  ;;  %v5083_v37 = vld [vmem:[%s8466_s0 + $0x98] sm:$0xff]  ;;  %v5088_v38 = vld [vmem:[%s8466_s0 + $0x90] sm:$0xff] }
  0x1d   :  { %319 = vadd.xlane.f32.xlu1 %v318_v43  ;;  %316 = vadd.xlane.f32.xlu0 %v315_v44  ;;  %v289_v43 = vmul.f32 %v5083_v37, %v4898_v13  ;;  %v288_v44 = vmul.f32 %v5088_v38, %v4879_v8 }
  0x21   :  { %313 = vadd.xlane.f32.xlu1 %v312_v49  ;;  %310 = vadd.xlane.f32.xlu0 %v309_v50  ;;  %v360_v49 = vsel %vm302_vm1, %v289_v43, 0.0  ;;  %v357_v50 = vsel %vm302_vm1, %v288_v44, 0.0 }
  0x25   :  { %397 = vadd.xlane.f32.xlu1 %v396_v55  ;;  %394 = vadd.xlane.f32.xlu0 %v393_v56  ;;  %v5115_v55 = vld [vmem:[%s8466_s0 + $0x80] sm:$0xff]  ;;  %v306_v56 = vsel %vm302_vm1, %v271_v51, 0.0 }
  0x26   :  { %v286_v58 = vmul.f32 %v5115_v55, %v4879_v8 }
  0x29   :  { %391 = vadd.xlane.f32.xlu1 %v390_v61  ;;  %388 = vadd.xlane.f32.xlu0 %v387_v62  ;;  %v351_v61 = vsel %vm302_vm1, %v286_v58, 0.0 }
  0x2d   :  { %385 = vadd.xlane.f32.xlu1 %v384_v12  ;;  %382 = vadd.xlane.f32.xlu0 %v381_v16 }
  0x31   :  { %379 = vadd.xlane.f32.xlu1 %v378_v21  ;;  %376 = vadd.xlane.f32.xlu0 %v375_v22 }
  0x35   :  { %373 = vadd.xlane.f32.xlu1 %v372_v31  ;;  %370 = vadd.xlane.f32.xlu0 %v369_v32 }
  0x39   :  { %367 = vadd.xlane.f32.xlu1 %v366_v39  ;;  %364 = vadd.xlane.f32.xlu0 %v363_v40 }
  0x3d   :  { %361 = vadd.xlane.f32.xlu1 %v360_v49  ;;  %358 = vadd.xlane.f32.xlu0 %v357_v50 }
  0x41   :  { %307 = vadd.xlane.f32.xlu1 %v306_v56  ;;  %304 = vadd.xlane.f32.xlu0 %v303_v57 }
  0x45   :  { %352 = vadd.xlane.f32.xlu1 %v351_v61 }
  0x92   :  { %v347_v62 = vpop.xlane.xlu0 %346  ;;  %v341_v63 = vpop.xlane.xlu1 %340 }
  0x96   :  { %v344_v0 = vpop.xlane.xlu1 %343  ;;  %v335_v12 = vpop.xlane.xlu0 %334 }
  0x97   :  { %v441_v16 = vadd.f32 %v344_v0, %v341_v63 }
  0x99   :  { %v442_v17 = vrot.slane %v441_v16, 4 }
  0x9a   :  { %v338_v18 = vpop.xlane.xlu1 %337  ;;  %v350_v21 = vpop.xlane.xlu0 %349 }
  0x9b   :  { %v443_v22 = vadd.f32 %v442_v17, %v441_v16  ;;  %v434_v25 = vadd.f32 %v338_v18, %v335_v12  ;;  %v448_v26 = vadd.f32 %v350_v21, %v347_v62 }
  0x9d   :  { %v444_v31 = vrot.slane %v443_v22, 2  ;;  %v435_v32 = vrot.slane %v434_v25, 4  ;;  %v449_v33 = vrot.slane %v448_v26, 4 }
  0x9e   :  { %v332_v8 = vpop.xlane.xlu1 %331  ;;  %v329_v34 = vpop.xlane.xlu0 %328 }
  0x9f   :  { %v445_v39 = vadd.f32 %v444_v31, %v443_v22  ;;  %v436_v40 = vadd.f32 %v435_v32, %v434_v25  ;;  %v450_v43 = vadd.f32 %v449_v33, %v448_v26  ;;  %v427_v44 = vadd.f32 %v332_v8, %v329_v34 }
  0xa1   :  { %v446_v49 = vrot.slane %v445_v39, 1  ;;  %v451_v50 = vrot.slane %v450_v43, 2  ;;  %v428_v51 = vrot.slane %v427_v44, 4  ;;  %v437_v52 = vrot.slane %v436_v40, 2 }
  0xa2   :  { %v5122_v56 = vpop.xlane.xlu1 %325  ;;  %v5124_v57 = vpop.xlane.xlu0 %322 }
  0xa3   :  { %v452_v58 = vadd.f32 %v451_v50, %v450_v43  ;;  %v429_v61 = vadd.f32 %v428_v51, %v427_v44  ;;  %v5126_v62 = vadd.f32 %v446_v49, %v445_v39  ;;  %v438_v0 = vadd.f32 %v437_v52, %v436_v40 }
  0xa5   :  { %8802 = vst [vmem:[#allocation3_spill] sm:$0xff] %v5126_v62  ;;  %v453_v63 = vrot.slane %v452_v58, 1  ;;  %v430_v18 = vrot.slane %v429_v61, 2  ;;  %4734 = vrcp.f32 %v5126_v62  ;;  %v439_v25 = vrot.slane %v438_v0, 1 }
  0xa6   :  { %v320_v12 = vpop.xlane.xlu1 %319  ;;  %v317_v16 = vpop.xlane.xlu0 %316 }
  0xa7   :  { %v5128_v17 = vadd.f32 %v453_v63, %v452_v58  ;;  %v413_v21 = vadd.f32 %v320_v12, %v317_v16  ;;  %v431_v32 = vadd.f32 %v430_v18, %v429_v61  ;;  %v5132_v40 = vadd.f32 %v439_v25, %v438_v0 }
  0xa9   :  { %8803 = vst [vmem:[#allocation4_spill] sm:$0xff] %v5128_v17  ;;  %4736 = vrcp.f32 %v5128_v17  ;;  %v414_v22 = vrot.slane %v413_v21, 4  ;;  %8804 = vst [vmem:[#allocation5_spill] sm:$0xff] %v5132_v40  ;;  %v432_v49 = vrot.slane %v431_v32, 1 }
  0xaa   :  { %v314_v26 = vpop.xlane.xlu1 %313  ;;  %v311_v31 = vpop.xlane.xlu0 %310  ;;  %4738 = vrcp.f32 %v5132_v40 }
  0xab   :  { %v415_v33 = vadd.f32 %v414_v22, %v413_v21  ;;  %v406_v8 = vadd.f32 %v314_v26, %v311_v31  ;;  %v5135_v61 = vadd.f32 %v432_v49, %v431_v32  ;;  %v8807_v49 = vmov 0.0  }
  0xac   :  { %902 = vmatprep.subr.mxu0 %v8807_v49  ;;  %1223 = vmatprep.mubr.f32.mxu1 %v8807_v49 }
  0xad   :  { %v416_v34 = vrot.slane %v415_v33, 2  ;;  %v407_v39 = vrot.slane %v406_v8, 4  ;;  %8805 = vst [vmem:[#allocation6_spill] sm:$0xff] %v5135_v61  ;;  %4740 = vrcp.f32 %v5135_v61 }
  0xae   :  { %v398_v43 = vpop.xlane.xlu1 %397  ;;  %v395_v44 = vpop.xlane.xlu0 %394 }
  0xaf   :  { %v417_v50 = vadd.f32 %v416_v34, %v415_v33  ;;  %v408_v51 = vadd.f32 %v407_v39, %v406_v8  ;;  %v504_v52 = vadd.f32 %v398_v43, %v395_v44 }
  0xb1   :  { %v505_v58 = vrot.slane %v504_v52, 4  ;;  %v418_v63 = vrot.slane %v417_v50, 1  ;;  %v409_v12 = vrot.slane %v408_v51, 2 }
  0xb2   :  { %v392_v16 = vpop.xlane.xlu1 %391  ;;  %v389_v1 = vpop.xlane.xlu0 %388 }
  0xb3   :  { %v506_v18 = vadd.f32 %v505_v58, %v504_v52  ;;  %v497_v21 = vadd.f32 %v392_v16, %v389_v1  ;;  %v4735_v22 = vpop.eup %4734  ;;  %v5138_v25 = vadd.f32 %v418_v63, %v417_v50  ;;  %v410_v26 = vadd.f32 %v409_v12, %v408_v51 }
  0xb4   :  { %v540_v1 = vmul.f32 %v4735_v22, %v4884_v9  ;;  %v539_v16 = vmul.f32 %v4735_v22, %v4863_v5 }
  0xb5   :  { %8806 = vst [vmem:[#allocation7_spill] sm:$0xff] %v5138_v25  ;;  %v498_v31 = vrot.slane %v497_v21, 4  ;;  %v507_v43 = vrot.slane %v506_v18, 2  ;;  %4742 = vrcp.f32 %v5138_v25 }
  0xb6   :  { %v4737_v0 = vpop.eup %4736  ;;  %v386_v33 = vpop.xlane.xlu1 %385 }
  0xb7   :  { %v383_v8 = vpop.xlane.xlu0 %382  ;;  %v541_v34 = vmul.f32 %v4737_v0, %v4858_v4  ;;  %v542_v39 = vmul.f32 %v4737_v0, %v4908_v15  ;;  %v499_v32 = vadd.f32 %v498_v31, %v497_v21  ;;  %v411_v15 = vrot.slane %v410_v26, 1 }
  0xb8   :  { %v490_v44 = vadd.f32 %v386_v33, %v383_v8  ;;  %v508_v58 = vadd.f32 %v507_v43, %v506_v18  ;;  %v5150_v8 = vpop.eup %4738 }
  0xb9   :  { %629 = vrot.lane.b32.xlu1 %v541_v34, %s4800_s10  ;;  %631 = vrot.lane.b32.xlu0 %v542_v39, %s4800_s10  ;;  %v500_v51 = vrot.slane %v499_v32, 2  ;;  %v5152_v34 = vadd.f32 %v411_v15, %v410_v26  ;;  %v537_v5 = vmul.f32 %v5150_v8, %v4868_v6 }
  0xba   :  { %v491_v50 = vrot.slane %v490_v44, 4  ;;  %v380_v52 = vpop.xlane.xlu1 %379  ;;  %v509_v39 = vrot.slane %v508_v58, 1  ;;  %v5156_v43 = vpop.eup %4740 }
  0xbb   :  { %v377_v4 = vpop.xlane.xlu0 %376  ;;  %v501_v0 = vadd.f32 %v500_v51, %v499_v32  ;;  %8808 = vst [vmem:[#allocation8_spill] sm:$0xff] %v5152_v34  ;;  %4744 = vrcp.f32 %v5152_v34  ;;  %v535_v15 = vmul.f32 %v5156_v43, %v4928_v24  ;;  %v41_v34 = vadd.s32 208, %v4851_v2 }
  0xbc   :  { %v492_v63 = vadd.f32 %v491_v50, %v490_v44  ;;  %v483_v12 = vadd.f32 %v380_v52, %v377_v4  ;;  %v5160_v50 = vadd.f32 %v509_v39, %v508_v58 }
  0xbd   :  { %620 = vrot.lane.b32.xlu1 %v540_v1, %s4801_s11  ;;  %v502_v22 = vrot.slane %v501_v0, 1 }
  0xbe   :  { %v484_v21 = vrot.slane %v483_v12, 4  ;;  %v493_v9 = vrot.slane %v492_v63, 2  ;;  %v374_v31 = vpop.xlane.xlu1 %373  ;;  %8809 = vst [vmem:[#allocation9_spill] sm:$0xff] %v5160_v50  ;;  %4746 = vrcp.f32 %v5160_v50 }
  0xbf   :  { %v371_v33 = vpop.xlane.xlu0 %370  ;;  %v5166_v6 = vadd.f32 %v502_v22, %v501_v0 }
  0xc0   :  { %v485_v17 = vadd.f32 %v484_v21, %v483_v12  ;;  %v476_v62 = vadd.f32 %v374_v31, %v371_v33  ;;  %v494_v44 = vadd.f32 %v493_v9, %v492_v63  ;;  %v420_v33 = vadd.f32 %v5122_v56, %v5124_v57 }
  0xc1   :  { %618 = vrot.lane.b32.xlu1 %v539_v16, %s4801_s11  ;;  %8810 = vst [vmem:[#allocation10_spill] sm:$0xff] %v5166_v6  ;;  %4748 = vrcp.f32 %v5166_v6 }
  0xc2   :  { %v477_v18 = vrot.slane %v476_v62, 4  ;;  %v368_v32 = vpop.xlane.xlu1 %367  ;;  %v486_v26 = vrot.slane %v485_v17, 2  ;;  %v4743_v12 = vpop.eup %4742  ;;  %v495_v63 = vrot.slane %v494_v44, 1 }
  0xc3   :  { %v365_v1 = vpop.xlane.xlu0 %364  ;;  %v532_v24 = vmul.f32 %v4743_v12, %v4955_v35  ;;  %v531_v56 = vmul.f32 %v4743_v12, %v4960_v36 }
  0xc4   :  { %v478_v51 = vadd.f32 %v477_v18, %v476_v62  ;;  %v469_v52 = vadd.f32 %v368_v32, %v365_v1  ;;  %v487_v58 = vadd.f32 %v486_v26, %v485_v17  ;;  %v5173_v0 = vadd.f32 %v495_v63, %v494_v44  ;;  %v5183_v44 = vld [vmem:[%s8466_s0 + $0x88] sm:$0xff]  ;;  %s4805_s0 = smov 16  }
  0xc5   :  { %607 = vrot.lane.b32.xlu1 %v537_v5, %s4802_s12  ;;  %v287_v36 = vmul.f32 %v5183_v44, %v4898_v13 }
  0xc6   :  { %v470_v4 = vrot.slane %v469_v52, 4  ;;  %v362_v16 = vpop.xlane.xlu1 %361  ;;  %v479_v9 = vrot.slane %v478_v51, 2  ;;  %8811 = vst [vmem:[#allocation11_spill] sm:$0xff] %v5173_v0  ;;  %v488_v17 = vrot.slane %v487_v58, 1  ;;  %4750 = vrcp.f32 %v5173_v0 }
  0xc7   :  { %v359_v21 = vpop.xlane.xlu0 %358  ;;  %v45_v0 = vadd.s32 240, %v4851_v2 }
  0xc8   :  { %v471_v31 = vadd.f32 %v470_v4, %v469_v52  ;;  %v462_v62 = vadd.f32 %v362_v16, %v359_v21  ;;  %v480_v32 = vadd.f32 %v479_v9, %v478_v51  ;;  %v421_v52 = vrot.slane %v420_v33, 4  ;;  %v5178_v57 = vpop.eup %4744 }
  0xc9   :  { %596 = vrot.lane.b32.xlu1 %v535_v15, %s4803_s13  ;;  %v5185_v51 = vadd.f32 %v488_v17, %v487_v58  ;;  %v529_v12 = vmul.f32 %v5178_v57, %v4976_v42 }
  0xca   :  { %v463_v39 = vrot.slane %v462_v62, 4  ;;  %v472_v18 = vrot.slane %v471_v31, 2  ;;  %v308_v5 = vpop.xlane.xlu1 %307  ;;  %v481_v15 = vrot.slane %v480_v32, 1  ;;  %v422_v21 = vadd.f32 %v421_v52, %v420_v33 }
  0xcb   :  { %v305_v22 = vpop.xlane.xlu0 %304  ;;  %8812 = vst [vmem:[#allocation12_spill] sm:$0xff] %v5185_v51  ;;  %4752 = vrcp.f32 %v5185_v51  ;;  %v354_v33 = vsel %vm302_vm1, %v287_v36, 0.0 }
  0xcc   :  { %v464_v1 = vadd.f32 %v463_v39, %v462_v62  ;;  %v399_v26 = vadd.f32 %v308_v5, %v305_v22  ;;  %v473_v4 = vadd.f32 %v472_v18, %v471_v31  ;;  %v4747_v62 = vpop.eup %4746  ;;  %v5193_v31 = vadd.f32 %v481_v15, %v480_v32 }
  0xcd   :  { %576 = vrot.lane.b32.xlu1 %v532_v24, %s4804_s14  ;;  %v423_v18 = vrot.slane %v422_v21, 2  ;;  %v557_v13 = vmul.f32 %v4747_v62, %v4992_v48 }
  0xce   :  { %v400_v35 = vrot.slane %v399_v26, 4  ;;  %v465_v63 = vrot.slane %v464_v1, 2  ;;  %v474_v39 = vrot.slane %v473_v4, 1  ;;  %8813 = vst [vmem:[#allocation13_spill] sm:$0xff] %v5193_v31  ;;  %4754 = vrcp.f32 %v5193_v31  ;;  %v4749_v5 = vpop.eup %4748 }
  0xcf   :  { %v424_v32 = vadd.f32 %v423_v18, %v422_v21 }
  0xd0   :  { %v401_v16 = vadd.f32 %v400_v35, %v399_v26  ;;  %v466_v58 = vadd.f32 %v465_v63, %v464_v1  ;;  %v5199_v22 = vadd.f32 %v474_v39, %v473_v4  ;;  %v555_v1 = vmul.f32 %v4749_v5, %v5008_v54 }
  0xd1   :  { %574 = vrot.lane.b32.xlu1 %v531_v56, %s4804_s14  ;;  %v425_v56 = vrot.slane %v424_v32, 1  ;;  %v538_v39 = vmul.f32 %v5150_v8, %v4903_v14  ;;  %v556_v8 = vmul.f32 %v4749_v5, %v5003_v53 }
  0xd2   :  { %v402_v9 = vrot.slane %v401_v16, 2  ;;  %8814 = vst [vmem:[#allocation14_spill] sm:$0xff] %v5199_v22  ;;  %v467_v17 = vrot.slane %v466_v58, 1  ;;  %4756 = vrcp.f32 %v5199_v22 }
  0xd3   :  { %v4751_v48 = vpop.eup %4750  ;;  %v5212_v15 = vadd.f32 %v425_v56, %v424_v32 }
  0xd4   :  { %v403_v24 = vadd.f32 %v402_v9, %v401_v16  ;;  %v5207_v52 = vadd.f32 %v467_v17, %v466_v58  ;;  %v553_v35 = vmul.f32 %v4751_v48, %v5024_v60 }
  0xd5   :  { %563 = vrot.lane.b32.xlu1 %v529_v12, %s4805_s0  ;;  %8817 = vst [vmem:[#allocation17_spill] sm:$0xff] %v5212_v15 }
  0xd6   :  { %v404_v42 = vrot.slane %v403_v24, 1  ;;  %8816 = vst [vmem:[#allocation16_spill] sm:$0xff] %v5207_v52 }
  0xd8   :  { %v5201_v26 = vadd.f32 %v404_v42, %v403_v24  ;;  %355 = vadd.xlane.f32.xlu0 %v354_v33  ;;  %v4753_v4 = vpop.eup %4752  ;;  %v27_v24 = vadd.s32 96, %v4851_v2 }
  0xd9   :  { %702 = vrot.lane.b32.xlu1 %v557_v13, %s4800_s10  ;;  %v551_v63 = vmul.f32 %v4753_v4, %v5040_v11 }
  0xda   :  { %8815 = vst [vmem:[#allocation15_spill] sm:$0xff] %v5201_v26  ;;  %4758 = vrcp.f32 %v5201_v26  ;;  %vm70_vm9 = vcmp.eq.s32.totalorder %v27_v24, %v4853_v3 }
  0xdb   :  { %4760 = vrcp.f32 %v5207_v52  ;;  %v4755_v54 = vpop.eup %4754 }
  0xdc   :  { %4762 = vrcp.f32 %v5212_v15  ;;  %v549_v21 = vmul.f32 %v4755_v54, %v5056_v20 }
  0xdd   :  { %692 = vrot.lane.b32.xlu1 %v555_v1, %s4801_s11 }
  0xdf   :  { %v4757_v16 = vpop.eup %4756 }
  0xe0   :  { %v547_v9 = vmul.f32 %v4757_v16, %v5072_v28 }
  0xe1   :  { %682 = vrot.lane.b32.xlu1 %v553_v35, %s4802_s12 }
  0xe5   :  { %672 = vrot.lane.b32.xlu1 %v551_v63, %s4803_s13 }
  0xe7   :  { %v4759_v36 = vpop.eup %4758 }
  0xe8   :  { %v528_v60 = vmul.f32 %v4759_v36, %v5099_v45  ;;  %v527_v12 = vmul.f32 %v4759_v36, %v5104_v46  ;;  %v4761_v11 = vpop.eup %4760  ;;  %v536_v45 = vmul.f32 %v5156_v43, %v4923_v23  ;;  %v558_v23 = vmul.f32 %v4747_v62, %v4987_v47  ;;  %v5255_v43 = vpop.xlane.xlu1 %352 }
  0xe9   :  { %662 = vrot.lane.b32.xlu1 %v549_v21, %s4806_s17  ;;  %v545_v20 = vmul.f32 %v4761_v11, %v5088_v38  ;;  %v4763_v46 = vpop.eup %4762  ;;  %v530_v38 = vmul.f32 %v5178_v57, %v4971_v41  ;;  %v550_v41 = vmul.f32 %v4755_v54, %v5051_v19  ;;  %v548_v47 = vmul.f32 %v4757_v16, %v5067_v27 }
  0xea   :  { %560 = vst.msk [vmem:[#allocation2 + $0x10] sm:$0xff] %vm302_vm1, %v528_v60  ;;  %559 = vst.msk [vmem:[#allocation2] sm:$0xff] %vm302_vm1, %v527_v12  ;;  %v534_v28 = vmul.f32 %v4763_v46, %v4939_v29  ;;  %v533_v14 = vmul.f32 %v4763_v46, %v4944_v30  ;;  %v554_v29 = vmul.f32 %v4751_v48, %v5019_v59  ;;  %v30_v59 = vadd.s32 120, %v4851_v2 }
  0xeb   :  { %v552_v30 = vmul.f32 %v4753_v4, %v5035_v10  ;;  %v546_v53 = vmul.f32 %v4761_v11, %v5083_v37  ;;  %v29_v10 = vadd.s32 112, %v4851_v2  ;;  %v28_v19 = vadd.s32 104, %v4851_v2 }
  0xec   :  { %vm76_vm5 = vcmp.eq.s32.totalorder %v30_v59, %v4853_v3  ;;  %v5298_v4 = vsel %vm70_vm9, 3.0, %v8807_v49  ;;  %v24_v59 = vadd.s32 72, %v4851_v2 }
  0xed   :  { %652 = vrot.lane.b32.xlu1 %v547_v9, %s4804_s14  ;;  %vm74_vm6 = vcmp.eq.s32.totalorder %v29_v10, %v4853_v3  ;;  %v5266_v37 = vsel %vm76_vm5, 3.0, %v8807_v49  ;;  %vm72_vm7 = vcmp.eq.s32.totalorder %v28_v19, %v4853_v3  ;;  %8821 = vst [vmem:[#allocation21_spill] sm:$0xff] %v5298_v4 }
  0xee   :  { %609 = vrot.lane.b32.xlu0 %v538_v39, %s4802_s12  ;;  %8818 = vst [vmem:[#allocation18_spill] sm:$0xff] %v5266_v37  ;;  %v5269_v58 = vsel %vm74_vm6, 3.0, %v8807_v49  ;;  %v5283_v17 = vsel %vm72_vm7, 3.0, %v8807_v49  ;;  %vm64_vm5 = vcmp.eq.s32.totalorder %v24_v59, %v4853_v3 }
  0xef   :  { %8819 = vst [vmem:[#allocation19_spill] sm:$0xff] %v5269_v58  ;;  %8820 = vst [vmem:[#allocation20_spill] sm:$0xff] %v5283_v17 }
  0xf1   :  { %642 = vrot.lane.b32.xlu1 %v545_v20, %s4805_s0 }
  0xf2   :  { %598 = vrot.lane.b32.xlu0 %v536_v45, %s4803_s13 }
  0xf6   :  { %587 = vrot.lane.b32.xlu0 %v534_v28, %s4806_s17 }
  0xfa   :  { %585 = vrot.lane.b32.xlu0 %v533_v14, %s4806_s17 }
  0xfe   :  { %565 = vrot.lane.b32.xlu0 %v530_v38, %s4805_s0 }
 0x102   :  { %704 = vrot.lane.b32.xlu0 %v558_v23, %s4800_s10  ;;  %v25_v23 = vadd.s32 80, %v4851_v2 }
 0x104   :  { %vm66_vm14 = vcmp.eq.s32.totalorder %v25_v23, %v4853_v3  ;;  %v19_v23 = vadd.s32 32, %v4851_v2 }
 0x106   :  { %694 = vrot.lane.b32.xlu0 %v556_v8, %s4801_s11 }
 0x10a   :  { %684 = vrot.lane.b32.xlu0 %v554_v29, %s4802_s12 }
 0x10e   :  { %674 = vrot.lane.b32.xlu0 %v552_v30, %s4803_s13  ;;  %v26_v30 = vadd.s32 88, %v4851_v2 }
 0x110   :  { %vm68_vm15 = vcmp.eq.s32.totalorder %v26_v30, %v4853_v3  ;;  %v18_v30 = vadd.s32 24, %v4851_v2 }
 0x112   :  { %664 = vrot.lane.b32.xlu0 %v550_v41, %s4806_s17 }
 0x116   :  { %654 = vrot.lane.b32.xlu0 %v548_v47, %s4804_s14 }
 0x11a   :  { %644 = vrot.lane.b32.xlu0 %v546_v53, %s4805_s0 }
 0x12b   :  { %v630_v57 = vpop.permute.xlu1 %629  ;;  %v632_v62 = vpop.permute.xlu0 %631 }
 0x12c   :  { %636 = vst.msk [vmem:[#allocation2 + $0xe0] sm:$0xff] %vm635_vm3, %v630_v57  ;;  %637 = vst.msk [vmem:[#allocation2 + $0xf0] sm:$0xff] %vm635_vm3, %v632_v62  ;;  %v5334_v62 = vld [vmem:[#allocation2 + $0x8] sm:$0xff] }
 0x12d   :  { %v5337_v19 = vsel %vm68_vm15, 3.0, %v5334_v62  ;;  %vm54_vm15 = vcmp.eq.s32.totalorder %v19_v23, %v4853_v3  ;;  %v5436_v23 = vadd.s32 128, %v4853_v3  ;;  %v5463_v52 = vsel %vm14_vm2, 3.0, %v5334_v62 }
 0x12e   :  { %8822 = vst [vmem:[#allocation22_spill] sm:$0xff] %v5337_v19  ;;  %8833 = vst [vmem:[#allocation33_spill] sm:$0xff] %v5463_v52 }
 0x12f   :  { %v621_v27 = vpop.permute.xlu1 %620  ;;  %vm107_vm2 = vcmp.eq.s32.totalorder %v45_v0, %v5436_v23  ;;  %v42_v0 = vadd.s32 216, %v4851_v2 }
 0x130   :  { %626 = vst.msk [vmem:[#allocation2 + $0xd0] sm:$0xff] %vm624_vm4, %v621_v27  ;;  %v5340_v27 = vsel %vm66_vm14, 3.0, %v5334_v62  ;;  %v5509_v15 = vsel %vm107_vm2, 3.0, %v5334_v62 }
 0x131   :  { %8823 = vst [vmem:[#allocation23_spill] sm:$0xff] %v5340_v27  ;;  %8836 = vst [vmem:[#allocation36_spill] sm:$0xff] %v5509_v15 }
 0x133   :  { %v619_v18 = vpop.permute.xlu1 %618  ;;  %v5273_v33 = vld [vmem:[#allocation2 + $0xf0] sm:$0xff]  ;;  %v5275_v13 = vld [vmem:[#allocation2 + $0xe0] sm:$0xff] }
 0x134   :  { %625 = vst.msk [vmem:[#allocation2 + $0xc0] sm:$0xff] %vm624_vm4, %v619_v18  ;;  %v804_v42 = vsub.f32 %v5266_v37, %v5273_v33  ;;  %v802_v5 = vsub.f32 %v5269_v58, %v5275_v13 }
 0x136   :  { %v5285_v32 = vmul.f32 0.5, %v804_v42  ;;  %v5292_v56 = vmul.f32 0.5, %v802_v5  ;;  %v22_v42 = vadd.s32 56, %v4851_v2 }
 0x137   :  { %v608_v1 = vpop.permute.xlu1 %607  ;;  %v5288_v48 = vld [vmem:[#allocation2 + $0xd0] sm:$0xff] }
 0x138   :  { %614 = vst.msk [vmem:[#allocation2 + $0xa0] sm:$0xff] %vm613_vm8, %v608_v1  ;;  %903 = vmatpush1.msra.mxu0 %v5285_v32  ;;  %v800_v35 = vsub.f32 %v5283_v17, %v5288_v48  ;;  %vm60_vm7 = vcmp.eq.s32.totalorder %v22_v42, %v4853_v3 }
 0x139   :  { %904 = vmatprep.subr.mxu0 %v8807_v49 }
 0x13a   :  { %905 = vmatpush1.msra.mxu0 %v5292_v56  ;;  %v5301_v63 = vmul.f32 0.5, %v800_v35 }
 0x13b   :  { %906 = vmatprep.subr.mxu0 %v8807_v49  ;;  %v597_v54 = vpop.permute.xlu1 %596  ;;  %v5304_v16 = vld [vmem:[#allocation2 + $0xc0] sm:$0xff] }
 0x13c   :  { %907 = vmatpush1.msra.mxu0 %v5301_v63  ;;  %603 = vst.msk [vmem:[#allocation2 + $0x80] sm:$0xff] %vm602_vm10, %v597_v54  ;;  %v798_v21 = vsub.f32 %v5298_v4, %v5304_v16 }
 0x13d   :  { %908 = vmatprep.subr.mxu0 %v8807_v49 }
 0x13e   :  { %v5311_v36 = vmul.f32 0.5, %v798_v21 }
 0x13f   :  { %v577_v60 = vpop.permute.xlu1 %576  ;;  %v5342_v24 = vld [vmem:[#allocation2 + $0xa0] sm:$0xff] }
 0x140   :  { %909 = vmatpush1.msra.mxu0 %v5311_v36  ;;  %582 = vst.msk [vmem:[#allocation2 + $0x50] sm:$0xff] %vm580_vm11, %v577_v60  ;;  %v794_v21 = vsub.f32 %v5340_v27, %v5342_v24  ;;  %v5357_v60 = vsel %vm64_vm5, 3.0, %v5334_v62  ;;  %vm52_vm5 = vcmp.eq.s32.totalorder %v18_v30, %v4853_v3 }
 0x141   :  { %910 = vmatprep.subr.mxu0 %v8807_v49  ;;  %8825 = vst [vmem:[#allocation25_spill] sm:$0xff] %v5357_v60 }
 0x143   :  { %v575_v12 = vpop.permute.xlu1 %574 }
 0x144   :  { %581 = vst.msk [vmem:[#allocation2 + $0x40] sm:$0xff] %vm580_vm11, %v575_v12 }
 0x147   :  { %v564_v9 = vpop.permute.xlu1 %563 }
 0x148   :  { %570 = vst.msk [vmem:[#allocation2 + $0x20] sm:$0xff] %vm569_vm12, %v564_v9  ;;  %v5362_v9 = vld [vmem:[#allocation2 + $0x80] sm:$0xff] }
 0x14b   :  { %v703_v11 = vpop.permute.xlu1 %702 }
 0x14c   :  { %708 = vst.msk [vmem:[#allocation2 + $0x1e8] sm:$0xff] %vm635_vm3, %v703_v11  ;;  %v20_v11 = vadd.s32 40, %v4851_v2 }
 0x14e   :  { %vm56_vm14 = vcmp.eq.s32.totalorder %v20_v11, %v4853_v3  ;;  %v5421_v11 = vld [vmem:[#allocation2 + $0x40] sm:$0xff] }
 0x14f   :  { %v693_v39 = vpop.permute.xlu1 %692  ;;  %v5447_v6 = vld [vmem:[#allocation2 + $0x20] sm:$0xff] }
 0x150   :  { %698 = vst.msk [vmem:[#allocation2 + $0x1c8] sm:$0xff] %vm624_vm4, %v693_v39 }
 0x153   :  { %v683_v20 = vpop.permute.xlu1 %682 }
 0x154   :  { %688 = vst.msk [vmem:[#allocation2 + $0x1a8] sm:$0xff] %vm613_vm8, %v683_v20  ;;  %v21_v20 = vadd.s32 48, %v4851_v2 }
 0x156   :  { %vm58_vm9 = vcmp.eq.s32.totalorder %v21_v20, %v4853_v3 }
 0x157   :  { %v673_v45 = vpop.permute.xlu1 %672  ;;  %v5538_v37 = vld [vmem:[#allocation2 + $0x1c8] sm:$0xff] }
 0x158   :  { %678 = vst.msk [vmem:[#allocation2 + $0x188] sm:$0xff] %vm602_vm10, %v673_v45 }
 0x15b   :  { %v663_v46 = vpop.permute.xlu1 %662 }
 0x15c   :  { %668 = vst.msk [vmem:[#allocation2 + $0x168] sm:$0xff] %vm591_vm13, %v663_v46 }
 0x15f   :  { %v653_v28 = vpop.permute.xlu1 %652 }
 0x160   :  { %658 = vst.msk [vmem:[#allocation2 + $0x148] sm:$0xff] %vm580_vm11, %v653_v28  ;;  %v5374_v28 = vmul.f32 0.5, %v794_v21  ;;  %v5419_v21 = vsel %vm54_vm15, 3.0, %v5334_v62 }
 0x161   :  { %v356_v14 = vpop.xlane.xlu0 %355  ;;  %8830 = vst [vmem:[#allocation30_spill] sm:$0xff] %v5419_v21 }
 0x162   :  { %v455_v38 = vadd.f32 %v356_v14, %v5255_v43  ;;  %v23_v43 = vadd.s32 64, %v4851_v2 }
 0x163   :  { %v643_v8 = vpop.permute.xlu1 %642 }
 0x164   :  { %v456_v29 = vrot.slane %v455_v38, 4  ;;  %648 = vst.msk [vmem:[#allocation2 + $0x128] sm:$0xff] %vm569_vm12, %v643_v8  ;;  %vm62_vm6 = vcmp.eq.s32.totalorder %v23_v43, %v4853_v3  ;;  %v5383_v8 = vsel %vm60_vm7, 3.0, %v5334_v62  ;;  %v17_v43 = vadd.s32 16, %v4851_v2 }
 0x165   :  { %v610_v41 = vpop.permute.xlu0 %609  ;;  %v5360_v12 = vsel %vm62_vm6, 3.0, %v5334_v62  ;;  %8827 = vst [vmem:[#allocation27_spill] sm:$0xff] %v5383_v8 }
 0x166   :  { %v457_v47 = vadd.f32 %v456_v29, %v455_v38  ;;  %615 = vst.msk [vmem:[#allocation2 + $0xb0] sm:$0xff] %vm613_vm8, %v610_v41  ;;  %8826 = vst [vmem:[#allocation26_spill] sm:$0xff] %v5360_v12  ;;  %v790_v38 = vsub.f32 %v5360_v12, %v5362_v9  ;;  %vm50_vm6 = vcmp.eq.s32.totalorder %v17_v43, %v4853_v3 }
 0x167   :  { %v5445_v43 = vsel %vm50_vm6, 3.0, %v5334_v62 }
 0x168   :  { %v458_v53 = vrot.slane %v457_v47, 2  ;;  %8832 = vst [vmem:[#allocation32_spill] sm:$0xff] %v5445_v43 }
 0x169   :  { %v599_v10 = vpop.permute.xlu0 %598 }
 0x16a   :  { %v459_v57 = vadd.f32 %v458_v53, %v457_v47  ;;  %604 = vst.msk [vmem:[#allocation2 + $0x90] sm:$0xff] %vm602_vm10, %v599_v10  ;;  %v5396_v53 = vmul.f32 0.5, %v790_v38  ;;  %v5404_v10 = vsel %vm58_vm9, 3.0, %v5334_v62  ;;  %v46_v38 = vadd.s32 248, %v4851_v2 }
 0x16b   :  { %8828 = vst [vmem:[#allocation28_spill] sm:$0xff] %v5404_v10 }
 0x16c   :  { %v460_v18 = vrot.slane %v459_v57, 1 }
 0x16d   :  { %v588_v5 = vpop.permute.xlu0 %587  ;;  %v5347_v1 = vld [vmem:[#allocation2 + $0xb0] sm:$0xff] }
 0x16e   :  { %v5349_v35 = vadd.f32 %v460_v18, %v459_v57  ;;  %593 = vst.msk [vmem:[#allocation2 + $0x70] sm:$0xff] %vm591_vm13, %v588_v5  ;;  %v796_v54 = vsub.f32 %v5337_v19, %v5347_v1  ;;  %v5407_v57 = vsel %vm56_vm14, 3.0, %v5334_v62  ;;  %v5409_v18 = vld [vmem:[#allocation2 + $0x50] sm:$0xff]  ;;  %v5565_v19 = vld [vmem:[#allocation2 + $0x1a8] sm:$0xff] }
 0x16f   :  { %8829 = vst [vmem:[#allocation29_spill] sm:$0xff] %v5407_v57 }
 0x170   :  { %8824 = vst [vmem:[#allocation24_spill] sm:$0xff] %v5349_v35  ;;  %4764 = vrcp.f32 %v5349_v35  ;;  %v5366_v39 = vmul.f32 0.5, %v796_v54 }
 0x171   :  { %v586_v45 = vpop.permute.xlu0 %585  ;;  %v5370_v46 = vld [vmem:[#allocation2 + $0x90] sm:$0xff] }
 0x172   :  { %592 = vst.msk [vmem:[#allocation2 + $0x60] sm:$0xff] %vm591_vm13, %v586_v45  ;;  %911 = vmatpush1.msra.mxu0 %v5366_v39  ;;  %v792_v14 = vsub.f32 %v5357_v60, %v5370_v46  ;;  %v784_v45 = vsub.f32 %v5407_v57, %v5409_v18 }
 0x173   :  { %912 = vmatprep.subr.mxu0 %v8807_v49 }
 0x174   :  { %913 = vmatpush1.msra.mxu0 %v5374_v28  ;;  %v5386_v29 = vmul.f32 0.5, %v792_v14  ;;  %v5432_v14 = vsel %vm52_vm5, 3.0, %v5334_v62 }
 0x175   :  { %914 = vmatprep.subr.mxu0 %v8807_v49  ;;  %v566_v41 = vpop.permute.xlu0 %565  ;;  %v5392_v47 = vld [vmem:[#allocation2 + $0x70] sm:$0xff]  ;;  %8831 = vst [vmem:[#allocation31_spill] sm:$0xff] %v5432_v14 }
 0x176   :  { %571 = vst.msk [vmem:[#allocation2 + $0x30] sm:$0xff] %vm569_vm12, %v566_v41  ;;  %915 = vmatpush1.msra.mxu0 %v5386_v29  ;;  %v788_v59 = vsub.f32 %v5383_v8, %v5392_v47  ;;  %v782_v41 = vsub.f32 %v5419_v21, %v5421_v11  ;;  %v5592_v8 = vld [vmem:[#allocation2 + $0x188] sm:$0xff] }
 0x177   :  { %916 = vmatprep.subr.mxu0 %v8807_v49 }
 0x178   :  { %917 = vmatpush1.msra.mxu0 %v5396_v53  ;;  %v5412_v42 = vmul.f32 0.5, %v788_v59  ;;  %v5470_v40 = vmul.f32 0.5, %v782_v41  ;;  %v43_v41 = vadd.s32 224, %v4851_v2 }
 0x179   :  { %918 = vmatprep.subr.mxu0 %v8807_v49  ;;  %v705_v5 = vpop.permute.xlu0 %704  ;;  %v5416_v54 = vld [vmem:[#allocation2 + $0x60] sm:$0xff] }
 0x17a   :  { %709 = vst.msk [vmem:[#allocation2 + $0x1f8] sm:$0xff] %vm635_vm3, %v705_v5  ;;  %919 = vmatpush1.msra.mxu0 %v5412_v42  ;;  %v786_v20 = vsub.f32 %v5404_v10, %v5416_v54  ;;  %vm109_vm3 = vcmp.eq.s32.totalorder %v46_v38, %v5436_v23  ;;  %v5511_v38 = vld [vmem:[#allocation2 + $0x1e8] sm:$0xff] }
 0x17b   :  { %920 = vmatprep.subr.mxu0 %v8807_v49  ;;  %v5496_v3 = vsel %vm109_vm3, 3.0, %v5334_v62 }
 0x17c   :  { %v5438_v30 = vmul.f32 0.5, %v786_v20  ;;  %v5452_v20 = vmul.f32 0.5, %v784_v45  ;;  %v44_v45 = vadd.s32 232, %v4851_v2  ;;  %8835 = vst [vmem:[#allocation35_spill] sm:$0xff] %v5496_v3 }
 0x17d   :  { %v4765_v59 = vpop.eup %4764  ;;  %v695_v5 = vpop.permute.xlu0 %694  ;;  %v5442_v50 = vld [vmem:[#allocation2 + $0x30] sm:$0xff] }
 0x17e   :  { %699 = vst.msk [vmem:[#allocation2 + $0x1d8] sm:$0xff] %vm624_vm4, %v695_v5  ;;  %921 = vmatpush1.msra.mxu0 %v5438_v30  ;;  %v780_v51 = vsub.f32 %v5432_v14, %v5442_v50  ;;  %v544_v31 = vmul.f32 %v4765_v59, %v5183_v44  ;;  %v543_v22 = vmul.f32 %v4765_v59, %v5115_v55  ;;  %v5465_v5 = vld [vmem:[#allocation2 + $0x10] sm:$0xff]  ;;  %v5481_v44 = vsel %vm13_vm0, 3.0, %v5334_v62  ;;  %v5483_v59 = vld [vmem:[#allocation2] sm:$0xff]  ;;  %v5619_v14 = vld [vmem:[#allocation2 + $0x168] sm:$0xff] }
 0x17f   :  { %922 = vmatprep.subr.mxu0 %v8807_v49  ;;  %v778_v55 = vsub.f32 %v5445_v43, %v5447_v6  ;;  %8834 = vst [vmem:[#allocation34_spill] sm:$0xff] %v5481_v44  ;;  %vm105_vm0 = vcmp.eq.s32.totalorder %v44_v45, %v5436_v23  ;;  %vm103_vm4 = vcmp.eq.s32.totalorder %v43_v41, %v5436_v23  ;;  %v40_v41 = vadd.s32 200, %v4851_v2 }
 0x180   :  { %923 = vmatpush1.msra.mxu0 %v5452_v20  ;;  %639 = vst.msk [vmem:[#allocation2 + $0x118] sm:$0xff] %vm302_vm1, %v544_v31  ;;  %638 = vst.msk [vmem:[#allocation2 + $0x108] sm:$0xff] %vm302_vm1, %v543_v22  ;;  %v5489_v31 = vmul.f32 0.5, %v780_v51  ;;  %v776_v22 = vsub.f32 %v5463_v52, %v5465_v5  ;;  %v5523_v35 = vsel %vm105_vm0, 3.0, %v5334_v62 }
 0x181   :  { %924 = vmatprep.subr.mxu0 %v8807_v49  ;;  %v685_v7 = vpop.permute.xlu0 %684  ;;  %v5498_v61 = vld [vmem:[#allocation2 + $0x1f8] sm:$0xff]  ;;  %v5504_v51 = vmul.f32 0.5, %v778_v55  ;;  %8837 = vst [vmem:[#allocation37_spill] sm:$0xff] %v5523_v35  ;;  %vm97_vm7 = vcmp.eq.s32.totalorder %v40_v41, %v5436_v23  ;;  %v37_v41 = vadd.s32 176, %v4851_v2 }
 0x182   :  { %689 = vst.msk [vmem:[#allocation2 + $0x1b8] sm:$0xff] %vm613_vm8, %v685_v7  ;;  %925 = vmatpush1.msra.mxu0 %v5470_v40  ;;  %v774_v7 = vsub.f32 %v5481_v44, %v5483_v59  ;;  %v837_v45 = vsub.f32 %v5496_v3, %v5498_v61  ;;  %v5520_v55 = vmul.f32 0.5, %v776_v22  ;;  %v835_v3 = vsub.f32 %v5509_v15, %v5511_v38 }
 0x183   :  { %926 = vmatprep.subr.mxu0 %v8807_v49  ;;  %vm101_vm8 = vcmp.eq.s32.totalorder %v42_v0, %v5436_v23  ;;  %v5536_v22 = vsel %vm103_vm4, 3.0, %v5334_v62  ;;  %v39_v0 = vadd.s32 192, %v4851_v2 }
 0x184   :  { %927 = vmatpush1.msra.mxu0 %v5489_v31  ;;  %8838 = vst [vmem:[#allocation38_spill] sm:$0xff] %v5536_v22  ;;  %v5541_v17 = vmul.f32 0.5, %v837_v45  ;;  %v5555_v45 = vmul.f32 0.5, %v835_v3 }
 0x185   :  { %928 = vmatprep.subr.mxu0 %v8807_v49  ;;  %v675_v25 = vpop.permute.xlu0 %674  ;;  %v5525_v26 = vld [vmem:[#allocation2 + $0x1d8] sm:$0xff] }
 0x186   :  { %679 = vst.msk [vmem:[#allocation2 + $0x198] sm:$0xff] %vm602_vm10, %v675_v25  ;;  %929 = vmatpush1.msra.mxu0 %v5504_v51  ;;  %v5533_v25 = vmul.f32 0.5, %v774_v7  ;;  %v833_v15 = vsub.f32 %v5523_v35, %v5525_v26  ;;  %vm99_vm10 = vcmp.eq.s32.totalorder %v41_v34, %v5436_v23  ;;  %v5550_v7 = vsel %vm101_vm8, 3.0, %v5334_v62 }
 0x187   :  { %930 = vmatprep.subr.mxu0 %v8807_v49  ;;  %8839 = vst [vmem:[#allocation39_spill] sm:$0xff] %v5550_v7  ;;  %v831_v35 = vsub.f32 %v5536_v22, %v5538_v37  ;;  %v38_v34 = vadd.s32 184, %v4851_v2  ;;  %v5577_v22 = vsel %vm97_vm7, 3.0, %v5334_v62 }
 0x188   :  { %931 = vmatpush1.msra.mxu0 %v5520_v55  ;;  %v5568_v60 = vmul.f32 0.5, %v833_v15  ;;  %8841 = vst [vmem:[#allocation41_spill] sm:$0xff] %v5577_v22 }
 0x189   :  { %932 = vmatprep.subr.mxu0 %v8807_v49  ;;  %v665_v58 = vpop.permute.xlu0 %664  ;;  %v5552_v4 = vld [vmem:[#allocation2 + $0x1b8] sm:$0xff]  ;;  %v5582_v15 = vmul.f32 0.5, %v831_v35  ;;  %vm93_vm9 = vcmp.eq.s32.totalorder %v38_v34, %v5436_v23  ;;  %v35_v34 = vadd.s32 160, %v4851_v2 }
 0x18a   :  { %669 = vst.msk [vmem:[#allocation2 + $0x178] sm:$0xff] %vm591_vm13, %v665_v58  ;;  %933 = vmatpush1.msra.mxu0 %v5533_v25  ;;  %v5563_v58 = vsel %vm99_vm10, 3.0, %v5334_v62  ;;  %v829_v3 = vsub.f32 %v5550_v7, %v5552_v4  ;;  %vm95_vm13 = vcmp.eq.s32.totalorder %v39_v0, %v5436_v23  ;;  %v36_v0 = vadd.s32 168, %v4851_v2 }
 0x18b   :  { %934 = vmatprep.subr.mxu0 %v5541_v17  ;;  %8840 = vst [vmem:[#allocation40_spill] sm:$0xff] %v5563_v58  ;;  %8842 = vst [vmem:[#allocation42_spill] sm:$0xff] %v5582_v15  ;;  %v827_v7 = vsub.f32 %v5563_v58, %v5565_v19  ;;  %v5604_v58 = vsel %vm93_vm9, 3.0, %v5334_v62 }
 0x18c   :  { %935 = vmatpush2.msra.mxu0 %v8807_v49  ;;  %v5595_v57 = vmul.f32 0.5, %v829_v3  ;;  %8845 = vst [vmem:[#allocation45_spill] sm:$0xff] %v5604_v58  ;;  %vm89_vm14 = vcmp.eq.s32.totalorder %v36_v0, %v5436_v23  ;;  %v33_v0 = vadd.s32 144, %v4851_v2 }
 0x18d   :  { %936 = vmatprep.subr.mxu0 %v5555_v45  ;;  %v655_v27 = vpop.permute.xlu0 %654  ;;  %v5579_v12 = vld [vmem:[#allocation2 + $0x198] sm:$0xff]  ;;  %v5609_v3 = vmul.f32 0.5, %v827_v7 }
 0x18e   :  { %659 = vst.msk [vmem:[#allocation2 + $0x158] sm:$0xff] %vm580_vm11, %v655_v27  ;;  %937 = vmatpush2.msra.mxu0 %v8807_v49  ;;  %v5590_v27 = vsel %vm95_vm13, 3.0, %v5334_v62  ;;  %8844 = vst [vmem:[#allocation44_spill] sm:$0xff] %v5595_v57  ;;  %v825_v35 = vsub.f32 %v5577_v22, %v5579_v12  ;;  %vm91_vm11 = vcmp.eq.s32.totalorder %v37_v41, %v5436_v23  ;;  %v34_v41 = vadd.s32 152, %v4851_v2 }
 0x18f   :  { %938 = vmatprep.subr.mxu0 %v5568_v60  ;;  %8843 = vst [vmem:[#allocation43_spill] sm:$0xff] %v5590_v27  ;;  %8846 = vst [vmem:[#allocation46_spill] sm:$0xff] %v5609_v3  ;;  %v823_v22 = vsub.f32 %v5590_v27, %v5592_v8  ;;  %v5630_v27 = vsel %vm89_vm14, 3.0, %v5334_v62  ;;  %vm83_vm5 = vcmp.eq.s32.totalorder %v33_v0, %v5436_v23  ;;  %v5670_v0 = vld [vmem:[#allocation2 + $0x128] sm:$0xff] }
 0x190   :  { %939 = vmatpush2.msra.mxu0 %v8807_v49  ;;  %v5622_v43 = vmul.f32 0.5, %v825_v35  ;;  %8849 = vst [vmem:[#allocation49_spill] sm:$0xff] %v5630_v27  ;;  %vm85_vm15 = vcmp.eq.s32.totalorder %v34_v41, %v5436_v23  ;;  %v31_v41 = vadd.s32 128, %v4851_v2 }
 0x191   :  { %940 = vmatprep.subr.mxu0 %v5582_v15  ;;  %v645_v10 = vpop.permute.xlu0 %644  ;;  %v5606_v21 = vld [vmem:[#allocation2 + $0x178] sm:$0xff]  ;;  %v5635_v44 = vmul.f32 0.5, %v823_v22 }
 0x192   :  { %649 = vst.msk [vmem:[#allocation2 + $0x138] sm:$0xff] %vm569_vm12, %v645_v10  ;;  %941 = vmatpush2.msra.mxu0 %v8807_v49  ;;  %v5617_v10 = vsel %vm91_vm11, 3.0, %v5334_v62  ;;  %8848 = vst [vmem:[#allocation48_spill] sm:$0xff] %v5622_v43  ;;  %v821_v7 = vsub.f32 %v5604_v58, %v5606_v21  ;;  %vm87_vm12 = vcmp.eq.s32.totalorder %v35_v34, %v5436_v23  ;;  %v32_v34 = vadd.s32 136, %v4851_v2 }
 0x193   :  { %942 = vmatprep.subr.mxu0 %v5595_v57  ;;  %8847 = vst [vmem:[#allocation47_spill] sm:$0xff] %v5617_v10  ;;  %v819_v35 = vsub.f32 %v5617_v10, %v5619_v14  ;;  %v5643_v58 = vsel %vm87_vm12, 3.0, %v5334_v62  ;;  %v5656_v10 = vsel %vm85_vm15, 3.0, %v5334_v62  ;;  %v5668_v2 = vsel %vm83_vm5, 3.0, %v5334_v62 }
 0x194   :  { %943 = vmatpush2.msra.mxu0 %v8807_v49  ;;  %8850 = vst [vmem:[#allocation50_spill] sm:$0xff] %v5643_v58  ;;  %v5648_v57 = vmul.f32 0.5, %v821_v7  ;;  %8852 = vst [vmem:[#allocation52_spill] sm:$0xff] %v5656_v10  ;;  %vm81_vm6 = vcmp.eq.s32.totalorder %v32_v34, %v5436_v23  ;;  %vm79_vm3 = vcmp.eq.s32.totalorder %v31_v41, %v5436_v23 }
 0x195   :  { %944 = vmatprep.subr.mxu0 %v5609_v3  ;;  %v5632_v52 = vld [vmem:[#allocation2 + $0x158] sm:$0xff]  ;;  %v5645_v3 = vld [vmem:[#allocation2 + $0x148] sm:$0xff]  ;;  %v5661_v15 = vmul.f32 0.5, %v819_v35  ;;  %8854 = vst [vmem:[#allocation54_spill] sm:$0xff] %v5668_v2  ;;  %v5680_v34 = vsel %vm81_vm6, 3.0, %v5334_v62 }
 0x196   :  { %945 = vmatpush2.msra.mxu0 %v8807_v49  ;;  %8851 = vst [vmem:[#allocation51_spill] sm:$0xff] %v5648_v57  ;;  %v817_v22 = vsub.f32 %v5630_v27, %v5632_v52  ;;  %v815_v7 = vsub.f32 %v5643_v58, %v5645_v3  ;;  %8856 = vst [vmem:[#allocation56_spill] sm:$0xff] %v5680_v34  ;;  %v745_v58 = vld [vmem:[#allocation2 + $0x118] sm:$0xff] }
 0x197   :  { %946 = vmatprep.subr.mxu0 %v5622_v43  ;;  %8853 = vst [vmem:[#allocation53_spill] sm:$0xff] %v5661_v15  ;;  %v809_v41 = vsub.f32 %v5680_v34, %v745_v58 }
 0x198   :  { %947 = vmatpush2.msra.mxu0 %v8807_v49  ;;  %v5673_v27 = vmul.f32 0.5, %v817_v22  ;;  %v5689_v22 = vsel %vm79_vm3, 3.0, %v5334_v62 }
 0x199   :  { %948 = vmatprep.subr.mxu0 %v5635_v44  ;;  %v5658_v43 = vld [vmem:[#allocation2 + $0x138] sm:$0xff]  ;;  %8857 = vst [vmem:[#allocation57_spill] sm:$0xff] %v5689_v22 }
 0x19a   :  { %949 = vmatpush2.msra.mxu0 %v8807_v49  ;;  %8855 = vst [vmem:[#allocation55_spill] sm:$0xff] %v5673_v27  ;;  %v813_v35 = vsub.f32 %v5656_v10, %v5658_v43  ;;  %v743_v10 = vld [vmem:[#allocation2 + $0x108] sm:$0xff] }
 0x19b   :  { %950 = vmatprep.subr.mxu0 %v5648_v57  ;;  %v5683_v57 = vmul.f32 0.5, %v815_v7 }
 0x19c   :  { %951 = vmatpush2.msra.mxu0 %v8807_v49  ;;  %v5692_v23 = vmul.f32 0.5, %v813_v35 }
 0x19d   :  { %952 = vmatprep.subr.mxu0 %v5661_v15  ;;  %v811_v15 = vsub.f32 %v5668_v2, %v5670_v0  ;;  %v807_v2 = vsub.f32 %v5689_v22, %v743_v10 }
 0x19e   :  { %953 = vmatpush2.msra.mxu0 %v8807_v49 }
 0x19f   :  { %954 = vmatprep.subr.mxu0 %v5673_v27  ;;  %v5697_v7 = vmul.f32 0.5, %v811_v15  ;;  %v5702_v27 = vmul.f32 0.5, %v809_v41  ;;  %v5706_v35 = vmul.f32 0.5, %v807_v2 }
 0x1a0   :  { %955 = vmatpush2.msra.mxu0 %v8807_v49 }
 0x1a1   :  { %956 = vmatprep.subr.mxu0 %v5683_v57 }
 0x1a2   :  { %957 = vmatpush2.msra.mxu0 %v8807_v49 }
 0x1a3   :  { %958 = vmatprep.subr.mxu0 %v5692_v23 }
 0x1a4   :  { %959 = vmatpush2.msra.mxu0 %v8807_v49 }
 0x1a5   :  { %960 = vmatprep.subr.mxu0 %v5697_v7 }
 0x1a6   :  { %961 = vmatpush2.msra.mxu0 %v8807_v49 }
 0x1a7   :  { %962 = vmatprep.subr.mxu0 %v5702_v27 }
 0x1a8   :  { %963 = vmatpush2.msra.mxu0 %v8807_v49 }
 0x1a9   :  { %964 = vmatprep.subr.mxu0 %v5706_v35 }
 0x1aa   :  { %965 = vmatpush2.msra.mxu0 %v8807_v49 }
 0x1ab   :  { %967 = vmatmul.mubr.f32.vlgmr.msra.gmra.mxu0 %v5483_v59 }
 0x1ac   :  { %972 = vmatprep.mubr.f32.mxu0 %v5334_v62 }
 0x1af   :  { %973 = vmatmul.mubr.f32.gmra.mxu0 %v5465_v5 }
 0x1b0   :  { %978 = vmatprep.mubr.f32.mxu0 %v5334_v62 }
 0x1b3   :  { %979 = vmatmul.mubr.f32.gmra.mxu0 %v5447_v6 }
 0x1b4   :  { %984 = vmatprep.mubr.f32.mxu0 %v5334_v62 }
 0x1b7   :  { %985 = vmatmul.mubr.f32.gmra.mxu0 %v5442_v50 }
 0x1b8   :  { %990 = vmatprep.mubr.f32.mxu0 %v5334_v62 }
 0x1bb   :  { %991 = vmatmul.mubr.f32.gmra.mxu0 %v5421_v11 }
 0x1bc   :  { %996 = vmatprep.mubr.f32.mxu0 %v5334_v62 }
 0x1bf   :  { %997 = vmatmul.mubr.f32.gmra.mxu0 %v5409_v18 }
 0x1c0   :  { %1002 = vmatprep.mubr.f32.mxu0 %v5334_v62 }
 0x1c3   :  { %1003 = vmatmul.mubr.f32.gmra.mxu0 %v5416_v54 }
 0x1c4   :  { %1008 = vmatprep.mubr.f32.mxu0 %v5334_v62 }
 0x1c7   :  { %1009 = vmatmul.mubr.f32.gmra.mxu0 %v5392_v47 }
 0x1c8   :  { %1014 = vmatprep.mubr.f32.mxu0 %v5334_v62 }
 0x1cb   :  { %1015 = vmatmul.mubr.f32.gmra.mxu0 %v5362_v9 }
 0x1cc   :  { %1020 = vmatprep.mubr.f32.mxu0 %v5334_v62 }
 0x1cf   :  { %1021 = vmatmul.mubr.f32.gmra.mxu0 %v5370_v46 }
 0x1d0   :  { %1026 = vmatprep.mubr.f32.mxu0 %v5334_v62 }
 0x1d3   :  { %1027 = vmatmul.mubr.f32.gmra.mxu0 %v5342_v24 }
 0x1d4   :  { %1032 = vmatprep.mubr.f32.mxu0 %v5334_v62 }
 0x1d7   :  { %1033 = vmatmul.mubr.f32.gmra.mxu0 %v5347_v1 }
 0x1d8   :  { %1038 = vmatprep.mubr.f32.mxu0 %v5334_v62 }
 0x1db   :  { %1039 = vmatmul.mubr.f32.gmra.mxu0 %v5304_v16 }
 0x1dc   :  { %1044 = vmatprep.mubr.f32.mxu0 %v5334_v62 }
 0x1df   :  { %1045 = vmatmul.mubr.f32.gmra.mxu0 %v5288_v48 }
 0x1e0   :  { %1050 = vmatprep.mubr.f32.mxu0 %v5334_v62 }
 0x1e3   :  { %1051 = vmatmul.mubr.f32.gmra.mxu0 %v5275_v13 }
 0x1e4   :  { %1056 = vmatprep.mubr.f32.mxu0 %v5334_v62 }
 0x1e7   :  { %1057 = vmatmul.mubr.f32.gmra.mxu0 %v5273_v33 }
 0x1e8   :  { %1062 = vmatprep.mubr.f32.mxu0 %v743_v10 }
 0x1eb   :  { %1063 = vmatmul.mubr.f32.gmra.mxu0 %v5334_v62 }
 0x1ec   :  { %1068 = vmatprep.mubr.f32.mxu0 %v745_v58 }
 0x1ef   :  { %1069 = vmatmul.mubr.f32.gmra.mxu0 %v5334_v62 }
 0x1f0   :  { %1074 = vmatprep.mubr.f32.mxu0 %v5670_v0 }
 0x1f3   :  { %1075 = vmatmul.mubr.f32.gmra.mxu0 %v5334_v62 }
 0x1f4   :  { %1080 = vmatprep.mubr.f32.mxu0 %v5658_v43 }
 0x1f7   :  { %1081 = vmatmul.mubr.f32.gmra.mxu0 %v5334_v62 }
 0x1f8   :  { %1086 = vmatprep.mubr.f32.mxu0 %v5645_v3 }
 0x1fb   :  { %1087 = vmatmul.mubr.f32.gmra.mxu0 %v5334_v62 }
 0x1fc   :  { %1092 = vmatprep.mubr.f32.mxu0 %v5632_v52 }
 0x1ff   :  { %1093 = vmatmul.mubr.f32.gmra.mxu0 %v5334_v62 }
 0x200   :  { %1098 = vmatprep.mubr.f32.mxu0 %v5619_v14 }
 0x203   :  { %1099 = vmatmul.mubr.f32.gmra.mxu0 %v5334_v62 }
 0x204   :  { %1104 = vmatprep.mubr.f32.mxu0 %v5606_v21 }
 0x207   :  { %1105 = vmatmul.mubr.f32.gmra.mxu0 %v5334_v62 }
 0x208   :  { %1110 = vmatprep.mubr.f32.mxu0 %v5592_v8 }
 0x20b   :  { %1111 = vmatmul.mubr.f32.gmra.mxu0 %v5334_v62 }
 0x20c   :  { %1116 = vmatprep.mubr.f32.mxu0 %v5579_v12 }
 0x20f   :  { %1117 = vmatmul.mubr.f32.gmra.mxu0 %v5334_v62 }
 0x210   :  { %1122 = vmatprep.mubr.f32.mxu0 %v5565_v19 }
 0x213   :  { %1123 = vmatmul.mubr.f32.gmra.mxu0 %v5334_v62 }
 0x214   :  { %1128 = vmatprep.mubr.f32.mxu0 %v5552_v4 }
 0x217   :  { %1129 = vmatmul.mubr.f32.gmra.mxu0 %v5334_v62 }
 0x218   :  { %1134 = vmatprep.mubr.f32.mxu0 %v5538_v37 }
 0x21b   :  { %1135 = vmatmul.mubr.f32.gmra.mxu0 %v5334_v62 }
 0x21c   :  { %1140 = vmatprep.mubr.f32.mxu0 %v5525_v26 }
 0x21f   :  { %1141 = vmatmul.mubr.f32.gmra.mxu0 %v5334_v62 }
 0x220   :  { %1146 = vmatprep.mubr.f32.mxu0 %v5511_v38 }
 0x223   :  { %1147 = vmatmul.mubr.f32.gmra.mxu0 %v5334_v62 }
 0x224   :  { %1152 = vmatprep.mubr.f32.mxu0 %v5498_v61 }
 0x227   :  { %1153 = vmatmul.mubr.f32.gmra.mxu0 %v5334_v62 }
 0x26b   :  { %v5772_v50 = vpop.f32.mrf.mxu0 }
 0x26d   :  { %v5774_v6 = vpop.f32.mrf.mxu0 }
 0x26e   :  { %1608 = vmatprep.mubr.f32.mxu0 %v5774_v6 }
 0x26f   :  { %v5777_v52 = vpop.f32.mrf.mxu0 }
 0x271   :  { %v5779_v37 = vpop.f32.mrf.mxu0 }
 0x273   :  { %v5781_v26 = vpop.f32.mrf.mxu0 }
 0x274   :  { %8858 = vst [vmem:[#allocation58_spill] sm:$0xff] %v5781_v26 }
 0x275   :  { %v5783_v33 = vpop.f32.mrf.mxu0 }
 0x277   :  { %v5785_v13 = vpop.f32.mrf.mxu0 }
 0x278   :  { %8859 = vst [vmem:[#allocation59_spill] sm:$0xff] %v5785_v13 }
 0x279   :  { %v5787_v48 = vpop.f32.mrf.mxu0 }
 0x27a   :  { %8860 = vst [vmem:[#allocation60_spill] sm:$0xff] %v5787_v48 }
 0x27b   :  { %v5789_v61 = vpop.f32.mrf.mxu0 }
 0x27c   :  { %8861 = vst [vmem:[#allocation61_spill] sm:$0xff] %v5789_v61 }
 0x27d   :  { %v5791_v4 = vpop.f32.mrf.mxu0 }
 0x27e   :  { %8862 = vst [vmem:[#allocation62_spill] sm:$0xff] %v5791_v4 }
 0x27f   :  { %v5793_v16 = vpop.f32.mrf.mxu0 }
 0x280   :  { %8863 = vst [vmem:[#allocation63_spill] sm:$0xff] %v5793_v16 }
 0x281   :  { %v5795_v62 = vpop.f32.mrf.mxu0 }
 0x282   :  { %8864 = vst [vmem:[#allocation64_spill] sm:$0xff] %v5795_v62 }
 0x283   :  { %v5797_v19 = vpop.f32.mrf.mxu0 }
 0x284   :  { %8865 = vst [vmem:[#allocation65_spill] sm:$0xff] %v5797_v19 }
 0x285   :  { %v5799_v24 = vpop.f32.mrf.mxu0 }
 0x286   :  { %8866 = vst [vmem:[#allocation66_spill] sm:$0xff] %v5799_v24 }
 0x287   :  { %v5801_v1 = vpop.f32.mrf.mxu0 }
 0x288   :  { %8867 = vst [vmem:[#allocation67_spill] sm:$0xff] %v5801_v1 }
 0x289   :  { %v5803_v12 = vpop.f32.mrf.mxu0 }
 0x28a   :  { %8868 = vst [vmem:[#allocation68_spill] sm:$0xff] %v5803_v12 }
 0x28b   :  { %v5805_v9 = vpop.f32.mrf.mxu0 }
 0x28c   :  { %8869 = vst [vmem:[#allocation69_spill] sm:$0xff] %v5805_v9 }
 0x28d   :  { %v5807_v46 = vpop.f32.mrf.mxu0 }
 0x28e   :  { %8870 = vst [vmem:[#allocation70_spill] sm:$0xff] %v5807_v46 }
 0x28f   :  { %v5809_v8 = vpop.f32.mrf.mxu0 }
 0x290   :  { %8871 = vst [vmem:[#allocation71_spill] sm:$0xff] %v5809_v8 }
 0x291   :  { %v5811_v47 = vpop.f32.mrf.mxu0 }
 0x292   :  { %8872 = vst [vmem:[#allocation72_spill] sm:$0xff] %v5811_v47 }
 0x293   :  { %v5813_v18 = vpop.f32.mrf.mxu0 }
 0x294   :  { %8873 = vst [vmem:[#allocation73_spill] sm:$0xff] %v5813_v18 }
 0x295   :  { %v5815_v54 = vpop.f32.mrf.mxu0 }
 0x296   :  { %8874 = vst [vmem:[#allocation74_spill] sm:$0xff] %v5815_v54 }
 0x297   :  { %v5817_v21 = vpop.f32.mrf.mxu0 }
 0x298   :  { %8875 = vst [vmem:[#allocation75_spill] sm:$0xff] %v5817_v21 }
 0x299   :  { %v5819_v11 = vpop.f32.mrf.mxu0 }
 0x29a   :  { %8876 = vst [vmem:[#allocation76_spill] sm:$0xff] %v5819_v11 }
 0x29b   :  { %v5821_v14 = vpop.f32.mrf.mxu0 }
 0x29c   :  { %8877 = vst [vmem:[#allocation77_spill] sm:$0xff] %v5821_v14 }
 0x29d   :  { %v5823_v43 = vpop.f32.mrf.mxu0 }
 0x29e   :  { %8878 = vst [vmem:[#allocation78_spill] sm:$0xff] %v5823_v43 }
 0x29f   :  { %v5825_v5 = vpop.f32.mrf.mxu0 }
 0x2a0   :  { %8879 = vst [vmem:[#allocation79_spill] sm:$0xff] %v5825_v5 }
 0x2a1   :  { %v5827_v59 = vpop.f32.mrf.mxu0 }
 0x2a2   :  { %8880 = vst [vmem:[#allocation80_spill] sm:$0xff] %v5827_v59 }
 0x2a3   :  { %v5829_v38 = vpop.f32.mrf.mxu0 }
 0x2a4   :  { %8881 = vst [vmem:[#allocation81_spill] sm:$0xff] %v5829_v38 }
 0x2a5   :  { %v5831_v58 = vpop.f32.mrf.mxu0 }
 0x2a6   :  { %8882 = vst [vmem:[#allocation82_spill] sm:$0xff] %v5831_v58 }
 0x2a7   :  { %v5833_v15 = vpop.f32.mrf.mxu0 }
 0x2a8   :  { %8883 = vst [vmem:[#allocation83_spill] sm:$0xff] %v5833_v15 }
 0x2a9   :  { %v5835_v3 = vpop.f32.mrf.mxu0 }
 0x2aa   :  { %8884 = vst [vmem:[#allocation84_spill] sm:$0xff] %v5835_v3  ;;  %1159 = vmatprep.subr.mxu1 %v5835_v3 }
 0x2ab   :  { %v5838_v10 = vpop.f32.mrf.mxu0  ;;  %1160 = vmatpush1.msra.mxu1 %v5833_v15 }
 0x2ac   :  { %1161 = vmatprep.subr.mxu1 %v5831_v58 }
 0x2ad   :  { %v5842_v2 = vpop.f32.mrf.mxu0  ;;  %1162 = vmatpush1.msra.mxu1 %v5829_v38 }
 0x2ae   :  { %1163 = vmatprep.subr.mxu1 %v5827_v59 }
 0x2af   :  { %v5846_v0 = vpop.f32.mrf.mxu0  ;;  %1164 = vmatpush1.msra.mxu1 %v5825_v5 }
 0x2b0   :  { %1165 = vmatprep.subr.mxu1 %v5823_v43 }
 0x2b1   :  { %v5850_v41 = vpop.f32.mrf.mxu0  ;;  %1166 = vmatpush1.msra.mxu1 %v5821_v14 }
 0x2b2   :  { %1167 = vmatprep.subr.mxu1 %v5819_v11 }
 0x2b3   :  { %v5854_v15 = vpop.f32.mrf.mxu0  ;;  %1168 = vmatpush1.msra.mxu1 %v5817_v21 }
 0x2b4   :  { %1169 = vmatprep.subr.mxu1 %v5815_v54 }
 0x2b5   :  { %v5858_v3 = vpop.f32.mrf.mxu0  ;;  %1170 = vmatpush1.msra.mxu1 %v5813_v18 }
 0x2b6   :  { %1171 = vmatprep.subr.mxu1 %v5811_v47 }
 0x2b7   :  { %v5862_v38 = vpop.f32.mrf.mxu0  ;;  %1172 = vmatpush1.msra.mxu1 %v5809_v8 }
 0x2b8   :  { %1173 = vmatprep.subr.mxu1 %v5807_v46 }
 0x2b9   :  { %v5866_v58 = vpop.f32.mrf.mxu0  ;;  %1174 = vmatpush1.msra.mxu1 %v5805_v9 }
 0x2ba   :  { %1175 = vmatprep.subr.mxu1 %v5803_v12 }
 0x2bb   :  { %v5870_v5 = vpop.f32.mrf.mxu0  ;;  %1176 = vmatpush1.msra.mxu1 %v5801_v1 }
 0x2bc   :  { %1177 = vmatprep.subr.mxu1 %v5799_v24 }
 0x2bd   :  { %v5874_v59 = vpop.f32.mrf.mxu0  ;;  %1178 = vmatpush1.msra.mxu1 %v5797_v19 }
 0x2be   :  { %1179 = vmatprep.subr.mxu1 %v5795_v62 }
 0x2bf   :  { %v5878_v14 = vpop.f32.mrf.mxu0  ;;  %1180 = vmatpush1.msra.mxu1 %v5793_v16 }
 0x2c0   :  { %1181 = vmatprep.subr.mxu1 %v5791_v4 }
 0x2c1   :  { %v5882_v43 = vpop.f32.mrf.mxu0  ;;  %1182 = vmatpush1.msra.mxu1 %v5789_v61 }
 0x2c2   :  { %1183 = vmatprep.subr.mxu1 %v5787_v48 }
 0x2c3   :  { %v5886_v21 = vpop.f32.mrf.mxu0  ;;  %1184 = vmatpush1.msra.mxu1 %v5785_v13 }
 0x2c4   :  { %8885 = vst [vmem:[#allocation85_spill] sm:$0xff] %v5886_v21  ;;  %1185 = vmatprep.subr.mxu1 %v5783_v33 }
 0x2c5   :  { %v5890_v11 = vpop.f32.mrf.mxu0  ;;  %1186 = vmatpush1.msra.mxu1 %v5781_v26 }
 0x2c6   :  { %1187 = vmatprep.subr.mxu1 %v5779_v37 }
 0x2c7   :  { %v5894_v18 = vpop.f32.mrf.mxu0  ;;  %1188 = vmatpush1.msra.mxu1 %v5777_v52 }
 0x2c8   :  { %8886 = vst [vmem:[#allocation86_spill] sm:$0xff] %v5894_v18  ;;  %1189 = vmatprep.subr.mxu1 %v5774_v6 }
 0x2c9   :  { %v5898_v54 = vpop.f32.mrf.mxu0  ;;  %1190 = vmatpush1.msra.mxu1 %v5772_v50 }
 0x2ca   :  { %8887 = vst [vmem:[#allocation87_spill] sm:$0xff] %v5898_v54 }
 0x2cb   :  { %v5901_v8 = vpop.f32.mrf.mxu0 }
 0x2cc   :  { %8888 = vst [vmem:[#allocation88_spill] sm:$0xff] %v5901_v8 }
 0x2cd   :  { %v5903_v47 = vpop.f32.mrf.mxu0 }
 0x2ce   :  { %8889 = vst [vmem:[#allocation89_spill] sm:$0xff] %v5903_v47 }
 0x2cf   :  { %v5905_v9 = vpop.f32.mrf.mxu0 }
 0x2d0   :  { %8890 = vst [vmem:[#allocation90_spill] sm:$0xff] %v5905_v9 }
 0x2d1   :  { %v5907_v46 = vpop.f32.mrf.mxu0 }
 0x2d2   :  { %8891 = vst [vmem:[#allocation91_spill] sm:$0xff] %v5907_v46 }
 0x2d3   :  { %v5909_v1 = vpop.f32.mrf.mxu0 }
 0x2d4   :  { %8892 = vst [vmem:[#allocation92_spill] sm:$0xff] %v5909_v1 }
 0x2d5   :  { %v5911_v12 = vpop.f32.mrf.mxu0 }
 0x2d6   :  { %8893 = vst [vmem:[#allocation93_spill] sm:$0xff] %v5911_v12 }
 0x2d7   :  { %v5913_v19 = vpop.f32.mrf.mxu0 }
 0x2d8   :  { %8894 = vst [vmem:[#allocation94_spill] sm:$0xff] %v5913_v19 }
 0x2d9   :  { %v5915_v24 = vpop.f32.mrf.mxu0 }
 0x2da   :  { %8895 = vst [vmem:[#allocation95_spill] sm:$0xff] %v5915_v24 }
 0x2db   :  { %v5917_v6 = vpop.f32.mrf.mxu0 }
 0x2dc   :  { %8896 = vst [vmem:[#allocation96_spill] sm:$0xff] %v5917_v6 }
 0x2dd   :  { %v5919_v16 = vpop.f32.mrf.mxu0 }
 0x2de   :  { %8897 = vst [vmem:[#allocation97_spill] sm:$0xff] %v5919_v16 }
 0x2df   :  { %v5921_v62 = vpop.f32.mrf.mxu0 }
 0x2e0   :  { %8898 = vst [vmem:[#allocation98_spill] sm:$0xff] %v5921_v62 }
 0x2e1   :  { %v5923_v61 = vpop.f32.mrf.mxu0 }
 0x2e2   :  { %8899 = vst [vmem:[#allocation99_spill] sm:$0xff] %v5923_v61 }
 0x2e3   :  { %v5925_v4 = vpop.f32.mrf.mxu0 }
 0x2e4   :  { %8900 = vst [vmem:[#allocation100_spill] sm:$0xff] %v5925_v4 }
 0x2e5   :  { %v5927_v13 = vpop.f32.mrf.mxu0 }
 0x2e6   :  { %8901 = vst [vmem:[#allocation101_spill] sm:$0xff] %v5927_v13 }
 0x2e7   :  { %v5929_v48 = vpop.f32.mrf.mxu0 }
 0x2e8   :  { %8902 = vst [vmem:[#allocation102_spill] sm:$0xff] %v5929_v48 }
 0x2e9   :  { %v5931_v26 = vpop.f32.mrf.mxu0 }
 0x2ea   :  { %8903 = vst [vmem:[#allocation103_spill] sm:$0xff] %v5931_v26  ;;  %1191 = vmatprep.subr.mxu1 %v5931_v26 }
 0x2eb   :  { %1192 = vmatpush2.msra.mxu1 %v5929_v48 }
 0x2ec   :  { %1193 = vmatprep.subr.mxu1 %v5927_v13 }
 0x2ed   :  { %1194 = vmatpush2.msra.mxu1 %v5925_v4 }
 0x2ee   :  { %1195 = vmatprep.subr.mxu1 %v5923_v61 }
 0x2ef   :  { %1196 = vmatpush2.msra.mxu1 %v5921_v62 }
 0x2f0   :  { %1197 = vmatprep.subr.mxu1 %v5919_v16 }
 0x2f1   :  { %1198 = vmatpush2.msra.mxu1 %v5917_v6 }
 0x2f2   :  { %1199 = vmatprep.subr.mxu1 %v5915_v24 }
 0x2f3   :  { %1200 = vmatpush2.msra.mxu1 %v5913_v19 }
 0x2f4   :  { %1201 = vmatprep.subr.mxu1 %v5911_v12  ;;  %v8924_v12 = vld [vmem:[#allocation20_spill] sm:$0xff] }
 0x2f5   :  { %1202 = vmatpush2.msra.mxu1 %v5909_v1 }
 0x2f6   :  { %1203 = vmatprep.subr.mxu1 %v5907_v46 }
 0x2f7   :  { %1204 = vmatpush2.msra.mxu1 %v5905_v9 }
 0x2f8   :  { %1205 = vmatprep.subr.mxu1 %v5903_v47 }
 0x2f9   :  { %1206 = vmatpush2.msra.mxu1 %v5901_v8 }
 0x2fa   :  { %1207 = vmatprep.subr.mxu1 %v5898_v54 }
 0x2fb   :  { %1208 = vmatpush2.msra.mxu1 %v5894_v18 }
 0x2fc   :  { %1209 = vmatprep.subr.mxu1 %v5890_v11 }
 0x2fd   :  { %1210 = vmatpush2.msra.mxu1 %v5886_v21 }
 0x2fe   :  { %1211 = vmatprep.subr.mxu1 %v5882_v43 }
 0x2ff   :  { %1212 = vmatpush2.msra.mxu1 %v5878_v14 }
 0x300   :  { %1213 = vmatprep.subr.mxu1 %v5874_v59 }
 0x301   :  { %1214 = vmatpush2.msra.mxu1 %v5870_v5 }
 0x302   :  { %1215 = vmatprep.subr.mxu1 %v5866_v58 }
 0x303   :  { %1216 = vmatpush2.msra.mxu1 %v5862_v38 }
 0x304   :  { %1217 = vmatprep.subr.mxu1 %v5858_v3 }
 0x305   :  { %1218 = vmatpush2.msra.mxu1 %v5854_v15 }
 0x306   :  { %1219 = vmatprep.subr.mxu1 %v5850_v41 }
 0x307   :  { %1220 = vmatpush2.msra.mxu1 %v5846_v0 }
 0x308   :  { %1221 = vmatprep.subr.mxu1 %v5842_v2 }
 0x309   :  { %1222 = vmatpush2.msra.mxu1 %v5838_v10 }
 0x30a   :  { %1224 = vmatmul.mubr.f32.vlgmr.msra.gmra.mxu1 %v5533_v25  ;;  %1801 = vmatprep.subr.mxu1 %v8807_v49 }
 0x30b   :  { %1802 = vmatpush1.msra.mxu1 %v5285_v32  ;;  %1229 = vmatprep.mubr.f32.mxu1 %v8807_v49 }
 0x30c   :  { %1803 = vmatprep.subr.mxu1 %v8807_v49 }
 0x30d   :  { %1804 = vmatpush1.msra.mxu1 %v5292_v56 }
 0x30e   :  { %1230 = vmatmul.mubr.f32.gmra.mxu1 %v5520_v55  ;;  %1805 = vmatprep.subr.mxu1 %v8807_v49 }
 0x30f   :  { %1806 = vmatpush1.msra.mxu1 %v5301_v63  ;;  %1235 = vmatprep.mubr.f32.mxu1 %v8807_v49 }
 0x310   :  { %1807 = vmatprep.subr.mxu1 %v8807_v49 }
 0x311   :  { %1808 = vmatpush1.msra.mxu1 %v5311_v36 }
 0x312   :  { %1236 = vmatmul.mubr.f32.gmra.mxu1 %v5504_v51  ;;  %1809 = vmatprep.subr.mxu1 %v8807_v49 }
 0x313   :  { %1810 = vmatpush1.msra.mxu1 %v5366_v39  ;;  %1241 = vmatprep.mubr.f32.mxu1 %v8807_v49 }
 0x314   :  { %1811 = vmatprep.subr.mxu1 %v8807_v49 }
 0x315   :  { %1812 = vmatpush1.msra.mxu1 %v5374_v28 }
 0x316   :  { %1242 = vmatmul.mubr.f32.gmra.mxu1 %v5489_v31  ;;  %1813 = vmatprep.subr.mxu1 %v8807_v49 }
 0x317   :  { %1814 = vmatpush1.msra.mxu1 %v5386_v29  ;;  %1247 = vmatprep.mubr.f32.mxu1 %v8807_v49 }
 0x318   :  { %1815 = vmatprep.subr.mxu1 %v8807_v49 }
 0x319   :  { %1816 = vmatpush1.msra.mxu1 %v5396_v53 }
 0x31a   :  { %1248 = vmatmul.mubr.f32.gmra.mxu1 %v5470_v40  ;;  %1817 = vmatprep.subr.mxu1 %v8807_v49 }
 0x31b   :  { %1818 = vmatpush1.msra.mxu1 %v5412_v42  ;;  %1253 = vmatprep.mubr.f32.mxu1 %v8807_v49 }
 0x31c   :  { %1819 = vmatprep.subr.mxu1 %v8807_v49 }
 0x31d   :  { %1820 = vmatpush1.msra.mxu1 %v5438_v30 }
 0x31e   :  { %1254 = vmatmul.mubr.f32.gmra.mxu1 %v5452_v20  ;;  %1821 = vmatprep.subr.mxu1 %v8807_v49 }
 0x31f   :  { %1822 = vmatpush1.msra.mxu1 %v5452_v20  ;;  %1259 = vmatprep.mubr.f32.mxu1 %v8807_v49 }
 0x320   :  { %1823 = vmatprep.subr.mxu1 %v8807_v49 }
 0x321   :  { %1824 = vmatpush1.msra.mxu1 %v5470_v40  ;;  %v8904_v40 = vld [vmem:[#allocation42_spill] sm:$0xff] }
 0x322   :  { %1260 = vmatmul.mubr.f32.gmra.mxu1 %v5438_v30  ;;  %1825 = vmatprep.subr.mxu1 %v8807_v49  ;;  %v8909_v30 = vld [vmem:[#allocation53_spill] sm:$0xff] }
 0x323   :  { %1826 = vmatpush1.msra.mxu1 %v5489_v31  ;;  %1265 = vmatprep.mubr.f32.mxu1 %v8807_v49 }
 0x324   :  { %1827 = vmatprep.subr.mxu1 %v8807_v49 }
 0x325   :  { %1828 = vmatpush1.msra.mxu1 %v5504_v51 }
 0x326   :  { %1266 = vmatmul.mubr.f32.gmra.mxu1 %v5412_v42  ;;  %1829 = vmatprep.subr.mxu1 %v8807_v49  ;;  %v8906_v42 = vld [vmem:[#allocation46_spill] sm:$0xff] }
 0x327   :  { %1830 = vmatpush1.msra.mxu1 %v5520_v55  ;;  %1271 = vmatprep.mubr.f32.mxu1 %v8807_v49 }
 0x328   :  { %1831 = vmatprep.subr.mxu1 %v8807_v49 }
 0x329   :  { %1832 = vmatpush1.msra.mxu1 %v5533_v25 }
 0x32a   :  { %1272 = vmatmul.mubr.f32.gmra.mxu1 %v5396_v53  ;;  %1833 = vmatprep.subr.mxu1 %v5541_v17  ;;  %v8905_v53 = vld [vmem:[#allocation44_spill] sm:$0xff] }
 0x32b   :  { %1834 = vmatpush2.msra.mxu1 %v8807_v49  ;;  %1277 = vmatprep.mubr.f32.mxu1 %v8807_v49 }
 0x32c   :  { %1835 = vmatprep.subr.mxu1 %v5555_v45 }
 0x32d   :  { %1836 = vmatpush2.msra.mxu1 %v8807_v49 }
 0x32e   :  { %1278 = vmatmul.mubr.f32.gmra.mxu1 %v5386_v29  ;;  %1837 = vmatprep.subr.mxu1 %v5568_v60  ;;  %v8907_v29 = vld [vmem:[#allocation48_spill] sm:$0xff] }
 0x32f   :  { %1838 = vmatpush2.msra.mxu1 %v8807_v49  ;;  %1283 = vmatprep.mubr.f32.mxu1 %v8807_v49 }
 0x330   :  { %1839 = vmatprep.subr.mxu1 %v8904_v40 }
 0x331   :  { %1840 = vmatpush2.msra.mxu1 %v8807_v49 }
 0x332   :  { %1284 = vmatmul.mubr.f32.gmra.mxu1 %v5374_v28  ;;  %1841 = vmatprep.subr.mxu1 %v8905_v53  ;;  %v8908_v28 = vld [vmem:[#allocation51_spill] sm:$0xff] }
 0x333   :  { %1842 = vmatpush2.msra.mxu1 %v8807_v49  ;;  %1289 = vmatprep.mubr.f32.mxu1 %v8807_v49 }
 0x334   :  { %1843 = vmatprep.subr.mxu1 %v8906_v42 }
 0x335   :  { %1844 = vmatpush2.msra.mxu1 %v8807_v49 }
 0x336   :  { %1290 = vmatmul.mubr.f32.gmra.mxu1 %v5366_v39  ;;  %1845 = vmatprep.subr.mxu1 %v8907_v29  ;;  %v8910_v39 = vld [vmem:[#allocation55_spill] sm:$0xff] }
 0x337   :  { %1846 = vmatpush2.msra.mxu1 %v8807_v49  ;;  %1295 = vmatprep.mubr.f32.mxu1 %v8807_v49 }
 0x338   :  { %1847 = vmatprep.subr.mxu1 %v5635_v44 }
 0x339   :  { %1848 = vmatpush2.msra.mxu1 %v8807_v49 }
 0x33a   :  { %1296 = vmatmul.mubr.f32.gmra.mxu1 %v5311_v36  ;;  %1849 = vmatprep.subr.mxu1 %v8908_v28 }
 0x33b   :  { %1850 = vmatpush2.msra.mxu1 %v8807_v49  ;;  %1301 = vmatprep.mubr.f32.mxu1 %v8807_v49 }
 0x33c   :  { %1851 = vmatprep.subr.mxu1 %v8909_v30 }
 0x33d   :  { %1852 = vmatpush2.msra.mxu1 %v8807_v49 }
 0x33e   :  { %1302 = vmatmul.mubr.f32.gmra.mxu1 %v5301_v63  ;;  %1853 = vmatprep.subr.mxu1 %v8910_v39 }
 0x33f   :  { %1854 = vmatpush2.msra.mxu1 %v8807_v49  ;;  %1307 = vmatprep.mubr.f32.mxu1 %v8807_v49 }
 0x340   :  { %1855 = vmatprep.subr.mxu1 %v5683_v57 }
 0x341   :  { %1856 = vmatpush2.msra.mxu1 %v8807_v49 }
 0x342   :  { %1308 = vmatmul.mubr.f32.gmra.mxu1 %v5292_v56  ;;  %1857 = vmatprep.subr.mxu1 %v5692_v23  ;;  %v8911_v56 = vld [vmem:[#allocation34_spill] sm:$0xff] }
 0x343   :  { %1858 = vmatpush2.msra.mxu1 %v8807_v49  ;;  %1313 = vmatprep.mubr.f32.mxu1 %v8807_v49 }
 0x344   :  { %1859 = vmatprep.subr.mxu1 %v5697_v7 }
 0x345   :  { %1860 = vmatpush2.msra.mxu1 %v8807_v49 }
 0x346   :  { %1314 = vmatmul.mubr.f32.gmra.mxu1 %v5285_v32  ;;  %1861 = vmatprep.subr.mxu1 %v5702_v27 }
 0x347   :  { %1319 = vmatprep.mubr.f32.mxu1 %v5706_v35  ;;  %1862 = vmatpush2.msra.mxu1 %v8807_v49 }
 0x348   :  { %1863 = vmatprep.subr.mxu1 %v5706_v35 }
 0x349   :  { %1864 = vmatpush2.msra.mxu1 %v8807_v49 }
 0x34a   :  { %1320 = vmatmul.mubr.f32.gmra.mxu1 %v8807_v49 }
 0x34b   :  { %1325 = vmatprep.mubr.f32.mxu1 %v5702_v27  ;;  %v8913_v27 = vld [vmem:[#allocation32_spill] sm:$0xff] }
 0x34e   :  { %1326 = vmatmul.mubr.f32.gmra.mxu1 %v8807_v49 }
 0x34f   :  { %1331 = vmatprep.mubr.f32.mxu1 %v5697_v7 }
 0x352   :  { %1332 = vmatmul.mubr.f32.gmra.mxu1 %v8807_v49 }
 0x353   :  { %1337 = vmatprep.mubr.f32.mxu1 %v5692_v23 }
 0x356   :  { %1338 = vmatmul.mubr.f32.gmra.mxu1 %v8807_v49 }
 0x357   :  { %1343 = vmatprep.mubr.f32.mxu1 %v5683_v57 }
 0x35a   :  { %1344 = vmatmul.mubr.f32.gmra.mxu1 %v8807_v49 }
 0x35b   :  { %1349 = vmatprep.mubr.f32.mxu1 %v8910_v39 }
 0x35e   :  { %1350 = vmatmul.mubr.f32.gmra.mxu1 %v8807_v49 }
 0x35f   :  { %1355 = vmatprep.mubr.f32.mxu1 %v8909_v30 }
 0x362   :  { %1356 = vmatmul.mubr.f32.gmra.mxu1 %v8807_v49 }
 0x363   :  { %1361 = vmatprep.mubr.f32.mxu1 %v8908_v28 }
 0x366   :  { %1362 = vmatmul.mubr.f32.gmra.mxu1 %v8807_v49 }
 0x367   :  { %1367 = vmatprep.mubr.f32.mxu1 %v5635_v44 }
 0x36a   :  { %1368 = vmatmul.mubr.f32.gmra.mxu1 %v8807_v49 }
 0x36b   :  { %1373 = vmatprep.mubr.f32.mxu1 %v8907_v29  ;;  %v8914_v29 = vld [vmem:[#allocation31_spill] sm:$0xff] }
 0x36e   :  { %1374 = vmatmul.mubr.f32.gmra.mxu1 %v8807_v49 }
 0x36f   :  { %1379 = vmatprep.mubr.f32.mxu1 %v8906_v42 }
 0x372   :  { %1380 = vmatmul.mubr.f32.gmra.mxu1 %v8807_v49 }
 0x373   :  { %1385 = vmatprep.mubr.f32.mxu1 %v8905_v53 }
 0x376   :  { %1386 = vmatmul.mubr.f32.gmra.mxu1 %v8807_v49 }
 0x377   :  { %1391 = vmatprep.mubr.f32.mxu1 %v8904_v40 }
 0x37a   :  { %1392 = vmatmul.mubr.f32.gmra.mxu1 %v8807_v49 }
 0x37b   :  { %1397 = vmatprep.mubr.f32.mxu1 %v5568_v60  ;;  %v8912_v60 = vld [vmem:[#allocation33_spill] sm:$0xff] }
 0x37e   :  { %1398 = vmatmul.mubr.f32.gmra.mxu1 %v8807_v49 }
 0x37f   :  { %1403 = vmatprep.mubr.f32.mxu1 %v5555_v45 }
 0x382   :  { %1404 = vmatmul.mubr.f32.gmra.mxu1 %v8807_v49 }
 0x383   :  { %1409 = vmatprep.mubr.f32.mxu1 %v5541_v17 }
 0x386   :  { %1410 = vmatmul.mubr.f32.gmra.mxu1 %v8807_v49 }
 0x3ca   :  { %v1225_v32 = vpop.f32.mrf.mxu1 }
 0x3cb   :  { %v1416_v63 = vsub.f32 %v8911_v56, %v1225_v32 }
 0x3cc   :  { %v1227_v36 = vpop.f32.mrf.mxu1 }
 0x3cd   :  { %v1417_v57 = vsub.f32 0.0, %v1227_v36  ;;  %v6095_v31 = vmul.f32 0.5, %v1416_v63 }
 0x3ce   :  { %v1231_v20 = vpop.f32.mrf.mxu1 }
 0x3cf   :  { %v6093_v44 = vmul.f32 0.5, %v1417_v57  ;;  %v1418_v51 = vsub.f32 %v8912_v60, %v1231_v20  ;;  %v8915_v57 = vld [vmem:[#allocation30_spill] sm:$0xff] }
 0x3d0   :  { %v1233_v55 = vpop.f32.mrf.mxu1 }
 0x3d1   :  { %v1419_v25 = vsub.f32 0.0, %v1233_v55  ;;  %1865 = vmatprep.mubr.f32.mxu1 %v6093_v44  ;;  %v6102_v17 = vmul.f32 0.5, %v1418_v51 }
 0x3d2   :  { %v1237_v45 = vpop.f32.mrf.mxu1  ;;  %1866 = vmatmul.mubr.f32.vlgmr.msra.gmra.mxu1 %v6095_v31 }
 0x3d3   :  { %v6100_v49 = vmul.f32 0.5, %v1419_v25  ;;  %v1420_v23 = vsub.f32 %v8913_v27, %v1237_v45 }
 0x3d4   :  { %v1239_v7 = vpop.f32.mrf.mxu1 }
 0x3d5   :  { %v1421_v35 = vsub.f32 0.0, %v1239_v7  ;;  %1871 = vmatprep.mubr.f32.mxu1 %v6100_v49  ;;  %v6109_v42 = vmul.f32 0.5, %v1420_v23  ;;  %v8916_v7 = vld [vmem:[#allocation29_spill] sm:$0xff] }
 0x3d6   :  { %v1243_v40 = vpop.f32.mrf.mxu1  ;;  %1872 = vmatmul.mubr.f32.gmra.mxu1 %v6102_v17 }
 0x3d7   :  { %v6107_v53 = vmul.f32 0.5, %v1421_v35  ;;  %v1422_v28 = vsub.f32 %v8914_v29, %v1243_v40 }
 0x3d8   :  { %v1245_v30 = vpop.f32.mrf.mxu1 }
 0x3d9   :  { %v1423_v39 = vsub.f32 0.0, %v1245_v30  ;;  %1877 = vmatprep.mubr.f32.mxu1 %v6107_v53  ;;  %v6116_v36 = vmul.f32 0.5, %v1422_v28 }
 0x3da   :  { %v1249_v32 = vpop.f32.mrf.mxu1  ;;  %1878 = vmatmul.mubr.f32.gmra.mxu1 %v6109_v42 }
 0x3db   :  { %v6114_v63 = vmul.f32 0.5, %v1423_v39  ;;  %v1424_v20 = vsub.f32 %v8915_v57, %v1249_v32 }
 0x3dc   :  { %v1251_v51 = vpop.f32.mrf.mxu1 }
 0x3dd   :  { %v1425_v55 = vsub.f32 0.0, %v1251_v51  ;;  %1883 = vmatprep.mubr.f32.mxu1 %v6114_v63  ;;  %v6123_v23 = vmul.f32 0.5, %v1424_v20  ;;  %v8917_v51 = vld [vmem:[#allocation28_spill] sm:$0xff] }
 0x3de   :  { %v1255_v25 = vpop.f32.mrf.mxu1  ;;  %1884 = vmatmul.mubr.f32.gmra.mxu1 %v6116_v36 }
 0x3df   :  { %v6121_v45 = vmul.f32 0.5, %v1425_v55  ;;  %v1426_v35 = vsub.f32 %v8916_v7, %v1255_v25  ;;  %v8918_v7 = vld [vmem:[#allocation27_spill] sm:$0xff] }
 0x3e0   :  { %v1257_v40 = vpop.f32.mrf.mxu1 }
 0x3e1   :  { %v1427_v30 = vsub.f32 0.0, %v1257_v40  ;;  %1889 = vmatprep.mubr.f32.mxu1 %v6121_v45  ;;  %v6130_v32 = vmul.f32 0.5, %v1426_v35 }
 0x3e2   :  { %v1261_v28 = vpop.f32.mrf.mxu1  ;;  %1890 = vmatmul.mubr.f32.gmra.mxu1 %v6123_v23 }
 0x3e3   :  { %v6128_v39 = vmul.f32 0.5, %v1427_v30  ;;  %v1428_v57 = vsub.f32 %v8917_v51, %v1261_v28  ;;  %v8919_v51 = vld [vmem:[#allocation26_spill] sm:$0xff] }
 0x3e4   :  { %v1263_v29 = vpop.f32.mrf.mxu1 }
 0x3e5   :  { %v1429_v55 = vsub.f32 0.0, %v1263_v29  ;;  %1895 = vmatprep.mubr.f32.mxu1 %v6128_v39  ;;  %v6137_v40 = vmul.f32 0.5, %v1428_v57 }
 0x3e6   :  { %v1267_v20 = vpop.f32.mrf.mxu1  ;;  %1896 = vmatmul.mubr.f32.gmra.mxu1 %v6130_v32 }
 0x3e7   :  { %v6135_v25 = vmul.f32 0.5, %v1429_v55  ;;  %v1430_v27 = vsub.f32 %v8918_v7, %v1267_v20  ;;  %v8920_v7 = vld [vmem:[#allocation25_spill] sm:$0xff] }
 0x3e8   :  { %v1269_v60 = vpop.f32.mrf.mxu1 }
 0x3e9   :  { %v1431_v30 = vsub.f32 0.0, %v1269_v60  ;;  %1901 = vmatprep.mubr.f32.mxu1 %v6135_v25  ;;  %v6144_v29 = vmul.f32 0.5, %v1430_v27 }
 0x3ea   :  { %v1273_v35 = vpop.f32.mrf.mxu1  ;;  %1902 = vmatmul.mubr.f32.gmra.mxu1 %v6137_v40 }
 0x3eb   :  { %v6142_v28 = vmul.f32 0.5, %v1431_v30  ;;  %v1432_v56 = vsub.f32 %v8919_v51, %v1273_v35  ;;  %v8921_v51 = vld [vmem:[#allocation23_spill] sm:$0xff] }
 0x3ec   :  { %v1275_v48 = vpop.f32.mrf.mxu1 }
 0x3ed   :  { %v1433_v55 = vsub.f32 0.0, %v1275_v48  ;;  %1907 = vmatprep.mubr.f32.mxu1 %v6142_v28  ;;  %v6151_v60 = vmul.f32 0.5, %v1432_v56 }
 0x3ee   :  { %v1279_v57 = vpop.f32.mrf.mxu1  ;;  %1908 = vmatmul.mubr.f32.gmra.mxu1 %v6144_v29 }
 0x3ef   :  { %v6149_v20 = vmul.f32 0.5, %v1433_v55  ;;  %v1434_v26 = vsub.f32 %v8920_v7, %v1279_v57  ;;  %v8922_v7 = vld [vmem:[#allocation22_spill] sm:$0xff] }
 0x3f0   :  { %v1281_v4 = vpop.f32.mrf.mxu1 }
 0x3f1   :  { %v1435_v30 = vsub.f32 0.0, %v1281_v4  ;;  %1913 = vmatprep.mubr.f32.mxu1 %v6149_v20  ;;  %v6158_v48 = vmul.f32 0.5, %v1434_v26 }
 0x3f2   :  { %v1285_v27 = vpop.f32.mrf.mxu1  ;;  %1914 = vmatmul.mubr.f32.gmra.mxu1 %v6151_v60 }
 0x3f3   :  { %v6156_v35 = vmul.f32 0.5, %v1435_v30  ;;  %v1436_v13 = vsub.f32 %v8921_v51, %v1285_v27  ;;  %v8923_v51 = vld [vmem:[#allocation21_spill] sm:$0xff] }
 0x3f4   :  { %v1287_v62 = vpop.f32.mrf.mxu1 }
 0x3f5   :  { %v1437_v55 = vsub.f32 0.0, %v1287_v62  ;;  %1919 = vmatprep.mubr.f32.mxu1 %v6156_v35  ;;  %v6165_v4 = vmul.f32 0.5, %v1436_v13 }
 0x3f6   :  { %v1291_v56 = vpop.f32.mrf.mxu1  ;;  %1920 = vmatmul.mubr.f32.gmra.mxu1 %v6158_v48 }
 0x3f7   :  { %v6163_v57 = vmul.f32 0.5, %v1437_v55  ;;  %v1438_v61 = vsub.f32 %v8922_v7, %v1291_v56 }
 0x3f8   :  { %v1293_v6 = vpop.f32.mrf.mxu1 }
 0x3f9   :  { %v1439_v30 = vsub.f32 0.0, %v1293_v6  ;;  %1925 = vmatprep.mubr.f32.mxu1 %v6163_v57  ;;  %v1502_v62 = vmul.f32 0.5, %v1438_v61 }
 0x3fa   :  { %v1297_v26 = vpop.f32.mrf.mxu1  ;;  %1926 = vmatmul.mubr.f32.gmra.mxu1 %v6165_v4 }
 0x3fb   :  { %v1503_v27 = vmul.f32 0.5, %v1439_v30  ;;  %v1440_v16 = vsub.f32 %v8923_v51, %v1297_v26  ;;  %v8925_v30 = vld [vmem:[#allocation19_spill] sm:$0xff] }
 0x3fc   :  { %v1299_v19 = vpop.f32.mrf.mxu1 }
 0x3fd   :  { %v1441_v24 = vsub.f32 0.0, %v1299_v19  ;;  %1931 = vmatprep.mubr.f32.mxu1 %v1503_v27  ;;  %v1504_v1 = vmul.f32 0.5, %v1440_v16 }
 0x3fe   :  { %v1303_v55 = vpop.f32.mrf.mxu1  ;;  %1932 = vmatmul.mubr.f32.gmra.mxu1 %v1502_v62 }
 0x3ff   :  { %v1505_v13 = vmul.f32 0.5, %v1441_v24  ;;  %v1442_v56 = vsub.f32 %v8924_v12, %v1303_v55  ;;  %v8926_v24 = vld [vmem:[#allocation18_spill] sm:$0xff] }
 0x400   :  { %v1305_v7 = vpop.f32.mrf.mxu1 }
 0x401   :  { %v1443_v6 = vsub.f32 0.0, %v1305_v7  ;;  %1937 = vmatprep.mubr.f32.mxu1 %v1505_v13  ;;  %v1506_v8 = vmul.f32 0.5, %v1442_v56 }
 0x402   :  { %v1309_v9 = vpop.f32.mrf.mxu1  ;;  %1938 = vmatmul.mubr.f32.gmra.mxu1 %v1504_v1 }
 0x403   :  { %v1507_v46 = vmul.f32 0.5, %v1443_v6  ;;  %v1444_v61 = vsub.f32 %v8925_v30, %v1309_v9 }
 0x404   :  { %v1311_v47 = vpop.f32.mrf.mxu1 }
 0x405   :  { %v1445_v26 = vsub.f32 0.0, %v1311_v47  ;;  %1943 = vmatprep.mubr.f32.mxu1 %v1507_v46  ;;  %v1508_v18 = vmul.f32 0.5, %v1444_v61 }
 0x406   :  { %v1315_v19 = vpop.f32.mrf.mxu1  ;;  %1944 = vmatmul.mubr.f32.gmra.mxu1 %v1506_v8 }
 0x407   :  { %v1509_v51 = vmul.f32 0.5, %v1445_v26  ;;  %v1446_v16 = vsub.f32 %v8926_v24, %v1315_v19 }
 0x408   :  { %v1317_v54 = vpop.f32.mrf.mxu1 }
 0x409   :  { %v1447_v55 = vsub.f32 0.0, %v1317_v54  ;;  %1949 = vmatprep.mubr.f32.mxu1 %v1509_v51  ;;  %v1510_v21 = vmul.f32 0.5, %v1446_v16 }
 0x40a   :  { %v1321_v7 = vpop.f32.mrf.mxu1  ;;  %1950 = vmatmul.mubr.f32.gmra.mxu1 %v1508_v18 }
 0x40b   :  { %v1511_v12 = vmul.f32 0.5, %v1447_v55  ;;  %v1448_v6 = vsub.f32 0.0, %v1321_v7 }
 0x40c   :  { %v1323_v56 = vpop.f32.mrf.mxu1 }
 0x40d   :  { %v1449_v9 = vsub.f32 %v5689_v22, %v1323_v56  ;;  %1544 = vmatprep.subr.mxu0 %v1511_v12  ;;  %1955 = vmatprep.mubr.f32.mxu1 %v1511_v12  ;;  %v6177_v61 = vmul.f32 0.5, %v1448_v6  ;;  %v8927_v6 = vld [vmem:[#allocation54_spill] sm:$0xff] }
 0x40e   :  { %v1327_v47 = vpop.f32.mrf.mxu1  ;;  %1545 = vmatpush1.msra.mxu0 %v1510_v21  ;;  %1956 = vmatmul.mubr.f32.gmra.mxu1 %v1510_v21 }
 0x40f   :  { %v6175_v26 = vmul.f32 0.5, %v1449_v9  ;;  %1546 = vmatprep.subr.mxu0 %v1509_v51  ;;  %v1450_v54 = vsub.f32 0.0, %v1327_v47 }
 0x410   :  { %v1329_v19 = vpop.f32.mrf.mxu1  ;;  %1547 = vmatpush1.msra.mxu0 %v1508_v18 }
 0x411   :  { %v1451_v55 = vsub.f32 %v5680_v34, %v1329_v19  ;;  %1548 = vmatprep.subr.mxu0 %v1507_v46  ;;  %1961 = vmatprep.mubr.f32.mxu1 %v6175_v26  ;;  %v6184_v21 = vmul.f32 0.5, %v1450_v54 }
 0x412   :  { %v1333_v16 = vpop.f32.mrf.mxu1  ;;  %1549 = vmatpush1.msra.mxu0 %v1506_v8  ;;  %1962 = vmatmul.mubr.f32.gmra.mxu1 %v6177_v61 }
 0x413   :  { %v6182_v12 = vmul.f32 0.5, %v1451_v55  ;;  %1550 = vmatprep.subr.mxu0 %v1505_v13  ;;  %v1452_v51 = vsub.f32 0.0, %v1333_v16 }
 0x414   :  { %v1335_v7 = vpop.f32.mrf.mxu1  ;;  %1551 = vmatpush1.msra.mxu0 %v1504_v1  ;;  %v8928_v1 = vld [vmem:[#allocation52_spill] sm:$0xff] }
 0x415   :  { %v1453_v56 = vsub.f32 %v8927_v6, %v1335_v7  ;;  %1552 = vmatprep.subr.mxu0 %v1503_v27  ;;  %1967 = vmatprep.mubr.f32.mxu1 %v6182_v12  ;;  %v6192_v18 = vmul.f32 0.5, %v1452_v51 }
 0x416   :  { %v1339_v46 = vpop.f32.mrf.mxu1  ;;  %1553 = vmatpush1.msra.mxu0 %v1502_v62  ;;  %1968 = vmatmul.mubr.f32.gmra.mxu1 %v6184_v21 }
 0x417   :  { %v6189_v8 = vmul.f32 0.5, %v1453_v56  ;;  %1554 = vmatprep.subr.mxu0 %v6163_v57  ;;  %v1454_v13 = vsub.f32 0.0, %v1339_v46 }
 0x418   :  { %v1341_v9 = vpop.f32.mrf.mxu1  ;;  %1555 = vmatpush1.msra.mxu0 %v6165_v4  ;;  %v8929_v4 = vld [vmem:[#allocation50_spill] sm:$0xff] }
 0x419   :  { %v1455_v47 = vsub.f32 %v8928_v1, %v1341_v9  ;;  %1556 = vmatprep.subr.mxu0 %v6156_v35  ;;  %1973 = vmatprep.mubr.f32.mxu1 %v6189_v8  ;;  %v6203_v57 = vmul.f32 0.5, %v1454_v13 }
 0x41a   :  { %v1345_v27 = vpop.f32.mrf.mxu1  ;;  %1557 = vmatpush1.msra.mxu0 %v6158_v48  ;;  %1974 = vmatmul.mubr.f32.gmra.mxu1 %v6192_v18 }
 0x41b   :  { %v6200_v62 = vmul.f32 0.5, %v1455_v47  ;;  %1558 = vmatprep.subr.mxu0 %v6149_v20  ;;  %v1456_v54 = vsub.f32 0.0, %v1345_v27 }
 0x41c   :  { %v1347_v19 = vpop.f32.mrf.mxu1  ;;  %1559 = vmatpush1.msra.mxu0 %v6151_v60  ;;  %v8930_v60 = vld [vmem:[#allocation49_spill] sm:$0xff] }
 0x41d   :  { %v1457_v55 = vsub.f32 %v8929_v4, %v1347_v19  ;;  %1560 = vmatprep.subr.mxu0 %v6142_v28  ;;  %1979 = vmatprep.mubr.f32.mxu1 %v6200_v62  ;;  %v6214_v20 = vmul.f32 0.5, %v1456_v54 }
 0x41e   :  { %v1351_v35 = vpop.f32.mrf.mxu1  ;;  %1561 = vmatpush1.msra.mxu0 %v6144_v29  ;;  %1980 = vmatmul.mubr.f32.gmra.mxu1 %v6203_v57 }
 0x41f   :  { %v6211_v48 = vmul.f32 0.5, %v1457_v55  ;;  %1562 = vmatprep.subr.mxu0 %v6135_v25  ;;  %v1458_v16 = vsub.f32 0.0, %v1351_v35 }
 0x420   :  { %v1353_v51 = vpop.f32.mrf.mxu1  ;;  %1563 = vmatpush1.msra.mxu0 %v6137_v40  ;;  %v8931_v40 = vld [vmem:[#allocation47_spill] sm:$0xff] }
 0x421   :  { %v1459_v7 = vsub.f32 %v8930_v60, %v1353_v51  ;;  %1564 = vmatprep.subr.mxu0 %v6128_v39  ;;  %1985 = vmatprep.mubr.f32.mxu1 %v6211_v48  ;;  %v6225_v25 = vmul.f32 0.5, %v1458_v16 }
 0x422   :  { %v1357_v28 = vpop.f32.mrf.mxu1  ;;  %1565 = vmatpush1.msra.mxu0 %v6130_v32  ;;  %1986 = vmatmul.mubr.f32.gmra.mxu1 %v6214_v20 }
 0x423   :  { %v6222_v29 = vmul.f32 0.5, %v1459_v7  ;;  %1566 = vmatprep.subr.mxu0 %v6121_v45  ;;  %v1460_v56 = vsub.f32 0.0, %v1357_v28 }
 0x424   :  { %v1359_v46 = vpop.f32.mrf.mxu1  ;;  %1567 = vmatpush1.msra.mxu0 %v6123_v23  ;;  %v8932_v23 = vld [vmem:[#allocation45_spill] sm:$0xff] }
 0x425   :  { %v1461_v13 = vsub.f32 %v8931_v40, %v1359_v46  ;;  %1568 = vmatprep.subr.mxu0 %v6114_v63  ;;  %1991 = vmatprep.mubr.f32.mxu1 %v6222_v29  ;;  %v6236_v45 = vmul.f32 0.5, %v1460_v56 }
 0x426   :  { %v1363_v39 = vpop.f32.mrf.mxu1  ;;  %1569 = vmatpush1.msra.mxu0 %v6116_v36  ;;  %1992 = vmatmul.mubr.f32.gmra.mxu1 %v6225_v25 }
 0x427   :  { %v6233_v32 = vmul.f32 0.5, %v1461_v13  ;;  %1570 = vmatprep.subr.mxu0 %v6107_v53  ;;  %v1462_v9 = vsub.f32 0.0, %v1363_v39  ;;  %v8935_v39 = vld [vmem:[#allocation40_spill] sm:$0xff] }
 0x428   :  { %v1365_v47 = vpop.f32.mrf.mxu1  ;;  %1571 = vmatpush1.msra.mxu0 %v6109_v42  ;;  %v8933_v42 = vld [vmem:[#allocation43_spill] sm:$0xff] }
 0x429   :  { %v1463_v27 = vsub.f32 %v8932_v23, %v1365_v47  ;;  %1572 = vmatprep.subr.mxu0 %v6100_v49  ;;  %1997 = vmatprep.mubr.f32.mxu1 %v6233_v32  ;;  %v6247_v53 = vmul.f32 0.5, %v1462_v9 }
 0x42a   :  { %v1369_v63 = vpop.f32.mrf.mxu1  ;;  %1573 = vmatpush1.msra.mxu0 %v6102_v17  ;;  %1998 = vmatmul.mubr.f32.gmra.mxu1 %v6236_v45 }
 0x42b   :  { %v6244_v36 = vmul.f32 0.5, %v1463_v27  ;;  %1574 = vmatprep.subr.mxu0 %v6093_v44  ;;  %v1464_v54 = vsub.f32 0.0, %v1369_v63  ;;  %v8934_v44 = vld [vmem:[#allocation41_spill] sm:$0xff] }
 0x42c   :  { %v1371_v19 = vpop.f32.mrf.mxu1  ;;  %1575 = vmatpush1.msra.mxu0 %v6095_v31 }
 0x42d   :  { %v1465_v55 = vsub.f32 %v8933_v42, %v1371_v19  ;;  %2003 = vmatprep.mubr.f32.mxu1 %v6244_v36  ;;  %v6255_v35 = vmul.f32 0.5, %v1464_v54 }
 0x42e   :  { %v1375_v49 = vpop.f32.mrf.mxu1  ;;  %2004 = vmatmul.mubr.f32.gmra.mxu1 %v6247_v53 }
 0x42f   :  { %v6253_v17 = vmul.f32 0.5, %v1465_v55  ;;  %v1466_v16 = vsub.f32 0.0, %v1375_v49  ;;  %v8936_v55 = vld [vmem:[#allocation39_spill] sm:$0xff] }
 0x430   :  { %v1377_v51 = vpop.f32.mrf.mxu1 }
 0x431   :  { %v1467_v7 = vsub.f32 %v8934_v44, %v1377_v51  ;;  %2009 = vmatprep.mubr.f32.mxu1 %v6253_v17  ;;  %v1530_v56 = vmul.f32 0.5, %v1466_v16 }
 0x432   :  { %v1381_v28 = vpop.f32.mrf.mxu1  ;;  %2010 = vmatmul.mubr.f32.gmra.mxu1 %v6255_v35 }
 0x433   :  { %v1531_v31 = vmul.f32 0.5, %v1467_v7  ;;  %v1468_v46 = vsub.f32 0.0, %v1381_v28  ;;  %v8937_v28 = vld [vmem:[#allocation38_spill] sm:$0xff] }
 0x434   :  { %v1383_v13 = vpop.f32.mrf.mxu1 }
 0x435   :  { %v1469_v9 = vsub.f32 %v8935_v39, %v1383_v13  ;;  %2015 = vmatprep.mubr.f32.mxu1 %v1531_v31  ;;  %v1532_v63 = vmul.f32 0.5, %v1468_v46 }
 0x436   :  { %v1387_v47 = vpop.f32.mrf.mxu1  ;;  %2016 = vmatmul.mubr.f32.gmra.mxu1 %v1530_v56 }
 0x437   :  { %v1533_v27 = vmul.f32 0.5, %v1469_v9  ;;  %v1470_v54 = vsub.f32 0.0, %v1387_v47  ;;  %v8938_v47 = vld [vmem:[#allocation37_spill] sm:$0xff] }
 0x438   :  { %v1389_v19 = vpop.f32.mrf.mxu1 }
 0x439   :  { %v1471_v49 = vsub.f32 %v8936_v55, %v1389_v19  ;;  %2021 = vmatprep.mubr.f32.mxu1 %v1533_v27  ;;  %v1534_v42 = vmul.f32 0.5, %v1470_v54 }
 0x43a   :  { %v1393_v51 = vpop.f32.mrf.mxu1  ;;  %2022 = vmatmul.mubr.f32.gmra.mxu1 %v1532_v63 }
 0x43b   :  { %v1535_v44 = vmul.f32 0.5, %v1471_v49  ;;  %v1472_v7 = vsub.f32 0.0, %v1393_v51  ;;  %v8939_v51 = vld [vmem:[#allocation36_spill] sm:$0xff] }
 0x43c   :  { %v1395_v16 = vpop.f32.mrf.mxu1 }
 0x43d   :  { %v1473_v23 = vsub.f32 %v8937_v28, %v1395_v16  ;;  %2027 = vmatprep.mubr.f32.mxu1 %v1535_v44  ;;  %v1536_v40 = vmul.f32 0.5, %v1472_v7 }
 0x43e   :  { %v1399_v13 = vpop.f32.mrf.mxu1  ;;  %2028 = vmatmul.mubr.f32.gmra.mxu1 %v1534_v42 }
 0x43f   :  { %v1537_v39 = vmul.f32 0.5, %v1473_v23  ;;  %v1474_v9 = vsub.f32 0.0, %v1399_v13  ;;  %v8940_v13 = vld [vmem:[#allocation35_spill] sm:$0xff] }
 0x440   :  { %v1401_v46 = vpop.f32.mrf.mxu1 }
 0x441   :  { %v1475_v60 = vsub.f32 %v8938_v47, %v1401_v46  ;;  %2033 = vmatprep.mubr.f32.mxu1 %v1537_v39  ;;  %v1538_v4 = vmul.f32 0.5, %v1474_v9 }
 0x442   :  { %v1405_v19 = vpop.f32.mrf.mxu1  ;;  %2034 = vmatmul.mubr.f32.gmra.mxu1 %v1536_v40 }
 0x443   :  { %v1539_v55 = vmul.f32 0.5, %v1475_v60  ;;  %v1476_v49 = vsub.f32 0.0, %v1405_v19  ;;  %v8959_v60 = vld [vmem:[#allocation75_spill] sm:$0xff] }
 0x444   :  { %v1407_v54 = vpop.f32.mrf.mxu1 }
 0x445   :  { %v1477_v1 = vsub.f32 %v8939_v51, %v1407_v54  ;;  %2039 = vmatprep.mubr.f32.mxu1 %v1539_v55  ;;  %v1540_v6 = vmul.f32 0.5, %v1476_v49 }
 0x446   :  { %v1411_v16 = vpop.f32.mrf.mxu1  ;;  %2040 = vmatmul.mubr.f32.gmra.mxu1 %v1538_v4 }
 0x447   :  { %v1541_v28 = vmul.f32 0.5, %v1477_v1  ;;  %v1478_v23 = vsub.f32 0.0, %v1411_v16  ;;  %v8953_v1 = vld [vmem:[#allocation69_spill] sm:$0xff] }
 0x448   :  { %v1413_v7 = vpop.f32.mrf.mxu1 }
 0x449   :  { %v1479_v34 = vsub.f32 %v8940_v13, %v1413_v7  ;;  %2045 = vmatprep.mubr.f32.mxu1 %v1541_v28  ;;  %v1542_v47 = vmul.f32 0.5, %v1478_v23 }
 0x44a   :  { %2046 = vmatmul.mubr.f32.gmra.mxu1 %v1540_v6 }
 0x44b   :  { %v1543_v46 = vmul.f32 0.5, %v1479_v34  ;;  %v8941_v34 = vld [vmem:[#allocation58_spill] sm:$0xff] }
 0x44d   :  { %1576 = vmatprep.subr.mxu0 %v1543_v46  ;;  %2051 = vmatprep.mubr.f32.mxu1 %v1543_v46 }
 0x44e   :  { %1577 = vmatpush2.msra.mxu0 %v1542_v47  ;;  %2052 = vmatmul.mubr.f32.gmra.mxu1 %v1542_v47 }
 0x44f   :  { %1578 = vmatprep.subr.mxu0 %v1541_v28 }
 0x450   :  { %1579 = vmatpush2.msra.mxu0 %v1540_v6  ;;  %v8942_v6 = vld [vmem:[#allocation60_spill] sm:$0xff] }
 0x451   :  { %1580 = vmatprep.subr.mxu0 %v1539_v55 }
 0x452   :  { %1581 = vmatpush2.msra.mxu0 %v1538_v4  ;;  %v8956_v4 = vld [vmem:[#allocation74_spill] sm:$0xff] }
 0x453   :  { %1582 = vmatprep.subr.mxu0 %v1537_v39  ;;  %v8985_v39 = vld [vmem:[#allocation103_spill] sm:$0xff] }
 0x454   :  { %1583 = vmatpush2.msra.mxu0 %v1536_v40  ;;  %v8962_v40 = vld [vmem:[#allocation80_spill] sm:$0xff] }
 0x455   :  { %1584 = vmatprep.subr.mxu0 %v1535_v44  ;;  %v8983_v44 = vld [vmem:[#allocation101_spill] sm:$0xff] }
 0x456   :  { %1585 = vmatpush2.msra.mxu0 %v1534_v42  ;;  %v8967_v42 = vld [vmem:[#allocation83_spill] sm:$0xff] }
 0x457   :  { %1586 = vmatprep.subr.mxu0 %v1533_v27 }
 0x458   :  { %1587 = vmatpush2.msra.mxu0 %v1532_v63  ;;  %v8987_v63 = vld [vmem:[#allocation102_spill] sm:$0xff] }
 0x459   :  { %1588 = vmatprep.subr.mxu0 %v1531_v31 }
 0x45a   :  { %1589 = vmatpush2.msra.mxu0 %v1530_v56  ;;  %v8984_v56 = vld [vmem:[#allocation100_spill] sm:$0xff] }
 0x45b   :  { %1590 = vmatprep.subr.mxu0 %v6253_v17  ;;  %v8981_v17 = vld [vmem:[#allocation99_spill] sm:$0xff] }
 0x45c   :  { %1591 = vmatpush2.msra.mxu0 %v6255_v35  ;;  %v8982_v35 = vld [vmem:[#allocation98_spill] sm:$0xff] }
 0x45d   :  { %1592 = vmatprep.subr.mxu0 %v6244_v36  ;;  %v8965_v36 = vld [vmem:[#allocation81_spill] sm:$0xff] }
 0x45e   :  { %1593 = vmatpush2.msra.mxu0 %v6247_v53  ;;  %v8966_v53 = vld [vmem:[#allocation84_spill] sm:$0xff] }
 0x45f   :  { %1594 = vmatprep.subr.mxu0 %v6233_v32  ;;  %v8963_v32 = vld [vmem:[#allocation79_spill] sm:$0xff] }
 0x460   :  { %1595 = vmatpush2.msra.mxu0 %v6236_v45  ;;  %v8964_v45 = vld [vmem:[#allocation82_spill] sm:$0xff] }
 0x461   :  { %1596 = vmatprep.subr.mxu0 %v6222_v29  ;;  %v8960_v29 = vld [vmem:[#allocation78_spill] sm:$0xff] }
 0x462   :  { %1597 = vmatpush2.msra.mxu0 %v6225_v25  ;;  %v8961_v25 = vld [vmem:[#allocation77_spill] sm:$0xff] }
 0x463   :  { %1598 = vmatprep.subr.mxu0 %v6211_v48  ;;  %v8957_v48 = vld [vmem:[#allocation73_spill] sm:$0xff] }
 0x464   :  { %1599 = vmatpush2.msra.mxu0 %v6214_v20  ;;  %v8958_v20 = vld [vmem:[#allocation76_spill] sm:$0xff] }
 0x465   :  { %1600 = vmatprep.subr.mxu0 %v6200_v62  ;;  %v8954_v62 = vld [vmem:[#allocation72_spill] sm:$0xff] }
 0x466   :  { %1601 = vmatpush2.msra.mxu0 %v6203_v57  ;;  %v8955_v57 = vld [vmem:[#allocation71_spill] sm:$0xff] }
 0x467   :  { %1602 = vmatprep.subr.mxu0 %v6189_v8  ;;  %v8943_v8 = vld [vmem:[#allocation59_spill] sm:$0xff] }
 0x468   :  { %1603 = vmatpush2.msra.mxu0 %v6192_v18  ;;  %v8952_v18 = vld [vmem:[#allocation70_spill] sm:$0xff] }
 0x469   :  { %1604 = vmatprep.subr.mxu0 %v6182_v12  ;;  %v8944_v12 = vld [vmem:[#allocation62_spill] sm:$0xff] }
 0x46a   :  { %1605 = vmatpush2.msra.mxu0 %v6184_v21  ;;  %v8945_v21 = vld [vmem:[#allocation61_spill] sm:$0xff] }
 0x46b   :  { %1606 = vmatprep.subr.mxu0 %v6175_v26  ;;  %v8946_v26 = vld [vmem:[#allocation64_spill] sm:$0xff] }
 0x46c   :  { %1607 = vmatpush2.msra.mxu0 %v6177_v61  ;;  %v8947_v61 = vld [vmem:[#allocation63_spill] sm:$0xff] }
 0x46d   :  { %1609 = vmatmul.mubr.f32.vlgmr.msra.gmra.mxu0 %v5772_v50  ;;  %v8948_v50 = vld [vmem:[#allocation66_spill] sm:$0xff] }
 0x46e   :  { %1614 = vmatprep.mubr.f32.mxu0 %v5779_v37  ;;  %v8949_v37 = vld [vmem:[#allocation65_spill] sm:$0xff] }
 0x471   :  { %1615 = vmatmul.mubr.f32.gmra.mxu0 %v5777_v52  ;;  %v8950_v52 = vld [vmem:[#allocation68_spill] sm:$0xff] }
 0x472   :  { %1620 = vmatprep.mubr.f32.mxu0 %v5783_v33  ;;  %v8951_v33 = vld [vmem:[#allocation67_spill] sm:$0xff] }
 0x475   :  { %1621 = vmatmul.mubr.f32.gmra.mxu0 %v8941_v34 }
 0x476   :  { %1626 = vmatprep.mubr.f32.mxu0 %v8942_v6 }
 0x479   :  { %1627 = vmatmul.mubr.f32.gmra.mxu0 %v8943_v8 }
 0x47a   :  { %1632 = vmatprep.mubr.f32.mxu0 %v8944_v12 }
 0x47d   :  { %1633 = vmatmul.mubr.f32.gmra.mxu0 %v8945_v21 }
 0x47e   :  { %1638 = vmatprep.mubr.f32.mxu0 %v8946_v26 }
 0x481   :  { %1639 = vmatmul.mubr.f32.gmra.mxu0 %v8947_v61 }
 0x482   :  { %1644 = vmatprep.mubr.f32.mxu0 %v8948_v50 }
 0x485   :  { %1645 = vmatmul.mubr.f32.gmra.mxu0 %v8949_v37 }
 0x486   :  { %1650 = vmatprep.mubr.f32.mxu0 %v8950_v52 }
 0x489   :  { %1651 = vmatmul.mubr.f32.gmra.mxu0 %v8951_v33 }
 0x48a   :  { %1656 = vmatprep.mubr.f32.mxu0 %v8952_v18 }
 0x48d   :  { %1657 = vmatmul.mubr.f32.gmra.mxu0 %v8953_v1 }
 0x48e   :  { %1662 = vmatprep.mubr.f32.mxu0 %v8954_v62 }
 0x491   :  { %1663 = vmatmul.mubr.f32.gmra.mxu0 %v8955_v57 }
 0x492   :  { %1668 = vmatprep.mubr.f32.mxu0 %v8956_v4  ;;  %v6344_v31 = vpop.f32.mrf.mxu1 }
 0x494   :  { %v6348_v27 = vpop.f32.mrf.mxu1 }
 0x495   :  { %1669 = vmatmul.mubr.f32.gmra.mxu0 %v8957_v48  ;;  %8986 = vst [vmem:[#allocation42_spill] sm:$0xff] %v6348_v27 }
 0x496   :  { %1674 = vmatprep.mubr.f32.mxu0 %v8958_v20  ;;  %v6352_v55 = vpop.f32.mrf.mxu1 }
 0x498   :  { %v6354_v28 = vpop.f32.mrf.mxu1 }
 0x499   :  { %1675 = vmatmul.mubr.f32.gmra.mxu0 %v8959_v60 }
 0x49a   :  { %1680 = vmatprep.mubr.f32.mxu0 %v8960_v29  ;;  %v6356_v9 = vpop.f32.mrf.mxu1 }
 0x49c   :  { %v6358_v47 = vpop.f32.mrf.mxu1 }
 0x49d   :  { %1681 = vmatmul.mubr.f32.gmra.mxu0 %v8961_v25 }
 0x49e   :  { %1686 = vmatprep.mubr.f32.mxu0 %v8962_v40  ;;  %v6360_v19 = vpop.f32.mrf.mxu1 }
 0x4a0   :  { %v6362_v49 = vpop.f32.mrf.mxu1 }
 0x4a1   :  { %1687 = vmatmul.mubr.f32.gmra.mxu0 %v8963_v32 }
 0x4a2   :  { %1692 = vmatprep.mubr.f32.mxu0 %v8964_v45  ;;  %v6364_v54 = vpop.f32.mrf.mxu1 }
 0x4a4   :  { %v6366_v16 = vpop.f32.mrf.mxu1 }
 0x4a5   :  { %1693 = vmatmul.mubr.f32.gmra.mxu0 %v8965_v36 }
 0x4a6   :  { %1698 = vmatprep.mubr.f32.mxu0 %v8966_v53  ;;  %v6368_v23 = vpop.f32.mrf.mxu1 }
 0x4a7   :  { %8988 = vst [vmem:[#allocation44_spill] sm:$0xff] %v6368_v23 }
 0x4a8   :  { %v6370_v7 = vpop.f32.mrf.mxu1 }
 0x4a9   :  { %1699 = vmatmul.mubr.f32.gmra.mxu0 %v8967_v42 }
 0x4aa   :  { %1704 = vmatprep.mubr.f32.mxu0 %v5842_v2  ;;  %v8969_v2 = vld [vmem:[#allocation87_spill] sm:$0xff]  ;;  %v6372_v46 = vpop.f32.mrf.mxu1 }
 0x4ab   :  { %8989 = vst [vmem:[#allocation46_spill] sm:$0xff] %v6372_v46 }
 0x4ac   :  { %v6374_v34 = vpop.f32.mrf.mxu1 }
 0x4ad   :  { %1705 = vmatmul.mubr.f32.gmra.mxu0 %v5838_v10  ;;  %v8968_v10 = vld [vmem:[#allocation85_spill] sm:$0xff]  ;;  %8990 = vst [vmem:[#allocation48_spill] sm:$0xff] %v6374_v34 }
 0x4ae   :  { %1710 = vmatprep.mubr.f32.mxu0 %v5850_v41  ;;  %v8980_v41 = vld [vmem:[#allocation96_spill] sm:$0xff]  ;;  %v6376_v6 = vpop.f32.mrf.mxu1 }
 0x4af   :  { %8991 = vst [vmem:[#allocation51_spill] sm:$0xff] %v6376_v6 }
 0x4b0   :  { %v6378_v8 = vpop.f32.mrf.mxu1 }
 0x4b1   :  { %1711 = vmatmul.mubr.f32.gmra.mxu0 %v5846_v0  ;;  %v8979_v0 = vld [vmem:[#allocation97_spill] sm:$0xff] }
 0x4b2   :  { %1716 = vmatprep.mubr.f32.mxu0 %v5858_v3  ;;  %v8970_v3 = vld [vmem:[#allocation86_spill] sm:$0xff]  ;;  %v6382_v21 = vpop.f32.mrf.mxu1 }
 0x4b4   :  { %v6389_v50 = vpop.f32.mrf.mxu1 }
 0x4b5   :  { %1717 = vmatmul.mubr.f32.gmra.mxu0 %v5854_v15  ;;  %v8971_v15 = vld [vmem:[#allocation89_spill] sm:$0xff] }
 0x4b6   :  { %1722 = vmatprep.mubr.f32.mxu0 %v5866_v58  ;;  %v8972_v58 = vld [vmem:[#allocation88_spill] sm:$0xff]  ;;  %v6395_v33 = vpop.f32.mrf.mxu1 }
 0x4b8   :  { %v6401_v62 = vpop.f32.mrf.mxu1 }
 0x4b9   :  { %1723 = vmatmul.mubr.f32.gmra.mxu0 %v5862_v38  ;;  %v8973_v38 = vld [vmem:[#allocation91_spill] sm:$0xff] }
 0x4ba   :  { %1728 = vmatprep.mubr.f32.mxu0 %v5874_v59  ;;  %v8974_v59 = vld [vmem:[#allocation90_spill] sm:$0xff]  ;;  %v6407_v48 = vpop.f32.mrf.mxu1 }
 0x4bc   :  { %v6413_v29 = vpop.f32.mrf.mxu1 }
 0x4bd   :  { %1729 = vmatmul.mubr.f32.gmra.mxu0 %v5870_v5  ;;  %v8975_v5 = vld [vmem:[#allocation93_spill] sm:$0xff] }
 0x4be   :  { %1734 = vmatprep.mubr.f32.mxu0 %v5882_v43  ;;  %v8976_v43 = vld [vmem:[#allocation92_spill] sm:$0xff]  ;;  %v6419_v32 = vpop.f32.mrf.mxu1 }
 0x4c0   :  { %v6425_v53 = vpop.f32.mrf.mxu1 }
 0x4c1   :  { %1735 = vmatmul.mubr.f32.gmra.mxu0 %v5878_v14  ;;  %v8977_v14 = vld [vmem:[#allocation95_spill] sm:$0xff] }
 0x4c2   :  { %1740 = vmatprep.mubr.f32.mxu0 %v5890_v11  ;;  %v8978_v11 = vld [vmem:[#allocation94_spill] sm:$0xff] }
 0x4c5   :  { %1741 = vmatmul.mubr.f32.gmra.mxu0 %v8968_v10 }
 0x4c6   :  { %1746 = vmatprep.mubr.f32.mxu0 %v8969_v2  ;;  %v6431_v2 = vpop.f32.mrf.mxu1 }
 0x4c9   :  { %1747 = vmatmul.mubr.f32.gmra.mxu0 %v8970_v3 }
 0x4ca   :  { %1752 = vmatprep.mubr.f32.mxu0 %v8971_v15 }
 0x4cd   :  { %1753 = vmatmul.mubr.f32.gmra.mxu0 %v8972_v58  ;;  %v6437_v58 = vpop.f32.mrf.mxu1 }
 0x4ce   :  { %1758 = vmatprep.mubr.f32.mxu0 %v8973_v38 }
 0x4d1   :  { %1759 = vmatmul.mubr.f32.gmra.mxu0 %v8974_v59 }
 0x4d2   :  { %1764 = vmatprep.mubr.f32.mxu0 %v8975_v5  ;;  %v6443_v5 = vpop.f32.mrf.mxu1 }
 0x4d5   :  { %1765 = vmatmul.mubr.f32.gmra.mxu0 %v8976_v43 }
 0x4d6   :  { %1770 = vmatprep.mubr.f32.mxu0 %v8977_v14 }
 0x4d9   :  { %1771 = vmatmul.mubr.f32.gmra.mxu0 %v8978_v11  ;;  %v6449_v11 = vpop.f32.mrf.mxu1 }
 0x4da   :  { %1776 = vmatprep.mubr.f32.mxu0 %v8979_v0 }
 0x4dd   :  { %1777 = vmatmul.mubr.f32.gmra.mxu0 %v8980_v41 }
 0x4de   :  { %1782 = vmatprep.mubr.f32.mxu0 %v8981_v17  ;;  %v6455_v17 = vpop.f32.mrf.mxu1 }
 0x4e1   :  { %1783 = vmatmul.mubr.f32.gmra.mxu0 %v8982_v35 }
 0x4e2   :  { %1788 = vmatprep.mubr.f32.mxu0 %v8983_v44 }
 0x4e5   :  { %1789 = vmatmul.mubr.f32.gmra.mxu0 %v8984_v56  ;;  %v6461_v56 = vpop.f32.mrf.mxu1 }
 0x4e6   :  { %1794 = vmatprep.mubr.f32.mxu0 %v8985_v39 }
 0x4e7   :  { %v6467_v13 = vpop.f32.mrf.mxu1 }
 0x4e9   :  { %1795 = vmatmul.mubr.f32.gmra.mxu0 %v8987_v63  ;;  %v6473_v24 = vpop.f32.mrf.mxu1 }
 0x4ea   :  { %2122 = vmatprep.mubr.f32.mxu0 %v6348_v27 }
 0x4eb   :  { %v6482_v23 = vpop.f32.mrf.mxu1 }
 0x4ec   :  { %9023 = vst [vmem:[#allocation86_spill] sm:$0xff] %v6482_v23 }
 0x52d   :  { %v6380_v12 = vpop.f32.mrf.mxu0 }
 0x52e   :  { %8992 = vst [vmem:[#allocation53_spill] sm:$0xff] %v6380_v12 }
 0x52f   :  { %v6384_v26 = vpop.f32.mrf.mxu0 }
 0x530   :  { %2507 = vmatprep.mubr.f32.mxu1 %v6384_v26 }
 0x531   :  { %v6387_v61 = vpop.f32.mrf.mxu0 }
 0x532   :  { %8993 = vst [vmem:[#allocation55_spill] sm:$0xff] %v6387_v61 }
 0x533   :  { %v6391_v37 = vpop.f32.mrf.mxu0 }
 0x534   :  { %8994 = vst [vmem:[#allocation58_spill] sm:$0xff] %v6391_v37 }
 0x535   :  { %v6393_v52 = vpop.f32.mrf.mxu0 }
 0x536   :  { %8995 = vst [vmem:[#allocation60_spill] sm:$0xff] %v6393_v52 }
 0x537   :  { %v6397_v18 = vpop.f32.mrf.mxu0 }
 0x538   :  { %8996 = vst [vmem:[#allocation59_spill] sm:$0xff] %v6397_v18 }
 0x539   :  { %v6399_v1 = vpop.f32.mrf.mxu0 }
 0x53a   :  { %8997 = vst [vmem:[#allocation62_spill] sm:$0xff] %v6399_v1 }
 0x53b   :  { %v6403_v57 = vpop.f32.mrf.mxu0 }
 0x53c   :  { %8998 = vst [vmem:[#allocation61_spill] sm:$0xff] %v6403_v57 }
 0x53d   :  { %v6405_v4 = vpop.f32.mrf.mxu0 }
 0x53e   :  { %8999 = vst [vmem:[#allocation64_spill] sm:$0xff] %v6405_v4 }
 0x53f   :  { %v6409_v20 = vpop.f32.mrf.mxu0 }
 0x540   :  { %9000 = vst [vmem:[#allocation63_spill] sm:$0xff] %v6409_v20 }
 0x541   :  { %v6411_v60 = vpop.f32.mrf.mxu0 }
 0x542   :  { %9001 = vst [vmem:[#allocation66_spill] sm:$0xff] %v6411_v60 }
 0x543   :  { %v6415_v25 = vpop.f32.mrf.mxu0 }
 0x544   :  { %9002 = vst [vmem:[#allocation65_spill] sm:$0xff] %v6415_v25 }
 0x545   :  { %v6417_v40 = vpop.f32.mrf.mxu0 }
 0x546   :  { %9003 = vst [vmem:[#allocation68_spill] sm:$0xff] %v6417_v40 }
 0x547   :  { %v6421_v45 = vpop.f32.mrf.mxu0 }
 0x548   :  { %9004 = vst [vmem:[#allocation67_spill] sm:$0xff] %v6421_v45 }
 0x549   :  { %v6423_v36 = vpop.f32.mrf.mxu0 }
 0x54a   :  { %9005 = vst [vmem:[#allocation70_spill] sm:$0xff] %v6423_v36 }
 0x54b   :  { %v6427_v42 = vpop.f32.mrf.mxu0 }
 0x54c   :  { %9006 = vst [vmem:[#allocation69_spill] sm:$0xff] %v6427_v42 }
 0x54d   :  { %v6429_v10 = vpop.f32.mrf.mxu0 }
 0x54e   :  { %9007 = vst [vmem:[#allocation72_spill] sm:$0xff] %v6429_v10 }
 0x54f   :  { %v6433_v3 = vpop.f32.mrf.mxu0 }
 0x550   :  { %9008 = vst [vmem:[#allocation71_spill] sm:$0xff] %v6433_v3 }
 0x551   :  { %v6435_v15 = vpop.f32.mrf.mxu0 }
 0x552   :  { %9009 = vst [vmem:[#allocation74_spill] sm:$0xff] %v6435_v15 }
 0x553   :  { %v6439_v38 = vpop.f32.mrf.mxu0 }
 0x554   :  { %9010 = vst [vmem:[#allocation73_spill] sm:$0xff] %v6439_v38 }
 0x555   :  { %v6441_v59 = vpop.f32.mrf.mxu0 }
 0x556   :  { %9011 = vst [vmem:[#allocation76_spill] sm:$0xff] %v6441_v59 }
 0x557   :  { %v6445_v43 = vpop.f32.mrf.mxu0 }
 0x558   :  { %9012 = vst [vmem:[#allocation75_spill] sm:$0xff] %v6445_v43 }
 0x559   :  { %v6447_v14 = vpop.f32.mrf.mxu0 }
 0x55a   :  { %9013 = vst [vmem:[#allocation78_spill] sm:$0xff] %v6447_v14 }
 0x55b   :  { %v6451_v0 = vpop.f32.mrf.mxu0 }
 0x55c   :  { %9014 = vst [vmem:[#allocation77_spill] sm:$0xff] %v6451_v0 }
 0x55d   :  { %v6453_v41 = vpop.f32.mrf.mxu0 }
 0x55e   :  { %9015 = vst [vmem:[#allocation80_spill] sm:$0xff] %v6453_v41 }
 0x55f   :  { %v6457_v35 = vpop.f32.mrf.mxu0 }
 0x560   :  { %9016 = vst [vmem:[#allocation79_spill] sm:$0xff] %v6457_v35 }
 0x561   :  { %v6459_v44 = vpop.f32.mrf.mxu0 }
 0x562   :  { %9017 = vst [vmem:[#allocation82_spill] sm:$0xff] %v6459_v44 }
 0x563   :  { %v6463_v39 = vpop.f32.mrf.mxu0 }
 0x564   :  { %9018 = vst [vmem:[#allocation81_spill] sm:$0xff] %v6463_v39 }
 0x565   :  { %v6465_v63 = vpop.f32.mrf.mxu0 }
 0x566   :  { %9019 = vst [vmem:[#allocation84_spill] sm:$0xff] %v6465_v63 }
 0x567   :  { %v6469_v51 = vpop.f32.mrf.mxu0 }
 0x568   :  { %9020 = vst [vmem:[#allocation83_spill] sm:$0xff] %v6469_v51 }
 0x569   :  { %v6471_v22 = vpop.f32.mrf.mxu0 }
 0x56a   :  { %9021 = vst [vmem:[#allocation85_spill] sm:$0xff] %v6471_v22 }
 0x56b   :  { %v6475_v30 = vpop.f32.mrf.mxu0 }
 0x56c   :  { %9022 = vst [vmem:[#allocation87_spill] sm:$0xff] %v6475_v30  ;;  %2058 = vmatprep.subr.mxu0 %v6475_v30  ;;  %v6492_v30 = vpop.f32.mrf.mxu1 }
 0x56d   :  { %v6478_v27 = vpop.f32.mrf.mxu0  ;;  %2059 = vmatpush1.msra.mxu0 %v6471_v22  ;;  %9024 = vst [vmem:[#allocation89_spill] sm:$0xff] %v6492_v30 }
 0x56e   :  { %2060 = vmatprep.subr.mxu0 %v6469_v51 }
 0x56f   :  { %v6484_v46 = vpop.f32.mrf.mxu0  ;;  %2061 = vmatpush1.msra.mxu0 %v6465_v63  ;;  %v6502_v63 = vpop.f32.mrf.mxu1 }
 0x570   :  { %2062 = vmatprep.subr.mxu0 %v6463_v39  ;;  %9025 = vst [vmem:[#allocation88_spill] sm:$0xff] %v6502_v63 }
 0x571   :  { %v6488_v34 = vpop.f32.mrf.mxu0  ;;  %2063 = vmatpush1.msra.mxu0 %v6459_v44  ;;  %v6512_v39 = vpop.f32.mrf.mxu1 }
 0x572   :  { %2064 = vmatprep.subr.mxu0 %v6457_v35  ;;  %9026 = vst [vmem:[#allocation91_spill] sm:$0xff] %v6512_v39 }
 0x573   :  { %v6494_v6 = vpop.f32.mrf.mxu0  ;;  %2065 = vmatpush1.msra.mxu0 %v6453_v41 }
 0x574   :  { %2066 = vmatprep.subr.mxu0 %v6451_v0 }
 0x575   :  { %v6498_v22 = vpop.f32.mrf.mxu0  ;;  %2067 = vmatpush1.msra.mxu0 %v6447_v14  ;;  %v6522_v14 = vpop.f32.mrf.mxu1 }
 0x576   :  { %2068 = vmatprep.subr.mxu0 %v6445_v43  ;;  %9027 = vst [vmem:[#allocation90_spill] sm:$0xff] %v6522_v14 }
 0x577   :  { %v6504_v51 = vpop.f32.mrf.mxu0  ;;  %2069 = vmatpush1.msra.mxu0 %v6441_v59  ;;  %v6532_v43 = vpop.f32.mrf.mxu1 }
 0x578   :  { %2070 = vmatprep.subr.mxu0 %v6439_v38  ;;  %9028 = vst [vmem:[#allocation93_spill] sm:$0xff] %v6532_v43 }
 0x579   :  { %v6508_v44 = vpop.f32.mrf.mxu0  ;;  %2071 = vmatpush1.msra.mxu0 %v6435_v15 }
 0x57a   :  { %2072 = vmatprep.subr.mxu0 %v6433_v3 }
 0x57b   :  { %v6514_v41 = vpop.f32.mrf.mxu0  ;;  %2073 = vmatpush1.msra.mxu0 %v6429_v10  ;;  %v6542_v10 = vpop.f32.mrf.mxu1 }
 0x57c   :  { %2074 = vmatprep.subr.mxu0 %v6427_v42  ;;  %9029 = vst [vmem:[#allocation92_spill] sm:$0xff] %v6542_v10 }
 0x57d   :  { %v6518_v35 = vpop.f32.mrf.mxu0  ;;  %2075 = vmatpush1.msra.mxu0 %v6423_v36  ;;  %v6552_v42 = vpop.f32.mrf.mxu1 }
 0x57e   :  { %2076 = vmatprep.subr.mxu0 %v6421_v45  ;;  %9030 = vst [vmem:[#allocation95_spill] sm:$0xff] %v6552_v42 }
 0x57f   :  { %v6524_v0 = vpop.f32.mrf.mxu0  ;;  %2077 = vmatpush1.msra.mxu0 %v6417_v40 }
 0x580   :  { %2078 = vmatprep.subr.mxu0 %v6415_v25 }
 0x581   :  { %v6528_v59 = vpop.f32.mrf.mxu0  ;;  %2079 = vmatpush1.msra.mxu0 %v6411_v60  ;;  %v6559_v60 = vpop.f32.mrf.mxu1 }
 0x582   :  { %2080 = vmatprep.subr.mxu0 %v6409_v20  ;;  %9032 = vst [vmem:[#allocation97_spill] sm:$0xff] %v6559_v60 }
 0x583   :  { %v6534_v15 = vpop.f32.mrf.mxu0  ;;  %2081 = vmatpush1.msra.mxu0 %v6405_v4  ;;  %v6565_v20 = vpop.f32.mrf.mxu1 }
 0x584   :  { %2082 = vmatprep.subr.mxu0 %v6403_v57  ;;  %9035 = vst [vmem:[#allocation98_spill] sm:$0xff] %v6565_v20 }
 0x585   :  { %v6538_v38 = vpop.f32.mrf.mxu0  ;;  %2083 = vmatpush1.msra.mxu0 %v6399_v1 }
 0x586   :  { %2084 = vmatprep.subr.mxu0 %v6397_v18 }
 0x587   :  { %v6544_v3 = vpop.f32.mrf.mxu0  ;;  %2085 = vmatpush1.msra.mxu0 %v6393_v52 }
 0x588   :  { %2086 = vmatprep.subr.mxu0 %v6391_v37 }
 0x589   :  { %v6548_v36 = vpop.f32.mrf.mxu0  ;;  %2087 = vmatpush1.msra.mxu0 %v6387_v61 }
 0x58a   :  { %2088 = vmatprep.subr.mxu0 %v6384_v26  ;;  %v6571_v26 = vpop.f32.mrf.mxu1 }
 0x58b   :  { %v6554_v40 = vpop.f32.mrf.mxu0  ;;  %2089 = vmatpush1.msra.mxu0 %v6380_v12  ;;  %9038 = vst [vmem:[#allocation103_spill] sm:$0xff] %v6571_v26 }
 0x58c   :  { %v6577_v61 = vpop.f32.mrf.mxu1 }
 0x58d   :  { %v6557_v45 = vpop.f32.mrf.mxu0  ;;  %9041 = vst [vmem:[#allocation105_spill] sm:$0xff] %v6577_v61 }
 0x58e   :  { %9031 = vst [vmem:[#allocation94_spill] sm:$0xff] %v6557_v45  ;;  %v6583_v23 = vpop.f32.mrf.mxu1 }
 0x58f   :  { %v6561_v25 = vpop.f32.mrf.mxu0  ;;  %9044 = vst [vmem:[#allocation108_spill] sm:$0xff] %v6583_v23 }
 0x590   :  { %9033 = vst [vmem:[#allocation96_spill] sm:$0xff] %v6561_v25  ;;  %v6589_v39 = vpop.f32.mrf.mxu1 }
 0x591   :  { %v6563_v4 = vpop.f32.mrf.mxu0 }
 0x592   :  { %9034 = vst [vmem:[#allocation99_spill] sm:$0xff] %v6563_v4  ;;  %v6595_v10 = vpop.f32.mrf.mxu1 }
 0x593   :  { %v6567_v1 = vpop.f32.mrf.mxu0 }
 0x594   :  { %9036 = vst [vmem:[#allocation101_spill] sm:$0xff] %v6567_v1  ;;  %v6601_v20 = vpop.f32.mrf.mxu1 }
 0x595   :  { %v6569_v57 = vpop.f32.mrf.mxu0 }
 0x596   :  { %9037 = vst [vmem:[#allocation100_spill] sm:$0xff] %v6569_v57  ;;  %v6608_v61 = vpop.f32.mrf.mxu1 }
 0x597   :  { %v6573_v52 = vpop.f32.mrf.mxu0 }
 0x598   :  { %9039 = vst [vmem:[#allocation102_spill] sm:$0xff] %v6573_v52  ;;  %v6614_v23 = vpop.f32.mrf.mxu1 }
 0x599   :  { %v6575_v18 = vpop.f32.mrf.mxu0 }
 0x59a   :  { %9040 = vst [vmem:[#allocation104_spill] sm:$0xff] %v6575_v18 }
 0x59b   :  { %v6579_v37 = vpop.f32.mrf.mxu0 }
 0x59c   :  { %9042 = vst [vmem:[#allocation106_spill] sm:$0xff] %v6579_v37 }
 0x59d   :  { %v6581_v12 = vpop.f32.mrf.mxu0 }
 0x59e   :  { %9043 = vst [vmem:[#allocation107_spill] sm:$0xff] %v6581_v12 }
 0x59f   :  { %v6585_v63 = vpop.f32.mrf.mxu0 }
 0x5a0   :  { %9045 = vst [vmem:[#allocation109_spill] sm:$0xff] %v6585_v63 }
 0x5a1   :  { %v6587_v30 = vpop.f32.mrf.mxu0 }
 0x5a2   :  { %9046 = vst [vmem:[#allocation110_spill] sm:$0xff] %v6587_v30 }
 0x5a3   :  { %v6591_v14 = vpop.f32.mrf.mxu0 }
 0x5a4   :  { %9047 = vst [vmem:[#allocation111_spill] sm:$0xff] %v6591_v14 }
 0x5a5   :  { %v6593_v43 = vpop.f32.mrf.mxu0 }
 0x5a6   :  { %9048 = vst [vmem:[#allocation112_spill] sm:$0xff] %v6593_v43 }
 0x5a7   :  { %v6597_v42 = vpop.f32.mrf.mxu0 }
 0x5a8   :  { %9049 = vst [vmem:[#allocation113_spill] sm:$0xff] %v6597_v42 }
 0x5a9   :  { %v6599_v60 = vpop.f32.mrf.mxu0 }
 0x5aa   :  { %9050 = vst [vmem:[#allocation114_spill] sm:$0xff] %v6599_v60 }
 0x5ab   :  { %v6603_v26 = vpop.f32.mrf.mxu0 }
 0x5ac   :  { %9051 = vst [vmem:[#allocation115_spill] sm:$0xff] %v6603_v26  ;;  %2090 = vmatprep.subr.mxu0 %v6603_v26 }
 0x5ad   :  { %2091 = vmatpush2.msra.mxu0 %v6599_v60  ;;  %v6620_v60 = vpop.f32.mrf.mxu1 }
 0x5ae   :  { %2092 = vmatprep.subr.mxu0 %v6597_v42 }
 0x5af   :  { %2093 = vmatpush2.msra.mxu0 %v6593_v43  ;;  %v6626_v26 = vpop.f32.mrf.mxu1 }
 0x5b0   :  { %2094 = vmatprep.subr.mxu0 %v6591_v14 }
 0x5b1   :  { %2095 = vmatpush2.msra.mxu0 %v6587_v30  ;;  %v6632_v43 = vpop.f32.mrf.mxu1 }
 0x5b2   :  { %2096 = vmatprep.subr.mxu0 %v6585_v63 }
 0x5b3   :  { %2097 = vmatpush2.msra.mxu0 %v6581_v12  ;;  %v6638_v42 = vpop.f32.mrf.mxu1 }
 0x5b4   :  { %2098 = vmatprep.subr.mxu0 %v6579_v37 }
 0x5b5   :  { %2099 = vmatpush2.msra.mxu0 %v6575_v18  ;;  %v6644_v30 = vpop.f32.mrf.mxu1 }
 0x5b6   :  { %2100 = vmatprep.subr.mxu0 %v6573_v52  ;;  %v9053_v52 = vld [vmem:[#allocation48_spill] sm:$0xff] }
 0x5b7   :  { %2101 = vmatpush2.msra.mxu0 %v6569_v57  ;;  %v6650_v14 = vpop.f32.mrf.mxu1  ;;  %v9052_v57 = vld [vmem:[#allocation51_spill] sm:$0xff] }
 0x5b8   :  { %2102 = vmatprep.subr.mxu0 %v6567_v1  ;;  %v9054_v1 = vld [vmem:[#allocation46_spill] sm:$0xff] }
 0x5b9   :  { %2103 = vmatpush2.msra.mxu0 %v6563_v4  ;;  %v6658_v12 = vpop.f32.mrf.mxu1 }
 0x5ba   :  { %2104 = vmatprep.subr.mxu0 %v6561_v25 }
 0x5bb   :  { %2105 = vmatpush2.msra.mxu0 %v6557_v45  ;;  %v6666_v63 = vpop.f32.mrf.mxu1  ;;  %v9055_v45 = vld [vmem:[#allocation44_spill] sm:$0xff] }
 0x5bc   :  { %2106 = vmatprep.subr.mxu0 %v6554_v40 }
 0x5bd   :  { %2107 = vmatpush2.msra.mxu0 %v6548_v36  ;;  %v6674_v18 = vpop.f32.mrf.mxu1 }
 0x5be   :  { %2108 = vmatprep.subr.mxu0 %v6544_v3 }
 0x5bf   :  { %2109 = vmatpush2.msra.mxu0 %v6538_v38  ;;  %v6682_v37 = vpop.f32.mrf.mxu1 }
 0x5c0   :  { %2110 = vmatprep.subr.mxu0 %v6534_v15 }
 0x5c1   :  { %2111 = vmatpush2.msra.mxu0 %v6528_v59  ;;  %v6690_v4 = vpop.f32.mrf.mxu1 }
 0x5c2   :  { %2112 = vmatprep.subr.mxu0 %v6524_v0 }
 0x5c3   :  { %2113 = vmatpush2.msra.mxu0 %v6518_v35  ;;  %v6698_v25 = vpop.f32.mrf.mxu1 }
 0x5c4   :  { %2114 = vmatprep.subr.mxu0 %v6514_v41 }
 0x5c5   :  { %2115 = vmatpush2.msra.mxu0 %v6508_v44 }
 0x5c6   :  { %2116 = vmatprep.subr.mxu0 %v6504_v51 }
 0x5c7   :  { %2117 = vmatpush2.msra.mxu0 %v6498_v22 }
 0x5c8   :  { %2118 = vmatprep.subr.mxu0 %v6494_v6 }
 0x5c9   :  { %2119 = vmatpush2.msra.mxu0 %v6488_v34 }
 0x5ca   :  { %2120 = vmatprep.subr.mxu0 %v6484_v46 }
 0x5cb   :  { %2121 = vmatpush2.msra.mxu0 %v6478_v27 }
 0x5cc   :  { %2123 = vmatmul.mubr.f32.vlgmr.msra.gmra.mxu0 %v6344_v31  ;;  %2700 = vmatprep.subr.mxu0 %v6473_v24 }
 0x5cd   :  { %2128 = vmatprep.mubr.f32.mxu0 %v6354_v28  ;;  %2701 = vmatpush1.msra.mxu0 %v6467_v13 }
 0x5ce   :  { %2702 = vmatprep.subr.mxu0 %v6461_v56 }
 0x5cf   :  { %2703 = vmatpush1.msra.mxu0 %v6455_v17 }
 0x5d0   :  { %2129 = vmatmul.mubr.f32.gmra.mxu0 %v6352_v55  ;;  %2704 = vmatprep.subr.mxu0 %v6449_v11 }
 0x5d1   :  { %2134 = vmatprep.mubr.f32.mxu0 %v6358_v47  ;;  %2705 = vmatpush1.msra.mxu0 %v6443_v5 }
 0x5d2   :  { %2706 = vmatprep.subr.mxu0 %v6437_v58 }
 0x5d3   :  { %2707 = vmatpush1.msra.mxu0 %v6431_v2 }
 0x5d4   :  { %2135 = vmatmul.mubr.f32.gmra.mxu0 %v6356_v9  ;;  %2708 = vmatprep.subr.mxu0 %v6425_v53 }
 0x5d5   :  { %2140 = vmatprep.mubr.f32.mxu0 %v6362_v49  ;;  %2709 = vmatpush1.msra.mxu0 %v6419_v32 }
 0x5d6   :  { %2710 = vmatprep.subr.mxu0 %v6413_v29 }
 0x5d7   :  { %2711 = vmatpush1.msra.mxu0 %v6407_v48 }
 0x5d8   :  { %2141 = vmatmul.mubr.f32.gmra.mxu0 %v6360_v19  ;;  %2712 = vmatprep.subr.mxu0 %v6401_v62 }
 0x5d9   :  { %2146 = vmatprep.mubr.f32.mxu0 %v6366_v16  ;;  %2713 = vmatpush1.msra.mxu0 %v6395_v33 }
 0x5da   :  { %2714 = vmatprep.subr.mxu0 %v6389_v50 }
 0x5db   :  { %2715 = vmatpush1.msra.mxu0 %v6382_v21 }
 0x5dc   :  { %2147 = vmatmul.mubr.f32.gmra.mxu0 %v6364_v54  ;;  %2716 = vmatprep.subr.mxu0 %v6378_v8 }
 0x5dd   :  { %2152 = vmatprep.mubr.f32.mxu0 %v6370_v7  ;;  %2717 = vmatpush1.msra.mxu0 %v9052_v57 }
 0x5de   :  { %2718 = vmatprep.subr.mxu0 %v9053_v52 }
 0x5df   :  { %2719 = vmatpush1.msra.mxu0 %v9054_v1 }
 0x5e0   :  { %2153 = vmatmul.mubr.f32.gmra.mxu0 %v9055_v45  ;;  %2720 = vmatprep.subr.mxu0 %v6370_v7  ;;  %v6706_v7 = vpop.f32.mrf.mxu1 }
 0x5e1   :  { %2158 = vmatprep.mubr.f32.mxu0 %v9053_v52  ;;  %2721 = vmatpush1.msra.mxu0 %v9055_v45  ;;  %v9067_v52 = vld [vmem:[#allocation89_spill] sm:$0xff] }
 0x5e2   :  { %2722 = vmatprep.subr.mxu0 %v6366_v16  ;;  %v9063_v16 = vld [vmem:[#allocation92_spill] sm:$0xff] }
 0x5e3   :  { %2723 = vmatpush1.msra.mxu0 %v6364_v54  ;;  %v9056_v54 = vld [vmem:[#allocation42_spill] sm:$0xff] }
 0x5e4   :  { %2159 = vmatmul.mubr.f32.gmra.mxu0 %v9054_v1  ;;  %2724 = vmatprep.subr.mxu0 %v6362_v49  ;;  %v6714_v49 = vpop.f32.mrf.mxu1  ;;  %v9069_v1 = vld [vmem:[#allocation86_spill] sm:$0xff] }
 0x5e5   :  { %2164 = vmatprep.mubr.f32.mxu0 %v6378_v8  ;;  %2725 = vmatpush1.msra.mxu0 %v6360_v19  ;;  %v9062_v19 = vld [vmem:[#allocation95_spill] sm:$0xff]  ;;  %v9064_v8 = vld [vmem:[#allocation93_spill] sm:$0xff] }
 0x5e6   :  { %2726 = vmatprep.subr.mxu0 %v6358_v47  ;;  %v9061_v47 = vld [vmem:[#allocation97_spill] sm:$0xff] }
 0x5e7   :  { %2727 = vmatpush1.msra.mxu0 %v6356_v9  ;;  %v9060_v9 = vld [vmem:[#allocation98_spill] sm:$0xff] }
 0x5e8   :  { %2165 = vmatmul.mubr.f32.gmra.mxu0 %v9052_v57  ;;  %2728 = vmatprep.subr.mxu0 %v6354_v28  ;;  %v9059_v28 = vld [vmem:[#allocation103_spill] sm:$0xff] }
 0x5e9   :  { %2170 = vmatprep.mubr.f32.mxu0 %v6389_v50  ;;  %2729 = vmatpush1.msra.mxu0 %v6352_v55  ;;  %v9058_v55 = vld [vmem:[#allocation105_spill] sm:$0xff]  ;;  %v9066_v50 = vld [vmem:[#allocation91_spill] sm:$0xff] }
 0x5ea   :  { %2730 = vmatprep.subr.mxu0 %v9056_v54 }
 0x5eb   :  { %2731 = vmatpush1.msra.mxu0 %v6344_v31  ;;  %v9057_v31 = vld [vmem:[#allocation108_spill] sm:$0xff] }
 0x5ec   :  { %2171 = vmatmul.mubr.f32.gmra.mxu0 %v6382_v21  ;;  %2732 = vmatprep.subr.mxu0 %v6714_v49  ;;  %v9065_v21 = vld [vmem:[#allocation90_spill] sm:$0xff] }
 0x5ed   :  { %2176 = vmatprep.mubr.f32.mxu0 %v6401_v62  ;;  %2733 = vmatpush2.msra.mxu0 %v6706_v7 }
 0x5ee   :  { %2734 = vmatprep.subr.mxu0 %v6698_v25 }
 0x5ef   :  { %2735 = vmatpush2.msra.mxu0 %v6690_v4 }
 0x5f0   :  { %2177 = vmatmul.mubr.f32.gmra.mxu0 %v6395_v33  ;;  %2736 = vmatprep.subr.mxu0 %v6682_v37  ;;  %v9068_v33 = vld [vmem:[#allocation88_spill] sm:$0xff] }
 0x5f1   :  { %2182 = vmatprep.mubr.f32.mxu0 %v6413_v29  ;;  %2737 = vmatpush2.msra.mxu0 %v6674_v18 }
 0x5f2   :  { %2738 = vmatprep.subr.mxu0 %v6666_v63 }
 0x5f3   :  { %2739 = vmatpush2.msra.mxu0 %v6658_v12 }
 0x5f4   :  { %2183 = vmatmul.mubr.f32.gmra.mxu0 %v6407_v48  ;;  %2740 = vmatprep.subr.mxu0 %v6650_v14 }
 0x5f5   :  { %2188 = vmatprep.mubr.f32.mxu0 %v6425_v53  ;;  %2741 = vmatpush2.msra.mxu0 %v6644_v30 }
 0x5f6   :  { %2742 = vmatprep.subr.mxu0 %v6638_v42 }
 0x5f7   :  { %2743 = vmatpush2.msra.mxu0 %v6632_v43 }
 0x5f8   :  { %2189 = vmatmul.mubr.f32.gmra.mxu0 %v6419_v32  ;;  %2744 = vmatprep.subr.mxu0 %v6626_v26 }
 0x5f9   :  { %2194 = vmatprep.mubr.f32.mxu0 %v6437_v58  ;;  %2745 = vmatpush2.msra.mxu0 %v6620_v60  ;;  %v9073_v58 = vld [vmem:[#allocation31_spill] sm:$0xff] }
 0x5fa   :  { %2746 = vmatprep.subr.mxu0 %v6614_v23 }
 0x5fb   :  { %2747 = vmatpush2.msra.mxu0 %v6608_v61 }
 0x5fc   :  { %2195 = vmatmul.mubr.f32.gmra.mxu0 %v6431_v2  ;;  %2748 = vmatprep.subr.mxu0 %v6601_v20 }
 0x5fd   :  { %2200 = vmatprep.mubr.f32.mxu0 %v6449_v11  ;;  %2749 = vmatpush2.msra.mxu0 %v6595_v10 }
 0x5fe   :  { %2750 = vmatprep.subr.mxu0 %v6589_v39 }
 0x5ff   :  { %2751 = vmatpush2.msra.mxu0 %v9057_v31 }
 0x600   :  { %2201 = vmatmul.mubr.f32.gmra.mxu0 %v6443_v5  ;;  %2752 = vmatprep.subr.mxu0 %v9058_v55 }
 0x601   :  { %2206 = vmatprep.mubr.f32.mxu0 %v6461_v56  ;;  %2753 = vmatpush2.msra.mxu0 %v9059_v28 }
 0x602   :  { %2754 = vmatprep.subr.mxu0 %v9060_v9 }
 0x603   :  { %2755 = vmatpush2.msra.mxu0 %v9061_v47 }
 0x604   :  { %2207 = vmatmul.mubr.f32.gmra.mxu0 %v6455_v17  ;;  %2756 = vmatprep.subr.mxu0 %v9062_v19 }
 0x605   :  { %2212 = vmatprep.mubr.f32.mxu0 %v6473_v24  ;;  %2757 = vmatpush2.msra.mxu0 %v9063_v16 }
 0x606   :  { %2758 = vmatprep.subr.mxu0 %v9064_v8 }
 0x607   :  { %2759 = vmatpush2.msra.mxu0 %v9065_v21 }
 0x608   :  { %2213 = vmatmul.mubr.f32.gmra.mxu0 %v6467_v13  ;;  %2760 = vmatprep.subr.mxu0 %v9066_v50  ;;  %v9070_v13 = vld [vmem:[#allocation34_spill] sm:$0xff] }
 0x609   :  { %2218 = vmatprep.mubr.f32.mxu0 %v9067_v52  ;;  %2761 = vmatpush2.msra.mxu0 %v9068_v33 }
 0x60a   :  { %2762 = vmatprep.subr.mxu0 %v9067_v52 }
 0x60b   :  { %2763 = vmatpush2.msra.mxu0 %v9069_v1 }
 0x60c   :  { %2219 = vmatmul.mubr.f32.gmra.mxu0 %v9069_v1 }
 0x60d   :  { %2224 = vmatprep.mubr.f32.mxu0 %v9066_v50 }
 0x610   :  { %2225 = vmatmul.mubr.f32.gmra.mxu0 %v9068_v33 }
 0x611   :  { %2230 = vmatprep.mubr.f32.mxu0 %v9064_v8 }
 0x614   :  { %2231 = vmatmul.mubr.f32.gmra.mxu0 %v9065_v21  ;;  %v9076_v21 = vld [vmem:[#allocation28_spill] sm:$0xff] }
 0x615   :  { %2236 = vmatprep.mubr.f32.mxu0 %v9062_v19 }
 0x618   :  { %2237 = vmatmul.mubr.f32.gmra.mxu0 %v9063_v16 }
 0x619   :  { %2242 = vmatprep.mubr.f32.mxu0 %v9060_v9 }
 0x61c   :  { %2243 = vmatmul.mubr.f32.gmra.mxu0 %v9061_v47 }
 0x61d   :  { %2248 = vmatprep.mubr.f32.mxu0 %v9058_v55  ;;  %v9075_v55 = vld [vmem:[#allocation29_spill] sm:$0xff] }
 0x620   :  { %2249 = vmatmul.mubr.f32.gmra.mxu0 %v9059_v28 }
 0x621   :  { %2254 = vmatprep.mubr.f32.mxu0 %v6589_v39  ;;  %v9074_v39 = vld [vmem:[#allocation30_spill] sm:$0xff] }
 0x624   :  { %2255 = vmatmul.mubr.f32.gmra.mxu0 %v9057_v31 }
 0x625   :  { %2260 = vmatprep.mubr.f32.mxu0 %v6601_v20 }
 0x628   :  { %2261 = vmatmul.mubr.f32.gmra.mxu0 %v6595_v10 }
 0x629   :  { %2266 = vmatprep.mubr.f32.mxu0 %v6614_v23 }
 0x62c   :  { %2267 = vmatmul.mubr.f32.gmra.mxu0 %v6608_v61 }
 0x62d   :  { %2272 = vmatprep.mubr.f32.mxu0 %v6626_v26 }
 0x630   :  { %2273 = vmatmul.mubr.f32.gmra.mxu0 %v6620_v60 }
 0x631   :  { %2278 = vmatprep.mubr.f32.mxu0 %v6638_v42 }
 0x634   :  { %2279 = vmatmul.mubr.f32.gmra.mxu0 %v6632_v43 }
 0x635   :  { %2284 = vmatprep.mubr.f32.mxu0 %v6650_v14 }
 0x638   :  { %2285 = vmatmul.mubr.f32.gmra.mxu0 %v6644_v30 }
 0x639   :  { %2290 = vmatprep.mubr.f32.mxu0 %v6666_v63 }
 0x63c   :  { %2291 = vmatmul.mubr.f32.gmra.mxu0 %v6658_v12 }
 0x63d   :  { %2296 = vmatprep.mubr.f32.mxu0 %v6682_v37  ;;  %v9071_v37 = vld [vmem:[#allocation33_spill] sm:$0xff] }
 0x640   :  { %2297 = vmatmul.mubr.f32.gmra.mxu0 %v6674_v18 }
 0x641   :  { %2302 = vmatprep.mubr.f32.mxu0 %v6698_v25  ;;  %v9072_v25 = vld [vmem:[#allocation32_spill] sm:$0xff] }
 0x644   :  { %2303 = vmatmul.mubr.f32.gmra.mxu0 %v6690_v4 }
 0x645   :  { %2308 = vmatprep.mubr.f32.mxu0 %v6714_v49 }
 0x648   :  { %2309 = vmatmul.mubr.f32.gmra.mxu0 %v6706_v7 }
 0x68c   :  { %v2124_v24 = vpop.f32.mrf.mxu0 }
 0x68d   :  { %v2315_v23 = vsub.f32 %v9070_v13, %v2124_v24 }
 0x68e   :  { %v2126_v30 = vpop.f32.mrf.mxu0 }
 0x68f   :  { %v2316_v61 = vsub.f32 0.0, %v2126_v30  ;;  %v6799_v12 = vmul.f32 0.5, %v2315_v23  ;;  %v9077_v30 = vld [vmem:[#allocation27_spill] sm:$0xff] }
 0x690   :  { %v2130_v62 = vpop.f32.mrf.mxu0 }
 0x691   :  { %v6797_v57 = vmul.f32 0.5, %v2316_v61  ;;  %v2317_v18 = vsub.f32 %v9071_v37, %v2130_v62 }
 0x692   :  { %v2132_v48 = vpop.f32.mrf.mxu0 }
 0x693   :  { %v2318_v20 = vsub.f32 0.0, %v2132_v48  ;;  %2764 = vmatprep.mubr.f32.mxu0 %v6797_v57  ;;  %v6806_v29 = vmul.f32 0.5, %v2317_v18 }
 0x694   :  { %v2136_v4 = vpop.f32.mrf.mxu0  ;;  %2765 = vmatmul.mubr.f32.vlgmr.msra.gmra.mxu0 %v6799_v12 }
 0x695   :  { %v6804_v60 = vmul.f32 0.5, %v2318_v20  ;;  %v2319_v32 = vsub.f32 %v9072_v25, %v2136_v4  ;;  %v9086_v25 = vld [vmem:[#allocation57_spill] sm:$0xff] }
 0x696   :  { %v2138_v45 = vpop.f32.mrf.mxu0 }
 0x697   :  { %v2320_v53 = vsub.f32 0.0, %v2138_v45  ;;  %2770 = vmatprep.mubr.f32.mxu0 %v6804_v60  ;;  %v6813_v2 = vmul.f32 0.5, %v2319_v32  ;;  %v9078_v32 = vld [vmem:[#allocation26_spill] sm:$0xff] }
 0x698   :  { %v2142_v42 = vpop.f32.mrf.mxu0  ;;  %2771 = vmatmul.mubr.f32.gmra.mxu0 %v6806_v29 }
 0x699   :  { %v6811_v10 = vmul.f32 0.5, %v2320_v53  ;;  %v2321_v5 = vsub.f32 %v9073_v58, %v2142_v42 }
 0x69a   :  { %v2144_v43 = vpop.f32.mrf.mxu0 }
 0x69b   :  { %v2322_v14 = vsub.f32 0.0, %v2144_v43  ;;  %2776 = vmatprep.mubr.f32.mxu0 %v6811_v10  ;;  %v6820_v56 = vmul.f32 0.5, %v2321_v5 }
 0x69c   :  { %v2148_v11 = vpop.f32.mrf.mxu0  ;;  %2777 = vmatmul.mubr.f32.gmra.mxu0 %v6813_v2 }
 0x69d   :  { %v6818_v17 = vmul.f32 0.5, %v2322_v14  ;;  %v2323_v63 = vsub.f32 %v9074_v39, %v2148_v11  ;;  %v9079_v11 = vld [vmem:[#allocation25_spill] sm:$0xff] }
 0x69e   :  { %v2150_v26 = vpop.f32.mrf.mxu0 }
 0x69f   :  { %v2324_v7 = vsub.f32 0.0, %v2150_v26  ;;  %2782 = vmatprep.mubr.f32.mxu0 %v6818_v17  ;;  %v6827_v31 = vmul.f32 0.5, %v2323_v63 }
 0x6a0   :  { %v2154_v54 = vpop.f32.mrf.mxu0  ;;  %2783 = vmatmul.mubr.f32.gmra.mxu0 %v6820_v56 }
 0x6a1   :  { %v6825_v49 = vmul.f32 0.5, %v2324_v7  ;;  %v2325_v28 = vsub.f32 %v9075_v55, %v2154_v54 }
 0x6a2   :  { %v2156_v9 = vpop.f32.mrf.mxu0 }
 0x6a3   :  { %v2326_v47 = vsub.f32 0.0, %v2156_v9  ;;  %2788 = vmatprep.mubr.f32.mxu0 %v6825_v49  ;;  %v6834_v8 = vmul.f32 0.5, %v2325_v28 }
 0x6a4   :  { %v2160_v19 = vpop.f32.mrf.mxu0  ;;  %2789 = vmatmul.mubr.f32.gmra.mxu0 %v6827_v31 }
 0x6a5   :  { %v6832_v16 = vmul.f32 0.5, %v2326_v47  ;;  %v2327_v50 = vsub.f32 %v9076_v21, %v2160_v19  ;;  %v9080_v47 = vld [vmem:[#allocation23_spill] sm:$0xff] }
 0x6a6   :  { %v2162_v52 = vpop.f32.mrf.mxu0 }
 0x6a7   :  { %v2328_v33 = vsub.f32 0.0, %v2162_v52  ;;  %2794 = vmatprep.mubr.f32.mxu0 %v6832_v16  ;;  %v6841_v23 = vmul.f32 0.5, %v2327_v50 }
 0x6a8   :  { %v2166_v1 = vpop.f32.mrf.mxu0  ;;  %2795 = vmatmul.mubr.f32.gmra.mxu0 %v6834_v8 }
 0x6a9   :  { %v6839_v24 = vmul.f32 0.5, %v2328_v33  ;;  %v2329_v61 = vsub.f32 %v9077_v30, %v2166_v1 }
 0x6aa   :  { %v2168_v62 = vpop.f32.mrf.mxu0 }
 0x6ab   :  { %v2330_v18 = vsub.f32 0.0, %v2168_v62  ;;  %2800 = vmatprep.mubr.f32.mxu0 %v6839_v24  ;;  %v6848_v4 = vmul.f32 0.5, %v2329_v61  ;;  %v9081_v62 = vld [vmem:[#allocation22_spill] sm:$0xff] }
 0x6ac   :  { %v2172_v48 = vpop.f32.mrf.mxu0  ;;  %2801 = vmatmul.mubr.f32.gmra.mxu0 %v6841_v23 }
 0x6ad   :  { %v6846_v20 = vmul.f32 0.5, %v2330_v18  ;;  %v2331_v45 = vsub.f32 %v9078_v32, %v2172_v48 }
 0x6ae   :  { %v2174_v53 = vpop.f32.mrf.mxu0 }
 0x6af   :  { %v2332_v42 = vsub.f32 0.0, %v2174_v53  ;;  %2806 = vmatprep.mubr.f32.mxu0 %v6846_v20  ;;  %v6855_v14 = vmul.f32 0.5, %v2331_v45 }
 0x6b0   :  { %v2178_v5 = vpop.f32.mrf.mxu0  ;;  %2807 = vmatmul.mubr.f32.gmra.mxu0 %v6848_v4 }
 0x6b1   :  { %v6853_v43 = vmul.f32 0.5, %v2332_v42  ;;  %v2333_v63 = vsub.f32 %v9079_v11, %v2178_v5 }
 0x6b2   :  { %v2180_v26 = vpop.f32.mrf.mxu0 }
 0x6b3   :  { %v2334_v7 = vsub.f32 0.0, %v2180_v26  ;;  %2812 = vmatprep.mubr.f32.mxu0 %v6853_v43  ;;  %v6862_v9 = vmul.f32 0.5, %v2333_v63  ;;  %v9082_v63 = vld [vmem:[#allocation21_spill] sm:$0xff] }
 0x6b4   :  { %v2184_v54 = vpop.f32.mrf.mxu0  ;;  %2813 = vmatmul.mubr.f32.gmra.mxu0 %v6855_v14 }
 0x6b5   :  { %v6860_v28 = vmul.f32 0.5, %v2334_v7  ;;  %v2335_v19 = vsub.f32 %v9080_v47, %v2184_v54  ;;  %v9083_v47 = vld [vmem:[#allocation20_spill] sm:$0xff] }
 0x6b6   :  { %v2186_v50 = vpop.f32.mrf.mxu0 }
 0x6b7   :  { %v2336_v52 = vsub.f32 0.0, %v2186_v50  ;;  %2818 = vmatprep.mubr.f32.mxu0 %v6860_v28  ;;  %v6869_v61 = vmul.f32 0.5, %v2335_v19 }
 0x6b8   :  { %v2190_v33 = vpop.f32.mrf.mxu0  ;;  %2819 = vmatmul.mubr.f32.gmra.mxu0 %v6862_v9 }
 0x6b9   :  { %v6867_v1 = vmul.f32 0.5, %v2336_v52  ;;  %v2337_v18 = vsub.f32 %v9081_v62, %v2190_v33 }
 0x6ba   :  { %v2192_v48 = vpop.f32.mrf.mxu0 }
 0x6bb   :  { %v2338_v45 = vsub.f32 0.0, %v2192_v48  ;;  %2824 = vmatprep.mubr.f32.mxu0 %v6867_v1  ;;  %v2401_v5 = vmul.f32 0.5, %v2337_v18 }
 0x6bc   :  { %v2196_v53 = vpop.f32.mrf.mxu0  ;;  %2825 = vmatmul.mubr.f32.gmra.mxu0 %v6869_v61 }
 0x6bd   :  { %v2402_v42 = vmul.f32 0.5, %v2338_v45  ;;  %v2339_v26 = vsub.f32 %v9082_v63, %v2196_v53  ;;  %v9084_v45 = vld [vmem:[#allocation19_spill] sm:$0xff] }
 0x6be   :  { %v2198_v7 = vpop.f32.mrf.mxu0 }
 0x6bf   :  { %v2340_v54 = vsub.f32 0.0, %v2198_v7  ;;  %2830 = vmatprep.mubr.f32.mxu0 %v2402_v42  ;;  %v2403_v52 = vmul.f32 0.5, %v2339_v26 }
 0x6c0   :  { %v2202_v50 = vpop.f32.mrf.mxu0  ;;  %2831 = vmatmul.mubr.f32.gmra.mxu0 %v2401_v5 }
 0x6c1   :  { %v2404_v19 = vmul.f32 0.5, %v2340_v54  ;;  %v2341_v33 = vsub.f32 %v9083_v47, %v2202_v50  ;;  %v9085_v54 = vld [vmem:[#allocation18_spill] sm:$0xff] }
 0x6c2   :  { %v2204_v62 = vpop.f32.mrf.mxu0 }
 0x6c3   :  { %v2342_v48 = vsub.f32 0.0, %v2204_v62  ;;  %2836 = vmatprep.mubr.f32.mxu0 %v2404_v19  ;;  %v2405_v30 = vmul.f32 0.5, %v2341_v33 }
 0x6c4   :  { %v2208_v11 = vpop.f32.mrf.mxu0  ;;  %2837 = vmatmul.mubr.f32.gmra.mxu0 %v2403_v52 }
 0x6c5   :  { %v2406_v32 = vmul.f32 0.5, %v2342_v48  ;;  %v2343_v18 = vsub.f32 %v9084_v45, %v2208_v11 }
 0x6c6   :  { %v2210_v21 = vpop.f32.mrf.mxu0 }
 0x6c7   :  { %v2344_v53 = vsub.f32 0.0, %v2210_v21  ;;  %2842 = vmatprep.mubr.f32.mxu0 %v2406_v32  ;;  %v2407_v55 = vmul.f32 0.5, %v2343_v18 }
 0x6c8   :  { %v2214_v7 = vpop.f32.mrf.mxu0  ;;  %2843 = vmatmul.mubr.f32.gmra.mxu0 %v2405_v30 }
 0x6c9   :  { %v2408_v63 = vmul.f32 0.5, %v2344_v53  ;;  %v2345_v26 = vsub.f32 %v9085_v54, %v2214_v7  ;;  %v9087_v54 = vld [vmem:[#allocation56_spill] sm:$0xff] }
 0x6ca   :  { %v2216_v39 = vpop.f32.mrf.mxu0 }
 0x6cb   :  { %v2346_v50 = vsub.f32 0.0, %v2216_v39  ;;  %2848 = vmatprep.mubr.f32.mxu0 %v2408_v63  ;;  %v2409_v58 = vmul.f32 0.5, %v2345_v26 }
 0x6cc   :  { %v2220_v62 = vpop.f32.mrf.mxu0  ;;  %2849 = vmatmul.mubr.f32.gmra.mxu0 %v2407_v55 }
 0x6cd   :  { %v2410_v47 = vmul.f32 0.5, %v2346_v50  ;;  %v2347_v48 = vsub.f32 0.0, %v2220_v62 }
 0x6ce   :  { %v2222_v33 = vpop.f32.mrf.mxu0 }
 0x6cf   :  { %v2348_v11 = vsub.f32 %v9086_v25, %v2222_v33  ;;  %2443 = vmatprep.subr.mxu1 %v2410_v47  ;;  %2854 = vmatprep.mubr.f32.mxu0 %v2410_v47  ;;  %v6881_v18 = vmul.f32 0.5, %v2347_v48  ;;  %v9088_v48 = vld [vmem:[#allocation54_spill] sm:$0xff] }
 0x6d0   :  { %v2226_v21 = vpop.f32.mrf.mxu0  ;;  %2444 = vmatpush1.msra.mxu1 %v2409_v58  ;;  %2855 = vmatmul.mubr.f32.gmra.mxu0 %v2409_v58 }
 0x6d1   :  { %v6879_v53 = vmul.f32 0.5, %v2348_v11  ;;  %2445 = vmatprep.subr.mxu1 %v2408_v63  ;;  %v2349_v39 = vsub.f32 0.0, %v2226_v21 }
 0x6d2   :  { %v2228_v7 = vpop.f32.mrf.mxu0  ;;  %2446 = vmatpush1.msra.mxu1 %v2407_v55 }
 0x6d3   :  { %v2350_v50 = vsub.f32 %v9087_v54, %v2228_v7  ;;  %2447 = vmatprep.subr.mxu1 %v2406_v32  ;;  %2860 = vmatprep.mubr.f32.mxu0 %v6879_v53  ;;  %v6888_v58 = vmul.f32 0.5, %v2349_v39 }
 0x6d4   :  { %v2232_v26 = vpop.f32.mrf.mxu0  ;;  %2448 = vmatpush1.msra.mxu1 %v2405_v30  ;;  %2861 = vmatmul.mubr.f32.gmra.mxu0 %v6881_v18 }
 0x6d5   :  { %v6886_v47 = vmul.f32 0.5, %v2350_v50  ;;  %2449 = vmatprep.subr.mxu1 %v2404_v19  ;;  %v2351_v63 = vsub.f32 0.0, %v2232_v26 }
 0x6d6   :  { %v2234_v62 = vpop.f32.mrf.mxu0  ;;  %2450 = vmatpush1.msra.mxu1 %v2403_v52  ;;  %v9089_v52 = vld [vmem:[#allocation52_spill] sm:$0xff] }
 0x6d7   :  { %v2352_v33 = vsub.f32 %v9088_v48, %v2234_v62  ;;  %2451 = vmatprep.subr.mxu1 %v2402_v42  ;;  %2866 = vmatprep.mubr.f32.mxu0 %v6886_v47  ;;  %v6896_v32 = vmul.f32 0.5, %v2351_v63 }
 0x6d8   :  { %v2238_v55 = vpop.f32.mrf.mxu0  ;;  %2452 = vmatpush1.msra.mxu1 %v2401_v5  ;;  %2867 = vmatmul.mubr.f32.gmra.mxu0 %v6888_v58 }
 0x6d9   :  { %v6893_v30 = vmul.f32 0.5, %v2352_v33  ;;  %2453 = vmatprep.subr.mxu1 %v6867_v1  ;;  %v2353_v19 = vsub.f32 0.0, %v2238_v55 }
 0x6da   :  { %v2240_v11 = vpop.f32.mrf.mxu0  ;;  %2454 = vmatpush1.msra.mxu1 %v6869_v61  ;;  %v9090_v61 = vld [vmem:[#allocation50_spill] sm:$0xff] }
 0x6db   :  { %v2354_v21 = vsub.f32 %v9089_v52, %v2240_v11  ;;  %2455 = vmatprep.subr.mxu1 %v6860_v28  ;;  %2872 = vmatprep.mubr.f32.mxu0 %v6893_v30  ;;  %v6907_v1 = vmul.f32 0.5, %v2353_v19 }
 0x6dc   :  { %v2244_v42 = vpop.f32.mrf.mxu0  ;;  %2456 = vmatpush1.msra.mxu1 %v6862_v9  ;;  %2873 = vmatmul.mubr.f32.gmra.mxu0 %v6896_v32 }
 0x6dd   :  { %v6904_v5 = vmul.f32 0.5, %v2354_v21  ;;  %2457 = vmatprep.subr.mxu1 %v6853_v43  ;;  %v2355_v39 = vsub.f32 0.0, %v2244_v42 }
 0x6de   :  { %v2246_v7 = vpop.f32.mrf.mxu0  ;;  %2458 = vmatpush1.msra.mxu1 %v6855_v14  ;;  %v9091_v14 = vld [vmem:[#allocation49_spill] sm:$0xff] }
 0x6df   :  { %v2356_v50 = vsub.f32 %v9090_v61, %v2246_v7  ;;  %2459 = vmatprep.subr.mxu1 %v6846_v20  ;;  %2878 = vmatprep.mubr.f32.mxu0 %v6904_v5  ;;  %v6918_v43 = vmul.f32 0.5, %v2355_v39 }
 0x6e0   :  { %v2250_v28 = vpop.f32.mrf.mxu0  ;;  %2460 = vmatpush1.msra.mxu1 %v6848_v4  ;;  %2879 = vmatmul.mubr.f32.gmra.mxu0 %v6907_v1 }
 0x6e1   :  { %v6915_v9 = vmul.f32 0.5, %v2356_v50  ;;  %2461 = vmatprep.subr.mxu1 %v6839_v24  ;;  %v2357_v26 = vsub.f32 0.0, %v2250_v28 }
 0x6e2   :  { %v2252_v63 = vpop.f32.mrf.mxu0  ;;  %2462 = vmatpush1.msra.mxu1 %v6841_v23  ;;  %v9092_v23 = vld [vmem:[#allocation47_spill] sm:$0xff] }
 0x6e3   :  { %v2358_v62 = vsub.f32 %v9091_v14, %v2252_v63  ;;  %2463 = vmatprep.subr.mxu1 %v6832_v16  ;;  %2884 = vmatprep.mubr.f32.mxu0 %v6915_v9  ;;  %v6929_v24 = vmul.f32 0.5, %v2357_v26 }
 0x6e4   :  { %v2256_v20 = vpop.f32.mrf.mxu0  ;;  %2464 = vmatpush1.msra.mxu1 %v6834_v8  ;;  %2885 = vmatmul.mubr.f32.gmra.mxu0 %v6918_v43 }
 0x6e5   :  { %v6926_v4 = vmul.f32 0.5, %v2358_v62  ;;  %2465 = vmatprep.subr.mxu1 %v6825_v49  ;;  %v2359_v33 = vsub.f32 0.0, %v2256_v20 }
 0x6e6   :  { %v2258_v55 = vpop.f32.mrf.mxu0  ;;  %2466 = vmatpush1.msra.mxu1 %v6827_v31  ;;  %v9093_v31 = vld [vmem:[#allocation45_spill] sm:$0xff] }
 0x6e7   :  { %v2360_v19 = vsub.f32 %v9092_v23, %v2258_v55  ;;  %2467 = vmatprep.subr.mxu1 %v6818_v17  ;;  %2890 = vmatprep.mubr.f32.mxu0 %v6926_v4  ;;  %v6940_v49 = vmul.f32 0.5, %v2359_v33 }
 0x6e8   :  { %v2262_v16 = vpop.f32.mrf.mxu0  ;;  %2468 = vmatpush1.msra.mxu1 %v6820_v56  ;;  %2891 = vmatmul.mubr.f32.gmra.mxu0 %v6929_v24 }
 0x6e9   :  { %v6937_v8 = vmul.f32 0.5, %v2360_v19  ;;  %2469 = vmatprep.subr.mxu1 %v6811_v10  ;;  %v2361_v11 = vsub.f32 0.0, %v2262_v16  ;;  %v9096_v16 = vld [vmem:[#allocation40_spill] sm:$0xff] }
 0x6ea   :  { %v2264_v21 = vpop.f32.mrf.mxu0  ;;  %2470 = vmatpush1.msra.mxu1 %v6813_v2  ;;  %v9094_v2 = vld [vmem:[#allocation43_spill] sm:$0xff] }
 0x6eb   :  { %v2362_v42 = vsub.f32 %v9093_v31, %v2264_v21  ;;  %2471 = vmatprep.subr.mxu1 %v6804_v60  ;;  %2896 = vmatprep.mubr.f32.mxu0 %v6937_v8  ;;  %v6951_v10 = vmul.f32 0.5, %v2361_v11 }
 0x6ec   :  { %v2268_v17 = vpop.f32.mrf.mxu0  ;;  %2472 = vmatpush1.msra.mxu1 %v6806_v29  ;;  %2897 = vmatmul.mubr.f32.gmra.mxu0 %v6940_v49 }
 0x6ed   :  { %v6948_v56 = vmul.f32 0.5, %v2362_v42  ;;  %2473 = vmatprep.subr.mxu1 %v6797_v57  ;;  %v2363_v39 = vsub.f32 0.0, %v2268_v17  ;;  %v9095_v57 = vld [vmem:[#allocation41_spill] sm:$0xff] }
 0x6ee   :  { %v2270_v7 = vpop.f32.mrf.mxu0  ;;  %2474 = vmatpush1.msra.mxu1 %v6799_v12 }
 0x6ef   :  { %v2364_v50 = vsub.f32 %v9094_v2, %v2270_v7  ;;  %2902 = vmatprep.mubr.f32.mxu0 %v6948_v56  ;;  %v6959_v28 = vmul.f32 0.5, %v2363_v39 }
 0x6f0   :  { %v2274_v60 = vpop.f32.mrf.mxu0  ;;  %2903 = vmatmul.mubr.f32.gmra.mxu0 %v6951_v10 }
 0x6f1   :  { %v6957_v29 = vmul.f32 0.5, %v2364_v50  ;;  %v2365_v26 = vsub.f32 0.0, %v2274_v60  ;;  %v9097_v50 = vld [vmem:[#allocation39_spill] sm:$0xff] }
 0x6f2   :  { %v2276_v63 = vpop.f32.mrf.mxu0 }
 0x6f3   :  { %v2366_v62 = vsub.f32 %v9095_v57, %v2276_v63  ;;  %2908 = vmatprep.mubr.f32.mxu0 %v6957_v29  ;;  %v2429_v33 = vmul.f32 0.5, %v2365_v26 }
 0x6f4   :  { %v2280_v20 = vpop.f32.mrf.mxu0  ;;  %2909 = vmatmul.mubr.f32.gmra.mxu0 %v6959_v28 }
 0x6f5   :  { %v2430_v12 = vmul.f32 0.5, %v2366_v62  ;;  %v2367_v55 = vsub.f32 0.0, %v2280_v20  ;;  %v9098_v20 = vld [vmem:[#allocation38_spill] sm:$0xff] }
 0x6f6   :  { %v2282_v19 = vpop.f32.mrf.mxu0 }
 0x6f7   :  { %v2368_v11 = vsub.f32 %v9096_v16, %v2282_v19  ;;  %2914 = vmatprep.mubr.f32.mxu0 %v2430_v12  ;;  %v2431_v17 = vmul.f32 0.5, %v2367_v55 }
 0x6f8   :  { %v2286_v21 = vpop.f32.mrf.mxu0  ;;  %2915 = vmatmul.mubr.f32.gmra.mxu0 %v2429_v33 }
 0x6f9   :  { %v2432_v42 = vmul.f32 0.5, %v2368_v11  ;;  %v2369_v39 = vsub.f32 0.0, %v2286_v21  ;;  %v9099_v21 = vld [vmem:[#allocation37_spill] sm:$0xff] }
 0x6fa   :  { %v2288_v7 = vpop.f32.mrf.mxu0 }
 0x6fb   :  { %v2370_v60 = vsub.f32 %v9097_v50, %v2288_v7  ;;  %2920 = vmatprep.mubr.f32.mxu0 %v2432_v42  ;;  %v2433_v2 = vmul.f32 0.5, %v2369_v39 }
 0x6fc   :  { %v2292_v63 = vpop.f32.mrf.mxu0  ;;  %2921 = vmatmul.mubr.f32.gmra.mxu0 %v2431_v17 }
 0x6fd   :  { %v2434_v57 = vmul.f32 0.5, %v2370_v60  ;;  %v2371_v62 = vsub.f32 0.0, %v2292_v63  ;;  %v9100_v63 = vld [vmem:[#allocation36_spill] sm:$0xff] }
 0x6fe   :  { %v2294_v26 = vpop.f32.mrf.mxu0 }
 0x6ff   :  { %v2372_v31 = vsub.f32 %v9098_v20, %v2294_v26  ;;  %2926 = vmatprep.mubr.f32.mxu0 %v2434_v57  ;;  %v2435_v23 = vmul.f32 0.5, %v2371_v62 }
 0x700   :  { %v2298_v19 = vpop.f32.mrf.mxu0  ;;  %2927 = vmatmul.mubr.f32.gmra.mxu0 %v2433_v2 }
 0x701   :  { %v2436_v16 = vmul.f32 0.5, %v2372_v31  ;;  %v2373_v11 = vsub.f32 0.0, %v2298_v19  ;;  %v9101_v19 = vld [vmem:[#allocation35_spill] sm:$0xff] }
 0x702   :  { %v2300_v55 = vpop.f32.mrf.mxu0 }
 0x703   :  { %v2374_v14 = vsub.f32 %v9099_v21, %v2300_v55  ;;  %2932 = vmatprep.mubr.f32.mxu0 %v2436_v16  ;;  %v2437_v61 = vmul.f32 0.5, %v2373_v11 }
 0x704   :  { %v2304_v7 = vpop.f32.mrf.mxu0  ;;  %2933 = vmatmul.mubr.f32.gmra.mxu0 %v2435_v23 }
 0x705   :  { %v2438_v50 = vmul.f32 0.5, %v2374_v14  ;;  %v2375_v60 = vsub.f32 0.0, %v2304_v7  ;;  %v9116_v14 = vld [vmem:[#allocation70_spill] sm:$0xff] }
 0x706   :  { %v2306_v39 = vpop.f32.mrf.mxu0 }
 0x707   :  { %v2376_v52 = vsub.f32 %v9100_v63, %v2306_v39  ;;  %2938 = vmatprep.mubr.f32.mxu0 %v2438_v50  ;;  %v2439_v48 = vmul.f32 0.5, %v2375_v60 }
 0x708   :  { %v2310_v26 = vpop.f32.mrf.mxu0  ;;  %2939 = vmatmul.mubr.f32.gmra.mxu0 %v2437_v61 }
 0x709   :  { %v2440_v20 = vmul.f32 0.5, %v2376_v52  ;;  %v2377_v31 = vsub.f32 0.0, %v2310_v26  ;;  %v9104_v52 = vld [vmem:[#allocation55_spill] sm:$0xff] }
 0x70a   :  { %v2312_v62 = vpop.f32.mrf.mxu0 }
 0x70b   :  { %v2378_v54 = vsub.f32 %v9101_v19, %v2312_v62  ;;  %2944 = vmatprep.mubr.f32.mxu0 %v2440_v20  ;;  %v2441_v21 = vmul.f32 0.5, %v2377_v31 }
 0x70c   :  { %2945 = vmatmul.mubr.f32.gmra.mxu0 %v2439_v48 }
 0x70d   :  { %v2442_v55 = vmul.f32 0.5, %v2378_v54  ;;  %v9102_v54 = vld [vmem:[#allocation53_spill] sm:$0xff] }
 0x70f   :  { %2475 = vmatprep.subr.mxu1 %v2442_v55  ;;  %2950 = vmatprep.mubr.f32.mxu0 %v2442_v55 }
 0x710   :  { %2476 = vmatpush2.msra.mxu1 %v2441_v21  ;;  %2951 = vmatmul.mubr.f32.gmra.mxu0 %v2441_v21 }
 0x711   :  { %2477 = vmatprep.subr.mxu1 %v2440_v20  ;;  %v9149_v20 = vld [vmem:[#allocation114_spill] sm:$0xff] }
 0x712   :  { %2478 = vmatpush2.msra.mxu1 %v2439_v48  ;;  %v9103_v48 = vld [vmem:[#allocation58_spill] sm:$0xff] }
 0x713   :  { %2479 = vmatprep.subr.mxu1 %v2438_v50 }
 0x714   :  { %2480 = vmatpush2.msra.mxu1 %v2437_v61  ;;  %v9113_v61 = vld [vmem:[#allocation67_spill] sm:$0xff] }
 0x715   :  { %2481 = vmatprep.subr.mxu1 %v2436_v16  ;;  %v9130_v16 = vld [vmem:[#allocation84_spill] sm:$0xff] }
 0x716   :  { %2482 = vmatpush2.msra.mxu1 %v2435_v23  ;;  %v9119_v23 = vld [vmem:[#allocation73_spill] sm:$0xff] }
 0x717   :  { %2483 = vmatprep.subr.mxu1 %v2434_v57  ;;  %v9127_v57 = vld [vmem:[#allocation81_spill] sm:$0xff] }
 0x718   :  { %2484 = vmatpush2.msra.mxu1 %v2433_v2  ;;  %v9124_v2 = vld [vmem:[#allocation78_spill] sm:$0xff] }
 0x719   :  { %2485 = vmatprep.subr.mxu1 %v2432_v42  ;;  %v9131_v42 = vld [vmem:[#allocation87_spill] sm:$0xff] }
 0x71a   :  { %2486 = vmatpush2.msra.mxu1 %v2431_v17  ;;  %v9132_v17 = vld [vmem:[#allocation85_spill] sm:$0xff] }
 0x71b   :  { %2487 = vmatprep.subr.mxu1 %v2430_v12  ;;  %v9128_v12 = vld [vmem:[#allocation82_spill] sm:$0xff] }
 0x71c   :  { %2488 = vmatpush2.msra.mxu1 %v2429_v33  ;;  %v9129_v33 = vld [vmem:[#allocation83_spill] sm:$0xff] }
 0x71d   :  { %2489 = vmatprep.subr.mxu1 %v6957_v29  ;;  %v9125_v29 = vld [vmem:[#allocation79_spill] sm:$0xff] }
 0x71e   :  { %2490 = vmatpush2.msra.mxu1 %v6959_v28  ;;  %v9126_v28 = vld [vmem:[#allocation80_spill] sm:$0xff] }
 0x71f   :  { %2491 = vmatprep.subr.mxu1 %v6948_v56  ;;  %v9122_v56 = vld [vmem:[#allocation76_spill] sm:$0xff] }
 0x720   :  { %2492 = vmatpush2.msra.mxu1 %v6951_v10  ;;  %v9123_v10 = vld [vmem:[#allocation77_spill] sm:$0xff] }
 0x721   :  { %2493 = vmatprep.subr.mxu1 %v6937_v8  ;;  %v9120_v8 = vld [vmem:[#allocation74_spill] sm:$0xff] }
 0x722   :  { %2494 = vmatpush2.msra.mxu1 %v6940_v49  ;;  %v9121_v49 = vld [vmem:[#allocation75_spill] sm:$0xff] }
 0x723   :  { %2495 = vmatprep.subr.mxu1 %v6926_v4  ;;  %v9117_v4 = vld [vmem:[#allocation71_spill] sm:$0xff] }
 0x724   :  { %2496 = vmatpush2.msra.mxu1 %v6929_v24  ;;  %v9118_v24 = vld [vmem:[#allocation72_spill] sm:$0xff] }
 0x725   :  { %2497 = vmatprep.subr.mxu1 %v6915_v9  ;;  %v9114_v9 = vld [vmem:[#allocation68_spill] sm:$0xff] }
 0x726   :  { %2498 = vmatpush2.msra.mxu1 %v6918_v43  ;;  %v9115_v43 = vld [vmem:[#allocation69_spill] sm:$0xff] }
 0x727   :  { %2499 = vmatprep.subr.mxu1 %v6904_v5  ;;  %v9105_v5 = vld [vmem:[#allocation59_spill] sm:$0xff] }
 0x728   :  { %2500 = vmatpush2.msra.mxu1 %v6907_v1  ;;  %v9106_v1 = vld [vmem:[#allocation60_spill] sm:$0xff] }
 0x729   :  { %2501 = vmatprep.subr.mxu1 %v6893_v30  ;;  %v9107_v30 = vld [vmem:[#allocation61_spill] sm:$0xff] }
 0x72a   :  { %2502 = vmatpush2.msra.mxu1 %v6896_v32  ;;  %v9108_v32 = vld [vmem:[#allocation62_spill] sm:$0xff] }
 0x72b   :  { %2503 = vmatprep.subr.mxu1 %v6886_v47  ;;  %v9109_v47 = vld [vmem:[#allocation63_spill] sm:$0xff] }
 0x72c   :  { %2504 = vmatpush2.msra.mxu1 %v6888_v58  ;;  %v9110_v58 = vld [vmem:[#allocation64_spill] sm:$0xff] }
 0x72d   :  { %2505 = vmatprep.subr.mxu1 %v6879_v53  ;;  %v9111_v53 = vld [vmem:[#allocation65_spill] sm:$0xff] }
 0x72e   :  { %2506 = vmatpush2.msra.mxu1 %v6881_v18  ;;  %v9112_v18 = vld [vmem:[#allocation66_spill] sm:$0xff] }
 0x72f   :  { %2508 = vmatmul.mubr.f32.vlgmr.msra.gmra.mxu1 %v9102_v54 }
 0x730   :  { %2513 = vmatprep.mubr.f32.mxu1 %v9103_v48 }
 0x733   :  { %2514 = vmatmul.mubr.f32.gmra.mxu1 %v9104_v52 }
 0x734   :  { %2519 = vmatprep.mubr.f32.mxu1 %v9105_v5 }
 0x737   :  { %2520 = vmatmul.mubr.f32.gmra.mxu1 %v9106_v1 }
 0x738   :  { %2525 = vmatprep.mubr.f32.mxu1 %v9107_v30 }
 0x73b   :  { %2526 = vmatmul.mubr.f32.gmra.mxu1 %v9108_v32 }
 0x73c   :  { %2531 = vmatprep.mubr.f32.mxu1 %v9109_v47 }
 0x73f   :  { %2532 = vmatmul.mubr.f32.gmra.mxu1 %v9110_v58 }
 0x740   :  { %2537 = vmatprep.mubr.f32.mxu1 %v9111_v53 }
 0x743   :  { %2538 = vmatmul.mubr.f32.gmra.mxu1 %v9112_v18 }
 0x744   :  { %2543 = vmatprep.mubr.f32.mxu1 %v9113_v61 }
 0x747   :  { %2544 = vmatmul.mubr.f32.gmra.mxu1 %v9114_v9 }
 0x748   :  { %2549 = vmatprep.mubr.f32.mxu1 %v9115_v43 }
 0x74b   :  { %2550 = vmatmul.mubr.f32.gmra.mxu1 %v9116_v14 }
 0x74c   :  { %2555 = vmatprep.mubr.f32.mxu1 %v9117_v4 }
 0x74f   :  { %2556 = vmatmul.mubr.f32.gmra.mxu1 %v9118_v24 }
 0x750   :  { %2561 = vmatprep.mubr.f32.mxu1 %v9119_v23 }
 0x753   :  { %2562 = vmatmul.mubr.f32.gmra.mxu1 %v9120_v8 }
 0x754   :  { %2567 = vmatprep.mubr.f32.mxu1 %v9121_v49 }
 0x757   :  { %2568 = vmatmul.mubr.f32.gmra.mxu1 %v9122_v56 }
 0x758   :  { %2573 = vmatprep.mubr.f32.mxu1 %v9123_v10 }
 0x75b   :  { %2574 = vmatmul.mubr.f32.gmra.mxu1 %v9124_v2 }
 0x75c   :  { %2579 = vmatprep.mubr.f32.mxu1 %v9125_v29 }
 0x75f   :  { %2580 = vmatmul.mubr.f32.gmra.mxu1 %v9126_v28 }
 0x760   :  { %2585 = vmatprep.mubr.f32.mxu1 %v9127_v57 }
 0x763   :  { %2586 = vmatmul.mubr.f32.gmra.mxu1 %v9128_v12 }
 0x764   :  { %2591 = vmatprep.mubr.f32.mxu1 %v9129_v33 }
 0x767   :  { %2592 = vmatmul.mubr.f32.gmra.mxu1 %v9130_v16 }
 0x768   :  { %2597 = vmatprep.mubr.f32.mxu1 %v9131_v42 }
 0x76b   :  { %2598 = vmatmul.mubr.f32.gmra.mxu1 %v9132_v17 }
 0x76c   :  { %2603 = vmatprep.mubr.f32.mxu1 %v6484_v46  ;;  %v9136_v46 = vld [vmem:[#allocation99_spill] sm:$0xff] }
 0x76f   :  { %2604 = vmatmul.mubr.f32.gmra.mxu1 %v6478_v27  ;;  %v9135_v27 = vld [vmem:[#allocation101_spill] sm:$0xff] }
 0x770   :  { %2609 = vmatprep.mubr.f32.mxu1 %v6494_v6  ;;  %v9138_v6 = vld [vmem:[#allocation100_spill] sm:$0xff] }
 0x773   :  { %2610 = vmatmul.mubr.f32.gmra.mxu1 %v6488_v34  ;;  %v9137_v34 = vld [vmem:[#allocation102_spill] sm:$0xff] }
 0x774   :  { %2615 = vmatprep.mubr.f32.mxu1 %v6504_v51  ;;  %v9134_v51 = vld [vmem:[#allocation94_spill] sm:$0xff] }
 0x777   :  { %2616 = vmatmul.mubr.f32.gmra.mxu1 %v6498_v22  ;;  %v9133_v22 = vld [vmem:[#allocation96_spill] sm:$0xff] }
 0x778   :  { %2621 = vmatprep.mubr.f32.mxu1 %v6514_v41  ;;  %v7048_v41 = vpop.f32.mrf.mxu0 }
 0x77a   :  { %v7052_v50 = vpop.f32.mrf.mxu0 }
 0x77b   :  { %2622 = vmatmul.mubr.f32.gmra.mxu1 %v6508_v44  ;;  %v9147_v44 = vld [vmem:[#allocation115_spill] sm:$0xff]  ;;  %9148 = vst [vmem:[#allocation51_spill] sm:$0xff] %v7052_v50 }
 0x77c   :  { %2627 = vmatprep.mubr.f32.mxu1 %v6524_v0  ;;  %v9145_v0 = vld [vmem:[#allocation113_spill] sm:$0xff]  ;;  %v7056_v11 = vpop.f32.mrf.mxu0 }
 0x77e   :  { %v7058_v21 = vpop.f32.mrf.mxu0 }
 0x77f   :  { %2628 = vmatmul.mubr.f32.gmra.mxu1 %v6518_v35  ;;  %v9146_v35 = vld [vmem:[#allocation112_spill] sm:$0xff] }
 0x780   :  { %2633 = vmatprep.mubr.f32.mxu1 %v6534_v15  ;;  %v9139_v15 = vld [vmem:[#allocation106_spill] sm:$0xff]  ;;  %v7060_v7 = vpop.f32.mrf.mxu0 }
 0x782   :  { %v7062_v60 = vpop.f32.mrf.mxu0 }
 0x783   :  { %2634 = vmatmul.mubr.f32.gmra.mxu1 %v6528_v59  ;;  %v9144_v59 = vld [vmem:[#allocation110_spill] sm:$0xff] }
 0x784   :  { %2639 = vmatprep.mubr.f32.mxu1 %v6544_v3  ;;  %v9140_v3 = vld [vmem:[#allocation104_spill] sm:$0xff]  ;;  %v7064_v39 = vpop.f32.mrf.mxu0 }
 0x786   :  { %v7066_v26 = vpop.f32.mrf.mxu0 }
 0x787   :  { %2640 = vmatmul.mubr.f32.gmra.mxu1 %v6538_v38  ;;  %v9141_v38 = vld [vmem:[#allocation109_spill] sm:$0xff] }
 0x788   :  { %2645 = vmatprep.mubr.f32.mxu1 %v6554_v40  ;;  %v9142_v40 = vld [vmem:[#allocation107_spill] sm:$0xff]  ;;  %v7068_v31 = vpop.f32.mrf.mxu0 }
 0x78a   :  { %v7070_v62 = vpop.f32.mrf.mxu0 }
 0x78b   :  { %2646 = vmatmul.mubr.f32.gmra.mxu1 %v6548_v36  ;;  %v9143_v36 = vld [vmem:[#allocation111_spill] sm:$0xff] }
 0x78c   :  { %2651 = vmatprep.mubr.f32.mxu1 %v9133_v22  ;;  %v7072_v55 = vpop.f32.mrf.mxu0 }
 0x78d   :  { %9150 = vst [vmem:[#allocation48_spill] sm:$0xff] %v7072_v55 }
 0x78e   :  { %v7074_v54 = vpop.f32.mrf.mxu0 }
 0x78f   :  { %2652 = vmatmul.mubr.f32.gmra.mxu1 %v9134_v51 }
 0x790   :  { %2657 = vmatprep.mubr.f32.mxu1 %v9135_v27  ;;  %v7076_v48 = vpop.f32.mrf.mxu0 }
 0x791   :  { %9151 = vst [vmem:[#allocation46_spill] sm:$0xff] %v7076_v48 }
 0x792   :  { %v7078_v52 = vpop.f32.mrf.mxu0 }
 0x793   :  { %2658 = vmatmul.mubr.f32.gmra.mxu1 %v9136_v46  ;;  %9152 = vst [vmem:[#allocation44_spill] sm:$0xff] %v7078_v52 }
 0x794   :  { %2663 = vmatprep.mubr.f32.mxu1 %v9137_v34  ;;  %v7080_v5 = vpop.f32.mrf.mxu0 }
 0x795   :  { %9153 = vst [vmem:[#allocation42_spill] sm:$0xff] %v7080_v5 }
 0x796   :  { %v7082_v1 = vpop.f32.mrf.mxu0 }
 0x797   :  { %2664 = vmatmul.mubr.f32.gmra.mxu1 %v9138_v6 }
 0x798   :  { %2669 = vmatprep.mubr.f32.mxu1 %v9139_v15  ;;  %v7086_v32 = vpop.f32.mrf.mxu0 }
 0x79a   :  { %v7093_v53 = vpop.f32.mrf.mxu0 }
 0x79b   :  { %2670 = vmatmul.mubr.f32.gmra.mxu1 %v9140_v3 }
 0x79c   :  { %2675 = vmatprep.mubr.f32.mxu1 %v9141_v38  ;;  %v7099_v9 = vpop.f32.mrf.mxu0 }
 0x79e   :  { %v7105_v4 = vpop.f32.mrf.mxu0 }
 0x79f   :  { %2676 = vmatmul.mubr.f32.gmra.mxu1 %v9142_v40 }
 0x7a0   :  { %2681 = vmatprep.mubr.f32.mxu1 %v9143_v36  ;;  %v7111_v8 = vpop.f32.mrf.mxu0 }
 0x7a2   :  { %v7117_v10 = vpop.f32.mrf.mxu0 }
 0x7a3   :  { %2682 = vmatmul.mubr.f32.gmra.mxu1 %v9144_v59 }
 0x7a4   :  { %2687 = vmatprep.mubr.f32.mxu1 %v9145_v0  ;;  %v7123_v28 = vpop.f32.mrf.mxu0 }
 0x7a6   :  { %v7129_v33 = vpop.f32.mrf.mxu0 }
 0x7a7   :  { %2688 = vmatmul.mubr.f32.gmra.mxu1 %v9146_v35 }
 0x7a8   :  { %2693 = vmatprep.mubr.f32.mxu1 %v9147_v44  ;;  %v7135_v17 = vpop.f32.mrf.mxu0 }
 0x7aa   :  { %v7141_v27 = vpop.f32.mrf.mxu0 }
 0x7ab   :  { %2694 = vmatmul.mubr.f32.gmra.mxu1 %v9149_v20 }
 0x7ac   :  { %3021 = vmatprep.mubr.f32.mxu1 %v7052_v50  ;;  %v7147_v6 = vpop.f32.mrf.mxu0 }
 0x7ae   :  { %v7153_v38 = vpop.f32.mrf.mxu0 }
 0x7b0   :  { %v7159_v59 = vpop.f32.mrf.mxu0 }
 0x7b2   :  { %v7165_v44 = vpop.f32.mrf.mxu0 }
 0x7b4   :  { %v7171_v63 = vpop.f32.mrf.mxu0 }
 0x7b6   :  { %v7177_v37 = vpop.f32.mrf.mxu0 }
 0x7b8   :  { %v7186_v55 = vpop.f32.mrf.mxu0 }
 0x7b9   :  { %9185 = vst [vmem:[#allocation74_spill] sm:$0xff] %v7186_v55 }
 0x7ef   :  { %v7084_v30 = vpop.f32.mrf.mxu1 }
 0x7f0   :  { %9154 = vst [vmem:[#allocation108_spill] sm:$0xff] %v7084_v30 }
 0x7f1   :  { %v7088_v47 = vpop.f32.mrf.mxu1 }
 0x7f2   :  { %3406 = vmatprep.mubr.f32.mxu0 %v7088_v47 }
 0x7f3   :  { %v7091_v58 = vpop.f32.mrf.mxu1 }
 0x7f4   :  { %9155 = vst [vmem:[#allocation105_spill] sm:$0xff] %v7091_v58 }
 0x7f5   :  { %v7095_v18 = vpop.f32.mrf.mxu1 }
 0x7f6   :  { %9156 = vst [vmem:[#allocation103_spill] sm:$0xff] %v7095_v18 }
 0x7f7   :  { %v7097_v61 = vpop.f32.mrf.mxu1 }
 0x7f8   :  { %9157 = vst [vmem:[#allocation98_spill] sm:$0xff] %v7097_v61 }
 0x7f9   :  { %v7101_v43 = vpop.f32.mrf.mxu1 }
 0x7fa   :  { %9158 = vst [vmem:[#allocation97_spill] sm:$0xff] %v7101_v43 }
 0x7fb   :  { %v7103_v14 = vpop.f32.mrf.mxu1 }
 0x7fc   :  { %9159 = vst [vmem:[#allocation95_spill] sm:$0xff] %v7103_v14 }
 0x7fd   :  { %v7107_v24 = vpop.f32.mrf.mxu1 }
 0x7fe   :  { %9160 = vst [vmem:[#allocation92_spill] sm:$0xff] %v7107_v24 }
 0x7ff   :  { %v7109_v23 = vpop.f32.mrf.mxu1 }
 0x800   :  { %9161 = vst [vmem:[#allocation93_spill] sm:$0xff] %v7109_v23 }
 0x801   :  { %v7113_v49 = vpop.f32.mrf.mxu1 }
 0x802   :  { %9162 = vst [vmem:[#allocation90_spill] sm:$0xff] %v7113_v49 }
 0x803   :  { %v7115_v56 = vpop.f32.mrf.mxu1 }
 0x804   :  { %9163 = vst [vmem:[#allocation91_spill] sm:$0xff] %v7115_v56 }
 0x805   :  { %v7119_v2 = vpop.f32.mrf.mxu1 }
 0x806   :  { %9164 = vst [vmem:[#allocation89_spill] sm:$0xff] %v7119_v2 }
 0x807   :  { %v7121_v29 = vpop.f32.mrf.mxu1 }
 0x808   :  { %9165 = vst [vmem:[#allocation88_spill] sm:$0xff] %v7121_v29 }
 0x809   :  { %v7125_v57 = vpop.f32.mrf.mxu1 }
 0x80a   :  { %9166 = vst [vmem:[#allocation86_spill] sm:$0xff] %v7125_v57 }
 0x80b   :  { %v7127_v12 = vpop.f32.mrf.mxu1 }
 0x80c   :  { %9167 = vst [vmem:[#allocation53_spill] sm:$0xff] %v7127_v12 }
 0x80d   :  { %v7131_v16 = vpop.f32.mrf.mxu1 }
 0x80e   :  { %9168 = vst [vmem:[#allocation58_spill] sm:$0xff] %v7131_v16 }
 0x80f   :  { %v7133_v42 = vpop.f32.mrf.mxu1 }
 0x810   :  { %9169 = vst [vmem:[#allocation55_spill] sm:$0xff] %v7133_v42 }
 0x811   :  { %v7137_v22 = vpop.f32.mrf.mxu1 }
 0x812   :  { %9170 = vst [vmem:[#allocation59_spill] sm:$0xff] %v7137_v22 }
 0x813   :  { %v7139_v51 = vpop.f32.mrf.mxu1 }
 0x814   :  { %9171 = vst [vmem:[#allocation60_spill] sm:$0xff] %v7139_v51 }
 0x815   :  { %v7143_v46 = vpop.f32.mrf.mxu1 }
 0x816   :  { %9172 = vst [vmem:[#allocation61_spill] sm:$0xff] %v7143_v46 }
 0x817   :  { %v7145_v34 = vpop.f32.mrf.mxu1 }
 0x818   :  { %9173 = vst [vmem:[#allocation62_spill] sm:$0xff] %v7145_v34 }
 0x819   :  { %v7149_v15 = vpop.f32.mrf.mxu1 }
 0x81a   :  { %9174 = vst [vmem:[#allocation63_spill] sm:$0xff] %v7149_v15 }
 0x81b   :  { %v7151_v3 = vpop.f32.mrf.mxu1 }
 0x81c   :  { %9175 = vst [vmem:[#allocation64_spill] sm:$0xff] %v7151_v3 }
 0x81d   :  { %v7155_v40 = vpop.f32.mrf.mxu1 }
 0x81e   :  { %9176 = vst [vmem:[#allocation65_spill] sm:$0xff] %v7155_v40 }
 0x81f   :  { %v7157_v36 = vpop.f32.mrf.mxu1 }
 0x820   :  { %9177 = vst [vmem:[#allocation66_spill] sm:$0xff] %v7157_v36 }
 0x821   :  { %v7161_v0 = vpop.f32.mrf.mxu1 }
 0x822   :  { %9178 = vst [vmem:[#allocation67_spill] sm:$0xff] %v7161_v0 }
 0x823   :  { %v7163_v35 = vpop.f32.mrf.mxu1 }
 0x824   :  { %9179 = vst [vmem:[#allocation68_spill] sm:$0xff] %v7163_v35 }
 0x825   :  { %v7167_v20 = vpop.f32.mrf.mxu1 }
 0x826   :  { %9180 = vst [vmem:[#allocation69_spill] sm:$0xff] %v7167_v20 }
 0x827   :  { %v7169_v19 = vpop.f32.mrf.mxu1 }
 0x828   :  { %9181 = vst [vmem:[#allocation70_spill] sm:$0xff] %v7169_v19 }
 0x829   :  { %v7173_v25 = vpop.f32.mrf.mxu1 }
 0x82a   :  { %9182 = vst [vmem:[#allocation71_spill] sm:$0xff] %v7173_v25 }
 0x82b   :  { %v7175_v45 = vpop.f32.mrf.mxu1 }
 0x82c   :  { %9183 = vst [vmem:[#allocation72_spill] sm:$0xff] %v7175_v45 }
 0x82d   :  { %v7179_v13 = vpop.f32.mrf.mxu1 }
 0x82e   :  { %9184 = vst [vmem:[#allocation73_spill] sm:$0xff] %v7179_v13  ;;  %2957 = vmatprep.subr.mxu1 %v7179_v13  ;;  %v7196_v13 = vpop.f32.mrf.mxu0 }
 0x82f   :  { %v7182_v50 = vpop.f32.mrf.mxu1  ;;  %2958 = vmatpush1.msra.mxu1 %v7175_v45  ;;  %9186 = vst [vmem:[#allocation75_spill] sm:$0xff] %v7196_v13 }
 0x830   :  { %2959 = vmatprep.subr.mxu1 %v7173_v25 }
 0x831   :  { %v7188_v48 = vpop.f32.mrf.mxu1  ;;  %2960 = vmatpush1.msra.mxu1 %v7169_v19  ;;  %v7206_v19 = vpop.f32.mrf.mxu0 }
 0x832   :  { %2961 = vmatprep.subr.mxu1 %v7167_v20  ;;  %9187 = vst [vmem:[#allocation76_spill] sm:$0xff] %v7206_v19 }
 0x833   :  { %v7192_v52 = vpop.f32.mrf.mxu1  ;;  %2962 = vmatpush1.msra.mxu1 %v7163_v35  ;;  %v7216_v20 = vpop.f32.mrf.mxu0 }
 0x834   :  { %2963 = vmatprep.subr.mxu1 %v7161_v0  ;;  %9188 = vst [vmem:[#allocation77_spill] sm:$0xff] %v7216_v20 }
 0x835   :  { %v7198_v5 = vpop.f32.mrf.mxu1  ;;  %2964 = vmatpush1.msra.mxu1 %v7157_v36 }
 0x836   :  { %2965 = vmatprep.subr.mxu1 %v7155_v40 }
 0x837   :  { %v7202_v45 = vpop.f32.mrf.mxu1  ;;  %2966 = vmatpush1.msra.mxu1 %v7151_v3  ;;  %v7226_v3 = vpop.f32.mrf.mxu0 }
 0x838   :  { %2967 = vmatprep.subr.mxu1 %v7149_v15  ;;  %9189 = vst [vmem:[#allocation78_spill] sm:$0xff] %v7226_v3 }
 0x839   :  { %v7208_v25 = vpop.f32.mrf.mxu1  ;;  %2968 = vmatpush1.msra.mxu1 %v7145_v34  ;;  %v7236_v15 = vpop.f32.mrf.mxu0 }
 0x83a   :  { %2969 = vmatprep.subr.mxu1 %v7143_v46  ;;  %9190 = vst [vmem:[#allocation79_spill] sm:$0xff] %v7236_v15 }
 0x83b   :  { %v7212_v35 = vpop.f32.mrf.mxu1  ;;  %2970 = vmatpush1.msra.mxu1 %v7139_v51 }
 0x83c   :  { %2971 = vmatprep.subr.mxu1 %v7137_v22 }
 0x83d   :  { %v7218_v36 = vpop.f32.mrf.mxu1  ;;  %2972 = vmatpush1.msra.mxu1 %v7133_v42  ;;  %v7246_v42 = vpop.f32.mrf.mxu0 }
 0x83e   :  { %2973 = vmatprep.subr.mxu1 %v7131_v16  ;;  %9191 = vst [vmem:[#allocation80_spill] sm:$0xff] %v7246_v42 }
 0x83f   :  { %v7222_v0 = vpop.f32.mrf.mxu1  ;;  %2974 = vmatpush1.msra.mxu1 %v7127_v12  ;;  %v7256_v16 = vpop.f32.mrf.mxu0 }
 0x840   :  { %2975 = vmatprep.subr.mxu1 %v7125_v57  ;;  %9192 = vst [vmem:[#allocation81_spill] sm:$0xff] %v7256_v16 }
 0x841   :  { %v7228_v40 = vpop.f32.mrf.mxu1  ;;  %2976 = vmatpush1.msra.mxu1 %v7121_v29 }
 0x842   :  { %2977 = vmatprep.subr.mxu1 %v7119_v2 }
 0x843   :  { %v7232_v34 = vpop.f32.mrf.mxu1  ;;  %2978 = vmatpush1.msra.mxu1 %v7115_v56  ;;  %v7263_v56 = vpop.f32.mrf.mxu0 }
 0x844   :  { %2979 = vmatprep.subr.mxu1 %v7113_v49  ;;  %9194 = vst [vmem:[#allocation83_spill] sm:$0xff] %v7263_v56 }
 0x845   :  { %v7238_v51 = vpop.f32.mrf.mxu1  ;;  %2980 = vmatpush1.msra.mxu1 %v7109_v23  ;;  %v7269_v49 = vpop.f32.mrf.mxu0 }
 0x846   :  { %2981 = vmatprep.subr.mxu1 %v7107_v24  ;;  %9197 = vst [vmem:[#allocation85_spill] sm:$0xff] %v7269_v49 }
 0x847   :  { %v7242_v46 = vpop.f32.mrf.mxu1  ;;  %2982 = vmatpush1.msra.mxu1 %v7103_v14 }
 0x848   :  { %2983 = vmatprep.subr.mxu1 %v7101_v43 }
 0x849   :  { %v7248_v22 = vpop.f32.mrf.mxu1  ;;  %2984 = vmatpush1.msra.mxu1 %v7097_v61 }
 0x84a   :  { %2985 = vmatprep.subr.mxu1 %v7095_v18 }
 0x84b   :  { %v7252_v12 = vpop.f32.mrf.mxu1  ;;  %2986 = vmatpush1.msra.mxu1 %v7091_v58 }
 0x84c   :  { %2987 = vmatprep.subr.mxu1 %v7088_v47  ;;  %v7275_v47 = vpop.f32.mrf.mxu0 }
 0x84d   :  { %v7258_v29 = vpop.f32.mrf.mxu1  ;;  %2988 = vmatpush1.msra.mxu1 %v7084_v30  ;;  %9200 = vst [vmem:[#allocation101_spill] sm:$0xff] %v7275_v47 }
 0x84e   :  { %v7281_v58 = vpop.f32.mrf.mxu0 }
 0x84f   :  { %v7261_v57 = vpop.f32.mrf.mxu1  ;;  %9203 = vst [vmem:[#allocation100_spill] sm:$0xff] %v7281_v58 }
 0x850   :  { %9193 = vst [vmem:[#allocation82_spill] sm:$0xff] %v7261_v57  ;;  %v7287_v55 = vpop.f32.mrf.mxu0 }
 0x851   :  { %v7265_v2 = vpop.f32.mrf.mxu1  ;;  %9206 = vst [vmem:[#allocation109_spill] sm:$0xff] %v7287_v55 }
 0x852   :  { %9195 = vst [vmem:[#allocation84_spill] sm:$0xff] %v7265_v2  ;;  %v7293_v20 = vpop.f32.mrf.mxu0 }
 0x853   :  { %v7267_v23 = vpop.f32.mrf.mxu1 }
 0x854   :  { %9196 = vst [vmem:[#allocation87_spill] sm:$0xff] %v7267_v23  ;;  %v7299_v42 = vpop.f32.mrf.mxu0 }
 0x855   :  { %v7271_v14 = vpop.f32.mrf.mxu1 }
 0x856   :  { %9198 = vst [vmem:[#allocation96_spill] sm:$0xff] %v7271_v14  ;;  %v7305_v49 = vpop.f32.mrf.mxu0 }
 0x857   :  { %v7273_v24 = vpop.f32.mrf.mxu1 }
 0x858   :  { %9199 = vst [vmem:[#allocation94_spill] sm:$0xff] %v7273_v24  ;;  %v7312_v58 = vpop.f32.mrf.mxu0 }
 0x859   :  { %v7277_v61 = vpop.f32.mrf.mxu1 }
 0x85a   :  { %9201 = vst [vmem:[#allocation99_spill] sm:$0xff] %v7277_v61  ;;  %v7318_v55 = vpop.f32.mrf.mxu0 }
 0x85b   :  { %v7279_v43 = vpop.f32.mrf.mxu1 }
 0x85c   :  { %9202 = vst [vmem:[#allocation102_spill] sm:$0xff] %v7279_v43 }
 0x85d   :  { %v7283_v18 = vpop.f32.mrf.mxu1 }
 0x85e   :  { %9204 = vst [vmem:[#allocation106_spill] sm:$0xff] %v7283_v18 }
 0x85f   :  { %v7285_v30 = vpop.f32.mrf.mxu1 }
 0x860   :  { %9205 = vst [vmem:[#allocation104_spill] sm:$0xff] %v7285_v30 }
 0x861   :  { %v7289_v19 = vpop.f32.mrf.mxu1 }
 0x862   :  { %9207 = vst [vmem:[#allocation107_spill] sm:$0xff] %v7289_v19 }
 0x863   :  { %v7291_v13 = vpop.f32.mrf.mxu1 }
 0x864   :  { %9208 = vst [vmem:[#allocation111_spill] sm:$0xff] %v7291_v13 }
 0x865   :  { %v7295_v3 = vpop.f32.mrf.mxu1 }
 0x866   :  { %9209 = vst [vmem:[#allocation110_spill] sm:$0xff] %v7295_v3 }
 0x867   :  { %v7297_v15 = vpop.f32.mrf.mxu1 }
 0x868   :  { %9210 = vst [vmem:[#allocation113_spill] sm:$0xff] %v7297_v15 }
 0x869   :  { %v7301_v16 = vpop.f32.mrf.mxu1 }
 0x86a   :  { %9211 = vst [vmem:[#allocation112_spill] sm:$0xff] %v7301_v16 }
 0x86b   :  { %v7303_v56 = vpop.f32.mrf.mxu1 }
 0x86c   :  { %9212 = vst [vmem:[#allocation115_spill] sm:$0xff] %v7303_v56 }
 0x86d   :  { %v7307_v47 = vpop.f32.mrf.mxu1 }
 0x86e   :  { %9213 = vst [vmem:[#allocation114_spill] sm:$0xff] %v7307_v47  ;;  %2989 = vmatprep.subr.mxu1 %v7307_v47 }
 0x86f   :  { %2990 = vmatpush2.msra.mxu1 %v7303_v56  ;;  %v7324_v56 = vpop.f32.mrf.mxu0 }
 0x870   :  { %2991 = vmatprep.subr.mxu1 %v7301_v16 }
 0x871   :  { %2992 = vmatpush2.msra.mxu1 %v7297_v15  ;;  %v7330_v47 = vpop.f32.mrf.mxu0 }
 0x872   :  { %2993 = vmatprep.subr.mxu1 %v7295_v3 }
 0x873   :  { %2994 = vmatpush2.msra.mxu1 %v7291_v13  ;;  %v7336_v15 = vpop.f32.mrf.mxu0 }
 0x874   :  { %2995 = vmatprep.subr.mxu1 %v7289_v19 }
 0x875   :  { %2996 = vmatpush2.msra.mxu1 %v7285_v30  ;;  %v7342_v16 = vpop.f32.mrf.mxu0 }
 0x876   :  { %2997 = vmatprep.subr.mxu1 %v7283_v18 }
 0x877   :  { %2998 = vmatpush2.msra.mxu1 %v7279_v43  ;;  %v7348_v13 = vpop.f32.mrf.mxu0 }
 0x878   :  { %2999 = vmatprep.subr.mxu1 %v7277_v61  ;;  %v9215_v61 = vld [vmem:[#allocation44_spill] sm:$0xff] }
 0x879   :  { %3000 = vmatpush2.msra.mxu1 %v7273_v24  ;;  %v7354_v3 = vpop.f32.mrf.mxu0  ;;  %v9214_v24 = vld [vmem:[#allocation42_spill] sm:$0xff] }
 0x87a   :  { %3001 = vmatprep.subr.mxu1 %v7271_v14  ;;  %v9216_v14 = vld [vmem:[#allocation46_spill] sm:$0xff] }
 0x87b   :  { %3002 = vmatpush2.msra.mxu1 %v7267_v23  ;;  %v7362_v30 = vpop.f32.mrf.mxu0 }
 0x87c   :  { %3003 = vmatprep.subr.mxu1 %v7265_v2 }
 0x87d   :  { %3004 = vmatpush2.msra.mxu1 %v7261_v57  ;;  %v7370_v19 = vpop.f32.mrf.mxu0  ;;  %v9217_v57 = vld [vmem:[#allocation48_spill] sm:$0xff] }
 0x87e   :  { %3005 = vmatprep.subr.mxu1 %v7258_v29 }
 0x87f   :  { %3006 = vmatpush2.msra.mxu1 %v7252_v12  ;;  %v7378_v43 = vpop.f32.mrf.mxu0 }
 0x880   :  { %3007 = vmatprep.subr.mxu1 %v7248_v22 }
 0x881   :  { %3008 = vmatpush2.msra.mxu1 %v7242_v46  ;;  %v7386_v18 = vpop.f32.mrf.mxu0 }
 0x882   :  { %3009 = vmatprep.subr.mxu1 %v7238_v51 }
 0x883   :  { %3010 = vmatpush2.msra.mxu1 %v7232_v34  ;;  %v7394_v23 = vpop.f32.mrf.mxu0 }
 0x884   :  { %3011 = vmatprep.subr.mxu1 %v7228_v40 }
 0x885   :  { %3012 = vmatpush2.msra.mxu1 %v7222_v0  ;;  %v7402_v2 = vpop.f32.mrf.mxu0 }
 0x886   :  { %3013 = vmatprep.subr.mxu1 %v7218_v36 }
 0x887   :  { %3014 = vmatpush2.msra.mxu1 %v7212_v35 }
 0x888   :  { %3015 = vmatprep.subr.mxu1 %v7208_v25 }
 0x889   :  { %3016 = vmatpush2.msra.mxu1 %v7202_v45 }
 0x88a   :  { %3017 = vmatprep.subr.mxu1 %v7198_v5 }
 0x88b   :  { %3018 = vmatpush2.msra.mxu1 %v7192_v52 }
 0x88c   :  { %3019 = vmatprep.subr.mxu1 %v7188_v48 }
 0x88d   :  { %3020 = vmatpush2.msra.mxu1 %v7182_v50 }
 0x88e   :  { %3022 = vmatmul.mubr.f32.vlgmr.msra.gmra.mxu1 %v7048_v41  ;;  %3599 = vmatprep.subr.mxu1 %v7177_v37 }
 0x88f   :  { %3027 = vmatprep.mubr.f32.mxu1 %v7058_v21  ;;  %3600 = vmatpush1.msra.mxu1 %v7171_v63 }
 0x890   :  { %3601 = vmatprep.subr.mxu1 %v7165_v44 }
 0x891   :  { %3602 = vmatpush1.msra.mxu1 %v7159_v59 }
 0x892   :  { %3028 = vmatmul.mubr.f32.gmra.mxu1 %v7056_v11  ;;  %3603 = vmatprep.subr.mxu1 %v7153_v38 }
 0x893   :  { %3033 = vmatprep.mubr.f32.mxu1 %v7062_v60  ;;  %3604 = vmatpush1.msra.mxu1 %v7147_v6 }
 0x894   :  { %3605 = vmatprep.subr.mxu1 %v7141_v27 }
 0x895   :  { %3606 = vmatpush1.msra.mxu1 %v7135_v17 }
 0x896   :  { %3034 = vmatmul.mubr.f32.gmra.mxu1 %v7060_v7  ;;  %3607 = vmatprep.subr.mxu1 %v7129_v33 }
 0x897   :  { %3039 = vmatprep.mubr.f32.mxu1 %v7066_v26  ;;  %3608 = vmatpush1.msra.mxu1 %v7123_v28 }
 0x898   :  { %3609 = vmatprep.subr.mxu1 %v7117_v10 }
 0x899   :  { %3610 = vmatpush1.msra.mxu1 %v7111_v8 }
 0x89a   :  { %3040 = vmatmul.mubr.f32.gmra.mxu1 %v7064_v39  ;;  %3611 = vmatprep.subr.mxu1 %v7105_v4 }
 0x89b   :  { %3045 = vmatprep.mubr.f32.mxu1 %v7070_v62  ;;  %3612 = vmatpush1.msra.mxu1 %v7099_v9 }
 0x89c   :  { %3613 = vmatprep.subr.mxu1 %v7093_v53 }
 0x89d   :  { %3614 = vmatpush1.msra.mxu1 %v7086_v32 }
 0x89e   :  { %3046 = vmatmul.mubr.f32.gmra.mxu1 %v7068_v31  ;;  %3615 = vmatprep.subr.mxu1 %v7082_v1 }
 0x89f   :  { %3051 = vmatprep.mubr.f32.mxu1 %v7074_v54  ;;  %3616 = vmatpush1.msra.mxu1 %v9214_v24 }
 0x8a0   :  { %3617 = vmatprep.subr.mxu1 %v9215_v61 }
 0x8a1   :  { %3618 = vmatpush1.msra.mxu1 %v9216_v14 }
 0x8a2   :  { %3052 = vmatmul.mubr.f32.gmra.mxu1 %v9217_v57  ;;  %3619 = vmatprep.subr.mxu1 %v7074_v54  ;;  %v7410_v54 = vpop.f32.mrf.mxu0 }
 0x8a3   :  { %3057 = vmatprep.mubr.f32.mxu1 %v9215_v61  ;;  %3620 = vmatpush1.msra.mxu1 %v9217_v57  ;;  %v9229_v61 = vld [vmem:[#allocation75_spill] sm:$0xff] }
 0x8a4   :  { %3621 = vmatprep.subr.mxu1 %v7070_v62  ;;  %v9225_v62 = vld [vmem:[#allocation80_spill] sm:$0xff] }
 0x8a5   :  { %3622 = vmatpush1.msra.mxu1 %v7068_v31  ;;  %v9218_v31 = vld [vmem:[#allocation51_spill] sm:$0xff] }
 0x8a6   :  { %3058 = vmatmul.mubr.f32.gmra.mxu1 %v9216_v14  ;;  %3623 = vmatprep.subr.mxu1 %v7066_v26  ;;  %v7418_v26 = vpop.f32.mrf.mxu0  ;;  %v9231_v14 = vld [vmem:[#allocation74_spill] sm:$0xff] }
 0x8a7   :  { %3063 = vmatprep.mubr.f32.mxu1 %v7082_v1  ;;  %3624 = vmatpush1.msra.mxu1 %v7064_v39  ;;  %v9224_v39 = vld [vmem:[#allocation81_spill] sm:$0xff]  ;;  %v9226_v1 = vld [vmem:[#allocation79_spill] sm:$0xff] }
 0x8a8   :  { %3625 = vmatprep.subr.mxu1 %v7062_v60  ;;  %v9223_v60 = vld [vmem:[#allocation83_spill] sm:$0xff] }
 0x8a9   :  { %3626 = vmatpush1.msra.mxu1 %v7060_v7  ;;  %v9222_v7 = vld [vmem:[#allocation85_spill] sm:$0xff] }
 0x8aa   :  { %3064 = vmatmul.mubr.f32.gmra.mxu1 %v9214_v24  ;;  %3627 = vmatprep.subr.mxu1 %v7058_v21  ;;  %v9221_v21 = vld [vmem:[#allocation101_spill] sm:$0xff] }
 0x8ab   :  { %3069 = vmatprep.mubr.f32.mxu1 %v7093_v53  ;;  %3628 = vmatpush1.msra.mxu1 %v7056_v11  ;;  %v9220_v11 = vld [vmem:[#allocation100_spill] sm:$0xff]  ;;  %v9228_v53 = vld [vmem:[#allocation77_spill] sm:$0xff] }
 0x8ac   :  { %3629 = vmatprep.subr.mxu1 %v9218_v31 }
 0x8ad   :  { %3630 = vmatpush1.msra.mxu1 %v7048_v41  ;;  %v9219_v41 = vld [vmem:[#allocation109_spill] sm:$0xff] }
 0x8ae   :  { %3070 = vmatmul.mubr.f32.gmra.mxu1 %v7086_v32  ;;  %3631 = vmatprep.subr.mxu1 %v7418_v26  ;;  %v9227_v32 = vld [vmem:[#allocation78_spill] sm:$0xff] }
 0x8af   :  { %3075 = vmatprep.mubr.f32.mxu1 %v7105_v4  ;;  %3632 = vmatpush2.msra.mxu1 %v7410_v54 }
 0x8b0   :  { %3633 = vmatprep.subr.mxu1 %v7402_v2 }
 0x8b1   :  { %3634 = vmatpush2.msra.mxu1 %v7394_v23 }
 0x8b2   :  { %3076 = vmatmul.mubr.f32.gmra.mxu1 %v7099_v9  ;;  %3635 = vmatprep.subr.mxu1 %v7386_v18  ;;  %v9230_v9 = vld [vmem:[#allocation76_spill] sm:$0xff] }
 0x8b3   :  { %3081 = vmatprep.mubr.f32.mxu1 %v7117_v10  ;;  %3636 = vmatpush2.msra.mxu1 %v7378_v43  ;;  %v9234_v10 = vld [vmem:[#allocation32_spill] sm:$0xff] }
 0x8b4   :  { %3637 = vmatprep.subr.mxu1 %v7370_v19 }
 0x8b5   :  { %3638 = vmatpush2.msra.mxu1 %v7362_v30 }
 0x8b6   :  { %3082 = vmatmul.mubr.f32.gmra.mxu1 %v7111_v8  ;;  %3639 = vmatprep.subr.mxu1 %v7354_v3 }
 0x8b7   :  { %3087 = vmatprep.mubr.f32.mxu1 %v7129_v33  ;;  %3640 = vmatpush2.msra.mxu1 %v7348_v13 }
 0x8b8   :  { %3641 = vmatprep.subr.mxu1 %v7342_v16 }
 0x8b9   :  { %3642 = vmatpush2.msra.mxu1 %v7336_v15 }
 0x8ba   :  { %3088 = vmatmul.mubr.f32.gmra.mxu1 %v7123_v28  ;;  %3643 = vmatprep.subr.mxu1 %v7330_v47 }
 0x8bb   :  { %3093 = vmatprep.mubr.f32.mxu1 %v7141_v27  ;;  %3644 = vmatpush2.msra.mxu1 %v7324_v56 }
 0x8bc   :  { %3645 = vmatprep.subr.mxu1 %v7318_v55 }
 0x8bd   :  { %3646 = vmatpush2.msra.mxu1 %v7312_v58 }
 0x8be   :  { %3094 = vmatmul.mubr.f32.gmra.mxu1 %v7135_v17  ;;  %3647 = vmatprep.subr.mxu1 %v7305_v49  ;;  %v9235_v17 = vld [vmem:[#allocation31_spill] sm:$0xff] }
 0x8bf   :  { %3099 = vmatprep.mubr.f32.mxu1 %v7153_v38  ;;  %3648 = vmatpush2.msra.mxu1 %v7299_v42 }
 0x8c0   :  { %3649 = vmatprep.subr.mxu1 %v7293_v20 }
 0x8c1   :  { %3650 = vmatpush2.msra.mxu1 %v9219_v41 }
 0x8c2   :  { %3100 = vmatmul.mubr.f32.gmra.mxu1 %v7147_v6  ;;  %3651 = vmatprep.subr.mxu1 %v9220_v11 }
 0x8c3   :  { %3105 = vmatprep.mubr.f32.mxu1 %v7165_v44  ;;  %3652 = vmatpush2.msra.mxu1 %v9221_v21  ;;  %v9236_v44 = vld [vmem:[#allocation30_spill] sm:$0xff] }
 0x8c4   :  { %3653 = vmatprep.subr.mxu1 %v9222_v7 }
 0x8c5   :  { %3654 = vmatpush2.msra.mxu1 %v9223_v60 }
 0x8c6   :  { %3106 = vmatmul.mubr.f32.gmra.mxu1 %v7159_v59  ;;  %3655 = vmatprep.subr.mxu1 %v9224_v39 }
 0x8c7   :  { %3111 = vmatprep.mubr.f32.mxu1 %v7177_v37  ;;  %3656 = vmatpush2.msra.mxu1 %v9225_v62 }
 0x8c8   :  { %3657 = vmatprep.subr.mxu1 %v9226_v1 }
 0x8c9   :  { %3658 = vmatpush2.msra.mxu1 %v9227_v32 }
 0x8ca   :  { %3112 = vmatmul.mubr.f32.gmra.mxu1 %v7171_v63  ;;  %3659 = vmatprep.subr.mxu1 %v9228_v53  ;;  %v9232_v63 = vld [vmem:[#allocation34_spill] sm:$0xff] }
 0x8cb   :  { %3117 = vmatprep.mubr.f32.mxu1 %v9229_v61  ;;  %3660 = vmatpush2.msra.mxu1 %v9230_v9 }
 0x8cc   :  { %3661 = vmatprep.subr.mxu1 %v9229_v61 }
 0x8cd   :  { %3662 = vmatpush2.msra.mxu1 %v9231_v14 }
 0x8ce   :  { %3118 = vmatmul.mubr.f32.gmra.mxu1 %v9231_v14 }
 0x8cf   :  { %3123 = vmatprep.mubr.f32.mxu1 %v9228_v53 }
 0x8d2   :  { %3124 = vmatmul.mubr.f32.gmra.mxu1 %v9230_v9 }
 0x8d3   :  { %3129 = vmatprep.mubr.f32.mxu1 %v9226_v1 }
 0x8d6   :  { %3130 = vmatmul.mubr.f32.gmra.mxu1 %v9227_v32  ;;  %v9238_v32 = vld [vmem:[#allocation28_spill] sm:$0xff] }
 0x8d7   :  { %3135 = vmatprep.mubr.f32.mxu1 %v9224_v39 }
 0x8da   :  { %3136 = vmatmul.mubr.f32.gmra.mxu1 %v9225_v62 }
 0x8db   :  { %3141 = vmatprep.mubr.f32.mxu1 %v9222_v7 }
 0x8de   :  { %3142 = vmatmul.mubr.f32.gmra.mxu1 %v9223_v60 }
 0x8df   :  { %3147 = vmatprep.mubr.f32.mxu1 %v9220_v11  ;;  %v9237_v11 = vld [vmem:[#allocation29_spill] sm:$0xff] }
 0x8e2   :  { %3148 = vmatmul.mubr.f32.gmra.mxu1 %v9221_v21 }
 0x8e3   :  { %3153 = vmatprep.mubr.f32.mxu1 %v7293_v20 }
 0x8e6   :  { %3154 = vmatmul.mubr.f32.gmra.mxu1 %v9219_v41 }
 0x8e7   :  { %3159 = vmatprep.mubr.f32.mxu1 %v7305_v49 }
 0x8ea   :  { %3160 = vmatmul.mubr.f32.gmra.mxu1 %v7299_v42 }
 0x8eb   :  { %3165 = vmatprep.mubr.f32.mxu1 %v7318_v55 }
 0x8ee   :  { %3166 = vmatmul.mubr.f32.gmra.mxu1 %v7312_v58 }
 0x8ef   :  { %3171 = vmatprep.mubr.f32.mxu1 %v7330_v47 }
 0x8f2   :  { %3172 = vmatmul.mubr.f32.gmra.mxu1 %v7324_v56 }
 0x8f3   :  { %3177 = vmatprep.mubr.f32.mxu1 %v7342_v16 }
 0x8f6   :  { %3178 = vmatmul.mubr.f32.gmra.mxu1 %v7336_v15 }
 0x8f7   :  { %3183 = vmatprep.mubr.f32.mxu1 %v7354_v3 }
 0x8fa   :  { %3184 = vmatmul.mubr.f32.gmra.mxu1 %v7348_v13 }
 0x8fb   :  { %3189 = vmatprep.mubr.f32.mxu1 %v7370_v19 }
 0x8fe   :  { %3190 = vmatmul.mubr.f32.gmra.mxu1 %v7362_v30 }
 0x8ff   :  { %3195 = vmatprep.mubr.f32.mxu1 %v7386_v18  ;;  %v9233_v18 = vld [vmem:[#allocation33_spill] sm:$0xff] }
 0x902   :  { %3196 = vmatmul.mubr.f32.gmra.mxu1 %v7378_v43 }
 0x903   :  { %3201 = vmatprep.mubr.f32.mxu1 %v7402_v2 }
 0x906   :  { %3202 = vmatmul.mubr.f32.gmra.mxu1 %v7394_v23 }
 0x907   :  { %3207 = vmatprep.mubr.f32.mxu1 %v7418_v26 }
 0x90a   :  { %3208 = vmatmul.mubr.f32.gmra.mxu1 %v7410_v54 }
 0x94e   :  { %v3023_v37 = vpop.f32.mrf.mxu1 }
 0x94f   :  { %v3214_v55 = vsub.f32 %v9232_v63, %v3023_v37  ;;  %v9245_v63 = vld [vmem:[#allocation20_spill] sm:$0xff] }
 0x950   :  { %v3025_v13 = vpop.f32.mrf.mxu1 }
 0x951   :  { %v3215_v58 = vsub.f32 0.0, %v3025_v13  ;;  %v7503_v30 = vmul.f32 0.5, %v3214_v55  ;;  %v9239_v13 = vld [vmem:[#allocation27_spill] sm:$0xff] }
 0x952   :  { %v3029_v19 = vpop.f32.mrf.mxu1 }
 0x953   :  { %v7501_v4 = vmul.f32 0.5, %v3215_v58  ;;  %v3216_v43 = vsub.f32 %v9233_v18, %v3029_v19 }
 0x954   :  { %v3031_v24 = vpop.f32.mrf.mxu1 }
 0x955   :  { %v3217_v8 = vsub.f32 0.0, %v3031_v24  ;;  %3663 = vmatprep.mubr.f32.mxu1 %v7501_v4  ;;  %v7510_v56 = vmul.f32 0.5, %v3216_v43 }
 0x956   :  { %v3035_v23 = vpop.f32.mrf.mxu1  ;;  %3664 = vmatmul.mubr.f32.vlgmr.msra.gmra.mxu1 %v7503_v30 }
 0x957   :  { %v7508_v49 = vmul.f32 0.5, %v3217_v8  ;;  %v3218_v2 = vsub.f32 %v9234_v10, %v3035_v23 }
 0x958   :  { %v3037_v28 = vpop.f32.mrf.mxu1 }
 0x959   :  { %v3219_v57 = vsub.f32 0.0, %v3037_v28  ;;  %3669 = vmatprep.mubr.f32.mxu1 %v7508_v49  ;;  %v7517_v42 = vmul.f32 0.5, %v3218_v2  ;;  %v9240_v2 = vld [vmem:[#allocation26_spill] sm:$0xff] }
 0x95a   :  { %v3041_v33 = vpop.f32.mrf.mxu1  ;;  %3670 = vmatmul.mubr.f32.gmra.mxu1 %v7510_v56 }
 0x95b   :  { %v7515_v16 = vmul.f32 0.5, %v3219_v57  ;;  %v3220_v27 = vsub.f32 %v9235_v17, %v3041_v33 }
 0x95c   :  { %v3043_v6 = vpop.f32.mrf.mxu1 }
 0x95d   :  { %v3221_v15 = vsub.f32 0.0, %v3043_v6  ;;  %3675 = vmatprep.mubr.f32.mxu1 %v7515_v16  ;;  %v7524_v59 = vmul.f32 0.5, %v3220_v27 }
 0x95e   :  { %v3047_v3 = vpop.f32.mrf.mxu1  ;;  %3676 = vmatmul.mubr.f32.gmra.mxu1 %v7517_v42 }
 0x95f   :  { %v7522_v38 = vmul.f32 0.5, %v3221_v15  ;;  %v3222_v20 = vsub.f32 %v9236_v44, %v3047_v3  ;;  %v9241_v3 = vld [vmem:[#allocation25_spill] sm:$0xff] }
 0x960   :  { %v3049_v47 = vpop.f32.mrf.mxu1 }
 0x961   :  { %v3223_v54 = vsub.f32 0.0, %v3049_v47  ;;  %3681 = vmatprep.mubr.f32.mxu1 %v7522_v38  ;;  %v7531_v41 = vmul.f32 0.5, %v3222_v20 }
 0x962   :  { %v3053_v31 = vpop.f32.mrf.mxu1  ;;  %3682 = vmatmul.mubr.f32.gmra.mxu1 %v7524_v59 }
 0x963   :  { %v7529_v26 = vmul.f32 0.5, %v3223_v54  ;;  %v3224_v21 = vsub.f32 %v9237_v11, %v3053_v31 }
 0x964   :  { %v3055_v7 = vpop.f32.mrf.mxu1 }
 0x965   :  { %v3225_v60 = vsub.f32 0.0, %v3055_v7  ;;  %3687 = vmatprep.mubr.f32.mxu1 %v7529_v26  ;;  %v7538_v1 = vmul.f32 0.5, %v3224_v21 }
 0x966   :  { %v3059_v39 = vpop.f32.mrf.mxu1  ;;  %3688 = vmatmul.mubr.f32.gmra.mxu1 %v7531_v41 }
 0x967   :  { %v7536_v62 = vmul.f32 0.5, %v3225_v60  ;;  %v3226_v53 = vsub.f32 %v9238_v32, %v3059_v39  ;;  %v9242_v60 = vld [vmem:[#allocation23_spill] sm:$0xff] }
 0x968   :  { %v3061_v61 = vpop.f32.mrf.mxu1 }
 0x969   :  { %v3227_v9 = vsub.f32 0.0, %v3061_v61  ;;  %3693 = vmatprep.mubr.f32.mxu1 %v7536_v62  ;;  %v7545_v55 = vmul.f32 0.5, %v3226_v53 }
 0x96a   :  { %v3065_v14 = vpop.f32.mrf.mxu1  ;;  %3694 = vmatmul.mubr.f32.gmra.mxu1 %v7538_v1 }
 0x96b   :  { %v7543_v37 = vmul.f32 0.5, %v3227_v9  ;;  %v3228_v58 = vsub.f32 %v9239_v13, %v3065_v14 }
 0x96c   :  { %v3067_v19 = vpop.f32.mrf.mxu1 }
 0x96d   :  { %v3229_v43 = vsub.f32 0.0, %v3067_v19  ;;  %3699 = vmatprep.mubr.f32.mxu1 %v7543_v37  ;;  %v7552_v23 = vmul.f32 0.5, %v3228_v58  ;;  %v9243_v19 = vld [vmem:[#allocation22_spill] sm:$0xff] }
 0x96e   :  { %v3071_v24 = vpop.f32.mrf.mxu1  ;;  %3700 = vmatmul.mubr.f32.gmra.mxu1 %v7545_v55 }
 0x96f   :  { %v7550_v8 = vmul.f32 0.5, %v3229_v43  ;;  %v3230_v28 = vsub.f32 %v9240_v2, %v3071_v24 }
 0x970   :  { %v3073_v57 = vpop.f32.mrf.mxu1 }
 0x971   :  { %v3231_v33 = vsub.f32 0.0, %v3073_v57  ;;  %3705 = vmatprep.mubr.f32.mxu1 %v7550_v8  ;;  %v7559_v15 = vmul.f32 0.5, %v3230_v28 }
 0x972   :  { %v3077_v27 = vpop.f32.mrf.mxu1  ;;  %3706 = vmatmul.mubr.f32.gmra.mxu1 %v7552_v23 }
 0x973   :  { %v7557_v6 = vmul.f32 0.5, %v3231_v33  ;;  %v3232_v20 = vsub.f32 %v9241_v3, %v3077_v27 }
 0x974   :  { %v3079_v47 = vpop.f32.mrf.mxu1 }
 0x975   :  { %v3233_v54 = vsub.f32 0.0, %v3079_v47  ;;  %3711 = vmatprep.mubr.f32.mxu1 %v7557_v6  ;;  %v7566_v7 = vmul.f32 0.5, %v3232_v20  ;;  %v9244_v20 = vld [vmem:[#allocation21_spill] sm:$0xff] }
 0x976   :  { %v3083_v31 = vpop.f32.mrf.mxu1  ;;  %3712 = vmatmul.mubr.f32.gmra.mxu1 %v7559_v15 }
 0x977   :  { %v7564_v21 = vmul.f32 0.5, %v3233_v54  ;;  %v3234_v39 = vsub.f32 %v9242_v60, %v3083_v31 }
 0x978   :  { %v3085_v53 = vpop.f32.mrf.mxu1 }
 0x979   :  { %v3235_v61 = vsub.f32 0.0, %v3085_v53  ;;  %3717 = vmatprep.mubr.f32.mxu1 %v7564_v21  ;;  %v7573_v58 = vmul.f32 0.5, %v3234_v39 }
 0x97a   :  { %v3089_v9 = vpop.f32.mrf.mxu1  ;;  %3718 = vmatmul.mubr.f32.gmra.mxu1 %v7566_v7 }
 0x97b   :  { %v7571_v14 = vmul.f32 0.5, %v3235_v61  ;;  %v3236_v43 = vsub.f32 %v9243_v19, %v3089_v9  ;;  %v9248_v19 = vld [vmem:[#allocation57_spill] sm:$0xff] }
 0x97c   :  { %v3091_v24 = vpop.f32.mrf.mxu1 }
 0x97d   :  { %v3237_v28 = vsub.f32 0.0, %v3091_v24  ;;  %3723 = vmatprep.mubr.f32.mxu1 %v7571_v14  ;;  %v3300_v27 = vmul.f32 0.5, %v3236_v43 }
 0x97e   :  { %v3095_v57 = vpop.f32.mrf.mxu1  ;;  %3724 = vmatmul.mubr.f32.gmra.mxu1 %v7573_v58 }
 0x97f   :  { %v3301_v33 = vmul.f32 0.5, %v3237_v28  ;;  %v3238_v47 = vsub.f32 %v9244_v20, %v3095_v57  ;;  %v9246_v28 = vld [vmem:[#allocation19_spill] sm:$0xff]  ;;  %v9249_v20 = vld [vmem:[#allocation56_spill] sm:$0xff] }
 0x980   :  { %v3097_v54 = vpop.f32.mrf.mxu1 }
 0x981   :  { %v3239_v31 = vsub.f32 0.0, %v3097_v54  ;;  %3729 = vmatprep.mubr.f32.mxu1 %v3301_v33  ;;  %v3302_v61 = vmul.f32 0.5, %v3238_v47 }
 0x982   :  { %v3101_v53 = vpop.f32.mrf.mxu1  ;;  %3730 = vmatmul.mubr.f32.gmra.mxu1 %v3300_v27 }
 0x983   :  { %v3303_v39 = vmul.f32 0.5, %v3239_v31  ;;  %v3240_v9 = vsub.f32 %v9245_v63, %v3101_v53  ;;  %v9247_v31 = vld [vmem:[#allocation18_spill] sm:$0xff] }
 0x984   :  { %v3103_v18 = vpop.f32.mrf.mxu1 }
 0x985   :  { %v3241_v24 = vsub.f32 0.0, %v3103_v18  ;;  %3735 = vmatprep.mubr.f32.mxu1 %v3303_v39  ;;  %v3304_v44 = vmul.f32 0.5, %v3240_v9 }
 0x986   :  { %v3107_v10 = vpop.f32.mrf.mxu1  ;;  %3736 = vmatmul.mubr.f32.gmra.mxu1 %v3302_v61 }
 0x987   :  { %v3305_v17 = vmul.f32 0.5, %v3241_v24  ;;  %v3242_v43 = vsub.f32 %v9246_v28, %v3107_v10 }
 0x988   :  { %v3109_v11 = vpop.f32.mrf.mxu1 }
 0x989   :  { %v3243_v57 = vsub.f32 0.0, %v3109_v11  ;;  %3741 = vmatprep.mubr.f32.mxu1 %v3305_v17  ;;  %v3306_v13 = vmul.f32 0.5, %v3242_v43 }
 0x98a   :  { %v3113_v54 = vpop.f32.mrf.mxu1  ;;  %3742 = vmatmul.mubr.f32.gmra.mxu1 %v3304_v44 }
 0x98b   :  { %v3307_v32 = vmul.f32 0.5, %v3243_v57  ;;  %v3244_v47 = vsub.f32 %v9247_v31, %v3113_v54 }
 0x98c   :  { %v3115_v2 = vpop.f32.mrf.mxu1 }
 0x98d   :  { %v3245_v53 = vsub.f32 0.0, %v3115_v2  ;;  %3747 = vmatprep.mubr.f32.mxu1 %v3307_v32  ;;  %v3308_v60 = vmul.f32 0.5, %v3244_v47 }
 0x98e   :  { %v3119_v18 = vpop.f32.mrf.mxu1  ;;  %3748 = vmatmul.mubr.f32.gmra.mxu1 %v3306_v13 }
 0x98f   :  { %v3309_v3 = vmul.f32 0.5, %v3245_v53  ;;  %v3246_v24 = vsub.f32 0.0, %v3119_v18 }
 0x990   :  { %v3121_v9 = vpop.f32.mrf.mxu1 }
 0x991   :  { %v3247_v10 = vsub.f32 %v9248_v19, %v3121_v9  ;;  %3342 = vmatprep.subr.mxu0 %v3309_v3  ;;  %3753 = vmatprep.mubr.f32.mxu1 %v3309_v3  ;;  %v7585_v43 = vmul.f32 0.5, %v3246_v24  ;;  %v9250_v24 = vld [vmem:[#allocation54_spill] sm:$0xff] }
 0x992   :  { %v3125_v11 = vpop.f32.mrf.mxu1  ;;  %3343 = vmatpush1.msra.mxu0 %v3308_v60  ;;  %3754 = vmatmul.mubr.f32.gmra.mxu1 %v3308_v60 }
 0x993   :  { %v7583_v57 = vmul.f32 0.5, %v3247_v10  ;;  %3344 = vmatprep.subr.mxu0 %v3307_v32  ;;  %v3248_v2 = vsub.f32 0.0, %v3125_v11 }
 0x994   :  { %v3127_v54 = vpop.f32.mrf.mxu1  ;;  %3345 = vmatpush1.msra.mxu0 %v3306_v13 }
 0x995   :  { %v3249_v53 = vsub.f32 %v9249_v20, %v3127_v54  ;;  %3346 = vmatprep.subr.mxu0 %v3305_v17  ;;  %3759 = vmatprep.mubr.f32.mxu1 %v7583_v57  ;;  %v7592_v60 = vmul.f32 0.5, %v3248_v2 }
 0x996   :  { %v3131_v47 = vpop.f32.mrf.mxu1  ;;  %3347 = vmatpush1.msra.mxu0 %v3304_v44  ;;  %3760 = vmatmul.mubr.f32.gmra.mxu1 %v7585_v43 }
 0x997   :  { %v7590_v3 = vmul.f32 0.5, %v3249_v53  ;;  %3348 = vmatprep.subr.mxu0 %v3303_v39  ;;  %v3250_v32 = vsub.f32 0.0, %v3131_v47 }
 0x998   :  { %v3133_v18 = vpop.f32.mrf.mxu1  ;;  %3349 = vmatpush1.msra.mxu0 %v3302_v61  ;;  %v9251_v61 = vld [vmem:[#allocation52_spill] sm:$0xff] }
 0x999   :  { %v3251_v9 = vsub.f32 %v9250_v24, %v3133_v18  ;;  %3350 = vmatprep.subr.mxu0 %v3301_v33  ;;  %3765 = vmatprep.mubr.f32.mxu1 %v7590_v3  ;;  %v7600_v13 = vmul.f32 0.5, %v3250_v32 }
 0x99a   :  { %v3137_v17 = vpop.f32.mrf.mxu1  ;;  %3351 = vmatpush1.msra.mxu0 %v3300_v27  ;;  %3766 = vmatmul.mubr.f32.gmra.mxu1 %v7592_v60 }
 0x99b   :  { %v7597_v44 = vmul.f32 0.5, %v3251_v9  ;;  %3352 = vmatprep.subr.mxu0 %v7571_v14  ;;  %v3252_v39 = vsub.f32 0.0, %v3137_v17 }
 0x99c   :  { %v3139_v10 = vpop.f32.mrf.mxu1  ;;  %3353 = vmatpush1.msra.mxu0 %v7573_v58  ;;  %v9252_v58 = vld [vmem:[#allocation50_spill] sm:$0xff] }
 0x99d   :  { %v3253_v11 = vsub.f32 %v9251_v61, %v3139_v10  ;;  %3354 = vmatprep.subr.mxu0 %v7564_v21  ;;  %3771 = vmatprep.mubr.f32.mxu1 %v7597_v44  ;;  %v7611_v14 = vmul.f32 0.5, %v3252_v39 }
 0x99e   :  { %v3143_v33 = vpop.f32.mrf.mxu1  ;;  %3355 = vmatpush1.msra.mxu0 %v7566_v7  ;;  %3772 = vmatmul.mubr.f32.gmra.mxu1 %v7600_v13 }
 0x99f   :  { %v7608_v27 = vmul.f32 0.5, %v3253_v11  ;;  %3356 = vmatprep.subr.mxu0 %v7557_v6  ;;  %v3254_v2 = vsub.f32 0.0, %v3143_v33 }
 0x9a0   :  { %v3145_v54 = vpop.f32.mrf.mxu1  ;;  %3357 = vmatpush1.msra.mxu0 %v7559_v15  ;;  %v9253_v15 = vld [vmem:[#allocation49_spill] sm:$0xff] }
 0x9a1   :  { %v3255_v53 = vsub.f32 %v9252_v58, %v3145_v54  ;;  %3358 = vmatprep.subr.mxu0 %v7550_v8  ;;  %3777 = vmatprep.mubr.f32.mxu1 %v7608_v27  ;;  %v7622_v6 = vmul.f32 0.5, %v3254_v2 }
 0x9a2   :  { %v3149_v21 = vpop.f32.mrf.mxu1  ;;  %3359 = vmatpush1.msra.mxu0 %v7552_v23  ;;  %3778 = vmatmul.mubr.f32.gmra.mxu1 %v7611_v14 }
 0x9a3   :  { %v7619_v7 = vmul.f32 0.5, %v3255_v53  ;;  %3360 = vmatprep.subr.mxu0 %v7543_v37  ;;  %v3256_v47 = vsub.f32 0.0, %v3149_v21 }
 0x9a4   :  { %v3151_v32 = vpop.f32.mrf.mxu1  ;;  %3361 = vmatpush1.msra.mxu0 %v7545_v55  ;;  %v9254_v55 = vld [vmem:[#allocation47_spill] sm:$0xff] }
 0x9a5   :  { %v3257_v18 = vsub.f32 %v9253_v15, %v3151_v32  ;;  %3362 = vmatprep.subr.mxu0 %v7536_v62  ;;  %3783 = vmatprep.mubr.f32.mxu1 %v7619_v7  ;;  %v7633_v37 = vmul.f32 0.5, %v3256_v47 }
 0x9a6   :  { %v3155_v8 = vpop.f32.mrf.mxu1  ;;  %3363 = vmatpush1.msra.mxu0 %v7538_v1  ;;  %3784 = vmatmul.mubr.f32.gmra.mxu1 %v7622_v6 }
 0x9a7   :  { %v7630_v23 = vmul.f32 0.5, %v3257_v18  ;;  %3364 = vmatprep.subr.mxu0 %v7529_v26  ;;  %v3258_v9 = vsub.f32 0.0, %v3155_v8 }
 0x9a8   :  { %v3157_v17 = vpop.f32.mrf.mxu1  ;;  %3365 = vmatpush1.msra.mxu0 %v7531_v41  ;;  %v9255_v41 = vld [vmem:[#allocation45_spill] sm:$0xff] }
 0x9a9   :  { %v3259_v39 = vsub.f32 %v9254_v55, %v3157_v17  ;;  %3366 = vmatprep.subr.mxu0 %v7522_v38  ;;  %3789 = vmatprep.mubr.f32.mxu1 %v7630_v23  ;;  %v7644_v26 = vmul.f32 0.5, %v3258_v9 }
 0x9aa   :  { %v3161_v62 = vpop.f32.mrf.mxu1  ;;  %3367 = vmatpush1.msra.mxu0 %v7524_v59  ;;  %3790 = vmatmul.mubr.f32.gmra.mxu1 %v7633_v37 }
 0x9ab   :  { %v7641_v1 = vmul.f32 0.5, %v3259_v39  ;;  %3368 = vmatprep.subr.mxu0 %v7515_v16  ;;  %v3260_v10 = vsub.f32 0.0, %v3161_v62  ;;  %v9258_v62 = vld [vmem:[#allocation40_spill] sm:$0xff] }
 0x9ac   :  { %v3163_v11 = vpop.f32.mrf.mxu1  ;;  %3369 = vmatpush1.msra.mxu0 %v7517_v42  ;;  %v9256_v42 = vld [vmem:[#allocation43_spill] sm:$0xff] }
 0x9ad   :  { %v3261_v33 = vsub.f32 %v9255_v41, %v3163_v11  ;;  %3370 = vmatprep.subr.mxu0 %v7508_v49  ;;  %3795 = vmatprep.mubr.f32.mxu1 %v7641_v1  ;;  %v7655_v16 = vmul.f32 0.5, %v3260_v10 }
 0x9ae   :  { %v3167_v38 = vpop.f32.mrf.mxu1  ;;  %3371 = vmatpush1.msra.mxu0 %v7510_v56  ;;  %3796 = vmatmul.mubr.f32.gmra.mxu1 %v7644_v26 }
 0x9af   :  { %v7652_v59 = vmul.f32 0.5, %v3261_v33  ;;  %3372 = vmatprep.subr.mxu0 %v7501_v4  ;;  %v3262_v2 = vsub.f32 0.0, %v3167_v38  ;;  %v9257_v4 = vld [vmem:[#allocation41_spill] sm:$0xff] }
 0x9b0   :  { %v3169_v54 = vpop.f32.mrf.mxu1  ;;  %3373 = vmatpush1.msra.mxu0 %v7503_v30 }
 0x9b1   :  { %v3263_v53 = vsub.f32 %v9256_v42, %v3169_v54  ;;  %3801 = vmatprep.mubr.f32.mxu1 %v7652_v59  ;;  %v7663_v21 = vmul.f32 0.5, %v3262_v2 }
 0x9b2   :  { %v3173_v49 = vpop.f32.mrf.mxu1  ;;  %3802 = vmatmul.mubr.f32.gmra.mxu1 %v7655_v16 }
 0x9b3   :  { %v7661_v56 = vmul.f32 0.5, %v3263_v53  ;;  %v3264_v47 = vsub.f32 0.0, %v3173_v49  ;;  %v9259_v53 = vld [vmem:[#allocation39_spill] sm:$0xff] }
 0x9b4   :  { %v3175_v32 = vpop.f32.mrf.mxu1 }
 0x9b5   :  { %v3265_v18 = vsub.f32 %v9257_v4, %v3175_v32  ;;  %3807 = vmatprep.mubr.f32.mxu1 %v7661_v56  ;;  %v3328_v9 = vmul.f32 0.5, %v3264_v47 }
 0x9b6   :  { %v3179_v8 = vpop.f32.mrf.mxu1  ;;  %3808 = vmatmul.mubr.f32.gmra.mxu1 %v7663_v21 }
 0x9b7   :  { %v3329_v30 = vmul.f32 0.5, %v3265_v18  ;;  %v3266_v17 = vsub.f32 0.0, %v3179_v8  ;;  %v9260_v8 = vld [vmem:[#allocation38_spill] sm:$0xff] }
 0x9b8   :  { %v3181_v39 = vpop.f32.mrf.mxu1 }
 0x9b9   :  { %v3267_v10 = vsub.f32 %v9258_v62, %v3181_v39  ;;  %3813 = vmatprep.mubr.f32.mxu1 %v3329_v30  ;;  %v3330_v38 = vmul.f32 0.5, %v3266_v17 }
 0x9ba   :  { %v3185_v11 = vpop.f32.mrf.mxu1  ;;  %3814 = vmatmul.mubr.f32.gmra.mxu1 %v3328_v9 }
 0x9bb   :  { %v3331_v33 = vmul.f32 0.5, %v3267_v10  ;;  %v3268_v2 = vsub.f32 0.0, %v3185_v11  ;;  %v9261_v11 = vld [vmem:[#allocation37_spill] sm:$0xff] }
 0x9bc   :  { %v3187_v54 = vpop.f32.mrf.mxu1 }
 0x9bd   :  { %v3269_v49 = vsub.f32 %v9259_v53, %v3187_v54  ;;  %3819 = vmatprep.mubr.f32.mxu1 %v3331_v33  ;;  %v3332_v20 = vmul.f32 0.5, %v3268_v2 }
 0x9be   :  { %v3191_v32 = vpop.f32.mrf.mxu1  ;;  %3820 = vmatmul.mubr.f32.gmra.mxu1 %v3330_v38 }
 0x9bf   :  { %v3333_v19 = vmul.f32 0.5, %v3269_v49  ;;  %v3270_v18 = vsub.f32 0.0, %v3191_v32  ;;  %v9262_v32 = vld [vmem:[#allocation36_spill] sm:$0xff] }
 0x9c0   :  { %v3193_v47 = vpop.f32.mrf.mxu1 }
 0x9c1   :  { %v3271_v24 = vsub.f32 %v9260_v8, %v3193_v47  ;;  %3825 = vmatprep.mubr.f32.mxu1 %v3333_v19  ;;  %v3334_v58 = vmul.f32 0.5, %v3270_v18 }
 0x9c2   :  { %v3197_v39 = vpop.f32.mrf.mxu1  ;;  %3826 = vmatmul.mubr.f32.gmra.mxu1 %v3332_v20 }
 0x9c3   :  { %v3335_v61 = vmul.f32 0.5, %v3271_v24  ;;  %v3272_v10 = vsub.f32 0.0, %v3197_v39  ;;  %v9263_v39 = vld [vmem:[#allocation35_spill] sm:$0xff] }
 0x9c4   :  { %v3199_v17 = vpop.f32.mrf.mxu1 }
 0x9c5   :  { %v3273_v15 = vsub.f32 %v9261_v11, %v3199_v17  ;;  %3831 = vmatprep.mubr.f32.mxu1 %v3335_v61  ;;  %v3336_v41 = vmul.f32 0.5, %v3272_v10 }
 0x9c6   :  { %v3203_v54 = vpop.f32.mrf.mxu1  ;;  %3832 = vmatmul.mubr.f32.gmra.mxu1 %v3334_v58 }
 0x9c7   :  { %v3337_v55 = vmul.f32 0.5, %v3273_v15  ;;  %v3274_v49 = vsub.f32 0.0, %v3203_v54  ;;  %v9278_v15 = vld [vmem:[#allocation53_spill] sm:$0xff] }
 0x9c8   :  { %v3205_v2 = vpop.f32.mrf.mxu1 }
 0x9c9   :  { %v3275_v42 = vsub.f32 %v9262_v32, %v3205_v2  ;;  %3837 = vmatprep.mubr.f32.mxu1 %v3337_v55  ;;  %v3338_v62 = vmul.f32 0.5, %v3274_v49 }
 0x9ca   :  { %v3209_v47 = vpop.f32.mrf.mxu1  ;;  %3838 = vmatmul.mubr.f32.gmra.mxu1 %v3336_v41 }
 0x9cb   :  { %v3339_v4 = vmul.f32 0.5, %v3275_v42  ;;  %v3276_v24 = vsub.f32 0.0, %v3209_v47  ;;  %v9287_v42 = vld [vmem:[#allocation67_spill] sm:$0xff] }
 0x9cc   :  { %v3211_v18 = vpop.f32.mrf.mxu1 }
 0x9cd   :  { %v3277_v53 = vsub.f32 %v9263_v39, %v3211_v18  ;;  %3843 = vmatprep.mubr.f32.mxu1 %v3339_v4  ;;  %v3340_v8 = vmul.f32 0.5, %v3276_v24 }
 0x9ce   :  { %3844 = vmatmul.mubr.f32.gmra.mxu1 %v3338_v62 }
 0x9cf   :  { %v3341_v17 = vmul.f32 0.5, %v3277_v53  ;;  %v9310_v53 = vld [vmem:[#allocation115_spill] sm:$0xff] }
 0x9d1   :  { %3374 = vmatprep.subr.mxu0 %v3341_v17  ;;  %3849 = vmatprep.mubr.f32.mxu1 %v3341_v17 }
 0x9d2   :  { %3375 = vmatpush2.msra.mxu0 %v3340_v8  ;;  %3850 = vmatmul.mubr.f32.gmra.mxu1 %v3340_v8 }
 0x9d3   :  { %3376 = vmatprep.subr.mxu0 %v3339_v4  ;;  %v9290_v4 = vld [vmem:[#allocation68_spill] sm:$0xff] }
 0x9d4   :  { %3377 = vmatpush2.msra.mxu0 %v3338_v62  ;;  %v9293_v62 = vld [vmem:[#allocation73_spill] sm:$0xff] }
 0x9d5   :  { %3378 = vmatprep.subr.mxu0 %v3337_v55  ;;  %v9281_v55 = vld [vmem:[#allocation61_spill] sm:$0xff] }
 0x9d6   :  { %3379 = vmatpush2.msra.mxu0 %v3336_v41  ;;  %v9284_v41 = vld [vmem:[#allocation62_spill] sm:$0xff] }
 0x9d7   :  { %3380 = vmatprep.subr.mxu0 %v3335_v61  ;;  %v9266_v61 = vld [vmem:[#allocation105_spill] sm:$0xff] }
 0x9d8   :  { %3381 = vmatpush2.msra.mxu0 %v3334_v58  ;;  %v9275_v58 = vld [vmem:[#allocation86_spill] sm:$0xff] }
 0x9d9   :  { %3382 = vmatprep.subr.mxu0 %v3333_v19  ;;  %v9264_v19 = vld [vmem:[#allocation108_spill] sm:$0xff] }
 0x9da   :  { %3383 = vmatpush2.msra.mxu0 %v3332_v20  ;;  %v9265_v20 = vld [vmem:[#allocation103_spill] sm:$0xff] }
 0x9db   :  { %3384 = vmatprep.subr.mxu0 %v3331_v33  ;;  %v9294_v33 = vld [vmem:[#allocation72_spill] sm:$0xff] }
 0x9dc   :  { %3385 = vmatpush2.msra.mxu0 %v3330_v38 }
 0x9dd   :  { %3386 = vmatprep.subr.mxu0 %v3329_v30  ;;  %v9291_v30 = vld [vmem:[#allocation71_spill] sm:$0xff] }
 0x9de   :  { %3387 = vmatpush2.msra.mxu0 %v3328_v9  ;;  %v9292_v9 = vld [vmem:[#allocation70_spill] sm:$0xff] }
 0x9df   :  { %3388 = vmatprep.subr.mxu0 %v7661_v56  ;;  %v9288_v56 = vld [vmem:[#allocation66_spill] sm:$0xff] }
 0x9e0   :  { %3389 = vmatpush2.msra.mxu0 %v7663_v21  ;;  %v9289_v21 = vld [vmem:[#allocation69_spill] sm:$0xff] }
 0x9e1   :  { %3390 = vmatprep.subr.mxu0 %v7652_v59  ;;  %v9285_v59 = vld [vmem:[#allocation65_spill] sm:$0xff] }
 0x9e2   :  { %3391 = vmatpush2.msra.mxu0 %v7655_v16  ;;  %v9286_v16 = vld [vmem:[#allocation64_spill] sm:$0xff] }
 0x9e3   :  { %3392 = vmatprep.subr.mxu0 %v7641_v1  ;;  %v9282_v1 = vld [vmem:[#allocation60_spill] sm:$0xff] }
 0x9e4   :  { %3393 = vmatpush2.msra.mxu0 %v7644_v26  ;;  %v9283_v26 = vld [vmem:[#allocation63_spill] sm:$0xff] }
 0x9e5   :  { %3394 = vmatprep.subr.mxu0 %v7630_v23  ;;  %v9279_v23 = vld [vmem:[#allocation59_spill] sm:$0xff] }
 0x9e6   :  { %3395 = vmatpush2.msra.mxu0 %v7633_v37  ;;  %v9280_v37 = vld [vmem:[#allocation55_spill] sm:$0xff] }
 0x9e7   :  { %3396 = vmatprep.subr.mxu0 %v7619_v7  ;;  %v9276_v7 = vld [vmem:[#allocation88_spill] sm:$0xff] }
 0x9e8   :  { %3397 = vmatpush2.msra.mxu0 %v7622_v6  ;;  %v9277_v6 = vld [vmem:[#allocation58_spill] sm:$0xff] }
 0x9e9   :  { %3398 = vmatprep.subr.mxu0 %v7608_v27  ;;  %v9267_v27 = vld [vmem:[#allocation97_spill] sm:$0xff] }
 0x9ea   :  { %3399 = vmatpush2.msra.mxu0 %v7611_v14  ;;  %v9268_v14 = vld [vmem:[#allocation98_spill] sm:$0xff] }
 0x9eb   :  { %3400 = vmatprep.subr.mxu0 %v7597_v44  ;;  %v9269_v44 = vld [vmem:[#allocation92_spill] sm:$0xff] }
 0x9ec   :  { %3401 = vmatpush2.msra.mxu0 %v7600_v13  ;;  %v9270_v13 = vld [vmem:[#allocation95_spill] sm:$0xff] }
 0x9ed   :  { %3402 = vmatprep.subr.mxu0 %v7590_v3  ;;  %v9271_v3 = vld [vmem:[#allocation90_spill] sm:$0xff] }
 0x9ee   :  { %3403 = vmatpush2.msra.mxu0 %v7592_v60  ;;  %v9272_v60 = vld [vmem:[#allocation93_spill] sm:$0xff] }
 0x9ef   :  { %3404 = vmatprep.subr.mxu0 %v7583_v57  ;;  %v9273_v57 = vld [vmem:[#allocation89_spill] sm:$0xff] }
 0x9f0   :  { %3405 = vmatpush2.msra.mxu0 %v7585_v43  ;;  %v9274_v43 = vld [vmem:[#allocation91_spill] sm:$0xff] }
 0x9f1   :  { %3407 = vmatmul.mubr.f32.vlgmr.msra.gmra.mxu0 %v9264_v19 }
 0x9f2   :  { %3412 = vmatprep.mubr.f32.mxu0 %v9265_v20 }
 0x9f5   :  { %3413 = vmatmul.mubr.f32.gmra.mxu0 %v9266_v61 }
 0x9f6   :  { %3418 = vmatprep.mubr.f32.mxu0 %v9267_v27 }
 0x9f9   :  { %3419 = vmatmul.mubr.f32.gmra.mxu0 %v9268_v14 }
 0x9fa   :  { %3424 = vmatprep.mubr.f32.mxu0 %v9269_v44 }
 0x9fd   :  { %3425 = vmatmul.mubr.f32.gmra.mxu0 %v9270_v13 }
 0x9fe   :  { %3430 = vmatprep.mubr.f32.mxu0 %v9271_v3 }
 0xa01   :  { %3431 = vmatmul.mubr.f32.gmra.mxu0 %v9272_v60 }
 0xa02   :  { %3436 = vmatprep.mubr.f32.mxu0 %v9273_v57 }
 0xa05   :  { %3437 = vmatmul.mubr.f32.gmra.mxu0 %v9274_v43 }
 0xa06   :  { %3442 = vmatprep.mubr.f32.mxu0 %v9275_v58 }
 0xa09   :  { %3443 = vmatmul.mubr.f32.gmra.mxu0 %v9276_v7 }
 0xa0a   :  { %3448 = vmatprep.mubr.f32.mxu0 %v9277_v6 }
 0xa0d   :  { %3449 = vmatmul.mubr.f32.gmra.mxu0 %v9278_v15 }
 0xa0e   :  { %3454 = vmatprep.mubr.f32.mxu0 %v9279_v23 }
 0xa11   :  { %3455 = vmatmul.mubr.f32.gmra.mxu0 %v9280_v37 }
 0xa12   :  { %3460 = vmatprep.mubr.f32.mxu0 %v9281_v55 }
 0xa15   :  { %3461 = vmatmul.mubr.f32.gmra.mxu0 %v9282_v1 }
 0xa16   :  { %3466 = vmatprep.mubr.f32.mxu0 %v9283_v26 }
 0xa19   :  { %3467 = vmatmul.mubr.f32.gmra.mxu0 %v9284_v41 }
 0xa1a   :  { %3472 = vmatprep.mubr.f32.mxu0 %v9285_v59 }
 0xa1d   :  { %3473 = vmatmul.mubr.f32.gmra.mxu0 %v9286_v16 }
 0xa1e   :  { %3478 = vmatprep.mubr.f32.mxu0 %v9287_v42 }
 0xa21   :  { %3479 = vmatmul.mubr.f32.gmra.mxu0 %v9288_v56 }
 0xa22   :  { %3484 = vmatprep.mubr.f32.mxu0 %v9289_v21 }
 0xa25   :  { %3485 = vmatmul.mubr.f32.gmra.mxu0 %v9290_v4 }
 0xa26   :  { %3490 = vmatprep.mubr.f32.mxu0 %v9291_v30 }
 0xa29   :  { %3491 = vmatmul.mubr.f32.gmra.mxu0 %v9292_v9 }
 0xa2a   :  { %3496 = vmatprep.mubr.f32.mxu0 %v9293_v62 }
 0xa2d   :  { %3497 = vmatmul.mubr.f32.gmra.mxu0 %v9294_v33 }
 0xa2e   :  { %3502 = vmatprep.mubr.f32.mxu0 %v7188_v48  ;;  %v9298_v48 = vld [vmem:[#allocation87_spill] sm:$0xff] }
 0xa31   :  { %3503 = vmatmul.mubr.f32.gmra.mxu0 %v7182_v50  ;;  %v9297_v50 = vld [vmem:[#allocation96_spill] sm:$0xff] }
 0xa32   :  { %3508 = vmatprep.mubr.f32.mxu0 %v7198_v5  ;;  %v9300_v5 = vld [vmem:[#allocation94_spill] sm:$0xff] }
 0xa35   :  { %3509 = vmatmul.mubr.f32.gmra.mxu0 %v7192_v52  ;;  %v9299_v52 = vld [vmem:[#allocation99_spill] sm:$0xff] }
 0xa36   :  { %3514 = vmatprep.mubr.f32.mxu0 %v7208_v25  ;;  %v9295_v25 = vld [vmem:[#allocation84_spill] sm:$0xff] }
 0xa39   :  { %3515 = vmatmul.mubr.f32.gmra.mxu0 %v7202_v45  ;;  %v9296_v45 = vld [vmem:[#allocation82_spill] sm:$0xff] }
 0xa3a   :  { %3520 = vmatprep.mubr.f32.mxu0 %v7218_v36  ;;  %v7752_v36 = vpop.f32.mrf.mxu1 }
 0xa3c   :  { %v3667_v38 = vpop.f32.mrf.mxu1 }
 0xa3d   :  { %3521 = vmatmul.mubr.f32.gmra.mxu0 %v7212_v35  ;;  %v9309_v35 = vld [vmem:[#allocation114_spill] sm:$0xff] }
 0xa3e   :  { %3526 = vmatprep.mubr.f32.mxu0 %v7228_v40  ;;  %v9307_v40 = vld [vmem:[#allocation112_spill] sm:$0xff]  ;;  %v7794_v57 = vpop.f32.mrf.mxu1 }
 0xa40   :  { %v7800_v7 = vpop.f32.mrf.mxu1 }
 0xa41   :  { %3527 = vmatmul.mubr.f32.gmra.mxu0 %v7222_v0  ;;  %v9308_v0 = vld [vmem:[#allocation113_spill] sm:$0xff] }
 0xa42   :  { %3532 = vmatprep.mubr.f32.mxu0 %v7238_v51  ;;  %v9301_v51 = vld [vmem:[#allocation106_spill] sm:$0xff]  ;;  %v7806_v23 = vpop.f32.mrf.mxu1 }
 0xa44   :  { %v7812_v1 = vpop.f32.mrf.mxu1 }
 0xa45   :  { %3533 = vmatmul.mubr.f32.gmra.mxu0 %v7232_v34  ;;  %v9306_v34 = vld [vmem:[#allocation111_spill] sm:$0xff] }
 0xa46   :  { %3538 = vmatprep.mubr.f32.mxu0 %v7248_v22  ;;  %v9302_v22 = vld [vmem:[#allocation102_spill] sm:$0xff]  ;;  %v7818_v59 = vpop.f32.mrf.mxu1 }
 0xa48   :  { %v7824_v56 = vpop.f32.mrf.mxu1 }
 0xa49   :  { %3539 = vmatmul.mubr.f32.gmra.mxu0 %v7242_v46  ;;  %v9303_v46 = vld [vmem:[#allocation107_spill] sm:$0xff] }
 0xa4a   :  { %3544 = vmatprep.mubr.f32.mxu0 %v7258_v29  ;;  %v9304_v29 = vld [vmem:[#allocation104_spill] sm:$0xff]  ;;  %v7830_v30 = vpop.f32.mrf.mxu1 }
 0xa4c   :  { %v7836_v33 = vpop.f32.mrf.mxu1 }
 0xa4d   :  { %3545 = vmatmul.mubr.f32.gmra.mxu0 %v7252_v12  ;;  %v9305_v12 = vld [vmem:[#allocation110_spill] sm:$0xff] }
 0xa4e   :  { %3550 = vmatprep.mubr.f32.mxu0 %v9295_v25 }
 0xa51   :  { %3551 = vmatmul.mubr.f32.gmra.mxu0 %v9296_v45 }
 0xa52   :  { %3556 = vmatprep.mubr.f32.mxu0 %v9297_v50  ;;  %v7846_v50 = vpop.f32.mrf.mxu1 }
 0xa55   :  { %3557 = vmatmul.mubr.f32.gmra.mxu0 %v9298_v48 }
 0xa56   :  { %3562 = vmatprep.mubr.f32.mxu0 %v9299_v52 }
 0xa59   :  { %3563 = vmatmul.mubr.f32.gmra.mxu0 %v9300_v5  ;;  %v7856_v5 = vpop.f32.mrf.mxu1 }
 0xa5a   :  { %3568 = vmatprep.mubr.f32.mxu0 %v9301_v51 }
 0xa5d   :  { %3569 = vmatmul.mubr.f32.gmra.mxu0 %v9302_v22 }
 0xa5e   :  { %3574 = vmatprep.mubr.f32.mxu0 %v9303_v46  ;;  %v7866_v46 = vpop.f32.mrf.mxu1 }
 0xa61   :  { %3575 = vmatmul.mubr.f32.gmra.mxu0 %v9304_v29 }
 0xa62   :  { %3580 = vmatprep.mubr.f32.mxu0 %v9305_v12 }
 0xa65   :  { %3581 = vmatmul.mubr.f32.gmra.mxu0 %v9306_v34  ;;  %v7876_v34 = vpop.f32.mrf.mxu1 }
 0xa66   :  { %3586 = vmatprep.mubr.f32.mxu0 %v9307_v40 }
 0xa69   :  { %3587 = vmatmul.mubr.f32.gmra.mxu0 %v9308_v0 }
 0xa6a   :  { %3592 = vmatprep.mubr.f32.mxu0 %v9309_v35  ;;  %v7886_v35 = vpop.f32.mrf.mxu1 }
 0xa6d   :  { %3593 = vmatmul.mubr.f32.gmra.mxu0 %v9310_v53 }
 0xa6e   :  { %3920 = vmatprep.mubr.f32.mxu0 %v3667_v38 }
 0xab1   :  { %v7757_v8 = vpop.f32.mrf.mxu0 }
 0xab2   :  { %9311 = vst [vmem:[#allocation42_spill] sm:$0xff] %v7757_v8 }
 0xab3   :  { %v7759_v10 = vpop.f32.mrf.mxu0 }
 0xab4   :  { %4241 = vmatprep.mubr.f32.mxu1 %v7759_v10 }
 0xab5   :  { %v7762_v54 = vpop.f32.mrf.mxu0 }
 0xab6   :  { %9312 = vst [vmem:[#allocation44_spill] sm:$0xff] %v7762_v54 }
 0xab7   :  { %v7764_v49 = vpop.f32.mrf.mxu0 }
 0xab8   :  { %9313 = vst [vmem:[#allocation46_spill] sm:$0xff] %v7764_v49 }
 0xab9   :  { %v7766_v2 = vpop.f32.mrf.mxu0 }
 0xaba   :  { %9314 = vst [vmem:[#allocation48_spill] sm:$0xff] %v7766_v2 }
 0xabb   :  { %v7768_v47 = vpop.f32.mrf.mxu0 }
 0xabc   :  { %9315 = vst [vmem:[#allocation51_spill] sm:$0xff] %v7768_v47 }
 0xabd   :  { %v7770_v24 = vpop.f32.mrf.mxu0 }
 0xabe   :  { %9316 = vst [vmem:[#allocation109_spill] sm:$0xff] %v7770_v24 }
 0xabf   :  { %v7772_v18 = vpop.f32.mrf.mxu0 }
 0xac0   :  { %9317 = vst [vmem:[#allocation100_spill] sm:$0xff] %v7772_v18 }
 0xac1   :  { %v7774_v17 = vpop.f32.mrf.mxu0 }
 0xac2   :  { %9318 = vst [vmem:[#allocation101_spill] sm:$0xff] %v7774_v17 }
 0xac3   :  { %v7776_v19 = vpop.f32.mrf.mxu0 }
 0xac4   :  { %9319 = vst [vmem:[#allocation85_spill] sm:$0xff] %v7776_v19 }
 0xac5   :  { %v7778_v20 = vpop.f32.mrf.mxu0 }
 0xac6   :  { %9320 = vst [vmem:[#allocation83_spill] sm:$0xff] %v7778_v20 }
 0xac7   :  { %v7780_v61 = vpop.f32.mrf.mxu0 }
 0xac8   :  { %9321 = vst [vmem:[#allocation81_spill] sm:$0xff] %v7780_v61 }
 0xac9   :  { %v7782_v27 = vpop.f32.mrf.mxu0 }
 0xaca   :  { %9322 = vst [vmem:[#allocation80_spill] sm:$0xff] %v7782_v27 }
 0xacb   :  { %v7784_v14 = vpop.f32.mrf.mxu0 }
 0xacc   :  { %9323 = vst [vmem:[#allocation79_spill] sm:$0xff] %v7784_v14 }
 0xacd   :  { %v7786_v44 = vpop.f32.mrf.mxu0 }
 0xace   :  { %9324 = vst [vmem:[#allocation78_spill] sm:$0xff] %v7786_v44 }
 0xacf   :  { %v7788_v13 = vpop.f32.mrf.mxu0 }
 0xad0   :  { %9325 = vst [vmem:[#allocation77_spill] sm:$0xff] %v7788_v13 }
 0xad1   :  { %v7790_v3 = vpop.f32.mrf.mxu0 }
 0xad2   :  { %9326 = vst [vmem:[#allocation75_spill] sm:$0xff] %v7790_v3 }
 0xad3   :  { %v7792_v60 = vpop.f32.mrf.mxu0 }
 0xad4   :  { %9327 = vst [vmem:[#allocation76_spill] sm:$0xff] %v7792_v60 }
 0xad5   :  { %v7796_v43 = vpop.f32.mrf.mxu0 }
 0xad6   :  { %9328 = vst [vmem:[#allocation74_spill] sm:$0xff] %v7796_v43 }
 0xad7   :  { %v7798_v58 = vpop.f32.mrf.mxu0 }
 0xad8   :  { %9329 = vst [vmem:[#allocation20_spill] sm:$0xff] %v7798_v58 }
 0xad9   :  { %v7802_v6 = vpop.f32.mrf.mxu0 }
 0xada   :  { %9330 = vst [vmem:[#allocation19_spill] sm:$0xff] %v7802_v6 }
 0xadb   :  { %v7804_v15 = vpop.f32.mrf.mxu0 }
 0xadc   :  { %9331 = vst [vmem:[#allocation18_spill] sm:$0xff] %v7804_v15 }
 0xadd   :  { %v7808_v37 = vpop.f32.mrf.mxu0 }
 0xade   :  { %9332 = vst [vmem:[#allocation36_spill] sm:$0xff] %v7808_v37 }
 0xadf   :  { %v7810_v55 = vpop.f32.mrf.mxu0 }
 0xae0   :  { %9333 = vst [vmem:[#allocation35_spill] sm:$0xff] %v7810_v55 }
 0xae1   :  { %v7814_v26 = vpop.f32.mrf.mxu0 }
 0xae2   :  { %9334 = vst [vmem:[#allocation108_spill] sm:$0xff] %v7814_v26 }
 0xae3   :  { %v7816_v41 = vpop.f32.mrf.mxu0 }
 0xae4   :  { %9335 = vst [vmem:[#allocation103_spill] sm:$0xff] %v7816_v41 }
 0xae5   :  { %v7820_v16 = vpop.f32.mrf.mxu0 }
 0xae6   :  { %9336 = vst [vmem:[#allocation105_spill] sm:$0xff] %v7820_v16 }
 0xae7   :  { %v7822_v42 = vpop.f32.mrf.mxu0 }
 0xae8   :  { %9337 = vst [vmem:[#allocation97_spill] sm:$0xff] %v7822_v42 }
 0xae9   :  { %v7826_v21 = vpop.f32.mrf.mxu0 }
 0xaea   :  { %9338 = vst [vmem:[#allocation98_spill] sm:$0xff] %v7826_v21 }
 0xaeb   :  { %v7828_v4 = vpop.f32.mrf.mxu0 }
 0xaec   :  { %9339 = vst [vmem:[#allocation92_spill] sm:$0xff] %v7828_v4 }
 0xaed   :  { %v7832_v9 = vpop.f32.mrf.mxu0 }
 0xaee   :  { %9340 = vst [vmem:[#allocation95_spill] sm:$0xff] %v7832_v9 }
 0xaef   :  { %v7834_v62 = vpop.f32.mrf.mxu0 }
 0xaf0   :  { %9341 = vst [vmem:[#allocation90_spill] sm:$0xff] %v7834_v62  ;;  %3856 = vmatprep.subr.mxu0 %v7834_v62 }
 0xaf1   :  { %v7839_v25 = vpop.f32.mrf.mxu0  ;;  %3857 = vmatpush1.msra.mxu0 %v7832_v9  ;;  %v7896_v9 = vpop.f32.mrf.mxu1 }
 0xaf2   :  { %3858 = vmatprep.subr.mxu0 %v7828_v4 }
 0xaf3   :  { %v7843_v45 = vpop.f32.mrf.mxu0  ;;  %3859 = vmatpush1.msra.mxu0 %v7826_v21  ;;  %v7906_v4 = vpop.f32.mrf.mxu1 }
 0xaf4   :  { %3860 = vmatprep.subr.mxu0 %v7822_v42 }
 0xaf5   :  { %v7849_v48 = vpop.f32.mrf.mxu0  ;;  %3861 = vmatpush1.msra.mxu0 %v7820_v16 }
 0xaf6   :  { %3862 = vmatprep.subr.mxu0 %v7816_v41 }
 0xaf7   :  { %v7853_v52 = vpop.f32.mrf.mxu0  ;;  %3863 = vmatpush1.msra.mxu0 %v7814_v26  ;;  %v7916_v26 = vpop.f32.mrf.mxu1 }
 0xaf8   :  { %3864 = vmatprep.subr.mxu0 %v7810_v55 }
 0xaf9   :  { %v7859_v51 = vpop.f32.mrf.mxu0  ;;  %3865 = vmatpush1.msra.mxu0 %v7808_v37  ;;  %v7922_v55 = vpop.f32.mrf.mxu1 }
 0xafa   :  { %3866 = vmatprep.subr.mxu0 %v7804_v15 }
 0xafb   :  { %v7863_v22 = vpop.f32.mrf.mxu0  ;;  %3867 = vmatpush1.msra.mxu0 %v7802_v6 }
 0xafc   :  { %3868 = vmatprep.subr.mxu0 %v7798_v58 }
 0xafd   :  { %v7869_v29 = vpop.f32.mrf.mxu0  ;;  %3869 = vmatpush1.msra.mxu0 %v7796_v43  ;;  %v7928_v43 = vpop.f32.mrf.mxu1 }
 0xafe   :  { %3870 = vmatprep.subr.mxu0 %v7792_v60 }
 0xaff   :  { %v7873_v12 = vpop.f32.mrf.mxu0  ;;  %3871 = vmatpush1.msra.mxu0 %v7790_v3  ;;  %v7934_v3 = vpop.f32.mrf.mxu1 }
 0xb00   :  { %3872 = vmatprep.subr.mxu0 %v7788_v13 }
 0xb01   :  { %v7879_v40 = vpop.f32.mrf.mxu0  ;;  %3873 = vmatpush1.msra.mxu0 %v7786_v44  ;;  %v7940_v13 = vpop.f32.mrf.mxu1 }
 0xb02   :  { %3874 = vmatprep.subr.mxu0 %v7784_v14 }
 0xb03   :  { %v7883_v0 = vpop.f32.mrf.mxu0  ;;  %3875 = vmatpush1.msra.mxu0 %v7782_v27 }
 0xb04   :  { %3876 = vmatprep.subr.mxu0 %v7780_v61 }
 0xb05   :  { %v7889_v38 = vpop.f32.mrf.mxu0  ;;  %3877 = vmatpush1.msra.mxu0 %v7778_v20  ;;  %v7946_v20 = vpop.f32.mrf.mxu1 }
 0xb06   :  { %3878 = vmatprep.subr.mxu0 %v7776_v19 }
 0xb07   :  { %v7893_v53 = vpop.f32.mrf.mxu0  ;;  %3879 = vmatpush1.msra.mxu0 %v7774_v17  ;;  %v7952_v19 = vpop.f32.mrf.mxu1 }
 0xb08   :  { %3880 = vmatprep.subr.mxu0 %v7772_v18 }
 0xb09   :  { %v7899_v62 = vpop.f32.mrf.mxu0  ;;  %3881 = vmatpush1.msra.mxu0 %v7770_v24 }
 0xb0a   :  { %3882 = vmatprep.subr.mxu0 %v7768_v47 }
 0xb0b   :  { %v7903_v21 = vpop.f32.mrf.mxu0  ;;  %3883 = vmatpush1.msra.mxu0 %v7766_v2  ;;  %v7958_v2 = vpop.f32.mrf.mxu1 }
 0xb0c   :  { %3884 = vmatprep.subr.mxu0 %v7764_v49 }
 0xb0d   :  { %v7909_v16 = vpop.f32.mrf.mxu0  ;;  %3885 = vmatpush1.msra.mxu0 %v7762_v54  ;;  %v7964_v49 = vpop.f32.mrf.mxu1 }
 0xb0e   :  { %3886 = vmatprep.subr.mxu0 %v7759_v10 }
 0xb0f   :  { %v7913_v42 = vpop.f32.mrf.mxu0  ;;  %3887 = vmatpush1.msra.mxu0 %v7757_v8  ;;  %v7970_v8 = vpop.f32.mrf.mxu1 }
 0xb11   :  { %v7918_v41 = vpop.f32.mrf.mxu0  ;;  %v7976_v11 = vpop.f32.mrf.mxu1 }
 0xb12   :  { %9342 = vst [vmem:[#allocation93_spill] sm:$0xff] %v7918_v41 }
 0xb13   :  { %v7920_v37 = vpop.f32.mrf.mxu0 }
 0xb15   :  { %v7924_v6 = vpop.f32.mrf.mxu0 }
 0xb16   :  { %9343 = vst [vmem:[#allocation89_spill] sm:$0xff] %v7924_v6 }
 0xb17   :  { %v7926_v15 = vpop.f32.mrf.mxu0 }
 0xb18   :  { %9344 = vst [vmem:[#allocation91_spill] sm:$0xff] %v7926_v15 }
 0xb19   :  { %v7930_v58 = vpop.f32.mrf.mxu0 }
 0xb1a   :  { %9345 = vst [vmem:[#allocation86_spill] sm:$0xff] %v7930_v58 }
 0xb1b   :  { %v7932_v10 = vpop.f32.mrf.mxu0 }
 0xb1c   :  { %9346 = vst [vmem:[#allocation88_spill] sm:$0xff] %v7932_v10 }
 0xb1d   :  { %v7936_v60 = vpop.f32.mrf.mxu0 }
 0xb1e   :  { %9347 = vst [vmem:[#allocation58_spill] sm:$0xff] %v7936_v60 }
 0xb1f   :  { %v7938_v44 = vpop.f32.mrf.mxu0 }
 0xb20   :  { %9348 = vst [vmem:[#allocation53_spill] sm:$0xff] %v7938_v44 }
 0xb21   :  { %v7942_v27 = vpop.f32.mrf.mxu0 }
 0xb22   :  { %9349 = vst [vmem:[#allocation59_spill] sm:$0xff] %v7942_v27 }
 0xb23   :  { %v7944_v14 = vpop.f32.mrf.mxu0 }
 0xb24   :  { %9350 = vst [vmem:[#allocation55_spill] sm:$0xff] %v7944_v14 }
 0xb25   :  { %v7948_v61 = vpop.f32.mrf.mxu0 }
 0xb26   :  { %9351 = vst [vmem:[#allocation61_spill] sm:$0xff] %v7948_v61 }
 0xb27   :  { %v7950_v17 = vpop.f32.mrf.mxu0 }
 0xb28   :  { %9352 = vst [vmem:[#allocation60_spill] sm:$0xff] %v7950_v17 }
 0xb29   :  { %v7954_v24 = vpop.f32.mrf.mxu0 }
 0xb2a   :  { %9353 = vst [vmem:[#allocation63_spill] sm:$0xff] %v7954_v24 }
 0xb2b   :  { %v7956_v18 = vpop.f32.mrf.mxu0 }
 0xb2c   :  { %9354 = vst [vmem:[#allocation62_spill] sm:$0xff] %v7956_v18 }
 0xb2d   :  { %v7960_v47 = vpop.f32.mrf.mxu0 }
 0xb2e   :  { %9355 = vst [vmem:[#allocation65_spill] sm:$0xff] %v7960_v47 }
 0xb2f   :  { %v7962_v54 = vpop.f32.mrf.mxu0 }
 0xb30   :  { %9356 = vst [vmem:[#allocation64_spill] sm:$0xff] %v7962_v54  ;;  %3888 = vmatprep.subr.mxu0 %v7962_v54 }
 0xb31   :  { %3889 = vmatpush2.msra.mxu0 %v7960_v47  ;;  %v7982_v47 = vpop.f32.mrf.mxu1 }
 0xb32   :  { %3890 = vmatprep.subr.mxu0 %v7956_v18 }
 0xb33   :  { %3891 = vmatpush2.msra.mxu0 %v7954_v24  ;;  %v3751_v54 = vpop.f32.mrf.mxu1 }
 0xb34   :  { %3892 = vmatprep.subr.mxu0 %v7950_v17 }
 0xb35   :  { %3893 = vmatpush2.msra.mxu0 %v7948_v61  ;;  %v3755_v24 = vpop.f32.mrf.mxu1 }
 0xb36   :  { %3894 = vmatprep.subr.mxu0 %v7944_v14 }
 0xb37   :  { %3895 = vmatpush2.msra.mxu0 %v7942_v27  ;;  %v3757_v18 = vpop.f32.mrf.mxu1 }
 0xb38   :  { %3896 = vmatprep.subr.mxu0 %v7938_v44 }
 0xb39   :  { %3897 = vmatpush2.msra.mxu0 %v7936_v60  ;;  %v3761_v61 = vpop.f32.mrf.mxu1 }
 0xb3a   :  { %3898 = vmatprep.subr.mxu0 %v7932_v10 }
 0xb3b   :  { %3899 = vmatpush2.msra.mxu0 %v7930_v58  ;;  %v3763_v17 = vpop.f32.mrf.mxu1 }
 0xb3c   :  { %3900 = vmatprep.subr.mxu0 %v7926_v15 }
 0xb3d   :  { %3901 = vmatpush2.msra.mxu0 %v7924_v6  ;;  %v3767_v27 = vpop.f32.mrf.mxu1 }
 0xb3e   :  { %3902 = vmatprep.subr.mxu0 %v7920_v37 }
 0xb3f   :  { %3903 = vmatpush2.msra.mxu0 %v7918_v41  ;;  %v3769_v14 = vpop.f32.mrf.mxu1 }
 0xb40   :  { %3904 = vmatprep.subr.mxu0 %v7913_v42 }
 0xb41   :  { %3905 = vmatpush2.msra.mxu0 %v7909_v16  ;;  %v3773_v60 = vpop.f32.mrf.mxu1 }
 0xb42   :  { %3906 = vmatprep.subr.mxu0 %v7903_v21 }
 0xb43   :  { %3907 = vmatpush2.msra.mxu0 %v7899_v62  ;;  %v3775_v44 = vpop.f32.mrf.mxu1 }
 0xb44   :  { %3908 = vmatprep.subr.mxu0 %v7893_v53 }
 0xb45   :  { %3909 = vmatpush2.msra.mxu0 %v7889_v38 }
 0xb46   :  { %3910 = vmatprep.subr.mxu0 %v7883_v0 }
 0xb47   :  { %3911 = vmatpush2.msra.mxu0 %v7879_v40 }
 0xb48   :  { %3912 = vmatprep.subr.mxu0 %v7873_v12 }
 0xb49   :  { %3913 = vmatpush2.msra.mxu0 %v7869_v29 }
 0xb4a   :  { %3914 = vmatprep.subr.mxu0 %v7863_v22 }
 0xb4b   :  { %3915 = vmatpush2.msra.mxu0 %v7859_v51 }
 0xb4c   :  { %3916 = vmatprep.subr.mxu0 %v7853_v52 }
 0xb4d   :  { %3917 = vmatpush2.msra.mxu0 %v7849_v48 }
 0xb4e   :  { %3918 = vmatprep.subr.mxu0 %v7843_v45 }
 0xb4f   :  { %3919 = vmatpush2.msra.mxu0 %v7839_v25 }
 0xb50   :  { %3921 = vmatmul.mubr.f32.vlgmr.msra.gmra.mxu0 %v7752_v36  ;;  %v3779_v36 = vpop.f32.mrf.mxu1 }
 0xb51   :  { %3926 = vmatprep.mubr.f32.mxu0 %v7800_v7 }
 0xb54   :  { %3927 = vmatmul.mubr.f32.gmra.mxu0 %v7794_v57  ;;  %v3781_v57 = vpop.f32.mrf.mxu1 }
 0xb55   :  { %3932 = vmatprep.mubr.f32.mxu0 %v7812_v1 }
 0xb56   :  { %v3785_v7 = vpop.f32.mrf.mxu1 }
 0xb58   :  { %3933 = vmatmul.mubr.f32.gmra.mxu0 %v7806_v23  ;;  %v3787_v23 = vpop.f32.mrf.mxu1 }
 0xb59   :  { %3938 = vmatprep.mubr.f32.mxu0 %v7824_v56 }
 0xb5a   :  { %v3791_v1 = vpop.f32.mrf.mxu1 }
 0xb5c   :  { %3939 = vmatmul.mubr.f32.gmra.mxu0 %v7818_v59  ;;  %v3793_v59 = vpop.f32.mrf.mxu1 }
 0xb5d   :  { %3944 = vmatprep.mubr.f32.mxu0 %v7836_v33 }
 0xb5e   :  { %v3797_v56 = vpop.f32.mrf.mxu1 }
 0xb60   :  { %3945 = vmatmul.mubr.f32.gmra.mxu0 %v7830_v30 }
 0xb61   :  { %3950 = vmatprep.mubr.f32.mxu0 %v7856_v5 }
 0xb64   :  { %3951 = vmatmul.mubr.f32.gmra.mxu0 %v7846_v50 }
 0xb65   :  { %3956 = vmatprep.mubr.f32.mxu0 %v7876_v34 }
 0xb68   :  { %3957 = vmatmul.mubr.f32.gmra.mxu0 %v7866_v46 }
 0xb69   :  { %3962 = vmatprep.mubr.f32.mxu0 %v7896_v9 }
 0xb6c   :  { %3963 = vmatmul.mubr.f32.gmra.mxu0 %v7886_v35 }
 0xb6d   :  { %3968 = vmatprep.mubr.f32.mxu0 %v7916_v26  ;;  %v3799_v26 = vpop.f32.mrf.mxu1 }
 0xb70   :  { %3969 = vmatmul.mubr.f32.gmra.mxu0 %v7906_v4 }
 0xb71   :  { %3974 = vmatprep.mubr.f32.mxu0 %v7928_v43  ;;  %v3803_v43 = vpop.f32.mrf.mxu1 }
 0xb74   :  { %3975 = vmatmul.mubr.f32.gmra.mxu0 %v7922_v55 }
 0xb75   :  { %3980 = vmatprep.mubr.f32.mxu0 %v7940_v13  ;;  %v3805_v13 = vpop.f32.mrf.mxu1 }
 0xb78   :  { %3981 = vmatmul.mubr.f32.gmra.mxu0 %v7934_v3  ;;  %v3809_v3 = vpop.f32.mrf.mxu1 }
 0xb79   :  { %3986 = vmatprep.mubr.f32.mxu0 %v7952_v19 }
 0xb7a   :  { %v3811_v19 = vpop.f32.mrf.mxu1 }
 0xb7c   :  { %3987 = vmatmul.mubr.f32.gmra.mxu0 %v7946_v20 }
 0xb7d   :  { %3992 = vmatprep.mubr.f32.mxu0 %v7964_v49  ;;  %v3815_v49 = vpop.f32.mrf.mxu1 }
 0xb80   :  { %3993 = vmatmul.mubr.f32.gmra.mxu0 %v7958_v2  ;;  %v3817_v2 = vpop.f32.mrf.mxu1 }
 0xb81   :  { %3998 = vmatprep.mubr.f32.mxu0 %v7976_v11 }
 0xb82   :  { %v3821_v11 = vpop.f32.mrf.mxu1 }
 0xb84   :  { %3999 = vmatmul.mubr.f32.gmra.mxu0 %v7970_v8  ;;  %v3823_v8 = vpop.f32.mrf.mxu1 }
 0xb85   :  { %4004 = vmatprep.mubr.f32.mxu0 %v3751_v54 }
 0xb86   :  { %v3827_v54 = vpop.f32.mrf.mxu1 }
 0xb88   :  { %4005 = vmatmul.mubr.f32.gmra.mxu0 %v7982_v47  ;;  %v3829_v47 = vpop.f32.mrf.mxu1 }
 0xb89   :  { %4010 = vmatprep.mubr.f32.mxu0 %v3757_v18 }
 0xb8c   :  { %4011 = vmatmul.mubr.f32.gmra.mxu0 %v3755_v24  ;;  %v3833_v24 = vpop.f32.mrf.mxu1 }
 0xb8d   :  { %4016 = vmatprep.mubr.f32.mxu0 %v3763_v17 }
 0xb8e   :  { %v3835_v18 = vpop.f32.mrf.mxu1 }
 0xb90   :  { %4017 = vmatmul.mubr.f32.gmra.mxu0 %v3761_v61  ;;  %v3839_v17 = vpop.f32.mrf.mxu1 }
 0xb91   :  { %4022 = vmatprep.mubr.f32.mxu0 %v3769_v14 }
 0xb92   :  { %v3841_v20 = vpop.f32.mrf.mxu1 }
 0xb94   :  { %4023 = vmatmul.mubr.f32.gmra.mxu0 %v3767_v27  ;;  %v3845_v61 = vpop.f32.mrf.mxu1 }
 0xb95   :  { %4028 = vmatprep.mubr.f32.mxu0 %v3775_v44 }
 0xb96   :  { %v3847_v27 = vpop.f32.mrf.mxu1 }
 0xb98   :  { %4029 = vmatmul.mubr.f32.gmra.mxu0 %v3773_v60  ;;  %v3851_v14 = vpop.f32.mrf.mxu1 }
 0xb99   :  { %4034 = vmatprep.mubr.f32.mxu0 %v3781_v57 }
 0xb9a   :  { %v3853_v44 = vpop.f32.mrf.mxu1 }
 0xb9c   :  { %4035 = vmatmul.mubr.f32.gmra.mxu0 %v3779_v36 }
 0xb9d   :  { %4040 = vmatprep.mubr.f32.mxu0 %v3787_v23 }
 0xba0   :  { %4041 = vmatmul.mubr.f32.gmra.mxu0 %v3785_v7 }
 0xba1   :  { %4046 = vmatprep.mubr.f32.mxu0 %v3793_v59 }
 0xba4   :  { %4047 = vmatmul.mubr.f32.gmra.mxu0 %v3791_v1 }
 0xba5   :  { %4052 = vmatprep.mubr.f32.mxu0 %v3799_v26 }
 0xba8   :  { %4053 = vmatmul.mubr.f32.gmra.mxu0 %v3797_v56 }
 0xba9   :  { %4058 = vmatprep.mubr.f32.mxu0 %v3805_v13 }
 0xbac   :  { %4059 = vmatmul.mubr.f32.gmra.mxu0 %v3803_v43 }
 0xbad   :  { %4064 = vmatprep.mubr.f32.mxu0 %v3811_v19 }
 0xbb0   :  { %4065 = vmatmul.mubr.f32.gmra.mxu0 %v3809_v3 }
 0xbb1   :  { %4070 = vmatprep.mubr.f32.mxu0 %v3817_v2 }
 0xbb4   :  { %4071 = vmatmul.mubr.f32.gmra.mxu0 %v3815_v49 }
 0xbb5   :  { %4076 = vmatprep.mubr.f32.mxu0 %v3823_v8 }
 0xbb8   :  { %4077 = vmatmul.mubr.f32.gmra.mxu0 %v3821_v11 }
 0xbb9   :  { %4082 = vmatprep.mubr.f32.mxu0 %v3829_v47 }
 0xbbc   :  { %4083 = vmatmul.mubr.f32.gmra.mxu0 %v3827_v54 }
 0xbbd   :  { %4088 = vmatprep.mubr.f32.mxu0 %v3835_v18 }
 0xbc0   :  { %4089 = vmatmul.mubr.f32.gmra.mxu0 %v3833_v24 }
 0xbc1   :  { %4094 = vmatprep.mubr.f32.mxu0 %v3841_v20 }
 0xbc4   :  { %4095 = vmatmul.mubr.f32.gmra.mxu0 %v3839_v17 }
 0xbc5   :  { %4100 = vmatprep.mubr.f32.mxu0 %v3847_v27 }
 0xbc8   :  { %4101 = vmatmul.mubr.f32.gmra.mxu0 %v3845_v61 }
 0xbc9   :  { %4106 = vmatprep.mubr.f32.mxu0 %v3853_v44 }
 0xbcc   :  { %4107 = vmatmul.mubr.f32.gmra.mxu0 %v3851_v14 }
 0xc10   :  { %v8032_v60 = vpop.f32.mrf.mxu0 }
 0xc12   :  { %v8034_v55 = vpop.f32.mrf.mxu0 }
 0xc14   :  { %v8036_v4 = vpop.f32.mrf.mxu0 }
 0xc16   :  { %v8038_v30 = vpop.f32.mrf.mxu0 }
 0xc18   :  { %v8040_v9 = vpop.f32.mrf.mxu0 }
 0xc1a   :  { %v8042_v33 = vpop.f32.mrf.mxu0 }
 0xc1c   :  { %v8044_v50 = vpop.f32.mrf.mxu0 }
 0xc1e   :  { %v8046_v5 = vpop.f32.mrf.mxu0 }
 0xc20   :  { %v8048_v46 = vpop.f32.mrf.mxu0 }
 0xc22   :  { %v8050_v34 = vpop.f32.mrf.mxu0 }
 0xc24   :  { %v8052_v35 = vpop.f32.mrf.mxu0 }
 0xc26   :  { %v8054_v36 = vpop.f32.mrf.mxu0 }
 0xc28   :  { %v8056_v57 = vpop.f32.mrf.mxu0 }
 0xc2a   :  { %v8058_v7 = vpop.f32.mrf.mxu0 }
 0xc2c   :  { %v8060_v23 = vpop.f32.mrf.mxu0 }
 0xc2e   :  { %v3966_v1 = vpop.f32.mrf.mxu0 }
 0xc30   :  { %v3970_v59 = vpop.f32.mrf.mxu0 }
 0xc32   :  { %v3972_v56 = vpop.f32.mrf.mxu0 }
 0xc34   :  { %v3976_v26 = vpop.f32.mrf.mxu0 }
 0xc36   :  { %v3978_v43 = vpop.f32.mrf.mxu0 }
 0xc38   :  { %v3982_v13 = vpop.f32.mrf.mxu0 }
 0xc3a   :  { %v3984_v3 = vpop.f32.mrf.mxu0 }
 0xc3c   :  { %v3988_v19 = vpop.f32.mrf.mxu0 }
 0xc3e   :  { %v3990_v49 = vpop.f32.mrf.mxu0 }
 0xc40   :  { %v3994_v2 = vpop.f32.mrf.mxu0 }
 0xc42   :  { %v3996_v11 = vpop.f32.mrf.mxu0 }
 0xc43   :  { %v4138_v41 = vsub.f32 0.0, %v3996_v11 }
 0xc44   :  { %v4000_v8 = vpop.f32.mrf.mxu0 }
 0xc45   :  { %v4139_v6 = vsub.f32 %v9245_v63, %v4000_v8  ;;  %v9359_v63 = vld [vmem:[#allocation23_spill] sm:$0xff] }
 0xc46   :  { %v4002_v54 = vpop.f32.mrf.mxu0  ;;  %v4133_v8 = vsub.f32 %v9359_v63, %v3982_v13  ;;  %v9362_v13 = vld [vmem:[#allocation27_spill] sm:$0xff] }
 0xc47   :  { %v4140_v10 = vsub.f32 0.0, %v4002_v54  ;;  %v4134_v54 = vsub.f32 0.0, %v3984_v3  ;;  %v4128_v3 = vsub.f32 0.0, %v3966_v1  ;;  %v9364_v1 = vld [vmem:[#allocation29_spill] sm:$0xff] }
 0xc48   :  { %v4006_v47 = vpop.f32.mrf.mxu0 }
 0xc49   :  { %v4141_v44 = vsub.f32 %v9246_v28, %v4006_v47  ;;  %v9358_v28 = vld [vmem:[#allocation22_spill] sm:$0xff] }
 0xc4a   :  { %v4008_v24 = vpop.f32.mrf.mxu0  ;;  %v4135_v47 = vsub.f32 %v9358_v28, %v3988_v19 }
 0xc4b   :  { %v4142_v14 = vsub.f32 0.0, %v4008_v24  ;;  %v4136_v24 = vsub.f32 0.0, %v3990_v49 }
 0xc4c   :  { %v4012_v18 = vpop.f32.mrf.mxu0 }
 0xc4d   :  { %v4143_v61 = vsub.f32 %v9247_v31, %v4012_v18 }
 0xc4e   :  { %v4014_v17 = vpop.f32.mrf.mxu0 }
 0xc4f   :  { %v4144_v20 = vsub.f32 0.0, %v4014_v17  ;;  %v9357_v17 = vld [vmem:[#allocation21_spill] sm:$0xff] }
 0xc50   :  { %v8063_v27 = vpop.f32.mrf.mxu0  ;;  %v4137_v31 = vsub.f32 %v9357_v17, %v3994_v2  ;;  %v9360_v2 = vld [vmem:[#allocation25_spill] sm:$0xff] }
 0xc51   :  { %4177 = vmatprep.subr.mxu1 %v4144_v20  ;;  %v4131_v11 = vsub.f32 %v9360_v2, %v3976_v26  ;;  %v4126_v26 = vsub.f32 0.0, %v8058_v7  ;;  %v9365_v7 = vld [vmem:[#allocation30_spill] sm:$0xff] }
 0xc52   :  { %v8066_v58 = vpop.f32.mrf.mxu0  ;;  %4178 = vmatpush1.msra.mxu1 %v4143_v61 }
 0xc53   :  { %4179 = vmatprep.subr.mxu1 %v4142_v14 }
 0xc54   :  { %v8069_v15 = vpop.f32.mrf.mxu0  ;;  %4180 = vmatpush1.msra.mxu1 %v4141_v44  ;;  %v4127_v44 = vsub.f32 %v9362_v13, %v8060_v23  ;;  %v4122_v23 = vsub.f32 0.0, %v8050_v34  ;;  %v9367_v34 = vld [vmem:[#allocation32_spill] sm:$0xff] }
 0xc55   :  { %4181 = vmatprep.subr.mxu1 %v4140_v10  ;;  %v4132_v10 = vsub.f32 0.0, %v3978_v43  ;;  %v9363_v43 = vld [vmem:[#allocation28_spill] sm:$0xff] }
 0xc56   :  { %v8072_v18 = vpop.f32.mrf.mxu0  ;;  %4182 = vmatpush1.msra.mxu1 %v4139_v6  ;;  %v4130_v6 = vsub.f32 0.0, %v3972_v56  ;;  %v4125_v56 = vsub.f32 %v9363_v43, %v8056_v57  ;;  %v4120_v57 = vsub.f32 0.0, %v8046_v5  ;;  %v9368_v5 = vld [vmem:[#allocation33_spill] sm:$0xff] }
 0xc57   :  { %4183 = vmatprep.subr.mxu1 %v4138_v41  ;;  %v9361_v41 = vld [vmem:[#allocation26_spill] sm:$0xff] }
 0xc58   :  { %v8075_v20 = vpop.f32.mrf.mxu0  ;;  %4184 = vmatpush1.msra.mxu1 %v4137_v31  ;;  %v4129_v19 = vsub.f32 %v9361_v41, %v3970_v59  ;;  %v4124_v59 = vsub.f32 0.0, %v8054_v36  ;;  %v9366_v36 = vld [vmem:[#allocation31_spill] sm:$0xff] }
 0xc59   :  { %4185 = vmatprep.subr.mxu1 %v4136_v24  ;;  %v4123_v24 = vsub.f32 %v9364_v1, %v8052_v35  ;;  %v4119_v63 = vsub.f32 %v9366_v36, %v8044_v50  ;;  %v4118_v35 = vsub.f32 0.0, %v8042_v33  ;;  %v4114_v50 = vsub.f32 0.0, %v8034_v55  ;;  %v9369_v33 = vld [vmem:[#allocation34_spill] sm:$0xff] }
 0xc5a   :  { %v8078_v61 = vpop.f32.mrf.mxu0  ;;  %4186 = vmatpush1.msra.mxu1 %v4135_v47  ;;  %v4121_v47 = vsub.f32 %v9365_v7, %v8048_v46  ;;  %v4116_v46 = vsub.f32 0.0, %v8038_v30  ;;  %v4113_v41 = vsub.f32 %v9369_v33, %v8032_v60 }
 0xc5b   :  { %4187 = vmatprep.subr.mxu1 %v4134_v54 }
 0xc5c   :  { %v8081_v14 = vpop.f32.mrf.mxu0  ;;  %4188 = vmatpush1.msra.mxu1 %v4133_v8 }
 0xc5d   :  { %4189 = vmatprep.subr.mxu1 %v4132_v10  ;;  %v4117_v10 = vsub.f32 %v9367_v34, %v8040_v9 }
 0xc5e   :  { %v8084_v49 = vpop.f32.mrf.mxu0  ;;  %4190 = vmatpush1.msra.mxu1 %v4131_v11  ;;  %v4115_v11 = vsub.f32 %v9368_v5, %v8036_v4 }
 0xc5f   :  { %4191 = vmatprep.subr.mxu1 %v4130_v6 }
 0xc60   :  { %v8088_v17 = vpop.f32.mrf.mxu0  ;;  %4192 = vmatpush1.msra.mxu1 %v4129_v19 }
 0xc61   :  { %4193 = vmatprep.subr.mxu1 %v4128_v3 }
 0xc62   :  { %v8093_v31 = vpop.f32.mrf.mxu0  ;;  %4194 = vmatpush1.msra.mxu1 %v4127_v44 }
 0xc63   :  { %4195 = vmatprep.subr.mxu1 %v4126_v26 }
 0xc64   :  { %v8098_v28 = vpop.f32.mrf.mxu0  ;;  %4196 = vmatpush1.msra.mxu1 %v4125_v56 }
 0xc65   :  { %4197 = vmatprep.subr.mxu1 %v4124_v59 }
 0xc66   :  { %v8103_v54 = vpop.f32.mrf.mxu0  ;;  %4198 = vmatpush1.msra.mxu1 %v4123_v24 }
 0xc67   :  { %4199 = vmatprep.subr.mxu1 %v4122_v23 }
 0xc68   :  { %v8108_v8 = vpop.f32.mrf.mxu0  ;;  %4200 = vmatpush1.msra.mxu1 %v4121_v47 }
 0xc69   :  { %4201 = vmatprep.subr.mxu1 %v4120_v57 }
 0xc6a   :  { %v8113_v2 = vpop.f32.mrf.mxu0  ;;  %4202 = vmatpush1.msra.mxu1 %v4119_v63 }
 0xc6b   :  { %4203 = vmatprep.subr.mxu1 %v4118_v35  ;;  %v9370_v35 = vld [vmem:[#allocation37_spill] sm:$0xff] }
 0xc6c   :  { %v4060_v6 = vpop.f32.mrf.mxu0  ;;  %4204 = vmatpush1.msra.mxu1 %v4117_v10 }
 0xc6d   :  { %4205 = vmatprep.subr.mxu1 %v4116_v46  ;;  %v9371_v46 = vld [vmem:[#allocation38_spill] sm:$0xff] }
 0xc6e   :  { %v4062_v19 = vpop.f32.mrf.mxu0  ;;  %4206 = vmatpush1.msra.mxu1 %v4115_v11 }
 0xc6f   :  { %4207 = vmatprep.subr.mxu1 %v4114_v50  ;;  %v9372_v50 = vld [vmem:[#allocation39_spill] sm:$0xff] }
 0xc70   :  { %v4066_v9 = vpop.f32.mrf.mxu0  ;;  %4208 = vmatpush1.msra.mxu1 %v4113_v41  ;;  %v9373_v41 = vld [vmem:[#allocation40_spill] sm:$0xff] }
 0xc72   :  { %v4068_v3 = vpop.f32.mrf.mxu0 }
 0xc74   :  { %v4072_v13 = vpop.f32.mrf.mxu0 }
 0xc76   :  { %v4074_v30 = vpop.f32.mrf.mxu0 }
 0xc78   :  { %v4078_v44 = vpop.f32.mrf.mxu0 }
 0xc7a   :  { %v4080_v26 = vpop.f32.mrf.mxu0 }
 0xc7c   :  { %v4084_v43 = vpop.f32.mrf.mxu0 }
 0xc7e   :  { %v4086_v4 = vpop.f32.mrf.mxu0 }
 0xc7f   :  { %v4168_v33 = vsub.f32 %v9372_v50, %v4086_v4  ;;  %v9395_v50 = vld [vmem:[#allocation79_spill] sm:$0xff] }
 0xc80   :  { %v4090_v56 = vpop.f32.mrf.mxu0 }
 0xc81   :  { %v4169_v11 = vsub.f32 0.0, %v4090_v56  ;;  %v4161_v56 = vsub.f32 0.0, %v4066_v9  ;;  %v9379_v9 = vld [vmem:[#allocation50_spill] sm:$0xff] }
 0xc82   :  { %v4092_v59 = vpop.f32.mrf.mxu0 }
 0xc83   :  { %v4170_v5 = vsub.f32 %v9371_v46, %v4092_v59  ;;  %v9390_v46 = vld [vmem:[#allocation109_spill] sm:$0xff] }
 0xc84   :  { %v4096_v1 = vpop.f32.mrf.mxu0 }
 0xc85   :  { %v4171_v10 = vsub.f32 0.0, %v4096_v1  ;;  %v4163_v1 = vsub.f32 0.0, %v4072_v13  ;;  %v9378_v13 = vld [vmem:[#allocation49_spill] sm:$0xff] }
 0xc86   :  { %v4098_v55 = vpop.f32.mrf.mxu0 }
 0xc87   :  { %v4172_v34 = vsub.f32 %v9370_v35, %v4098_v55 }
 0xc88   :  { %v4102_v24 = vpop.f32.mrf.mxu0 }
 0xc89   :  { %v4173_v63 = vsub.f32 0.0, %v4102_v24  ;;  %v4165_v24 = vsub.f32 0.0, %v4078_v44  ;;  %v4157_v44 = vsub.f32 0.0, %v8108_v8  ;;  %v4151_v8 = vsub.f32 0.0, %v8081_v14 }
 0xc8a   :  { %v4104_v23 = vpop.f32.mrf.mxu0  ;;  %v4145_v14 = vsub.f32 0.0, %v8063_v27  ;;  %v9392_v27 = vld [vmem:[#allocation101_spill] sm:$0xff] }
 0xc8b   :  { %v4174_v36 = vsub.f32 %v9262_v32, %v4104_v23  ;;  %v4166_v32 = vsub.f32 %v9373_v41, %v4080_v26  ;;  %v9374_v23 = vld [vmem:[#allocation41_spill] sm:$0xff]  ;;  %v9377_v26 = vld [vmem:[#allocation47_spill] sm:$0xff]  ;;  %v9398_v41 = vld [vmem:[#allocation78_spill] sm:$0xff] }
 0xc8c   :  { %v4108_v7 = vpop.f32.mrf.mxu0  ;;  %v4164_v55 = vsub.f32 %v9374_v23, %v4074_v30  ;;  %v4156_v30 = vsub.f32 %v9378_v13, %v8103_v54  ;;  %v9381_v54 = vld [vmem:[#allocation54_spill] sm:$0xff]  ;;  %v9401_v23 = vld [vmem:[#allocation20_spill] sm:$0xff] }
 0xc8d   :  { %v4175_v57 = vsub.f32 0.0, %v4108_v7  ;;  %v9375_v7 = vld [vmem:[#allocation43_spill] sm:$0xff]  ;;  %v9413_v13 = vld [vmem:[#allocation90_spill] sm:$0xff] }
 0xc8e   :  { %v4110_v60 = vpop.f32.mrf.mxu0  ;;  %v4162_v59 = vsub.f32 %v9375_v7, %v4068_v3  ;;  %v4155_v3 = vsub.f32 0.0, %v8098_v28  ;;  %v4149_v28 = vsub.f32 0.0, %v8075_v20  ;;  %v9385_v20 = vld [vmem:[#allocation46_spill] sm:$0xff]  ;;  %v9404_v7 = vld [vmem:[#allocation19_spill] sm:$0xff] }
 0xc8f   :  { %v4176_v47 = vsub.f32 %v9263_v39, %v4110_v60  ;;  %v4167_v39 = vsub.f32 0.0, %v4084_v43  ;;  %v9376_v60 = vld [vmem:[#allocation45_spill] sm:$0xff]  ;;  %v4159_v43 = vsub.f32 0.0, %v4060_v6  ;;  %v4153_v6 = vsub.f32 0.0, %v8088_v17 }
 0xc90   :  { %v4160_v4 = vsub.f32 %v9376_v60, %v4062_v19  ;;  %v4154_v19 = vsub.f32 %v9379_v9, %v8093_v31  ;;  %v9382_v31 = vld [vmem:[#allocation56_spill] sm:$0xff]  ;;  %v4147_v17 = vsub.f32 0.0, %v8069_v15  ;;  %v9407_v60 = vld [vmem:[#allocation103_spill] sm:$0xff] }
 0xc91   :  { %4209 = vmatprep.subr.mxu1 %v4176_v47  ;;  %v4158_v47 = vsub.f32 %v9377_v26, %v8113_v2  ;;  %v9380_v2 = vld [vmem:[#allocation52_spill] sm:$0xff]  ;;  %v9410_v26 = vld [vmem:[#allocation105_spill] sm:$0xff] }
 0xc92   :  { %4210 = vmatpush2.msra.mxu1 %v4175_v57  ;;  %v4152_v57 = vsub.f32 %v9380_v2, %v8084_v49  ;;  %v9383_v49 = vld [vmem:[#allocation57_spill] sm:$0xff]  ;;  %v9389_v15 = vld [vmem:[#allocation100_spill] sm:$0xff] }
 0xc93   :  { %4211 = vmatprep.subr.mxu1 %v4174_v36  ;;  %v4150_v36 = vsub.f32 %v9381_v54, %v8078_v61  ;;  %v4146_v35 = vsub.f32 %v9383_v49, %v8066_v58  ;;  %v9384_v61 = vld [vmem:[#allocation42_spill] sm:$0xff]  ;;  %v9391_v58 = vld [vmem:[#allocation85_spill] sm:$0xff] }
 0xc94   :  { %4212 = vmatpush2.msra.mxu1 %v4173_v63  ;;  %v4148_v63 = vsub.f32 %v9382_v31, %v8072_v18  ;;  %v9387_v18 = vld [vmem:[#allocation51_spill] sm:$0xff] }
 0xc95   :  { %4213 = vmatprep.subr.mxu1 %v4172_v34  ;;  %v9386_v34 = vld [vmem:[#allocation44_spill] sm:$0xff] }
 0xc96   :  { %4214 = vmatpush2.msra.mxu1 %v4171_v10  ;;  %v9388_v10 = vld [vmem:[#allocation48_spill] sm:$0xff] }
 0xc97   :  { %4215 = vmatprep.subr.mxu1 %v4170_v5  ;;  %v9393_v5 = vld [vmem:[#allocation81_spill] sm:$0xff] }
 0xc98   :  { %4216 = vmatpush2.msra.mxu1 %v4169_v11  ;;  %v9394_v11 = vld [vmem:[#allocation83_spill] sm:$0xff] }
 0xc99   :  { %4217 = vmatprep.subr.mxu1 %v4168_v33  ;;  %v9396_v33 = vld [vmem:[#allocation80_spill] sm:$0xff] }
 0xc9a   :  { %4218 = vmatpush2.msra.mxu1 %v4167_v39  ;;  %v9397_v39 = vld [vmem:[#allocation77_spill] sm:$0xff] }
 0xc9b   :  { %4219 = vmatprep.subr.mxu1 %v4166_v32  ;;  %v9399_v32 = vld [vmem:[#allocation76_spill] sm:$0xff] }
 0xc9c   :  { %4220 = vmatpush2.msra.mxu1 %v4165_v24  ;;  %v9400_v24 = vld [vmem:[#allocation75_spill] sm:$0xff] }
 0xc9d   :  { %4221 = vmatprep.subr.mxu1 %v4164_v55  ;;  %v9402_v55 = vld [vmem:[#allocation74_spill] sm:$0xff] }
 0xc9e   :  { %4222 = vmatpush2.msra.mxu1 %v4163_v1  ;;  %v9403_v1 = vld [vmem:[#allocation18_spill] sm:$0xff] }
 0xc9f   :  { %4223 = vmatprep.subr.mxu1 %v4162_v59  ;;  %v9405_v59 = vld [vmem:[#allocation35_spill] sm:$0xff] }
 0xca0   :  { %4224 = vmatpush2.msra.mxu1 %v4161_v56  ;;  %v9406_v56 = vld [vmem:[#allocation36_spill] sm:$0xff] }
 0xca1   :  { %4225 = vmatprep.subr.mxu1 %v4160_v4  ;;  %v9408_v4 = vld [vmem:[#allocation108_spill] sm:$0xff] }
 0xca2   :  { %4226 = vmatpush2.msra.mxu1 %v4159_v43  ;;  %v9409_v43 = vld [vmem:[#allocation97_spill] sm:$0xff] }
 0xca3   :  { %4227 = vmatprep.subr.mxu1 %v4158_v47  ;;  %v9411_v47 = vld [vmem:[#allocation92_spill] sm:$0xff] }
 0xca4   :  { %4228 = vmatpush2.msra.mxu1 %v4157_v44  ;;  %v9412_v44 = vld [vmem:[#allocation98_spill] sm:$0xff] }
 0xca5   :  { %4229 = vmatprep.subr.mxu1 %v4156_v30  ;;  %v9414_v30 = vld [vmem:[#allocation95_spill] sm:$0xff] }
 0xca6   :  { %4230 = vmatpush2.msra.mxu1 %v4155_v3 }
 0xca7   :  { %4231 = vmatprep.subr.mxu1 %v4154_v19 }
 0xca8   :  { %4232 = vmatpush2.msra.mxu1 %v4153_v6 }
 0xca9   :  { %4233 = vmatprep.subr.mxu1 %v4152_v57 }
 0xcaa   :  { %4234 = vmatpush2.msra.mxu1 %v4151_v8 }
 0xcab   :  { %4235 = vmatprep.subr.mxu1 %v4150_v36 }
 0xcac   :  { %4236 = vmatpush2.msra.mxu1 %v4149_v28 }
 0xcad   :  { %4237 = vmatprep.subr.mxu1 %v4148_v63 }
 0xcae   :  { %4238 = vmatpush2.msra.mxu1 %v4147_v17 }
 0xcaf   :  { %4239 = vmatprep.subr.mxu1 %v4146_v35 }
 0xcb0   :  { %4240 = vmatpush2.msra.mxu1 %v4145_v14 }
 0xcb1   :  { %4242 = vmatmul.mubr.f32.vlgmr.msra.gmra.mxu1 %v9384_v61 }
 0xcb2   :  { %4246 = vmatprep.mubr.f32.mxu1 %v9385_v20 }
 0xcb5   :  { %4247 = vmatmul.mubr.f32.gmra.mxu1 %v9386_v34 }
 0xcb6   :  { %4251 = vmatprep.mubr.f32.mxu1 %v9387_v18 }
 0xcb9   :  { %4252 = vmatmul.mubr.f32.gmra.mxu1 %v9388_v10 }
 0xcba   :  { %4256 = vmatprep.mubr.f32.mxu1 %v9389_v15 }
 0xcbd   :  { %4257 = vmatmul.mubr.f32.gmra.mxu1 %v9390_v46 }
 0xcbe   :  { %4261 = vmatprep.mubr.f32.mxu1 %v9391_v58 }
 0xcc1   :  { %4262 = vmatmul.mubr.f32.gmra.mxu1 %v9392_v27 }
 0xcc2   :  { %4266 = vmatprep.mubr.f32.mxu1 %v9393_v5 }
 0xcc5   :  { %4267 = vmatmul.mubr.f32.gmra.mxu1 %v9394_v11 }
 0xcc6   :  { %4271 = vmatprep.mubr.f32.mxu1 %v9395_v50 }
 0xcc9   :  { %4272 = vmatmul.mubr.f32.gmra.mxu1 %v9396_v33 }
 0xcca   :  { %4276 = vmatprep.mubr.f32.mxu1 %v9397_v39 }
 0xccd   :  { %4277 = vmatmul.mubr.f32.gmra.mxu1 %v9398_v41 }
 0xcce   :  { %4281 = vmatprep.mubr.f32.mxu1 %v9399_v32 }
 0xcd1   :  { %4282 = vmatmul.mubr.f32.gmra.mxu1 %v9400_v24 }
 0xcd2   :  { %4286 = vmatprep.mubr.f32.mxu1 %v9401_v23 }
 0xcd5   :  { %4287 = vmatmul.mubr.f32.gmra.mxu1 %v9402_v55 }
 0xcd6   :  { %4291 = vmatprep.mubr.f32.mxu1 %v9403_v1 }
 0xcd9   :  { %4292 = vmatmul.mubr.f32.gmra.mxu1 %v9404_v7 }
 0xcda   :  { %4296 = vmatprep.mubr.f32.mxu1 %v9405_v59 }
 0xcdd   :  { %4297 = vmatmul.mubr.f32.gmra.mxu1 %v9406_v56 }
 0xcde   :  { %4301 = vmatprep.mubr.f32.mxu1 %v9407_v60 }
 0xce1   :  { %4302 = vmatmul.mubr.f32.gmra.mxu1 %v9408_v4 }
 0xce2   :  { %4306 = vmatprep.mubr.f32.mxu1 %v9409_v43  ;;  %v9431_v43 = vld [vmem:[#allocation24_spill] sm:$0xff] }
 0xce3   :  { %vm4604_vm4 = vcmp.eq.f32.partialorder %v9431_v43, inf  ;;  %vm4606_vm8 = vcmp.eq.f32.partialorder %v9431_v43, 0.0 }
 0xce5   :  { %4307 = vmatmul.mubr.f32.gmra.mxu1 %v9410_v26 }
 0xce6   :  { %4311 = vmatprep.mubr.f32.mxu1 %v9411_v47 }
 0xce9   :  { %4312 = vmatmul.mubr.f32.gmra.mxu1 %v9412_v44 }
 0xcea   :  { %4316 = vmatprep.mubr.f32.mxu1 %v9413_v13 }
 0xced   :  { %4317 = vmatmul.mubr.f32.gmra.mxu1 %v9414_v30 }
 0xcee   :  { %4321 = vmatprep.mubr.f32.mxu1 %v7843_v45  ;;  %v9416_v45 = vld [vmem:[#allocation91_spill] sm:$0xff] }
 0xcf1   :  { %4322 = vmatmul.mubr.f32.gmra.mxu1 %v7839_v25  ;;  %v9415_v25 = vld [vmem:[#allocation93_spill] sm:$0xff] }
 0xcf2   :  { %4326 = vmatprep.mubr.f32.mxu1 %v7853_v52  ;;  %v9418_v52 = vld [vmem:[#allocation88_spill] sm:$0xff] }
 0xcf5   :  { %4327 = vmatmul.mubr.f32.gmra.mxu1 %v7849_v48  ;;  %v9417_v48 = vld [vmem:[#allocation89_spill] sm:$0xff] }
 0xcf6   :  { %4331 = vmatprep.mubr.f32.mxu1 %v7863_v22  ;;  %v9420_v22 = vld [vmem:[#allocation53_spill] sm:$0xff] }
 0xcf9   :  { %4332 = vmatmul.mubr.f32.gmra.mxu1 %v7859_v51  ;;  %v9419_v51 = vld [vmem:[#allocation86_spill] sm:$0xff] }
 0xcfa   :  { %4336 = vmatprep.mubr.f32.mxu1 %v7873_v12  ;;  %v9427_v12 = vld [vmem:[#allocation63_spill] sm:$0xff] }
 0xcfd   :  { %4337 = vmatmul.mubr.f32.gmra.mxu1 %v7869_v29  ;;  %v9426_v29 = vld [vmem:[#allocation62_spill] sm:$0xff] }
 0xcfe   :  { %4341 = vmatprep.mubr.f32.mxu1 %v7883_v0  ;;  %v9429_v0 = vld [vmem:[#allocation65_spill] sm:$0xff] }
 0xd01   :  { %4342 = vmatmul.mubr.f32.gmra.mxu1 %v7879_v40  ;;  %v9428_v40 = vld [vmem:[#allocation64_spill] sm:$0xff] }
 0xd02   :  { %4346 = vmatprep.mubr.f32.mxu1 %v7893_v53 }
 0xd05   :  { %4347 = vmatmul.mubr.f32.gmra.mxu1 %v7889_v38  ;;  %v9430_v38 = vld [vmem:[#allocation15_spill] sm:$0xff] }
 0xd06   :  { %4351 = vmatprep.mubr.f32.mxu1 %v7903_v21  ;;  %v9421_v21 = vld [vmem:[#allocation58_spill] sm:$0xff]  ;;  %4766 = vrsqrt.f32 %v9430_v38  ;;  %vm4548_vm2 = vcmp.eq.f32.partialorder %v9430_v38, inf  ;;  %v4551_v9 = vand.u32 2147483648, %v9430_v38  ;;  %vm4550_vm0 = vcmp.eq.f32.partialorder %v9430_v38, 0.0 }
 0xd07   :  { %4768 = vrsqrt.f32 %v9431_v43 }
 0xd09   :  { %4352 = vmatmul.mubr.f32.gmra.mxu1 %v7899_v62  ;;  %v9422_v62 = vld [vmem:[#allocation55_spill] sm:$0xff] }
 0xd0a   :  { %4356 = vmatprep.mubr.f32.mxu1 %v7913_v42  ;;  %v9423_v42 = vld [vmem:[#allocation59_spill] sm:$0xff] }
 0xd0d   :  { %4357 = vmatmul.mubr.f32.gmra.mxu1 %v7909_v16  ;;  %v9424_v16 = vld [vmem:[#allocation60_spill] sm:$0xff] }
 0xd0e   :  { %4361 = vmatprep.mubr.f32.mxu1 %v7920_v37  ;;  %v9425_v37 = vld [vmem:[#allocation61_spill] sm:$0xff] }
 0xd11   :  { %4362 = vmatmul.mubr.f32.gmra.mxu1 %v9415_v25 }
 0xd12   :  { %4366 = vmatprep.mubr.f32.mxu1 %v9416_v45 }
 0xd13   :  { %v4767_v53 = vpop.eup %4766 }
 0xd14   :  { %v4547_v3 = vmul.f32 %v4767_v53, %v9430_v38 }
 0xd15   :  { %4367 = vmatmul.mubr.f32.gmra.mxu1 %v9417_v48 }
 0xd16   :  { %4371 = vmatprep.mubr.f32.mxu1 %v9418_v52  ;;  %v4549_v19 = vsel %vm4548_vm2, %v9430_v38, %v4547_v3 }
 0xd17   :  { %v4552_v57 = vsel %vm4550_vm0, %v4551_v9, %v4549_v19 }
 0xd19   :  { %4372 = vmatmul.mubr.f32.gmra.mxu1 %v9419_v51  ;;  %v4769_v51 = vpop.eup %4768 }
 0xd1a   :  { %4376 = vmatprep.mubr.f32.mxu1 %v9420_v22 }
 0xd1d   :  { %4377 = vmatmul.mubr.f32.gmra.mxu1 %v9421_v21 }
 0xd1e   :  { %4381 = vmatprep.mubr.f32.mxu1 %v9422_v62 }
 0xd21   :  { %4382 = vmatmul.mubr.f32.gmra.mxu1 %v9423_v42  ;;  %v4603_v42 = vmul.f32 %v4769_v51, %v9431_v43 }
 0xd22   :  { %4386 = vmatprep.mubr.f32.mxu1 %v9424_v16 }
 0xd25   :  { %4387 = vmatmul.mubr.f32.gmra.mxu1 %v9425_v37 }
 0xd26   :  { %4391 = vmatprep.mubr.f32.mxu1 %v9426_v29  ;;  %v4605_v29 = vsel %vm4604_vm4, %v9431_v43, %v4603_v42 }
 0xd29   :  { %4392 = vmatmul.mubr.f32.gmra.mxu1 %v9427_v12 }
 0xd2a   :  { %4396 = vmatprep.mubr.f32.mxu1 %v9428_v40  ;;  %v4607_v40 = vand.u32 2147483648, %v9431_v43 }
 0xd2c   :  { %v4608_v38 = vsel %vm4606_vm8, %v4607_v40, %v4605_v29 }
 0xd2d   :  { %4397 = vmatmul.mubr.f32.gmra.mxu1 %v9429_v0 }
 0xd71   :  { %v4243_v6 = vpop.f32.mrf.mxu1 }
 0xd72   :  { %v4402_v2 = vmul.f32 0.5, %v4243_v6 }
 0xd73   :  { %v4245_v8 = vpop.f32.mrf.mxu1 }
 0xd74   :  { %v4658_v54 = vmul.f32 %v4552_v57, %v4402_v2 }
 0xd75   :  { %v4248_v36 = vpop.f32.mrf.mxu1 }
 0xd76   :  { %4690 = vst.msk [vmem:[%s8467_s1] sm:$0xff] %vm302_vm1, %v4658_v54  ;;  %v4403_v28 = vmul.f32 0.5, %v4248_v36 }
 0xd77   :  { %v4250_v31 = vpop.f32.mrf.mxu1 }
 0xd78   :  { %v4659_v63 = vmul.f32 %v4552_v57, %v4403_v28 }
 0xd79   :  { %v4253_v17 = vpop.f32.mrf.mxu1 }
 0xd7a   :  { %4691 = vst.msk [vmem:[%s8467_s1 + $0x8] sm:$0xff] %vm302_vm1, %v4659_v63  ;;  %v4404_v49 = vmul.f32 0.5, %v4253_v17 }
 0xd7b   :  { %v4255_v35 = vpop.f32.mrf.mxu1 }
 0xd7c   :  { %4436 = vrot.lane.b32.xlu0 %v4404_v49, %s4800_s10 }
 0xd7d   :  { %v4258_v14 = vpop.f32.mrf.mxu1 }
 0xd7e   :  { %v4405_v61 = vmul.f32 0.5, %v4258_v14 }
 0xd7f   :  { %v4260_v20 = vpop.f32.mrf.mxu1 }
 0xd80   :  { %4438 = vrot.lane.b32.xlu1 %v4405_v61, %s4800_s10 }
 0xd81   :  { %v4263_v34 = vpop.f32.mrf.mxu1 }
 0xd82   :  { %v4406_v18 = vmul.f32 0.5, %v4263_v34 }
 0xd83   :  { %v4265_v10 = vpop.f32.mrf.mxu1 }
 0xd84   :  { %4444 = vrot.lane.b32.xlu0 %v4406_v18, %s4801_s11 }
 0xd85   :  { %v4268_v15 = vpop.f32.mrf.mxu1 }
 0xd86   :  { %v4407_v46 = vmul.f32 0.5, %v4268_v15 }
 0xd87   :  { %v4270_v58 = vpop.f32.mrf.mxu1 }
 0xd88   :  { %4446 = vrot.lane.b32.xlu1 %v4407_v46, %s4801_s11 }
 0xd89   :  { %v4273_v27 = vpop.f32.mrf.mxu1 }
 0xd8a   :  { %v4408_v5 = vmul.f32 0.5, %v4273_v27 }
 0xd8b   :  { %v4275_v11 = vpop.f32.mrf.mxu1 }
 0xd8c   :  { %4452 = vrot.lane.b32.xlu0 %v4408_v5, %s4802_s12 }
 0xd8d   :  { %v4278_v50 = vpop.f32.mrf.mxu1 }
 0xd8e   :  { %v4409_v33 = vmul.f32 0.5, %v4278_v50  ;;  %v9432_v50 = vld [vmem:[#allocation8_spill] sm:$0xff] }
 0xd8f   :  { %v4280_v39 = vpop.f32.mrf.mxu1  ;;  %4770 = vrsqrt.f32 %v9432_v50  ;;  %vm4555_vm10 = vcmp.eq.f32.partialorder %v9432_v50, inf  ;;  %vm4557_vm7 = vcmp.eq.f32.partialorder %v9432_v50, 0.0 }
 0xd90   :  { %4454 = vrot.lane.b32.xlu1 %v4409_v33, %s4802_s12 }
 0xd91   :  { %v4283_v41 = vpop.f32.mrf.mxu1 }
 0xd92   :  { %v4410_v32 = vmul.f32 0.5, %v4283_v41 }
 0xd93   :  { %v4285_v24 = vpop.f32.mrf.mxu1 }
 0xd94   :  { %4460 = vrot.lane.b32.xlu0 %v4410_v32, %s4803_s13 }
 0xd95   :  { %v4288_v23 = vpop.f32.mrf.mxu1 }
 0xd96   :  { %v4411_v55 = vmul.f32 0.5, %v4288_v23 }
 0xd97   :  { %v4290_v1 = vpop.f32.mrf.mxu1 }
 0xd98   :  { %4462 = vrot.lane.b32.xlu1 %v4411_v55, %s4803_s13  ;;  %v9433_v55 = vld [vmem:[#allocation7_spill] sm:$0xff] }
 0xd99   :  { %v4293_v7 = vpop.f32.mrf.mxu1  ;;  %4772 = vrsqrt.f32 %v9433_v55  ;;  %vm4562_vm13 = vcmp.eq.f32.partialorder %v9433_v55, inf  ;;  %v4565_v40 = vand.u32 2147483648, %v9433_v55  ;;  %vm4564_vm9 = vcmp.eq.f32.partialorder %v9433_v55, 0.0 }
 0xd9a   :  { %v4412_v59 = vmul.f32 0.5, %v4293_v7 }
 0xd9b   :  { %v4295_v56 = vpop.f32.mrf.mxu1 }
 0xd9c   :  { %4468 = vrot.lane.b32.xlu0 %v4412_v59, %s4806_s17  ;;  %v4771_v56 = vpop.eup %4770 }
 0xd9d   :  { %v4298_v60 = vpop.f32.mrf.mxu1 }
 0xd9e   :  { %v4413_v4 = vmul.f32 0.5, %v4298_v60 }
 0xd9f   :  { %v4300_v26 = vpop.f32.mrf.mxu1 }
 0xda0   :  { %4470 = vrot.lane.b32.xlu1 %v4413_v4, %s4806_s17  ;;  %v4554_v26 = vmul.f32 %v4771_v56, %v9432_v50 }
 0xda1   :  { %v4303_v47 = vpop.f32.mrf.mxu1 }
 0xda2   :  { %v4414_v44 = vmul.f32 0.5, %v4303_v47  ;;  %v9434_v47 = vld [vmem:[#allocation17_spill] sm:$0xff] }
 0xda3   :  { %v4305_v13 = vpop.f32.mrf.mxu1  ;;  %4774 = vrsqrt.f32 %v9434_v47  ;;  %vm4569_vm11 = vcmp.eq.f32.partialorder %v9434_v47, inf  ;;  %vm4571_vm14 = vcmp.eq.f32.partialorder %v9434_v47, 0.0 }
 0xda4   :  { %4476 = vrot.lane.b32.xlu0 %v4414_v44, %s4804_s14 }
 0xda5   :  { %v4308_v30 = vpop.f32.mrf.mxu1 }
 0xda6   :  { %v4415_v25 = vmul.f32 0.5, %v4308_v30  ;;  %v4558_v30 = vand.u32 2147483648, %v9432_v50 }
 0xda7   :  { %v4310_v45 = vpop.f32.mrf.mxu1 }
 0xda8   :  { %4478 = vrot.lane.b32.xlu1 %v4415_v25, %s4804_s14  ;;  %v4556_v45 = vsel %vm4555_vm10, %v9432_v50, %v4554_v26 }
 0xda9   :  { %v4313_v48 = vpop.f32.mrf.mxu1 }
 0xdaa   :  { %v4416_v52 = vmul.f32 0.5, %v4313_v48  ;;  %v4773_v48 = vpop.eup %4772 }
 0xdab   :  { %v4315_v22 = vpop.f32.mrf.mxu1 }
 0xdac   :  { %4484 = vrot.lane.b32.xlu0 %v4416_v52, %s4805_s0  ;;  %v4559_v22 = vsel %vm4557_vm7, %v4558_v30, %v4556_v45 }
 0xdad   :  { %v4318_v21 = vpop.f32.mrf.mxu1 }
 0xdae   :  { %v4417_v62 = vmul.f32 0.5, %v4318_v21 }
 0xdaf   :  { %v4320_v16 = vpop.f32.mrf.mxu1 }
 0xdb0   :  { %4486 = vrot.lane.b32.xlu1 %v4417_v62, %s4805_s0  ;;  %v4561_v16 = vmul.f32 %v4773_v48, %v9433_v55 }
 0xdb1   :  { %v4323_v37 = vpop.f32.mrf.mxu1 }
 0xdb2   :  { %v9435_v37 = vld [vmem:[#allocation6_spill] sm:$0xff] }
 0xdb3   :  { %v4324_v12 = vpop.f32.mrf.mxu1  ;;  %4776 = vrsqrt.f32 %v9435_v37  ;;  %vm4576_vm12 = vcmp.eq.f32.partialorder %v9435_v37, inf  ;;  %vm4578_vm15 = vcmp.eq.f32.partialorder %v9435_v37, 0.0 }
 0xdb4   :  { %v4418_v0 = vmul.f32 0.5, %v4324_v12 }
 0xdb5   :  { %v4328_v53 = vpop.f32.mrf.mxu1 }
 0xdb6   :  { %v4674_v3 = vmul.f32 %v4608_v38, %v4418_v0  ;;  %v4775_v53 = vpop.eup %4774 }
 0xdb7   :  { %v4329_v9 = vpop.f32.mrf.mxu1 }
 0xdb8   :  { %4706 = vst.msk [vmem:[%s8467_s1 + $0x80] sm:$0xff] %vm302_vm1, %v4674_v3  ;;  %v4419_v19 = vmul.f32 0.5, %v4329_v9 }
 0xdb9   :  { %v4333_v6 = vpop.f32.mrf.mxu1 }
 0xdba   :  { %v4675_v2 = vmul.f32 %v4608_v38, %v4419_v19  ;;  %v4563_v38 = vsel %vm4562_vm13, %v9433_v55, %v4561_v16  ;;  %v4568_v6 = vmul.f32 %v4775_v53, %v9434_v47  ;;  %v9441_v16 = vld [vmem:[#allocation13_spill] sm:$0xff] }
 0xdbb   :  { %v4334_v57 = vpop.f32.mrf.mxu1  ;;  %v4566_v3 = vsel %vm4564_vm9, %v4565_v40, %v4563_v38  ;;  %vm4625_vm9 = vcmp.eq.f32.partialorder %v9441_v16, inf }
 0xdbc   :  { %4707 = vst.msk [vmem:[%s8467_s1 + $0x88] sm:$0xff] %vm302_vm1, %v4675_v2  ;;  %v4420_v8 = vmul.f32 0.5, %v4334_v57  ;;  %v9436_v2 = vld [vmem:[#allocation5_spill] sm:$0xff] }
 0xdbd   :  { %v4338_v54 = vpop.f32.mrf.mxu1  ;;  %4778 = vrsqrt.f32 %v9436_v2  ;;  %vm4583_vm5 = vcmp.eq.f32.partialorder %v9436_v2, inf  ;;  %vm4585_vm6 = vcmp.eq.f32.partialorder %v9436_v2, 0.0 }
 0xdbe   :  { %4492 = vrot.lane.b32.xlu0 %v4420_v8, %s4800_s10  ;;  %v4572_v8 = vand.u32 2147483648, %v9434_v47 }
 0xdbf   :  { %v4339_v36 = vpop.f32.mrf.mxu1 }
 0xdc0   :  { %v4421_v28 = vmul.f32 0.5, %v4339_v36  ;;  %v4570_v36 = vsel %vm4569_vm11, %v9434_v47, %v4568_v6  ;;  %v9439_v47 = vld [vmem:[#allocation16_spill] sm:$0xff]  ;;  %vm4627_vm11 = vcmp.eq.f32.partialorder %v9441_v16, 0.0 }
 0xdc1   :  { %v4343_v31 = vpop.f32.mrf.mxu1  ;;  %vm4611_vm8 = vcmp.eq.f32.partialorder %v9439_v47, inf  ;;  %vm4613_vm10 = vcmp.eq.f32.partialorder %v9439_v47, 0.0 }
 0xdc2   :  { %4494 = vrot.lane.b32.xlu1 %v4421_v28, %s4800_s10  ;;  %v4777_v28 = vpop.eup %4776  ;;  %v4573_v31 = vsel %vm4571_vm14, %v4572_v8, %v4570_v36 }
 0xdc3   :  { %v4344_v63 = vpop.f32.mrf.mxu1 }
 0xdc4   :  { %v4422_v17 = vmul.f32 0.5, %v4344_v63 }
 0xdc5   :  { %v4348_v49 = vpop.f32.mrf.mxu1 }
 0xdc6   :  { %4500 = vrot.lane.b32.xlu0 %v4422_v17, %s4801_s11  ;;  %v4575_v49 = vmul.f32 %v4777_v28, %v9435_v37 }
 0xdc7   :  { %v4349_v35 = vpop.f32.mrf.mxu1 }
 0xdc8   :  { %v4423_v14 = vmul.f32 0.5, %v4349_v35  ;;  %v9437_v35 = vld [vmem:[#allocation3_spill] sm:$0xff] }
 0xdc9   :  { %v4353_v61 = vpop.f32.mrf.mxu1  ;;  %4780 = vrsqrt.f32 %v9437_v35  ;;  %vm4590_vm3 = vcmp.eq.f32.partialorder %v9437_v35, inf  ;;  %vm4592_vm2 = vcmp.eq.f32.partialorder %v9437_v35, 0.0 }
 0xdca   :  { %4502 = vrot.lane.b32.xlu1 %v4423_v14, %s4801_s11  ;;  %v4579_v61 = vand.u32 2147483648, %v9435_v37 }
 0xdcb   :  { %v4354_v20 = vpop.f32.mrf.mxu1 }
 0xdcc   :  { %v4424_v34 = vmul.f32 0.5, %v4354_v20 }
 0xdcd   :  { %v4358_v18 = vpop.f32.mrf.mxu1 }
 0xdce   :  { %4508 = vrot.lane.b32.xlu0 %v4424_v34, %s4802_s12  ;;  %v4577_v34 = vsel %vm4576_vm12, %v9435_v37, %v4575_v49  ;;  %v4779_v18 = vpop.eup %4778  ;;  %v4614_v37 = vand.u32 2147483648, %v9439_v47 }
 0xdcf   :  { %v4359_v10 = vpop.f32.mrf.mxu1 }
 0xdd0   :  { %v4425_v15 = vmul.f32 0.5, %v4359_v10  ;;  %v4580_v10 = vsel %vm4578_vm15, %v4579_v61, %v4577_v34 }
 0xdd1   :  { %v4363_v46 = vpop.f32.mrf.mxu1 }
 0xdd2   :  { %4510 = vrot.lane.b32.xlu1 %v4425_v15, %s4802_s12 }
 0xdd3   :  { %v4364_v58 = vpop.f32.mrf.mxu1 }
 0xdd4   :  { %v4426_v27 = vmul.f32 0.5, %v4364_v58  ;;  %v4582_v58 = vmul.f32 %v4779_v18, %v9436_v2 }
 0xdd5   :  { %v4368_v5 = vpop.f32.mrf.mxu1 }
 0xdd6   :  { %4516 = vrot.lane.b32.xlu0 %v4426_v27, %s4803_s13  ;;  %v9438_v27 = vld [vmem:[#allocation4_spill] sm:$0xff]  ;;  %v4584_v50 = vsel %vm4583_vm5, %v9436_v2, %v4582_v58 }
 0xdd7   :  { %v4369_v11 = vpop.f32.mrf.mxu1  ;;  %4782 = vrsqrt.f32 %v9438_v27  ;;  %vm4597_vm0 = vcmp.eq.f32.partialorder %v9438_v27, inf  ;;  %vm4599_vm4 = vcmp.eq.f32.partialorder %v9438_v27, 0.0 }
 0xdd8   :  { %v4427_v33 = vmul.f32 0.5, %v4369_v11  ;;  %4784 = vrsqrt.f32 %v9439_v47 }
 0xdd9   :  { %v4373_v39 = vpop.f32.mrf.mxu1 }
 0xdda   :  { %4518 = vrot.lane.b32.xlu1 %v4427_v33, %s4803_s13  ;;  %v4781_v33 = vpop.eup %4780  ;;  %v4586_v39 = vand.u32 2147483648, %v9436_v2 }
 0xddb   :  { %v4374_v41 = vpop.f32.mrf.mxu1 }
 0xddc   :  { %v4428_v32 = vmul.f32 0.5, %v4374_v41  ;;  %v4587_v41 = vsel %vm4585_vm6, %v4586_v39, %v4584_v50 }
 0xddd   :  { %v4378_v24 = vpop.f32.mrf.mxu1 }
 0xdde   :  { %4524 = vrot.lane.b32.xlu0 %v4428_v32, %s4806_s17 }
 0xddf   :  { %v4379_v23 = vpop.f32.mrf.mxu1 }
 0xde0   :  { %v4429_v1 = vmul.f32 0.5, %v4379_v23  ;;  %v4589_v23 = vmul.f32 %v4781_v33, %v9437_v35 }
 0xde1   :  { %v4383_v7 = vpop.f32.mrf.mxu1 }
 0xde2   :  { %4526 = vrot.lane.b32.xlu1 %v4429_v1, %s4806_s17  ;;  %v4593_v1 = vand.u32 2147483648, %v9437_v35 }
 0xde3   :  { %v4384_v59 = vpop.f32.mrf.mxu1 }
 0xde4   :  { %v4430_v60 = vmul.f32 0.5, %v4384_v59  ;;  %v4591_v59 = vsel %vm4590_vm3, %v9437_v35, %v4589_v23  ;;  %v4783_v56 = vpop.eup %4782 }
 0xde5   :  { %v4388_v4 = vpop.f32.mrf.mxu1  ;;  %v4596_v26 = vmul.f32 %v4783_v56, %v9438_v27 }
 0xde6   :  { %4532 = vrot.lane.b32.xlu0 %v4430_v60, %s4804_s14  ;;  %v4594_v60 = vsel %vm4592_vm2, %v4593_v1, %v4591_v59 }
 0xde7   :  { %v4389_v43 = vpop.f32.mrf.mxu1  ;;  %v4598_v30 = vsel %vm4597_vm0, %v9438_v27, %v4596_v26 }
 0xde8   :  { %v4431_v44 = vmul.f32 0.5, %v4389_v43 }
 0xde9   :  { %v4393_v13 = vpop.f32.mrf.mxu1 }
 0xdea   :  { %4534 = vrot.lane.b32.xlu1 %v4431_v44, %s4804_s14 }
 0xdeb   :  { %v4394_v25 = vpop.f32.mrf.mxu1 }
 0xdec   :  { %v4432_v52 = vmul.f32 0.5, %v4394_v25  ;;  %v4600_v25 = vand.u32 2147483648, %v9438_v27 }
 0xded   :  { %v4398_v51 = vpop.f32.mrf.mxu1 }
 0xdee   :  { %v4437_v21 = vpop.permute.xlu0 %4436  ;;  %4540 = vrot.lane.b32.xlu0 %v4432_v52, %s4805_s0  ;;  %v4601_v45 = vsel %vm4599_vm4, %v4600_v25, %v4598_v30  ;;  %v9440_v51 = vld [vmem:[#allocation14_spill] sm:$0xff] }
 0xdef   :  { %v4660_v62 = vmul.f32 %v4559_v22, %v4437_v21  ;;  %v4399_v42 = vpop.f32.mrf.mxu1  ;;  %4786 = vrsqrt.f32 %v9440_v51  ;;  %vm4618_vm7 = vcmp.eq.f32.partialorder %v9440_v51, inf  ;;  %vm4620_vm13 = vcmp.eq.f32.partialorder %v9440_v51, 0.0 }
 0xdf0   :  { %v4433_v29 = vmul.f32 0.5, %v4399_v42  ;;  %4788 = vrsqrt.f32 %v9441_v16 }
 0xdf1   :  { %4692 = vst.msk [vmem:[%s8467_s1 + $0x10] sm:$0xff] %vm302_vm1, %v4660_v62  ;;  %v4785_v62 = vpop.eup %4784 }
 0xdf2   :  { %v4439_v12 = vpop.permute.xlu1 %4438  ;;  %4542 = vrot.lane.b32.xlu1 %v4433_v29, %s4805_s0  ;;  %v4610_v42 = vmul.f32 %v4785_v62, %v9439_v47 }
 0xdf3   :  { %v4661_v0 = vmul.f32 %v4559_v22, %v4439_v12 }
 0xdf4   :  { %v4612_v29 = vsel %vm4611_vm8, %v9439_v47, %v4610_v42 }
 0xdf5   :  { %4693 = vst.msk [vmem:[%s8467_s1 + $0x18] sm:$0xff] %vm302_vm1, %v4661_v0  ;;  %v4615_v40 = vsel %vm4613_vm10, %v4614_v37, %v4612_v29 }
 0xdf6   :  { %v4445_v9 = vpop.permute.xlu0 %4444 }
 0xdf7   :  { %v4662_v19 = vmul.f32 %v4566_v3, %v4445_v9 }
 0xdf9   :  { %4694 = vst.msk [vmem:[%s8467_s1 + $0x20] sm:$0xff] %vm302_vm1, %v4662_v19  ;;  %v4621_v19 = vand.u32 2147483648, %v9440_v51 }
 0xdfa   :  { %v4447_v57 = vpop.permute.xlu1 %4446 }
 0xdfb   :  { %v4663_v54 = vmul.f32 %v4566_v3, %v4447_v57  ;;  %v9442_v3 = vld [vmem:[#allocation12_spill] sm:$0xff] }
 0xdfc   :  { %v4787_v12 = vpop.eup %4786  ;;  %4790 = vrsqrt.f32 %v9442_v3  ;;  %vm4632_vm14 = vcmp.eq.f32.partialorder %v9442_v3, inf  ;;  %vm4634_vm12 = vcmp.eq.f32.partialorder %v9442_v3, 0.0 }
 0xdfd   :  { %4695 = vst.msk [vmem:[%s8467_s1 + $0x28] sm:$0xff] %vm302_vm1, %v4663_v54  ;;  %v4617_v53 = vmul.f32 %v4787_v12, %v9440_v51  ;;  %v4789_v57 = vpop.eup %4788 }
 0xdfe   :  { %v4453_v63 = vpop.permute.xlu0 %4452  ;;  %v4624_v28 = vmul.f32 %v4789_v57, %v9441_v16 }
 0xdff   :  { %v4664_v17 = vmul.f32 %v4573_v31, %v4453_v63  ;;  %v4619_v2 = vsel %vm4618_vm7, %v9440_v51, %v4617_v53 }
 0xe00   :  { %v4622_v8 = vsel %vm4620_vm13, %v4621_v19, %v4619_v2  ;;  %v4626_v35 = vsel %vm4625_vm9, %v9441_v16, %v4624_v28 }
 0xe01   :  { %4696 = vst.msk [vmem:[%s8467_s1 + $0x30] sm:$0xff] %vm302_vm1, %v4664_v17  ;;  %v4628_v17 = vand.u32 2147483648, %v9441_v16 }
 0xe02   :  { %v4455_v14 = vpop.permute.xlu1 %4454 }
 0xe03   :  { %v4665_v20 = vmul.f32 %v4573_v31, %v4455_v14  ;;  %v9443_v31 = vld [vmem:[#allocation11_spill] sm:$0xff]  ;;  %v4629_v61 = vsel %vm4627_vm11, %v4628_v17, %v4626_v35 }
 0xe04   :  { %4792 = vrsqrt.f32 %v9443_v31  ;;  %vm4639_vm15 = vcmp.eq.f32.partialorder %v9443_v31, inf  ;;  %vm4641_vm5 = vcmp.eq.f32.partialorder %v9443_v31, 0.0 }
 0xe05   :  { %4697 = vst.msk [vmem:[%s8467_s1 + $0x38] sm:$0xff] %vm302_vm1, %v4665_v20 }
 0xe06   :  { %v4461_v15 = vpop.permute.xlu0 %4460 }
 0xe07   :  { %v4666_v46 = vmul.f32 %v4580_v10, %v4461_v15 }
 0xe09   :  { %4698 = vst.msk [vmem:[%s8467_s1 + $0x40] sm:$0xff] %vm302_vm1, %v4666_v46  ;;  %v4791_v14 = vpop.eup %4790  ;;  %v4635_v46 = vand.u32 2147483648, %v9442_v3 }
 0xe0a   :  { %v4463_v5 = vpop.permute.xlu1 %4462  ;;  %v4631_v18 = vmul.f32 %v4791_v14, %v9442_v3 }
 0xe0b   :  { %v4667_v11 = vmul.f32 %v4580_v10, %v4463_v5  ;;  %v9444_v10 = vld [vmem:[#allocation10_spill] sm:$0xff] }
 0xe0c   :  { %4794 = vrsqrt.f32 %v9444_v10  ;;  %v4633_v27 = vsel %vm4632_vm14, %v9442_v3, %v4631_v18  ;;  %vm4646_vm6 = vcmp.eq.f32.partialorder %v9444_v10, inf  ;;  %vm4648_vm3 = vcmp.eq.f32.partialorder %v9444_v10, 0.0 }
 0xe0d   :  { %4699 = vst.msk [vmem:[%s8467_s1 + $0x48] sm:$0xff] %vm302_vm1, %v4667_v11  ;;  %v4636_v11 = vsel %vm4634_vm12, %v4635_v46, %v4633_v27 }
 0xe0e   :  { %v4469_v32 = vpop.permute.xlu0 %4468 }
 0xe0f   :  { %v4668_v24 = vmul.f32 %v4587_v41, %v4469_v32 }
 0xe11   :  { %4700 = vst.msk [vmem:[%s8467_s1 + $0x50] sm:$0xff] %vm302_vm1, %v4668_v24  ;;  %v4793_v5 = vpop.eup %4792  ;;  %v4642_v24 = vand.u32 2147483648, %v9443_v31 }
 0xe12   :  { %v4471_v55 = vpop.permute.xlu1 %4470  ;;  %v4638_v39 = vmul.f32 %v4793_v5, %v9443_v31 }
 0xe13   :  { %v4669_v7 = vmul.f32 %v4587_v41, %v4471_v55  ;;  %v9445_v41 = vld [vmem:[#allocation9_spill] sm:$0xff] }
 0xe14   :  { %4796 = vrsqrt.f32 %v9445_v41  ;;  %v4640_v55 = vsel %vm4639_vm15, %v9443_v31, %v4638_v39  ;;  %vm4653_vm2 = vcmp.eq.f32.partialorder %v9445_v41, inf  ;;  %vm4655_vm0 = vcmp.eq.f32.partialorder %v9445_v41, 0.0 }
 0xe15   :  { %4701 = vst.msk [vmem:[%s8467_s1 + $0x58] sm:$0xff] %vm302_vm1, %v4669_v7  ;;  %v4643_v7 = vsel %vm4641_vm5, %v4642_v24, %v4640_v55 }
 0xe16   :  { %v4477_v4 = vpop.permute.xlu0 %4476 }
 0xe17   :  { %v4670_v43 = vmul.f32 %v4594_v60, %v4477_v4 }
 0xe19   :  { %4702 = vst.msk [vmem:[%s8467_s1 + $0x60] sm:$0xff] %vm302_vm1, %v4670_v43  ;;  %v4795_v1 = vpop.eup %4794  ;;  %v4649_v43 = vand.u32 2147483648, %v9444_v10 }
 0xe1a   :  { %v4479_v44 = vpop.permute.xlu1 %4478 }
 0xe1b   :  { %v4671_v13 = vmul.f32 %v4594_v60, %v4479_v44  ;;  %v4645_v60 = vmul.f32 %v4795_v1, %v9444_v10 }
 0xe1d   :  { %4703 = vst.msk [vmem:[%s8467_s1 + $0x68] sm:$0xff] %vm302_vm1, %v4671_v13  ;;  %v4647_v47 = vsel %vm4646_vm6, %v9444_v10, %v4645_v60 }
 0xe1e   :  { %v4485_v48 = vpop.permute.xlu0 %4484  ;;  %v4650_v13 = vsel %vm4648_vm3, %v4649_v43, %v4647_v47 }
 0xe1f   :  { %v4672_v52 = vmul.f32 %v4601_v45, %v4485_v48 }
 0xe21   :  { %4704 = vst.msk [vmem:[%s8467_s1 + $0x70] sm:$0xff] %vm302_vm1, %v4672_v52  ;;  %v4797_v44 = vpop.eup %4796  ;;  %v4656_v52 = vand.u32 2147483648, %v9445_v41 }
 0xe22   :  { %v4487_v22 = vpop.permute.xlu1 %4486 }
 0xe23   :  { %v4673_v21 = vmul.f32 %v4601_v45, %v4487_v22  ;;  %v4652_v45 = vmul.f32 %v4797_v44, %v9445_v41 }
 0xe25   :  { %4705 = vst.msk [vmem:[%s8467_s1 + $0x78] sm:$0xff] %vm302_vm1, %v4673_v21  ;;  %v4654_v22 = vsel %vm4653_vm2, %v9445_v41, %v4652_v45 }
 0xe26   :  { %v4657_v21 = vsel %vm4655_vm0, %v4656_v52, %v4654_v22 }
 0xe30   :  { %v4493_v0 = vpop.permute.xlu0 %4492 }
 0xe31   :  { %v4676_v38 = vmul.f32 %v4615_v40, %v4493_v0 }
 0xe33   :  { %4708 = vst.msk [vmem:[%s8467_s1 + $0x90] sm:$0xff] %vm302_vm1, %v4676_v38 }
 0xe34   :  { %v4495_v9 = vpop.permute.xlu1 %4494 }
 0xe35   :  { %v4677_v6 = vmul.f32 %v4615_v40, %v4495_v9 }
 0xe37   :  { %4709 = vst.msk [vmem:[%s8467_s1 + $0x98] sm:$0xff] %vm302_vm1, %v4677_v6 }
 0xe38   :  { %v4501_v54 = vpop.permute.xlu0 %4500 }
 0xe39   :  { %v4678_v36 = vmul.f32 %v4622_v8, %v4501_v54 }
 0xe3b   :  { %4710 = vst.msk [vmem:[%s8467_s1 + $0xa0] sm:$0xff] %vm302_vm1, %v4678_v36 }
 0xe3c   :  { %v4503_v63 = vpop.permute.xlu1 %4502 }
 0xe3d   :  { %v4679_v49 = vmul.f32 %v4622_v8, %v4503_v63 }
 0xe3f   :  { %4711 = vst.msk [vmem:[%s8467_s1 + $0xa8] sm:$0xff] %vm302_vm1, %v4679_v49 }
 0xe40   :  { %v4509_v20 = vpop.permute.xlu0 %4508 }
 0xe41   :  { %v4680_v34 = vmul.f32 %v4629_v61, %v4509_v20 }
 0xe43   :  { %4712 = vst.msk [vmem:[%s8467_s1 + $0xb0] sm:$0xff] %vm302_vm1, %v4680_v34 }
 0xe44   :  { %v4511_v15 = vpop.permute.xlu1 %4510 }
 0xe45   :  { %v4681_v58 = vmul.f32 %v4629_v61, %v4511_v15 }
 0xe47   :  { %4713 = vst.msk [vmem:[%s8467_s1 + $0xb8] sm:$0xff] %vm302_vm1, %v4681_v58 }
 0xe48   :  { %v4517_v50 = vpop.permute.xlu0 %4516 }
 0xe49   :  { %v4682_v33 = vmul.f32 %v4636_v11, %v4517_v50 }
 0xe4b   :  { %4714 = vst.msk [vmem:[%s8467_s1 + $0xc0] sm:$0xff] %vm302_vm1, %v4682_v33 }
 0xe4c   :  { %v4519_v32 = vpop.permute.xlu1 %4518 }
 0xe4d   :  { %v4683_v23 = vmul.f32 %v4636_v11, %v4519_v32 }
 0xe4f   :  { %4715 = vst.msk [vmem:[%s8467_s1 + $0xc8] sm:$0xff] %vm302_vm1, %v4683_v23 }
 0xe50   :  { %v4525_v59 = vpop.permute.xlu0 %4524 }
 0xe51   :  { %v4684_v56 = vmul.f32 %v4643_v7, %v4525_v59 }
 0xe53   :  { %4716 = vst.msk [vmem:[%s8467_s1 + $0xd0] sm:$0xff] %vm302_vm1, %v4684_v56 }
 0xe54   :  { %v4527_v4 = vpop.permute.xlu1 %4526 }
 0xe55   :  { %v4685_v26 = vmul.f32 %v4643_v7, %v4527_v4 }
 0xe57   :  { %4717 = vst.msk [vmem:[%s8467_s1 + $0xd8] sm:$0xff] %vm302_vm1, %v4685_v26 }
 0xe58   :  { %v4533_v30 = vpop.permute.xlu0 %4532 }
 0xe59   :  { %v4686_v25 = vmul.f32 %v4650_v13, %v4533_v30 }
 0xe5b   :  { %4718 = vst.msk [vmem:[%s8467_s1 + $0xe0] sm:$0xff] %vm302_vm1, %v4686_v25 }
 0xe5c   :  { %v4535_v48 = vpop.permute.xlu1 %4534 }
 0xe5d   :  { %v4687_v51 = vmul.f32 %v4650_v13, %v4535_v48 }
 0xe5f   :  { %4719 = vst.msk [vmem:[%s8467_s1 + $0xe8] sm:$0xff] %vm302_vm1, %v4687_v51 }
 0xe60   :  { %v4541_v62 = vpop.permute.xlu0 %4540 }
 0xe61   :  { %v4688_v42 = vmul.f32 %v4657_v21, %v4541_v62 }
 0xe63   :  { %4720 = vst.msk [vmem:[%s8467_s1 + $0xf0] sm:$0xff] %vm302_vm1, %v4688_v42 }
 0xe64   :  { %v4543_v16 = vpop.permute.xlu1 %4542 }
 0xe65   :  { %v4689_v37 = vmul.f32 %v4657_v21, %v4543_v16 }
 0xe67   :  { %4721 = vst.msk [vmem:[%s8467_s1 + $0xf8] sm:$0xff] %vm302_vm1, %v4689_v37 }

</bundles_post_ra>
